<compile_context>
chip_gen: v7x
topology: tpu7x:2x2x1
jax: 0.10.0
libtpu: 0.0.40
codegen_flags: <defaults>
</compile_context>

<pallas_src>
import jax
import jax.numpy as jnp
import numpy as np
from jax.experimental import pallas as pl
from jax.experimental.pallas import tpu as pltpu


_VMEM_LIMIT = 48 * 1024 * 1024   # comfortably under v7x's 64 MiB physical VMEM


def _round_up(n, m):
    return ((n + m - 1) // m) * m


def _pick_bt(b):
    # Largest power-of-two batch tile <= 64 that still yields >= 2 grid steps
    # once the batch is big enough (keeps both v7x TensorCores busy).
    t = 8
    while t * 2 <= 64 and t * 2 <= max(b // 2, 8):
        t *= 2
    return t


# ----------------------------- Pallas kernels -----------------------------

def _conv1_pool_kernel(p_ref, w_ref, b_ref, o_ref):
    # p_ref: [Bt, 4, 144, 25] bf16 im2col patches, phase-major rows so that
    #        AvgPool2d(2) of the conv1 output is the mean over the phase axis.
    # w_ref: [25, 16] bf16, b_ref: [1, 16] f32, o_ref: [Bt, 144, 16] bf16.
    bt = p_ref.shape[0]
    w = w_ref[...]
    b = b_ref[...]
    acc = jnp.zeros((bt * 144, 16), jnp.float32)
    for ph in range(4):                                     # static, unrolled
        p = p_ref[:, ph, :, :].reshape(bt * 144, 25)        # [Bt*144, 25]
        y = jnp.dot(p, w, preferred_element_type=jnp.float32)
        acc = acc + jnp.maximum(y + b, 0.0)                 # ReLU before pool
    pooled = acc * 0.25                                     # [Bt*144, 16] f32
    o_ref[...] = pooled.reshape(bt, 144, 16).astype(jnp.bfloat16)


def _conv2_tail_kernel(p_ref, wc2_ref, bc2_ref, wf1_ref, bf1_ref,
                       wf2_ref, bf2_ref, o_ref):
    # conv2 GEMM + bias + ReLU + AvgPool2d(2) + flatten + fc1 + ReLU
    # + fc2 (padded to 128 lanes) + softmax, for one batch tile.
    bt = p_ref.shape[0]
    wc2 = wc2_ref[...]
    bc2 = bc2_ref[...]
    acc = jnp.zeros((bt * 16, 32), jnp.float32)
    for ph in range(4):                                     # static, unrolled
        p = p_ref[:, ph, :, :].reshape(bt * 16, 400)        # [Bt*16, 400]
        y = jnp.dot(p, wc2, preferred_element_type=jnp.float32)
        acc = acc + jnp.maximum(y + bc2, 0.0)               # ReLU before pool
    pooled = (acc * 0.25).reshape(bt, 16, 32)               # [Bt, 16, 32] f32

    # flatten + fc1: K-chunked GEMM with M = Bt.  wf1 rows are pre-permuted
    # to (pos, c) order so the PyTorch NCHW flatten order is matched exactly.
    h = jnp.zeros((bt, 512), jnp.float32)
    for r in range(16):                                     # static, unrolled
        h = h + jnp.dot(pooled[:, r, :].astype(jnp.bfloat16),
                        wf1_ref[r * 32:(r + 1) * 32, :],
                        preferred_element_type=jnp.float32)
    h = jnp.maximum(h + bf1_ref[...], 0.0)                  # [Bt, 512] f32

    # fc2 padded to 128 output lanes (cols >= 10 have zero weight and -1e30
    # bias, so they contribute exactly 0 to the softmax sum).
    logits = jnp.dot(h.astype(jnp.bfloat16), wf2_ref[...],
                     preferred_element_type=jnp.float32) + bf2_ref[...]
    m = jnp.max(logits, axis=-1, keepdims=True)
    e = jnp.exp(logits - m)
    s = jnp.sum(e, axis=-1, keepdims=True)
    o_ref[...] = e * pl.reciprocal(s, approx=False)         # [Bt, 128] f32


# --------------------------- pallas_call wrappers ---------------------------

def conv1_pool(p1, w, b, bt):
    bpad = p1.shape[0]
    flops = 2 * bpad * 576 * 25 * 16
    bytes_accessed = (p1.size * 2 + w.size * 2 + b.size * 4
                      + bpad * 144 * 16 * 2)
    return pl.pallas_call(
        _conv1_pool_kernel,
        out_shape=jax.ShapeDtypeStruct((bpad, 144, 16), jnp.bfloat16),
        grid=(bpad // bt,),
        in_specs=[
            pl.BlockSpec((bt, 4, 144, 25), lambda i: (i, 0, 0, 0)),
            pl.BlockSpec((25, 16), lambda i: (0, 0)),       # resident weight
            pl.BlockSpec((1, 16), lambda i: (0, 0)),        # resident bias
        ],
        out_specs=pl.BlockSpec((bt, 144, 16), lambda i: (i, 0, 0)),
        compiler_params=pltpu.CompilerParams(
            dimension_semantics=("parallel",),
            vmem_limit_bytes=_VMEM_LIMIT),
        cost_estimate=pl.CostEstimate(flops=flops, transcendentals=0,
                                      bytes_accessed=bytes_accessed),
    )(p1, w, b)


def conv2_tail(p2, wc2, bc2, wf1, bf1, wf2, bf2, bt):
    bpad = p2.shape[0]
    flops = bpad * (2 * 64 * 400 * 32 + 2 * 512 * 512 + 2 * 512 * 128)
    bytes_accessed = (p2.size * 2 + wc2.size * 2 + wf1.size * 2 + wf2.size * 2
                      + (bc2.size + bf1.size + bf2.size) * 4 + bpad * 128 * 4)
    return pl.pallas_call(
        _conv2_tail_kernel,
        out_shape=jax.ShapeDtypeStruct((bpad, 128), jnp.float32),
        grid=(bpad // bt,),
        in_specs=[
            pl.BlockSpec((bt, 4, 16, 400), lambda i: (i, 0, 0, 0)),
            pl.BlockSpec((400, 32), lambda i: (0, 0)),
            pl.BlockSpec((1, 32), lambda i: (0, 0)),
            pl.BlockSpec((512, 512), lambda i: (0, 0)),
            pl.BlockSpec((1, 512), lambda i: (0, 0)),
            pl.BlockSpec((512, 128), lambda i: (0, 0)),
            pl.BlockSpec((1, 128), lambda i: (0, 0)),
        ],
        out_specs=pl.BlockSpec((bt, 128), lambda i: (i, 0)),
        compiler_params=pltpu.CompilerParams(
            dimension_semantics=("parallel",),
            vmem_limit_bytes=_VMEM_LIMIT),
        cost_estimate=pl.CostEstimate(flops=flops, transcendentals=128 * bpad,
                                      bytes_accessed=bytes_accessed),
    )(p2, wc2, bc2, wf1, bf1, wf2, bf2)


# ------------------------------- glue (JAX) -------------------------------

def _patches_conv1(x):
    # x: [B, 1, 28, 28] f32 -> [B, 4, 144, 25] bf16; rows ordered
    # (phase p*2+q, pooled-row i, pooled-col j) where the conv1 output
    # position is (2i+p, 2j+q); columns are (kh, kw).
    b = x.shape[0]
    xs = x[:, 0].astype(jnp.bfloat16)                        # [B, 28, 28]
    cols = [xs[:, di:di + 24, dj:dj + 24]
            for di in range(5) for dj in range(5)]
    pf = jnp.stack(cols, axis=-1)                            # [B, 24, 24, 25]
    ph = jnp.stack([pf[:, p::2, q::2, :] for p in (0, 1) for q in (0, 1)],
                   axis=1)                                   # [B, 4, 12, 12, 25]
    return ph.reshape(b, 4, 144, 25)


def _patches_conv2(y1):
    # y1: [B, 144, 16] bf16 (NHWC 12x12x16 flattened) -> [B, 4, 16, 400];
    # rows ordered (phase, i, j), columns ordered (kh, kw, c).
    b = y1.shape[0]
    t = y1.reshape(b, 12, 12, 16)
    cols = [t[:, di:di + 8, dj:dj + 8, :]
            for di in range(5) for dj in range(5)]
    pf = jnp.concatenate(cols, axis=-1)                      # [B, 8, 8, 400]
    ph = jnp.stack([pf[:, p::2, q::2, :] for p in (0, 1) for q in (0, 1)],
                   axis=1)                                   # [B, 4, 4, 4, 400]
    return ph.reshape(b, 4, 16, 400)


def prepare_params(params):
    # One-time weight permutation / padding / cast so the kernels need no
    # activation transposes and the fc2 output is lane-dense.
    wc1, bc1, wc2, bc2, wf1, bf1, wf2, bf2 = params
    wc1k = wc1.reshape(16, 25).T.astype(jnp.bfloat16)                # (kh,kw) rows
    wc2k = jnp.transpose(wc2, (2, 3, 1, 0)).reshape(400, 32)         # (kh,kw,c) rows
    wc2k = wc2k.astype(jnp.bfloat16)
    # fc1 input index in PyTorch is c*16 + pos (NCHW flatten); reorder rows
    # to (pos, c) so the kernel's (pos, c) pooled map feeds it directly.
    wf1pc = (wf1.T.reshape(32, 16, 512).transpose(1, 0, 2)
             .reshape(512, 512).astype(jnp.bfloat16))
    # fc2 padded to 128 lane-dense output columns; pad bias with -1e30 so the
    # padded columns contribute exactly 0 to the softmax.
    wf2p = jnp.zeros((512, 128), jnp.bfloat16).at[:, :10].set(
        wf2.T.astype(jnp.bfloat16))
    bf2p = jnp.full((1, 128), -1e30, jnp.float32).at[0, :10].set(
        bf2.astype(jnp.float32))
    return (wc1k, bc1.reshape(1, 16).astype(jnp.float32),
            wc2k, bc2.reshape(1, 32).astype(jnp.float32),
            wf1pc, bf1.reshape(1, 512).astype(jnp.float32),
            wf2p, bf2p)


@jax.jit
def badnet_forward(x, prep):
    wc1k, bc1, wc2k, bc2, wf1pc, bf1, wf2p, bf2p = prep
    b = x.shape[0]
    bt2 = _pick_bt(b)                 # batch tile for the conv2/fc kernel
    bt1 = min(bt2, 32)                # conv1 tile kept smaller (25-lane K pad)
    bpad = _round_up(b, bt2)
    if bpad != b:
        x = jnp.pad(x, ((0, bpad - b), (0, 0), (0, 0), (0, 0)))
    p1 = _patches_conv1(x)                                   # [Bp, 4, 144, 25]
    y1 = conv1_pool(p1, wc1k, bc1, bt1)                      # [Bp, 144, 16] bf16
    p2 = _patches_conv2(y1)                                  # [Bp, 4, 16, 400]
    out = conv2_tail(p2, wc2k, bc2, wf1pc, bf1, wf2p, bf2p, bt2)  # [Bp, 128]
    return out[:b, :10]


# --------------------------- pure-JAX reference ---------------------------

def _avgpool_ref_nchw(x):
    b, c, h, w = x.shape
    return x.reshape(b, c, h // 2, 2, w // 2, 2).mean(axis=(3, 5))


def badnet_reference(x, params):
    wc1, bc1, wc2, bc2, wf1, bf1, wf2, bf2 = params
    dn = ('NCHW', 'OIHW', 'NCHW')
    y = jax.lax.conv_general_dilated(x, wc1, (1, 1), 'VALID',
                                     dimension_numbers=dn)
    y = jax.nn.relu(y + bc1.reshape(1, -1, 1, 1))
    y = _avgpool_ref_nchw(y)
    y = jax.lax.conv_general_dilated(y, wc2, (1, 1), 'VALID',
                                     dimension_numbers=dn)
    y = jax.nn.relu(y + bc2.reshape(1, -1, 1, 1))
    y = _avgpool_ref_nchw(y)
    f = y.reshape(y.shape[0], -1)
    h = jax.nn.relu(f @ wf1.T + bf1)
    logits = h @ wf2.T + bf2
    return jax.nn.softmax(logits, axis=-1)


# ---------------------------------- main -----------------------------------

def init_params(key):
    ks = jax.random.split(key, 8)

    def u(k, shape, fan_in):
        bound = 1.0 / np.sqrt(fan_in)
        return jax.random.uniform(k, shape, jnp.float32, -bound, bound)

    wc1 = u(ks[0], (16, 1, 5, 5), 25)
    bc1 = u(ks[1], (16,), 25)
    wc2 = u(ks[2], (32, 16, 5, 5), 400)
    bc2 = u(ks[3], (32,), 400)
    wf1 = u(ks[4], (512, 512), 512)
    bf1 = u(ks[5], (512,), 512)
    wf2 = u(ks[6], (10, 512), 512)
    bf2 = u(ks[7], (10,), 512)
    return (wc1, bc1, wc2, bc2, wf1, bf1, wf2, bf2)


if __name__ == "__main__":
    key = jax.random.PRNGKey(0)
    kx, kp = jax.random.split(key)

    # Input consistent with the module: 28x28 single-channel so the flattened
    # conv stack yields exactly the 512 features fc1 expects.
    x = jax.random.normal(kx, (2, 1, 28, 28), dtype=jnp.float32)
    params = init_params(kp)

    prep = prepare_params(params)      # one-time weight permute/pad + bf16
    out = jax.block_until_ready(badnet_forward(x, prep))
    ref = jax.block_until_ready(badnet_reference(x, params))

    assert out.shape == (2, 10), out.shape
    assert np.all(np.isfinite(np.asarray(out)))
    np.testing.assert_allclose(np.asarray(out).sum(axis=-1), 1.0, atol=1e-5)
    np.testing.assert_allclose(np.asarray(out), np.asarray(ref),
                               atol=1e-2, rtol=1e-2)
    print("KERNEL_OK")
</pallas_src>

<mosaic_0001>
module attributes {stable_mosaic.version = 11 : i64} {
  func.func @_conv1_pool_kernel(%arg0: i32, %arg1: memref<8x4x144x25xbf16, #tpu.memory_space<vmem>>, %arg2: memref<25x16xbf16, #tpu.memory_space<vmem>>, %arg3: memref<1x16xf32, #tpu.memory_space<vmem>>, %arg4: memref<8x144x16xbf16, #tpu.memory_space<vmem>>) attributes {dimension_semantics = [#tpu.dimension_semantics<parallel>], iteration_bounds = array<i64: 1>, scalar_prefetch = 0 : i64, scratch_operands = 0 : i64, tpu.core_type = #tpu.core_type<tc>, window_params = [{transform_indices = @transform_0, window_bounds = array<i64: 8, 4, 144, 25>}, {pipeline_mode = #tpu.pipeline_mode<synchronous>, transform_indices = @transform_1, window_bounds = array<i64: 25, 16>}, {pipeline_mode = #tpu.pipeline_mode<synchronous>, transform_indices = @transform_2, window_bounds = array<i64: 1, 16>}, {transform_indices = @transform_3, window_bounds = array<i64: 8, 144, 16>}]} {
    %c0 = arith.constant 0 : index
    %c0_0 = arith.constant 0 : index
    %0 = vector.load %arg2[%c0, %c0_0] : memref<25x16xbf16, #tpu.memory_space<vmem>>, vector<25x16xbf16>
    %c0_1 = arith.constant 0 : index
    %c0_2 = arith.constant 0 : index
    %1 = vector.load %arg3[%c0_1, %c0_2] : memref<1x16xf32, #tpu.memory_space<vmem>>, vector<1x16xf32>
    %cst = arith.constant 0.000000e+00 : f32
    %2 = vector.broadcast %cst : f32 to vector<1152x16xf32>
    %c0_3 = arith.constant 0 : index
    %c0_4 = arith.constant 0 : index
    %c0_5 = arith.constant 0 : index
    %c0_6 = arith.constant 0 : index
    %3 = vector.load %arg1[%c0_3, %c0_4, %c0_5, %c0_6] : memref<8x4x144x25xbf16, #tpu.memory_space<vmem>>, vector<8x1x144x25xbf16>
    %4 = vector.shape_cast %3 : vector<8x1x144x25xbf16> to vector<8x144x25xbf16>
    %5 = vector.shape_cast %4 : vector<8x144x25xbf16> to vector<1152x25xbf16>
    %cst_7 = arith.constant dense<0.000000e+00> : vector<1152x16xf32>
    %6 = tpu.matmul %5, %0, %cst_7 {dimension_numbers = #tpu.dot_dimension_numbers<[1], [0], [0], [1], [0, 0, 1, 1], [], []>} : vector<1152x25xbf16>, vector<25x16xbf16>, vector<1152x16xf32> -> vector<1152x16xf32>
    %7 = vector.broadcast %1 : vector<1x16xf32> to vector<1152x16xf32>
    %8 = arith.addf %6, %7 : vector<1152x16xf32>
    %cst_8 = arith.constant 0.000000e+00 : f32
    %9 = vector.broadcast %cst_8 : f32 to vector<1152x16xf32>
    %10 = arith.maximumf %8, %9 : vector<1152x16xf32>
    %11 = arith.addf %2, %10 : vector<1152x16xf32>
    %c0_9 = arith.constant 0 : index
    %c1 = arith.constant 1 : index
    %c0_10 = arith.constant 0 : index
    %c0_11 = arith.constant 0 : index
    %12 = vector.load %arg1[%c0_9, %c1, %c0_10, %c0_11] : memref<8x4x144x25xbf16, #tpu.memory_space<vmem>>, vector<8x1x144x25xbf16>
    %13 = vector.shape_cast %12 : vector<8x1x144x25xbf16> to vector<8x144x25xbf16>
    %14 = vector.shape_cast %13 : vector<8x144x25xbf16> to vector<1152x25xbf16>
    %cst_12 = arith.constant dense<0.000000e+00> : vector<1152x16xf32>
    %15 = tpu.matmul %14, %0, %cst_12 {dimension_numbers = #tpu.dot_dimension_numbers<[1], [0], [0], [1], [0, 0, 1, 1], [], []>} : vector<1152x25xbf16>, vector<25x16xbf16>, vector<1152x16xf32> -> vector<1152x16xf32>
    %16 = vector.broadcast %1 : vector<1x16xf32> to vector<1152x16xf32>
    %17 = arith.addf %15, %16 : vector<1152x16xf32>
    %cst_13 = arith.constant 0.000000e+00 : f32
    %18 = vector.broadcast %cst_13 : f32 to vector<1152x16xf32>
    %19 = arith.maximumf %17, %18 : vector<1152x16xf32>
    %20 = arith.addf %11, %19 : vector<1152x16xf32>
    %c0_14 = arith.constant 0 : index
    %c2 = arith.constant 2 : index
    %c0_15 = arith.constant 0 : index
    %c0_16 = arith.constant 0 : index
    %21 = vector.load %arg1[%c0_14, %c2, %c0_15, %c0_16] : memref<8x4x144x25xbf16, #tpu.memory_space<vmem>>, vector<8x1x144x25xbf16>
    %22 = vector.shape_cast %21 : vector<8x1x144x25xbf16> to vector<8x144x25xbf16>
    %23 = vector.shape_cast %22 : vector<8x144x25xbf16> to vector<1152x25xbf16>
    %cst_17 = arith.constant dense<0.000000e+00> : vector<1152x16xf32>
    %24 = tpu.matmul %23, %0, %cst_17 {dimension_numbers = #tpu.dot_dimension_numbers<[1], [0], [0], [1], [0, 0, 1, 1], [], []>} : vector<1152x25xbf16>, vector<25x16xbf16>, vector<1152x16xf32> -> vector<1152x16xf32>
    %25 = vector.broadcast %1 : vector<1x16xf32> to vector<1152x16xf32>
    %26 = arith.addf %24, %25 : vector<1152x16xf32>
    %cst_18 = arith.constant 0.000000e+00 : f32
    %27 = vector.broadcast %cst_18 : f32 to vector<1152x16xf32>
    %28 = arith.maximumf %26, %27 : vector<1152x16xf32>
    %29 = arith.addf %20, %28 : vector<1152x16xf32>
    %c0_19 = arith.constant 0 : index
    %c3 = arith.constant 3 : index
    %c0_20 = arith.constant 0 : index
    %c0_21 = arith.constant 0 : index
    %30 = vector.load %arg1[%c0_19, %c3, %c0_20, %c0_21] : memref<8x4x144x25xbf16, #tpu.memory_space<vmem>>, vector<8x1x144x25xbf16>
    %31 = vector.shape_cast %30 : vector<8x1x144x25xbf16> to vector<8x144x25xbf16>
    %32 = vector.shape_cast %31 : vector<8x144x25xbf16> to vector<1152x25xbf16>
    %cst_22 = arith.constant dense<0.000000e+00> : vector<1152x16xf32>
    %33 = tpu.matmul %32, %0, %cst_22 {dimension_numbers = #tpu.dot_dimension_numbers<[1], [0], [0], [1], [0, 0, 1, 1], [], []>} : vector<1152x25xbf16>, vector<25x16xbf16>, vector<1152x16xf32> -> vector<1152x16xf32>
    %34 = vector.broadcast %1 : vector<1x16xf32> to vector<1152x16xf32>
    %35 = arith.addf %33, %34 : vector<1152x16xf32>
    %cst_23 = arith.constant 0.000000e+00 : f32
    %36 = vector.broadcast %cst_23 : f32 to vector<1152x16xf32>
    %37 = arith.maximumf %35, %36 : vector<1152x16xf32>
    %38 = arith.addf %29, %37 : vector<1152x16xf32>
    %cst_24 = arith.constant 2.500000e-01 : f32
    %39 = vector.broadcast %cst_24 : f32 to vector<1152x16xf32>
    %40 = arith.mulf %38, %39 : vector<1152x16xf32>
    %41 = vector.shape_cast %40 : vector<1152x16xf32> to vector<8x144x16xf32>
    %42 = arith.truncf %41 : vector<8x144x16xf32> to vector<8x144x16xbf16>
    %c0_25 = arith.constant 0 : index
    %c0_26 = arith.constant 0 : index
    %c0_27 = arith.constant 0 : index
    %43 = vector.load %arg4[%c0_25, %c0_26, %c0_27] : memref<8x144x16xbf16, #tpu.memory_space<vmem>>, vector<8x144x16xbf16>
    tpu.vector_store %arg4[%c0_25, %c0_26, %c0_27], %42 {strides = array<i32>} : memref<8x144x16xbf16, #tpu.memory_space<vmem>>, vector<8x144x16xbf16>,
    return
  }
  func.func @transform_0(%arg0: i32) -> (i32, i32, i32, i32) {
    %c0_i32 = arith.constant 0 : i32
    %c0_i32_0 = arith.constant 0 : i32
    %c0_i32_1 = arith.constant 0 : i32
    %c0_i32_2 = arith.constant 0 : i32
    return %arg0, %c0_i32, %c0_i32_0, %c0_i32_1 : i32, i32, i32, i32
  }
  func.func @transform_1(%arg0: i32) -> (i32, i32) {
    %c0_i32 = arith.constant 0 : i32
    %c0_i32_0 = arith.constant 0 : i32
    %c0_i32_1 = arith.constant 0 : i32
    return %c0_i32, %c0_i32_0 : i32, i32
  }
  func.func @transform_2(%arg0: i32) -> (i32, i32) {
    %c0_i32 = arith.constant 0 : i32
    %c0_i32_0 = arith.constant 0 : i32
    %c0_i32_1 = arith.constant 0 : i32
    return %c0_i32, %c0_i32_0 : i32, i32
  }
  func.func @transform_3(%arg0: i32) -> (i32, i32, i32) {
    %c0_i32 = arith.constant 0 : i32
    %c0_i32_0 = arith.constant 0 : i32
    %c0_i32_1 = arith.constant 0 : i32
    return %arg0, %c0_i32, %c0_i32_0 : i32, i32, i32
  }
}

module attributes {stable_mosaic.version = 11 : i64} {
  func.func @_conv2_tail_kernel(%arg0: i32, %arg1: memref<8x4x16x400xbf16, #tpu.memory_space<vmem>>, %arg2: memref<400x32xbf16, #tpu.memory_space<vmem>>, %arg3: memref<1x32xf32, #tpu.memory_space<vmem>>, %arg4: memref<512x512xbf16, #tpu.memory_space<vmem>>, %arg5: memref<1x512xf32, #tpu.memory_space<vmem>>, %arg6: memref<512x128xbf16, #tpu.memory_space<vmem>>, %arg7: memref<1x128xf32, #tpu.memory_space<vmem>>, %arg8: memref<8x128xf32, #tpu.memory_space<vmem>>) attributes {dimension_semantics = [#tpu.dimension_semantics<parallel>], iteration_bounds = array<i64: 1>, scalar_prefetch = 0 : i64, scratch_operands = 0 : i64, tpu.core_type = #tpu.core_type<tc>, window_params = [{transform_indices = @transform_0, window_bounds = array<i64: 8, 4, 16, 400>}, {pipeline_mode = #tpu.pipeline_mode<synchronous>, transform_indices = @transform_1, window_bounds = array<i64: 400, 32>}, {pipeline_mode = #tpu.pipeline_mode<synchronous>, transform_indices = @transform_2, window_bounds = array<i64: 1, 32>}, {pipeline_mode = #tpu.pipeline_mode<synchronous>, transform_indices = @transform_3, window_bounds = array<i64: 512, 512>}, {pipeline_mode = #tpu.pipeline_mode<synchronous>, transform_indices = @transform_4, window_bounds = array<i64: 1, 512>}, {pipeline_mode = #tpu.pipeline_mode<synchronous>, transform_indices = @transform_5, window_bounds = array<i64: 512, 128>}, {pipeline_mode = #tpu.pipeline_mode<synchronous>, transform_indices = @transform_6, window_bounds = array<i64: 1, 128>}, {transform_indices = @transform_7, window_bounds = array<i64: 8, 128>}]} {
    %c0 = arith.constant 0 : index
    %c0_0 = arith.constant 0 : index
    %0 = vector.load %arg2[%c0, %c0_0] : memref<400x32xbf16, #tpu.memory_space<vmem>>, vector<400x32xbf16>
    %c0_1 = arith.constant 0 : index
    %c0_2 = arith.constant 0 : index
    %1 = vector.load %arg3[%c0_1, %c0_2] : memref<1x32xf32, #tpu.memory_space<vmem>>, vector<1x32xf32>
    %cst = arith.constant 0.000000e+00 : f32
    %2 = vector.broadcast %cst : f32 to vector<128x32xf32>
    %c0_3 = arith.constant 0 : index
    %c0_4 = arith.constant 0 : index
    %c0_5 = arith.constant 0 : index
    %c0_6 = arith.constant 0 : index
    %3 = vector.load %arg1[%c0_3, %c0_4, %c0_5, %c0_6] : memref<8x4x16x400xbf16, #tpu.memory_space<vmem>>, vector<8x1x16x400xbf16>
    %4 = vector.shape_cast %3 : vector<8x1x16x400xbf16> to vector<8x16x400xbf16>
    %5 = vector.shape_cast %4 : vector<8x16x400xbf16> to vector<128x400xbf16>
    %cst_7 = arith.constant dense<0.000000e+00> : vector<128x32xf32>
    %6 = tpu.matmul %5, %0, %cst_7 {dimension_numbers = #tpu.dot_dimension_numbers<[1], [0], [0], [1], [0, 0, 1, 1], [], []>} : vector<128x400xbf16>, vector<400x32xbf16>, vector<128x32xf32> -> vector<128x32xf32>
    %7 = vector.broadcast %1 : vector<1x32xf32> to vector<128x32xf32>
    %8 = arith.addf %6, %7 : vector<128x32xf32>
    %cst_8 = arith.constant 0.000000e+00 : f32
    %9 = vector.broadcast %cst_8 : f32 to vector<128x32xf32>
    %10 = arith.maximumf %8, %9 : vector<128x32xf32>
    %11 = arith.addf %2, %10 : vector<128x32xf32>
    %c0_9 = arith.constant 0 : index
    %c1 = arith.constant 1 : index
    %c0_10 = arith.constant 0 : index
    %c0_11 = arith.constant 0 : index
    %12 = vector.load %arg1[%c0_9, %c1, %c0_10, %c0_11] : memref<8x4x16x400xbf16, #tpu.memory_space<vmem>>, vector<8x1x16x400xbf16>
    %13 = vector.shape_cast %12 : vector<8x1x16x400xbf16> to vector<8x16x400xbf16>
    %14 = vector.shape_cast %13 : vector<8x16x400xbf16> to vector<128x400xbf16>
    %cst_12 = arith.constant dense<0.000000e+00> : vector<128x32xf32>
    %15 = tpu.matmul %14, %0, %cst_12 {dimension_numbers = #tpu.dot_dimension_numbers<[1], [0], [0], [1], [0, 0, 1, 1], [], []>} : vector<128x400xbf16>, vector<400x32xbf16>, vector<128x32xf32> -> vector<128x32xf32>
    %16 = vector.broadcast %1 : vector<1x32xf32> to vector<128x32xf32>
    %17 = arith.addf %15, %16 : vector<128x32xf32>
    %cst_13 = arith.constant 0.000000e+00 : f32
    %18 = vector.broadcast %cst_13 : f32 to vector<128x32xf32>
    %19 = arith.maximumf %17, %18 : vector<128x32xf32>
    %20 = arith.addf %11, %19 : vector<128x32xf32>
    %c0_14 = arith.constant 0 : index
    %c2 = arith.constant 2 : index
    %c0_15 = arith.constant 0 : index
    %c0_16 = arith.constant 0 : index
    %21 = vector.load %arg1[%c0_14, %c2, %c0_15, %c0_16] : memref<8x4x16x400xbf16, #tpu.memory_space<vmem>>, vector<8x1x16x400xbf16>
    %22 = vector.shape_cast %21 : vector<8x1x16x400xbf16> to vector<8x16x400xbf16>
    %23 = vector.shape_cast %22 : vector<8x16x400xbf16> to vector<128x400xbf16>
    %cst_17 = arith.constant dense<0.000000e+00> : vector<128x32xf32>
    %24 = tpu.matmul %23, %0, %cst_17 {dimension_numbers = #tpu.dot_dimension_numbers<[1], [0], [0], [1], [0, 0, 1, 1], [], []>} : vector<128x400xbf16>, vector<400x32xbf16>, vector<128x32xf32> -> vector<128x32xf32>
    %25 = vector.broadcast %1 : vector<1x32xf32> to vector<128x32xf32>
    %26 = arith.addf %24, %25 : vector<128x32xf32>
    %cst_18 = arith.constant 0.000000e+00 : f32
    %27 = vector.broadcast %cst_18 : f32 to vector<128x32xf32>
    %28 = arith.maximumf %26, %27 : vector<128x32xf32>
    %29 = arith.addf %20, %28 : vector<128x32xf32>
    %c0_19 = arith.constant 0 : index
    %c3 = arith.constant 3 : index
    %c0_20 = arith.constant 0 : index
    %c0_21 = arith.constant 0 : index
    %30 = vector.load %arg1[%c0_19, %c3, %c0_20, %c0_21] : memref<8x4x16x400xbf16, #tpu.memory_space<vmem>>, vector<8x1x16x400xbf16>
    %31 = vector.shape_cast %30 : vector<8x1x16x400xbf16> to vector<8x16x400xbf16>
    %32 = vector.shape_cast %31 : vector<8x16x400xbf16> to vector<128x400xbf16>
    %cst_22 = arith.constant dense<0.000000e+00> : vector<128x32xf32>
    %33 = tpu.matmul %32, %0, %cst_22 {dimension_numbers = #tpu.dot_dimension_numbers<[1], [0], [0], [1], [0, 0, 1, 1], [], []>} : vector<128x400xbf16>, vector<400x32xbf16>, vector<128x32xf32> -> vector<128x32xf32>
    %34 = vector.broadcast %1 : vector<1x32xf32> to vector<128x32xf32>
    %35 = arith.addf %33, %34 : vector<128x32xf32>
    %cst_23 = arith.constant 0.000000e+00 : f32
    %36 = vector.broadcast %cst_23 : f32 to vector<128x32xf32>
    %37 = arith.maximumf %35, %36 : vector<128x32xf32>
    %38 = arith.addf %29, %37 : vector<128x32xf32>
    %cst_24 = arith.constant 2.500000e-01 : f32
    %39 = vector.broadcast %cst_24 : f32 to vector<128x32xf32>
    %40 = arith.mulf %38, %39 : vector<128x32xf32>
    %41 = vector.shape_cast %40 : vector<128x32xf32> to vector<8x16x32xf32>
    %cst_25 = arith.constant 0.000000e+00 : f32
    %42 = vector.broadcast %cst_25 : f32 to vector<8x512xf32>
    %43 = vector.extract_strided_slice %41 {offsets = [0, 0, 0], sizes = [8, 1, 32], strides = [1, 1, 1]} : vector<8x16x32xf32> to vector<8x1x32xf32>
    %44 = vector.shape_cast %43 : vector<8x1x32xf32> to vector<8x32xf32>
    %45 = arith.truncf %44 : vector<8x32xf32> to vector<8x32xbf16>
    %c0_26 = arith.constant 0 : index
    %c0_27 = arith.constant 0 : index
    %46 = vector.load %arg4[%c0_26, %c0_27] : memref<512x512xbf16, #tpu.memory_space<vmem>>, vector<32x512xbf16>
    %cst_28 = arith.constant dense<0.000000e+00> : vector<8x512xf32>
    %47 = tpu.matmul %45, %46, %cst_28 {dimension_numbers = #tpu.dot_dimension_numbers<[1], [0], [0], [1], [0, 0, 1, 1], [], []>} : vector<8x32xbf16>, vector<32x512xbf16>, vector<8x512xf32> -> vector<8x512xf32>
    %48 = arith.addf %42, %47 : vector<8x512xf32>
    %49 = vector.extract_strided_slice %41 {offsets = [0, 1, 0], sizes = [8, 1, 32], strides = [1, 1, 1]} : vector<8x16x32xf32> to vector<8x1x32xf32>
    %50 = vector.shape_cast %49 : vector<8x1x32xf32> to vector<8x32xf32>
    %51 = arith.truncf %50 : vector<8x32xf32> to vector<8x32xbf16>
    %c32 = arith.constant 32 : index
    %c0_29 = arith.constant 0 : index
    %52 = vector.load %arg4[%c32, %c0_29] : memref<512x512xbf16, #tpu.memory_space<vmem>>, vector<32x512xbf16>
    %cst_30 = arith.constant dense<0.000000e+00> : vector<8x512xf32>
    %53 = tpu.matmul %51, %52, %cst_30 {dimension_numbers = #tpu.dot_dimension_numbers<[1], [0], [0], [1], [0, 0, 1, 1], [], []>} : vector<8x32xbf16>, vector<32x512xbf16>, vector<8x512xf32> -> vector<8x512xf32>
    %54 = arith.addf %48, %53 : vector<8x512xf32>
    %55 = vector.extract_strided_slice %41 {offsets = [0, 2, 0], sizes = [8, 1, 32], strides = [1, 1, 1]} : vector<8x16x32xf32> to vector<8x1x32xf32>
    %56 = vector.shape_cast %55 : vector<8x1x32xf32> to vector<8x32xf32>
    %57 = arith.truncf %56 : vector<8x32xf32> to vector<8x32xbf16>
    %c64 = arith.constant 64 : index
    %c0_31 = arith.constant 0 : index
    %58 = vector.load %arg4[%c64, %c0_31] : memref<512x512xbf16, #tpu.memory_space<vmem>>, vector<32x512xbf16>
    %cst_32 = arith.constant dense<0.000000e+00> : vector<8x512xf32>
    %59 = tpu.matmul %57, %58, %cst_32 {dimension_numbers = #tpu.dot_dimension_numbers<[1], [0], [0], [1], [0, 0, 1, 1], [], []>} : vector<8x32xbf16>, vector<32x512xbf16>, vector<8x512xf32> -> vector<8x512xf32>
    %60 = arith.addf %54, %59 : vector<8x512xf32>
    %61 = vector.extract_strided_slice %41 {offsets = [0, 3, 0], sizes = [8, 1, 32], strides = [1, 1, 1]} : vector<8x16x32xf32> to vector<8x1x32xf32>
    %62 = vector.shape_cast %61 : vector<8x1x32xf32> to vector<8x32xf32>
    %63 = arith.truncf %62 : vector<8x32xf32> to vector<8x32xbf16>
    %c96 = arith.constant 96 : index
    %c0_33 = arith.constant 0 : index
    %64 = vector.load %arg4[%c96, %c0_33] : memref<512x512xbf16, #tpu.memory_space<vmem>>, vector<32x512xbf16>
    %cst_34 = arith.constant dense<0.000000e+00> : vector<8x512xf32>
    %65 = tpu.matmul %63, %64, %cst_34 {dimension_numbers = #tpu.dot_dimension_numbers<[1], [0], [0], [1], [0, 0, 1, 1], [], []>} : vector<8x32xbf16>, vector<32x512xbf16>, vector<8x512xf32> -> vector<8x512xf32>
    %66 = arith.addf %60, %65 : vector<8x512xf32>
    %67 = vector.extract_strided_slice %41 {offsets = [0, 4, 0], sizes = [8, 1, 32], strides = [1, 1, 1]} : vector<8x16x32xf32> to vector<8x1x32xf32>
    %68 = vector.shape_cast %67 : vector<8x1x32xf32> to vector<8x32xf32>
    %69 = arith.truncf %68 : vector<8x32xf32> to vector<8x32xbf16>
    %c128 = arith.constant 128 : index
    %c0_35 = arith.constant 0 : index
    %70 = vector.load %arg4[%c128, %c0_35] : memref<512x512xbf16, #tpu.memory_space<vmem>>, vector<32x512xbf16>
    %cst_36 = arith.constant dense<0.000000e+00> : vector<8x512xf32>
    %71 = tpu.matmul %69, %70, %cst_36 {dimension_numbers = #tpu.dot_dimension_numbers<[1], [0], [0], [1], [0, 0, 1, 1], [], []>} : vector<8x32xbf16>, vector<32x512xbf16>, vector<8x512xf32> -> vector<8x512xf32>
    %72 = arith.addf %66, %71 : vector<8x512xf32>
    %73 = vector.extract_strided_slice %41 {offsets = [0, 5, 0], sizes = [8, 1, 32], strides = [1, 1, 1]} : vector<8x16x32xf32> to vector<8x1x32xf32>
    %74 = vector.shape_cast %73 : vector<8x1x32xf32> to vector<8x32xf32>
    %75 = arith.truncf %74 : vector<8x32xf32> to vector<8x32xbf16>
    %c160 = arith.constant 160 : index
    %c0_37 = arith.constant 0 : index
    %76 = vector.load %arg4[%c160, %c0_37] : memref<512x512xbf16, #tpu.memory_space<vmem>>, vector<32x512xbf16>
    %cst_38 = arith.constant dense<0.000000e+00> : vector<8x512xf32>
    %77 = tpu.matmul %75, %76, %cst_38 {dimension_numbers = #tpu.dot_dimension_numbers<[1], [0], [0], [1], [0, 0, 1, 1], [], []>} : vector<8x32xbf16>, vector<32x512xbf16>, vector<8x512xf32> -> vector<8x512xf32>
    %78 = arith.addf %72, %77 : vector<8x512xf32>
    %79 = vector.extract_strided_slice %41 {offsets = [0, 6, 0], sizes = [8, 1, 32], strides = [1, 1, 1]} : vector<8x16x32xf32> to vector<8x1x32xf32>
    %80 = vector.shape_cast %79 : vector<8x1x32xf32> to vector<8x32xf32>
    %81 = arith.truncf %80 : vector<8x32xf32> to vector<8x32xbf16>
    %c192 = arith.constant 192 : index
    %c0_39 = arith.constant 0 : index
    %82 = vector.load %arg4[%c192, %c0_39] : memref<512x512xbf16, #tpu.memory_space<vmem>>, vector<32x512xbf16>
    %cst_40 = arith.constant dense<0.000000e+00> : vector<8x512xf32>
    %83 = tpu.matmul %81, %82, %cst_40 {dimension_numbers = #tpu.dot_dimension_numbers<[1], [0], [0], [1], [0, 0, 1, 1], [], []>} : vector<8x32xbf16>, vector<32x512xbf16>, vector<8x512xf32> -> vector<8x512xf32>
    %84 = arith.addf %78, %83 : vector<8x512xf32>
    %85 = vector.extract_strided_slice %41 {offsets = [0, 7, 0], sizes = [8, 1, 32], strides = [1, 1, 1]} : vector<8x16x32xf32> to vector<8x1x32xf32>
    %86 = vector.shape_cast %85 : vector<8x1x32xf32> to vector<8x32xf32>
    %87 = arith.truncf %86 : vector<8x32xf32> to vector<8x32xbf16>
    %c224 = arith.constant 224 : index
    %c0_41 = arith.constant 0 : index
    %88 = vector.load %arg4[%c224, %c0_41] : memref<512x512xbf16, #tpu.memory_space<vmem>>, vector<32x512xbf16>
    %cst_42 = arith.constant dense<0.000000e+00> : vector<8x512xf32>
    %89 = tpu.matmul %87, %88, %cst_42 {dimension_numbers = #tpu.dot_dimension_numbers<[1], [0], [0], [1], [0, 0, 1, 1], [], []>} : vector<8x32xbf16>, vector<32x512xbf16>, vector<8x512xf32> -> vector<8x512xf32>
    %90 = arith.addf %84, %89 : vector<8x512xf32>
    %91 = vector.extract_strided_slice %41 {offsets = [0, 8, 0], sizes = [8, 1, 32], strides = [1, 1, 1]} : vector<8x16x32xf32> to vector<8x1x32xf32>
    %92 = vector.shape_cast %91 : vector<8x1x32xf32> to vector<8x32xf32>
    %93 = arith.truncf %92 : vector<8x32xf32> to vector<8x32xbf16>
    %c256 = arith.constant 256 : index
    %c0_43 = arith.constant 0 : index
    %94 = vector.load %arg4[%c256, %c0_43] : memref<512x512xbf16, #tpu.memory_space<vmem>>, vector<32x512xbf16>
    %cst_44 = arith.constant dense<0.000000e+00> : vector<8x512xf32>
    %95 = tpu.matmul %93, %94, %cst_44 {dimension_numbers = #tpu.dot_dimension_numbers<[1], [0], [0], [1], [0, 0, 1, 1], [], []>} : vector<8x32xbf16>, vector<32x512xbf16>, vector<8x512xf32> -> vector<8x512xf32>
    %96 = arith.addf %90, %95 : vector<8x512xf32>
    %97 = vector.extract_strided_slice %41 {offsets = [0, 9, 0], sizes = [8, 1, 32], strides = [1, 1, 1]} : vector<8x16x32xf32> to vector<8x1x32xf32>
    %98 = vector.shape_cast %97 : vector<8x1x32xf32> to vector<8x32xf32>
    %99 = arith.truncf %98 : vector<8x32xf32> to vector<8x32xbf16>
    %c288 = arith.constant 288 : index
    %c0_45 = arith.constant 0 : index
    %100 = vector.load %arg4[%c288, %c0_45] : memref<512x512xbf16, #tpu.memory_space<vmem>>, vector<32x512xbf16>
    %cst_46 = arith.constant dense<0.000000e+00> : vector<8x512xf32>
    %101 = tpu.matmul %99, %100, %cst_46 {dimension_numbers = #tpu.dot_dimension_numbers<[1], [0], [0], [1], [0, 0, 1, 1], [], []>} : vector<8x32xbf16>, vector<32x512xbf16>, vector<8x512xf32> -> vector<8x512xf32>
    %102 = arith.addf %96, %101 : vector<8x512xf32>
    %103 = vector.extract_strided_slice %41 {offsets = [0, 10, 0], sizes = [8, 1, 32], strides = [1, 1, 1]} : vector<8x16x32xf32> to vector<8x1x32xf32>
    %104 = vector.shape_cast %103 : vector<8x1x32xf32> to vector<8x32xf32>
    %105 = arith.truncf %104 : vector<8x32xf32> to vector<8x32xbf16>
    %c320 = arith.constant 320 : index
    %c0_47 = arith.constant 0 : index
    %106 = vector.load %arg4[%c320, %c0_47] : memref<512x512xbf16, #tpu.memory_space<vmem>>, vector<32x512xbf16>
    %cst_48 = arith.constant dense<0.000000e+00> : vector<8x512xf32>
    %107 = tpu.matmul %105, %106, %cst_48 {dimension_numbers = #tpu.dot_dimension_numbers<[1], [0], [0], [1], [0, 0, 1, 1], [], []>} : vector<8x32xbf16>, vector<32x512xbf16>, vector<8x512xf32> -> vector<8x512xf32>
    %108 = arith.addf %102, %107 : vector<8x512xf32>
    %109 = vector.extract_strided_slice %41 {offsets = [0, 11, 0], sizes = [8, 1, 32], strides = [1, 1, 1]} : vector<8x16x32xf32> to vector<8x1x32xf32>
    %110 = vector.shape_cast %109 : vector<8x1x32xf32> to vector<8x32xf32>
    %111 = arith.truncf %110 : vector<8x32xf32> to vector<8x32xbf16>
    %c352 = arith.constant 352 : index
    %c0_49 = arith.constant 0 : index
    %112 = vector.load %arg4[%c352, %c0_49] : memref<512x512xbf16, #tpu.memory_space<vmem>>, vector<32x512xbf16>
    %cst_50 = arith.constant dense<0.000000e+00> : vector<8x512xf32>
    %113 = tpu.matmul %111, %112, %cst_50 {dimension_numbers = #tpu.dot_dimension_numbers<[1], [0], [0], [1], [0, 0, 1, 1], [], []>} : vector<8x32xbf16>, vector<32x512xbf16>, vector<8x512xf32> -> vector<8x512xf32>
    %114 = arith.addf %108, %113 : vector<8x512xf32>
    %115 = vector.extract_strided_slice %41 {offsets = [0, 12, 0], sizes = [8, 1, 32], strides = [1, 1, 1]} : vector<8x16x32xf32> to vector<8x1x32xf32>
    %116 = vector.shape_cast %115 : vector<8x1x32xf32> to vector<8x32xf32>
    %117 = arith.truncf %116 : vector<8x32xf32> to vector<8x32xbf16>
    %c384 = arith.constant 384 : index
    %c0_51 = arith.constant 0 : index
    %118 = vector.load %arg4[%c384, %c0_51] : memref<512x512xbf16, #tpu.memory_space<vmem>>, vector<32x512xbf16>
    %cst_52 = arith.constant dense<0.000000e+00> : vector<8x512xf32>
    %119 = tpu.matmul %117, %118, %cst_52 {dimension_numbers = #tpu.dot_dimension_numbers<[1], [0], [0], [1], [0, 0, 1, 1], [], []>} : vector<8x32xbf16>, vector<32x512xbf16>, vector<8x512xf32> -> vector<8x512xf32>
    %120 = arith.addf %114, %119 : vector<8x512xf32>
    %121 = vector.extract_strided_slice %41 {offsets = [0, 13, 0], sizes = [8, 1, 32], strides = [1, 1, 1]} : vector<8x16x32xf32> to vector<8x1x32xf32>
    %122 = vector.shape_cast %121 : vector<8x1x32xf32> to vector<8x32xf32>
    %123 = arith.truncf %122 : vector<8x32xf32> to vector<8x32xbf16>
    %c416 = arith.constant 416 : index
    %c0_53 = arith.constant 0 : index
    %124 = vector.load %arg4[%c416, %c0_53] : memref<512x512xbf16, #tpu.memory_space<vmem>>, vector<32x512xbf16>
    %cst_54 = arith.constant dense<0.000000e+00> : vector<8x512xf32>
    %125 = tpu.matmul %123, %124, %cst_54 {dimension_numbers = #tpu.dot_dimension_numbers<[1], [0], [0], [1], [0, 0, 1, 1], [], []>} : vector<8x32xbf16>, vector<32x512xbf16>, vector<8x512xf32> -> vector<8x512xf32>
    %126 = arith.addf %120, %125 : vector<8x512xf32>
    %127 = vector.extract_strided_slice %41 {offsets = [0, 14, 0], sizes = [8, 1, 32], strides = [1, 1, 1]} : vector<8x16x32xf32> to vector<8x1x32xf32>
    %128 = vector.shape_cast %127 : vector<8x1x32xf32> to vector<8x32xf32>
    %129 = arith.truncf %128 : vector<8x32xf32> to vector<8x32xbf16>
    %c448 = arith.constant 448 : index
    %c0_55 = arith.constant 0 : index
    %130 = vector.load %arg4[%c448, %c0_55] : memref<512x512xbf16, #tpu.memory_space<vmem>>, vector<32x512xbf16>
    %cst_56 = arith.constant dense<0.000000e+00> : vector<8x512xf32>
    %131 = tpu.matmul %129, %130, %cst_56 {dimension_numbers = #tpu.dot_dimension_numbers<[1], [0], [0], [1], [0, 0, 1, 1], [], []>} : vector<8x32xbf16>, vector<32x512xbf16>, vector<8x512xf32> -> vector<8x512xf32>
    %132 = arith.addf %126, %131 : vector<8x512xf32>
    %133 = vector.extract_strided_slice %41 {offsets = [0, 15, 0], sizes = [8, 1, 32], strides = [1, 1, 1]} : vector<8x16x32xf32> to vector<8x1x32xf32>
    %134 = vector.shape_cast %133 : vector<8x1x32xf32> to vector<8x32xf32>
    %135 = arith.truncf %134 : vector<8x32xf32> to vector<8x32xbf16>
    %c480 = arith.constant 480 : index
    %c0_57 = arith.constant 0 : index
    %136 = vector.load %arg4[%c480, %c0_57] : memref<512x512xbf16, #tpu.memory_space<vmem>>, vector<32x512xbf16>
    %cst_58 = arith.constant dense<0.000000e+00> : vector<8x512xf32>
    %137 = tpu.matmul %135, %136, %cst_58 {dimension_numbers = #tpu.dot_dimension_numbers<[1], [0], [0], [1], [0, 0, 1, 1], [], []>} : vector<8x32xbf16>, vector<32x512xbf16>, vector<8x512xf32> -> vector<8x512xf32>
    %138 = arith.addf %132, %137 : vector<8x512xf32>
    %c0_59 = arith.constant 0 : index
    %c0_60 = arith.constant 0 : index
    %139 = vector.load %arg5[%c0_59, %c0_60] : memref<1x512xf32, #tpu.memory_space<vmem>>, vector<1x512xf32>
    %140 = vector.broadcast %139 : vector<1x512xf32> to vector<8x512xf32>
    %141 = arith.addf %138, %140 : vector<8x512xf32>
    %cst_61 = arith.constant 0.000000e+00 : f32
    %142 = vector.broadcast %cst_61 : f32 to vector<8x512xf32>
    %143 = arith.maximumf %141, %142 : vector<8x512xf32>
    %144 = arith.truncf %143 : vector<8x512xf32> to vector<8x512xbf16>
    %c0_62 = arith.constant 0 : index
    %c0_63 = arith.constant 0 : index
    %145 = vector.load %arg6[%c0_62, %c0_63] : memref<512x128xbf16, #tpu.memory_space<vmem>>, vector<512x128xbf16>
    %cst_64 = arith.constant dense<0.000000e+00> : vector<8x128xf32>
    %146 = tpu.matmul %144, %145, %cst_64 {dimension_numbers = #tpu.dot_dimension_numbers<[1], [0], [0], [1], [0, 0, 1, 1], [], []>} : vector<8x512xbf16>, vector<512x128xbf16>, vector<8x128xf32> -> vector<8x128xf32>
    %c0_65 = arith.constant 0 : index
    %c0_66 = arith.constant 0 : index
    %147 = vector.load %arg7[%c0_65, %c0_66] : memref<1x128xf32, #tpu.memory_space<vmem>>, vector<1x128xf32>
    %148 = vector.broadcast %147 : vector<1x128xf32> to vector<8x128xf32>
    %149 = arith.addf %146, %148 : vector<8x128xf32>
    %cst_67 = arith.constant dense<0xFF800000> : vector<8xf32>
    %150 = vector.multi_reduction <maximumf>, %149, %cst_67 [1] : vector<8x128xf32> to vector<8xf32>
    %151 = vector.shape_cast %150 : vector<8xf32> to vector<8x1xf32>
    %152 = vector.broadcast %151 : vector<8x1xf32> to vector<8x128xf32>
    %153 = arith.subf %149, %152 : vector<8x128xf32>
    %154 = math.exp %153 : vector<8x128xf32>
    %cst_68 = arith.constant dense<0.000000e+00> : vector<8xf32>
    %155 = vector.multi_reduction <add>, %154, %cst_68 [1] : vector<8x128xf32> to vector<8xf32>
    %156 = vector.shape_cast %155 : vector<8xf32> to vector<8x1xf32>
    %157 = tpu.reciprocal %156 : vector<8x1xf32> -> vector<8x1xf32>
    %158 = vector.broadcast %157 : vector<8x1xf32> to vector<8x128xf32>
    %159 = arith.mulf %154, %158 : vector<8x128xf32>
    %c0_69 = arith.constant 0 : index
    %c0_70 = arith.constant 0 : index
    %160 = vector.load %arg8[%c0_69, %c0_70] : memref<8x128xf32, #tpu.memory_space<vmem>>, vector<8x128xf32>
    tpu.vector_store %arg8[%c0_69, %c0_70], %159 {strides = array<i32>} : memref<8x128xf32, #tpu.memory_space<vmem>>, vector<8x128xf32>,
    return
  }
  func.func @transform_0(%arg0: i32) -> (i32, i32, i32, i32) {
    %c0_i32 = arith.constant 0 : i32
    %c0_i32_0 = arith.constant 0 : i32
    %c0_i32_1 = arith.constant 0 : i32
    %c0_i32_2 = arith.constant 0 : i32
    return %arg0, %c0_i32, %c0_i32_0, %c0_i32_1 : i32, i32, i32, i32
  }
  func.func @transform_1(%arg0: i32) -> (i32, i32) {
    %c0_i32 = arith.constant 0 : i32
    %c0_i32_0 = arith.constant 0 : i32
    %c0_i32_1 = arith.constant 0 : i32
    return %c0_i32, %c0_i32_0 : i32, i32
  }
  func.func @transform_2(%arg0: i32) -> (i32, i32) {
    %c0_i32 = arith.constant 0 : i32
    %c0_i32_0 = arith.constant 0 : i32
    %c0_i32_1 = arith.constant 0 : i32
    return %c0_i32, %c0_i32_0 : i32, i32
  }
  func.func @transform_3(%arg0: i32) -> (i32, i32) {
    %c0_i32 = arith.constant 0 : i32
    %c0_i32_0 = arith.constant 0 : i32
    %c0_i32_1 = arith.constant 0 : i32
    return %c0_i32, %c0_i32_0 : i32, i32
  }
  func.func @transform_4(%arg0: i32) -> (i32, i32) {
    %c0_i32 = arith.constant 0 : i32
    %c0_i32_0 = arith.constant 0 : i32
    %c0_i32_1 = arith.constant 0 : i32
    return %c0_i32, %c0_i32_0 : i32, i32
  }
  func.func @transform_5(%arg0: i32) -> (i32, i32) {
    %c0_i32 = arith.constant 0 : i32
    %c0_i32_0 = arith.constant 0 : i32
    %c0_i32_1 = arith.constant 0 : i32
    return %c0_i32, %c0_i32_0 : i32, i32
  }
  func.func @transform_6(%arg0: i32) -> (i32, i32) {
    %c0_i32 = arith.constant 0 : i32
    %c0_i32_0 = arith.constant 0 : i32
    %c0_i32_1 = arith.constant 0 : i32
    return %c0_i32, %c0_i32_0 : i32, i32
  }
  func.func @transform_7(%arg0: i32) -> (i32, i32) {
    %c0_i32 = arith.constant 0 : i32
    %c0_i32_0 = arith.constant 0 : i32
    return %arg0, %c0_i32 : i32, i32
  }
}

</mosaic_0001>

<bundles_post_ra>
// kernel: badnet_forward.2
= control target key start
LH: loop header
LB: loop body
LE: loop exit
PB: predicated region body
PF: predicated region fallthrough
CT: control target
= control target key end

     0   :  { %vm758_vm0 = vcmask 1043456   ;;  %vm759_vm1 = vcmask 1044480   ;;  %vm541_vm2 = vcmask 203776   ;;  %v9868_v1 = vmov 65535   ;;  %s12661_s1 = inlined_call_operand.vmem [shape: bf16[25,16], index: 1, kind: input, shape index: {}]   ;;  %s12662_s0 = inlined_call_operand.vmem [shape: bf16[8,4,144,25], index: 0, kind: input, shape index: {}]   ;;  %s12663_s2 = inlined_call_operand.vmem [shape: f32[1,16], index: 2, kind: input, shape index: {}]   ;;  %s12664_s3 = inlined_call_operand.vmem [shape: bf16[8,144,16], index: 3, kind: output, shape index: {}]  }
   0x1   :  { %v9573_v0 = vld [vmem:[%s12661_s1] sm:$0xff]   ;;  %v760_v2 = vsel %vm758_vm0, 4294967295, %v9868_v1  ;;  %v9574_v3 = vld [vmem:[%s12661_s1 + $0x8] sm:$0x1f]   ;;  %v9578_v9 = vld [vmem:[%s12662_s0 + $0x50] sm:$0xff]   ;;  %vm7236_vm3 = vcmask 125952  }
   0x2   :  { %8980 = vmatprep.subr.bf16.mxu0 %v9573_v0  ;;  %9128 = vmatprep.subr.bf16.mxu1 %v9573_v0  ;;  %v761_v4 = vsel %vm759_vm1, %v760_v2, 0  ;;  %v9575_v5 = vld [vmem:[%s12662_s0] sm:$0xff]   ;;  %v9576_v7 = vld [vmem:[%s12662_s0 + $0x48] sm:$0xff]   ;;  %v9579_v10 = vld [vmem:[%s12662_s0 + $0x10] sm:$0xff]  }
   0x3   :  { %8981 = vmatpush3.bf16.msra.mxu0 %v9573_v0  ;;  %9129 = vmatpush3.bf16.msra.mxu1 %v9573_v0  ;;  %v763_v6 = vand.u32 %v9574_v3, %v761_v4  ;;  %v9577_v8 = vld [vmem:[%s12662_s0 + $0x8] sm:$0xff]   ;;  %v9580_v11 = vld [vmem:[%s12662_s0 + $0x58] sm:$0xff]   ;;  %v9582_v13 = vld [vmem:[%s12662_s0 + $0x60] sm:$0xff]  }
   0x4   :  { %8984 = vmatprep.mubr.msk.bf16.mxu0 %vm541_vm2, %v9575_v5  ;;  %9132 = vmatprep.mubr.msk.bf16.mxu1 %vm541_vm2, %v9576_v7  ;;  %v9581_v12 = vld [vmem:[%s12662_s0 + $0x18] sm:$0xff]   ;;  %v9583_v14 = vld [vmem:[%s12662_s0 + $0x20] sm:$0xff]   ;;  %v9584_v15 = vld [vmem:[%s12662_s0 + $0x68] sm:$0xff]  }
   0x5   :  { %8982 = vmatprep.subr.bf16.mxu0 %v763_v6  ;;  %9130 = vmatprep.subr.bf16.mxu1 %v763_v6  ;;  %v9585_v16 = vld [vmem:[%s12662_s0 + $0x28] sm:$0xff]   ;;  %v9586_v17 = vld [vmem:[%s12662_s0 + $0x70] sm:$0xff]   ;;  %v9588_v19 = vld [vmem:[%s12662_s0 + $0x78] sm:$0xff]  }
   0x6   :  { %v9587_v18 = vld [vmem:[%s12662_s0 + $0x30] sm:$0xff]   ;;  %v9589_v20 = vld [vmem:[%s12662_s0 + $0x38] sm:$0xff]   ;;  %v9590_v21 = vld [vmem:[%s12662_s0 + $0x80] sm:$0xff]  }
   0x7   :  { %8983 = vmatpush3.bf16.msra.mxu0 %v763_v6  ;;  %9131 = vmatpush3.bf16.msra.mxu1 %v763_v6  ;;  %v9591_v22 = vld [vmem:[%s12662_s0 + $0x40] sm:$0xff]   ;;  %v9592_v23 = vld [vmem:[%s12662_s0 + $0x88] sm:$0xff]   ;;  %v9596_v27 = vld [vmem:[%s12662_s0 + $0x170] sm:$0xff]  }
   0x8   :  { %9276 = vmatprep.subr.bf16.mxu0 %v9573_v0  ;;  %9424 = vmatprep.subr.bf16.mxu1 %v9573_v0  ;;  %v9593_v24 = vld [vmem:[%s12662_s0 + $0x120] sm:$0xff]   ;;  %v9594_v25 = vld [vmem:[%s12662_s0 + $0x168] sm:$0xff]   ;;  %v9597_v28 = vld [vmem:[%s12662_s0 + $0x130] sm:$0xff]  }
   0x9   :  { %v9595_v26 = vld [vmem:[%s12662_s0 + $0x128] sm:$0xff]   ;;  %v9598_v29 = vld [vmem:[%s12662_s0 + $0x178] sm:$0xff]   ;;  %v9600_v31 = vld [vmem:[%s12662_s0 + $0x180] sm:$0xff]  }
   0xa   :  { %8985 = vmatmul.mubr.msk.bf16.vlgmr.msra.gmra.mrb[0].mxu0 %vm541_vm2, %v9577_v8  ;;  %9133 = vmatmul.mubr.msk.bf16.vlgmr.msra.gmra.mrb[0].mxu1 %vm541_vm2, %v9578_v9  ;;  %v9599_v30 = vld [vmem:[%s12662_s0 + $0x138] sm:$0xff]   ;;  %v9601_v32 = vld [vmem:[%s12662_s0 + $0x140] sm:$0xff]   ;;  %v9602_v33 = vld [vmem:[%s12662_s0 + $0x188] sm:$0xff]  }
   0xb   :  { %9277 = vmatpush3.bf16.msra.mxu0 %v9573_v0  ;;  %9425 = vmatpush3.bf16.msra.mxu1 %v9573_v0  ;;  %v9603_v34 = vld [vmem:[%s12662_s0 + $0x148] sm:$0xff]   ;;  %v9604_v35 = vld [vmem:[%s12662_s0 + $0x190] sm:$0xff]   ;;  %v9606_v37 = vld [vmem:[%s12662_s0 + $0x198] sm:$0xff]  }
   0xc   :  { %8988 = vmatprep.mubr.msk.bf16.mxu0 %vm541_vm2, %v9579_v10  ;;  %9136 = vmatprep.mubr.msk.bf16.mxu1 %vm541_vm2, %v9580_v11  ;;  %v9605_v36 = vld [vmem:[%s12662_s0 + $0x150] sm:$0xff]   ;;  %v9607_v38 = vld [vmem:[%s12662_s0 + $0x158] sm:$0xff]   ;;  %v9608_v39 = vld [vmem:[%s12662_s0 + $0x1a0] sm:$0xff]  }
   0xd   :  { %9278 = vmatprep.subr.bf16.mxu0 %v763_v6  ;;  %9426 = vmatprep.subr.bf16.mxu1 %v763_v6  ;;  %v9609_v40 = vld [vmem:[%s12662_s0 + $0x160] sm:$0xff]   ;;  %v9610_v41 = vld [vmem:[%s12662_s0 + $0x1a8] sm:$0xff]   ;;  %v9614_v45 = vld [vmem:[%s12662_s0 + $0x290] sm:$0xff]  }
   0xe   :  { %v9611_v42 = vld [vmem:[%s12662_s0 + $0x240] sm:$0xff]   ;;  %v9612_v43 = vld [vmem:[%s12662_s0 + $0x288] sm:$0xff]   ;;  %v9615_v46 = vld [vmem:[%s12662_s0 + $0x250] sm:$0xff]  }
   0xf   :  { %9279 = vmatpush3.bf16.msra.mxu0 %v763_v6  ;;  %9427 = vmatpush3.bf16.msra.mxu1 %v763_v6  ;;  %v9613_v44 = vld [vmem:[%s12662_s0 + $0x248] sm:$0xff]   ;;  %v9616_v47 = vld [vmem:[%s12662_s0 + $0x298] sm:$0xff]   ;;  %v9618_v49 = vld [vmem:[%s12662_s0 + $0x2a0] sm:$0xff]  }
  0x10   :  { %v9617_v48 = vld [vmem:[%s12662_s0 + $0x258] sm:$0xff]   ;;  %v9619_v50 = vld [vmem:[%s12662_s0 + $0x260] sm:$0xff]   ;;  %v9620_v51 = vld [vmem:[%s12662_s0 + $0x2a8] sm:$0xff]  }
  0x11   :  { %v9621_v52 = vld [vmem:[%s12662_s0 + $0x268] sm:$0xff]   ;;  %v9622_v53 = vld [vmem:[%s12662_s0 + $0x2b0] sm:$0xff]   ;;  %v9624_v55 = vld [vmem:[%s12662_s0 + $0x2b8] sm:$0xff]  }
  0x12   :  { %8989 = vmatmul.mubr.msk.bf16.gmra.mrb[4].mxu0 %vm541_vm2, %v9581_v12  ;;  %9137 = vmatmul.mubr.msk.bf16.gmra.mrb[4].mxu1 %vm541_vm2, %v9582_v13  ;;  %v9623_v54 = vld [vmem:[%s12662_s0 + $0x270] sm:$0xff]   ;;  %v9625_v56 = vld [vmem:[%s12662_s0 + $0x278] sm:$0xff]   ;;  %v9626_v57 = vld [vmem:[%s12662_s0 + $0x2c0] sm:$0xff]  }
  0x13   :  { %8992 = vmatprep.mubr.msk.bf16.mxu0 %vm541_vm2, %v9583_v14  ;;  %9140 = vmatprep.mubr.msk.bf16.mxu1 %vm541_vm2, %v9584_v15  ;;  %v9627_v58 = vld [vmem:[%s12662_s0 + $0x280] sm:$0xff]   ;;  %v9628_v59 = vld [vmem:[%s12662_s0 + $0x2c8] sm:$0xff]   ;;  %v9632_v63 = vld [vmem:[%s12662_s0 + $0x3b0] sm:$0xff]  }
  0x14   :  { %v9629_v60 = vld [vmem:[%s12662_s0 + $0x360] sm:$0xff]   ;;  %v9630_v61 = vld [vmem:[%s12662_s0 + $0x3a8] sm:$0xff]   ;;  %v9633_v0 = vld [vmem:[%s12662_s0 + $0x370] sm:$0xff]  }
  0x15   :  { %v9631_v62 = vld [vmem:[%s12662_s0 + $0x368] sm:$0xff]   ;;  %v9634_v1 = vld [vmem:[%s12662_s0 + $0x3b8] sm:$0xff]   ;;  %v9636_v3 = vld [vmem:[%s12662_s0 + $0x3c0] sm:$0xff]  }
  0x16   :  { %v9635_v2 = vld [vmem:[%s12662_s0 + $0x378] sm:$0xff]   ;;  %v9637_v4 = vld [vmem:[%s12662_s0 + $0x380] sm:$0xff]   ;;  %v9638_v5 = vld [vmem:[%s12662_s0 + $0x3c8] sm:$0xff]  }
  0x17   :  { %v9639_v6 = vld [vmem:[%s12662_s0 + $0x388] sm:$0xff]   ;;  %v9640_v7 = vld [vmem:[%s12662_s0 + $0x3d0] sm:$0xff]   ;;  %v9642_v9 = vld [vmem:[%s12662_s0 + $0x3d8] sm:$0xff]  }
  0x18   :  { %v9641_v8 = vld [vmem:[%s12662_s0 + $0x390] sm:$0xff]   ;;  %v9643_v10 = vld [vmem:[%s12662_s0 + $0x398] sm:$0xff]   ;;  %v9644_v11 = vld [vmem:[%s12662_s0 + $0x3e0] sm:$0xff]  }
  0x19   :  { %v9645_v12 = vld [vmem:[%s12662_s0 + $0x3a0] sm:$0xff]   ;;  %v9646_v13 = vld [vmem:[%s12662_s0 + $0x3e8] sm:$0xff]  }
  0x1a   :  { %8993 = vmatmul.mubr.msk.bf16.gmra.mrb[8].mxu0 %vm541_vm2, %v9585_v16  ;;  %9141 = vmatmul.mubr.msk.bf16.gmra.mrb[8].mxu1 %vm541_vm2, %v9586_v17  ;;  %v9647_v14 = vld [vmem:[%s12662_s0 + $0x480] sm:$0xff]   ;;  %v9648_v15 = vld [vmem:[%s12662_s0 + $0x4c8] sm:$0xff]   ;;  %v9650_v17 = vld [vmem:[%s12662_s0 + $0x4d0] sm:$0xff]  }
  0x1b   :  { %8996 = vmatprep.mubr.msk.bf16.mxu0 %vm541_vm2, %v9587_v18  ;;  %9144 = vmatprep.mubr.msk.bf16.mxu1 %vm541_vm2, %v9588_v19  ;;  %v9649_v16 = vld [vmem:[%s12662_s0 + $0x488] sm:$0xff]   ;;  %v9651_v18 = vld [vmem:[%s12662_s0 + $0x490] sm:$0xff]   ;;  %v9652_v19 = vld [vmem:[%s12662_s0 + $0x4d8] sm:$0xff]  }
  0x22   :  { %8997 = vmatmul.mubr.msk.bf16.gmra.mrb[12].mxu0 %vm541_vm2, %v9589_v20  ;;  %9145 = vmatmul.mubr.msk.bf16.gmra.mrb[12].mxu1 %vm541_vm2, %v9590_v21  ;;  %v9653_v20 = vld [vmem:[%s12662_s0 + $0x498] sm:$0xff]   ;;  %v9654_v21 = vld [vmem:[%s12662_s0 + $0x4e0] sm:$0xff]  }
  0x23   :  { %9000 = vmatprep.mubr.msk.bf16.mxu0 %vm541_vm2, %v9591_v22  ;;  %9148 = vmatprep.mubr.msk.bf16.mxu1 %vm541_vm2, %v9592_v23  ;;  %v9655_v22 = vld [vmem:[%s12662_s0 + $0x4a0] sm:$0xff]   ;;  %v9656_v23 = vld [vmem:[%s12662_s0 + $0x4e8] sm:$0xff]  }
  0x2a   :  { %9001 = vmatmul.mubr.msk.bf16.gmra.mrb[16].mxu0 %vm541_vm2, %v9593_v24  ;;  %9149 = vmatmul.mubr.msk.bf16.gmra.mrb[16].mxu1 %vm541_vm2, %v9594_v25  ;;  %v9657_v24 = vld [vmem:[%s12662_s0 + $0x4a8] sm:$0xff]   ;;  %v9658_v25 = vld [vmem:[%s12662_s0 + $0x4f0] sm:$0xff]  }
  0x2b   :  { %9004 = vmatprep.mubr.msk.bf16.mxu0 %vm541_vm2, %v9595_v26  ;;  %9152 = vmatprep.mubr.msk.bf16.mxu1 %vm541_vm2, %v9596_v27  ;;  %v9659_v26 = vld [vmem:[%s12662_s0 + $0x4b0] sm:$0xff]   ;;  %v9660_v27 = vld [vmem:[%s12662_s0 + $0x4f8] sm:$0xff]  }
  0x32   :  { %9005 = vmatmul.mubr.msk.bf16.gmra.mrb[20].mxu0 %vm541_vm2, %v9597_v28  ;;  %9153 = vmatmul.mubr.msk.bf16.gmra.mrb[20].mxu1 %vm541_vm2, %v9598_v29  ;;  %v9661_v28 = vld [vmem:[%s12662_s0 + $0x4b8] sm:$0xff]   ;;  %v9662_v29 = vld [vmem:[%s12662_s0 + $0x500] sm:$0xff]  }
  0x33   :  { %9008 = vmatprep.mubr.msk.bf16.mxu0 %vm541_vm2, %v9599_v30  ;;  %9156 = vmatprep.mubr.msk.bf16.mxu1 %vm541_vm2, %v9600_v31  ;;  %v9663_v30 = vld [vmem:[%s12662_s0 + $0x4c0] sm:$0xff]   ;;  %v9664_v31 = vld [vmem:[%s12662_s0 + $0x508] sm:$0xff]  }
  0x3a   :  { %9009 = vmatmul.mubr.msk.bf16.gmra.mrb[24].mxu0 %vm541_vm2, %v9601_v32  ;;  %9157 = vmatmul.mubr.msk.bf16.gmra.mrb[24].mxu1 %vm541_vm2, %v9602_v33  ;;  %v9665_v32 = vld [vmem:[%s12662_s0 + $0x5a0] sm:$0xff]   ;;  %v9666_v33 = vld [vmem:[%s12662_s0 + $0x5e8] sm:$0xff]  }
  0x3b   :  { %9012 = vmatprep.mubr.msk.bf16.mxu0 %vm541_vm2, %v9603_v34  ;;  %9160 = vmatprep.mubr.msk.bf16.mxu1 %vm541_vm2, %v9604_v35  ;;  %v9667_v34 = vld [vmem:[%s12662_s0 + $0x5a8] sm:$0xff]   ;;  %v9668_v35 = vld [vmem:[%s12662_s0 + $0x5f0] sm:$0xff]  }
  0x42   :  { %9013 = vmatmul.mubr.msk.bf16.gmra.mrb[28].mxu0 %vm541_vm2, %v9605_v36  ;;  %9161 = vmatmul.mubr.msk.bf16.gmra.mrb[28].mxu1 %vm541_vm2, %v9606_v37  ;;  %v9669_v36 = vld [vmem:[%s12662_s0 + $0x5b0] sm:$0xff]   ;;  %v9670_v37 = vld [vmem:[%s12662_s0 + $0x5f8] sm:$0xff]  }
  0x43   :  { %9016 = vmatprep.mubr.msk.bf16.mxu0 %vm541_vm2, %v9607_v38  ;;  %9164 = vmatprep.mubr.msk.bf16.mxu1 %vm541_vm2, %v9608_v39  ;;  %v9671_v38 = vld [vmem:[%s12662_s0 + $0x5b8] sm:$0xff]   ;;  %v9672_v39 = vld [vmem:[%s12662_s0 + $0x600] sm:$0xff]  }
  0x4a   :  { %9017 = vmatmul.mubr.msk.bf16.gmra.mrb[32].mxu0 %vm541_vm2, %v9609_v40  ;;  %9165 = vmatmul.mubr.msk.bf16.gmra.mrb[32].mxu1 %vm541_vm2, %v9610_v41  ;;  %v9673_v40 = vld [vmem:[%s12662_s0 + $0x5c0] sm:$0xff]   ;;  %v9674_v41 = vld [vmem:[%s12662_s0 + $0x608] sm:$0xff]  }
  0x4b   :  { %9020 = vmatprep.mubr.msk.bf16.mxu0 %vm541_vm2, %v9611_v42  ;;  %9168 = vmatprep.mubr.msk.bf16.mxu1 %vm541_vm2, %v9612_v43  ;;  %v9675_v42 = vld [vmem:[%s12662_s0 + $0x5c8] sm:$0xff]   ;;  %v9676_v43 = vld [vmem:[%s12662_s0 + $0x610] sm:$0xff]  }
  0x52   :  { %9021 = vmatmul.mubr.msk.bf16.gmra.mrb[36].mxu0 %vm541_vm2, %v9613_v44  ;;  %9169 = vmatmul.mubr.msk.bf16.gmra.mrb[36].mxu1 %vm541_vm2, %v9614_v45  ;;  %v9677_v44 = vld [vmem:[%s12662_s0 + $0x5d0] sm:$0xff]   ;;  %v9678_v45 = vld [vmem:[%s12662_s0 + $0x618] sm:$0xff]  }
  0x53   :  { %9024 = vmatprep.mubr.msk.bf16.mxu0 %vm541_vm2, %v9615_v46  ;;  %9172 = vmatprep.mubr.msk.bf16.mxu1 %vm541_vm2, %v9616_v47  ;;  %v9679_v46 = vld [vmem:[%s12662_s0 + $0x5d8] sm:$0xff]   ;;  %v9680_v47 = vld [vmem:[%s12662_s0 + $0x620] sm:$0xff]  }
  0x5a   :  { %9025 = vmatmul.mubr.msk.bf16.gmra.mrb[40].mxu0 %vm541_vm2, %v9617_v48  ;;  %9173 = vmatmul.mubr.msk.bf16.gmra.mrb[40].mxu1 %vm541_vm2, %v9618_v49  ;;  %v9681_v48 = vld [vmem:[%s12662_s0 + $0x5e0] sm:$0xff]   ;;  %v9682_v49 = vld [vmem:[%s12662_s0 + $0x628] sm:$0xff]  }
  0x5b   :  { %9028 = vmatprep.mubr.msk.bf16.mxu0 %vm541_vm2, %v9619_v50  ;;  %9176 = vmatprep.mubr.msk.bf16.mxu1 %vm541_vm2, %v9620_v51  ;;  %v9683_v50 = vld [vmem:[%s12662_s0 + $0x6c0] sm:$0xff]   ;;  %v9684_v51 = vld [vmem:[%s12662_s0 + $0x708] sm:$0xff]  }
  0x62   :  { %9029 = vmatmul.mubr.msk.bf16.gmra.mrb[44].mxu0 %vm541_vm2, %v9621_v52  ;;  %9177 = vmatmul.mubr.msk.bf16.gmra.mrb[44].mxu1 %vm541_vm2, %v9622_v53  ;;  %v10334_v52 = vld [vmem:[%s12663_s2] ss:$0 sm:$0xff]  ;;  %v9685_v53 = vld [vmem:[%s12662_s0 + $0x6c8] sm:$0xff]  }
  0x63   :  { %9032 = vmatprep.mubr.msk.bf16.mxu0 %vm541_vm2, %v9623_v54  ;;  %9180 = vmatprep.mubr.msk.bf16.mxu1 %vm541_vm2, %v9624_v55  ;;  %v9686_v54 = vld [vmem:[%s12662_s0 + $0x710] sm:$0xff]  }
  0x6a   :  { %9033 = vmatmul.mubr.msk.bf16.gmra.mrb[48].mxu0 %vm541_vm2, %v9625_v56  ;;  %9181 = vmatmul.mubr.msk.bf16.gmra.mrb[48].mxu1 %vm541_vm2, %v9626_v57 }
  0x6b   :  { %9036 = vmatprep.mubr.msk.bf16.mxu0 %vm541_vm2, %v9627_v58  ;;  %9184 = vmatprep.mubr.msk.bf16.mxu1 %vm541_vm2, %v9628_v59 }
  0x72   :  { %9037 = vmatmul.mubr.msk.bf16.gmra.mrb[52].mxu0 %vm541_vm2, %v9629_v60  ;;  %9185 = vmatmul.mubr.msk.bf16.gmra.mrb[52].mxu1 %vm541_vm2, %v9630_v61 }
  0x73   :  { %9040 = vmatprep.mubr.msk.bf16.mxu0 %vm541_vm2, %v9631_v62  ;;  %9188 = vmatprep.mubr.msk.bf16.mxu1 %vm541_vm2, %v9632_v63 }
  0x7a   :  { %9041 = vmatmul.mubr.msk.bf16.gmra.mrb[56].mxu0 %vm541_vm2, %v9633_v0  ;;  %9189 = vmatmul.mubr.msk.bf16.gmra.mrb[56].mxu1 %vm541_vm2, %v9634_v1  ;;  %v9687_v1 = vld [vmem:[%s12662_s0 + $0x6d0] sm:$0xff]  }
  0x7b   :  { %9044 = vmatprep.mubr.msk.bf16.mxu0 %vm541_vm2, %v9635_v2  ;;  %9192 = vmatprep.mubr.msk.bf16.mxu1 %vm541_vm2, %v9636_v3  ;;  %v9688_v2 = vld [vmem:[%s12662_s0 + $0x718] sm:$0xff]  }
  0x82   :  { %9045 = vmatmul.mubr.msk.bf16.gmra.mrb[60].mxu0 %vm541_vm2, %v9637_v4  ;;  %9193 = vmatmul.mubr.msk.bf16.gmra.mrb[60].mxu1 %vm541_vm2, %v9638_v5 }
  0x83   :  { %9048 = vmatprep.mubr.msk.bf16.mxu0 %vm541_vm2, %v9639_v6  ;;  %9196 = vmatprep.mubr.msk.bf16.mxu1 %vm541_vm2, %v9640_v7 }
  0x8a   :  { %9049 = vmatmul.mubr.msk.bf16.gmra.mrb[64].mxu0 %vm541_vm2, %v9641_v8  ;;  %9197 = vmatmul.mubr.msk.bf16.gmra.mrb[64].mxu1 %vm541_vm2, %v9642_v9 }
  0x8b   :  { %9052 = vmatprep.mubr.msk.bf16.mxu0 %vm541_vm2, %v9643_v10  ;;  %9200 = vmatprep.mubr.msk.bf16.mxu1 %vm541_vm2, %v9644_v11 }
  0x92   :  { %9053 = vmatmul.mubr.msk.bf16.gmra.mrb[68].mxu0 %vm541_vm2, %v9645_v12  ;;  %9201 = vmatmul.mubr.msk.bf16.gmra.mrb[68].mxu1 %vm541_vm2, %v9646_v13 }
  0x93   :  { %9056 = vmatprep.mubr.msk.bf16.mxu0 %vm541_vm2, %v9647_v14  ;;  %9204 = vmatprep.mubr.msk.bf16.mxu1 %vm541_vm2, %v9648_v15 }
  0x9a   :  { %9057 = vmatmul.mubr.msk.bf16.gmra.mrb[72].mxu0 %vm541_vm2, %v9649_v16  ;;  %9205 = vmatmul.mubr.msk.bf16.gmra.mrb[72].mxu1 %vm541_vm2, %v9650_v17 }
  0x9b   :  { %9060 = vmatprep.mubr.msk.bf16.mxu0 %vm541_vm2, %v9651_v18  ;;  %9208 = vmatprep.mubr.msk.bf16.mxu1 %vm541_vm2, %v9652_v19  ;;  %v9689_v19 = vld [vmem:[%s12662_s0 + $0x6d8] sm:$0xff]  }
  0xa2   :  { %9061 = vmatmul.mubr.msk.bf16.gmra.mrb[76].mxu0 %vm541_vm2, %v9653_v20  ;;  %9209 = vmatmul.mubr.msk.bf16.gmra.mrb[76].mxu1 %vm541_vm2, %v9654_v21  ;;  %v9690_v20 = vld [vmem:[%s12662_s0 + $0x720] sm:$0xff]  }
  0xa3   :  { %9064 = vmatprep.mubr.msk.bf16.mxu0 %vm541_vm2, %v9655_v22  ;;  %9212 = vmatprep.mubr.msk.bf16.mxu1 %vm541_vm2, %v9656_v23 }
  0xaa   :  { %9065 = vmatmul.mubr.msk.bf16.gmra.mrb[80].mxu0 %vm541_vm2, %v9657_v24  ;;  %9213 = vmatmul.mubr.msk.bf16.gmra.mrb[80].mxu1 %vm541_vm2, %v9658_v25 }
  0xab   :  { %9068 = vmatprep.mubr.msk.bf16.mxu0 %vm541_vm2, %v9659_v26  ;;  %9216 = vmatprep.mubr.msk.bf16.mxu1 %vm541_vm2, %v9660_v27 }
  0xb2   :  { %9069 = vmatmul.mubr.msk.bf16.gmra.mrb[84].mxu0 %vm541_vm2, %v9661_v28  ;;  %9217 = vmatmul.mubr.msk.bf16.gmra.mrb[84].mxu1 %vm541_vm2, %v9662_v29 }
  0xb3   :  { %9072 = vmatprep.mubr.msk.bf16.mxu0 %vm541_vm2, %v9663_v30  ;;  %9220 = vmatprep.mubr.msk.bf16.mxu1 %vm541_vm2, %v9664_v31 }
  0xba   :  { %9073 = vmatmul.mubr.msk.bf16.gmra.mrb[88].mxu0 %vm541_vm2, %v9665_v32  ;;  %9221 = vmatmul.mubr.msk.bf16.gmra.mrb[88].mxu1 %vm541_vm2, %v9666_v33  ;;  %v9691_v33 = vld [vmem:[%s12662_s0 + $0x6e0] sm:$0xff]  }
  0xbb   :  { %9076 = vmatprep.mubr.msk.bf16.mxu0 %vm541_vm2, %v9667_v34  ;;  %9224 = vmatprep.mubr.msk.bf16.mxu1 %vm541_vm2, %v9668_v35  ;;  %v9692_v34 = vld [vmem:[%s12662_s0 + $0x728] sm:$0xff]  }
  0xc2   :  { %9077 = vmatmul.mubr.msk.bf16.gmra.mrb[92].mxu0 %vm541_vm2, %v9669_v36  ;;  %9225 = vmatmul.mubr.msk.bf16.gmra.mrb[92].mxu1 %vm541_vm2, %v9670_v37 }
  0xc3   :  { %9080 = vmatprep.mubr.msk.bf16.mxu0 %vm541_vm2, %v9671_v38  ;;  %9228 = vmatprep.mubr.msk.bf16.mxu1 %vm541_vm2, %v9672_v39 }
  0xca   :  { %9081 = vmatmul.mubr.msk.bf16.gmra.mrb[96].mxu0 %vm541_vm2, %v9673_v40  ;;  %9229 = vmatmul.mubr.msk.bf16.gmra.mrb[96].mxu1 %vm541_vm2, %v9674_v41 }
  0xcb   :  { %9084 = vmatprep.mubr.msk.bf16.mxu0 %vm541_vm2, %v9675_v42  ;;  %9232 = vmatprep.mubr.msk.bf16.mxu1 %vm541_vm2, %v9676_v43 }
  0xd2   :  { %9085 = vmatmul.mubr.msk.bf16.gmra.mrb[100].mxu0 %vm541_vm2, %v9677_v44  ;;  %9233 = vmatmul.mubr.msk.bf16.gmra.mrb[100].mxu1 %vm541_vm2, %v9678_v45 }
  0xd3   :  { %9088 = vmatprep.mubr.msk.bf16.mxu0 %vm541_vm2, %v9679_v46  ;;  %9236 = vmatprep.mubr.msk.bf16.mxu1 %vm541_vm2, %v9680_v47 }
  0xda   :  { %9089 = vmatmul.mubr.msk.bf16.gmra.mrb[104].mxu0 %vm541_vm2, %v9681_v48  ;;  %9237 = vmatmul.mubr.msk.bf16.gmra.mrb[104].mxu1 %vm541_vm2, %v9682_v49 }
  0xdb   :  { %9092 = vmatprep.mubr.msk.bf16.mxu0 %vm541_vm2, %v9683_v50  ;;  %9240 = vmatprep.mubr.msk.bf16.mxu1 %vm541_vm2, %v9684_v51  ;;  %v9693_v51 = vld [vmem:[%s12662_s0 + $0x6e8] sm:$0xff]  }
  0xdd   :  { %v8986_v55 = vpop.f32.mrb[0].mxu0  ;;  %v9134_v56 = vpop.f32.mrb[0].mxu1 }
  0xde   :  { %v808_v57 = vadd.f32 %v8986_v55, %v10334_v52  ;;  %v2426_v58 = vadd.f32 %v9134_v56, %v10334_v52  ;;  %v799_v59 = vpop.f32.mrb[1].mxu0  ;;  %v2417_v60 = vpop.f32.mrb[1].mxu1 }
  0xdf   :  { %v800_v61 = vadd.f32 %v10334_v52, %v799_v59  ;;  %v2418_v62 = vadd.f32 %v10334_v52, %v2417_v60  ;;  %v8987_v63 = vpop.f32.mrb[2].mxu0  ;;  %v9135_v0 = vpop.f32.mrb[2].mxu1 }
  0xe0   :  { %v1376_v3 = vmax.f32 %v808_v57, 0.0  ;;  %v2994_v4 = vmax.f32 %v2426_v58, 0.0  ;;  %v811_v5 = vadd.f32 %v8987_v63, %v10334_v52  ;;  %v2429_v6 = vadd.f32 %v9135_v0, %v10334_v52  ;;  %v802_v7 = vpop.f32.mrb[3].mxu0  ;;  %v2420_v8 = vpop.f32.mrb[3].mxu1 }
  0xe1   :  { %v1374_v9 = vmax.f32 %v800_v61, 0.0  ;;  %v2992_v10 = vmax.f32 %v2418_v62, 0.0  ;;  %v803_v11 = vadd.f32 %v10334_v52, %v802_v7  ;;  %v2421_v12 = vadd.f32 %v10334_v52, %v2420_v8 }
  0xe2   :  { %v1377_v13 = vmax.f32 %v811_v5, 0.0  ;;  %v2995_v14 = vmax.f32 %v2429_v6, 0.0  ;;  %9093 = vmatmul.mubr.msk.bf16.gmra.mrb[108].mxu0 %vm541_vm2, %v9685_v53  ;;  %9241 = vmatmul.mubr.msk.bf16.gmra.mrb[108].mxu1 %vm541_vm2, %v9686_v54  ;;  %v10362_v15 = vadd.f32 %v2994_v4, %v1376_v3  ;;  %v9694_v53 = vld [vmem:[%s12662_s0 + $0x730] sm:$0xff]   ;;  %v9696_v3 = vld [vmem:[%s12662_s0 + $0x738] sm:$0xff]  }
  0xe3   :  { %v1375_v16 = vmax.f32 %v803_v11, 0.0  ;;  %v2993_v17 = vmax.f32 %v2421_v12, 0.0  ;;  %9096 = vmatprep.mubr.msk.bf16.mxu0 %vm541_vm2, %v9687_v1  ;;  %9244 = vmatprep.mubr.msk.bf16.mxu1 %vm541_vm2, %v9688_v2  ;;  %v10366_v18 = vadd.f32 %v2992_v10, %v1374_v9  ;;  %v9695_v2 = vld [vmem:[%s12662_s0 + $0x6f0] sm:$0xff]  }
  0xe4   :  { %v10374_v21 = vadd.f32 %v2995_v14, %v1377_v13 }
  0xe5   :  { %v8990_v22 = vpop.f32.mrb[4].mxu0  ;;  %v9138_v23 = vpop.f32.mrb[4].mxu1  ;;  %v10376_v24 = vadd.f32 %v2993_v17, %v1375_v16 }
  0xe6   :  { %v824_v25 = vadd.f32 %v8990_v22, %v10334_v52  ;;  %v2442_v26 = vadd.f32 %v9138_v23, %v10334_v52  ;;  %v815_v27 = vpop.f32.mrb[5].mxu0  ;;  %v2433_v28 = vpop.f32.mrb[5].mxu1  ;;  %v9697_v23 = vld [vmem:[%s12662_s0 + $0x6f8] sm:$0xff]  }
  0xe7   :  { %v816_v29 = vadd.f32 %v10334_v52, %v815_v27  ;;  %v2434_v30 = vadd.f32 %v10334_v52, %v2433_v28  ;;  %v8991_v31 = vpop.f32.mrb[6].mxu0  ;;  %v9139_v32 = vpop.f32.mrb[6].mxu1 }
  0xe8   :  { %v1380_v35 = vmax.f32 %v824_v25, 0.0  ;;  %v2998_v36 = vmax.f32 %v2442_v26, 0.0  ;;  %v827_v37 = vadd.f32 %v8991_v31, %v10334_v52  ;;  %v2445_v38 = vadd.f32 %v9139_v32, %v10334_v52  ;;  %v818_v39 = vpop.f32.mrb[7].mxu0  ;;  %v2436_v40 = vpop.f32.mrb[7].mxu1  ;;  %v9698_v25 = vld [vmem:[%s12662_s0 + $0x740] sm:$0xff]  }
  0xe9   :  { %v1378_v41 = vmax.f32 %v816_v29, 0.0  ;;  %v2996_v42 = vmax.f32 %v2434_v30, 0.0  ;;  %v819_v43 = vadd.f32 %v10334_v52, %v818_v39  ;;  %v2437_v44 = vadd.f32 %v10334_v52, %v2436_v40  ;;  %v9700_v39 = vld [vmem:[%s12662_s0 + $0x748] sm:$0xff]  }
  0xea   :  { %v1381_v45 = vmax.f32 %v827_v37, 0.0  ;;  %v2999_v46 = vmax.f32 %v2445_v38, 0.0  ;;  %9097 = vmatmul.mubr.msk.bf16.gmra.mrb[112].mxu0 %vm541_vm2, %v9689_v19  ;;  %9245 = vmatmul.mubr.msk.bf16.gmra.mrb[112].mxu1 %vm541_vm2, %v9690_v20  ;;  %v10394_v47 = vadd.f32 %v2998_v36, %v1380_v35  ;;  %v9699_v38 = vld [vmem:[%s12662_s0 + $0x700] sm:$0xff]  }
  0xeb   :  { %v1379_v48 = vmax.f32 %v819_v43, 0.0  ;;  %v2997_v49 = vmax.f32 %v2437_v44, 0.0  ;;  %9100 = vmatprep.mubr.msk.bf16.mxu0 %vm541_vm2, %v9691_v33  ;;  %9248 = vmatprep.mubr.msk.bf16.mxu1 %vm541_vm2, %v9692_v34  ;;  %v10398_v50 = vadd.f32 %v2996_v42, %v1378_v41 }
  0xec   :  { %v10406_v54 = vadd.f32 %v2999_v46, %v1381_v45 }
  0xed   :  { %v8994_v55 = vpop.f32.mrb[8].mxu0  ;;  %v9142_v56 = vpop.f32.mrb[8].mxu1  ;;  %v10408_v57 = vadd.f32 %v2997_v49, %v1379_v48 }
  0xee   :  { %v840_v58 = vadd.f32 %v8994_v55, %v10334_v52  ;;  %v2458_v59 = vadd.f32 %v9142_v56, %v10334_v52  ;;  %v831_v60 = vpop.f32.mrb[9].mxu0  ;;  %v2449_v61 = vpop.f32.mrb[9].mxu1 }
  0xef   :  { %v832_v62 = vadd.f32 %v10334_v52, %v831_v60  ;;  %v2450_v63 = vadd.f32 %v10334_v52, %v2449_v61  ;;  %v8995_v0 = vpop.f32.mrb[10].mxu0  ;;  %v9143_v1 = vpop.f32.mrb[10].mxu1  ;;  %v9701_v61 = vld [vmem:[%s12662_s0 + $0x7e0] sm:$0xff]  }
  0xf0   :  { %v1384_v4 = vmax.f32 %v840_v58, 0.0  ;;  %v3002_v5 = vmax.f32 %v2458_v59, 0.0  ;;  %v843_v6 = vadd.f32 %v8995_v0, %v10334_v52  ;;  %v2461_v7 = vadd.f32 %v9143_v1, %v10334_v52  ;;  %v834_v8 = vpop.f32.mrb[11].mxu0  ;;  %v2452_v9 = vpop.f32.mrb[11].mxu1 }
  0xf1   :  { %v1382_v10 = vmax.f32 %v832_v62, 0.0  ;;  %v3000_v11 = vmax.f32 %v2450_v63, 0.0  ;;  %v835_v12 = vadd.f32 %v10334_v52, %v834_v8  ;;  %v2453_v13 = vadd.f32 %v10334_v52, %v2452_v9  ;;  %v9702_v62 = vld [vmem:[%s12662_s0 + $0x828] sm:$0xff]  }
  0xf2   :  { %v1385_v14 = vmax.f32 %v843_v6, 0.0  ;;  %v3003_v16 = vmax.f32 %v2461_v7, 0.0  ;;  %9101 = vmatmul.mubr.msk.bf16.gmra.mrb[116].mxu0 %vm541_vm2, %v9693_v51  ;;  %9249 = vmatmul.mubr.msk.bf16.gmra.mrb[116].mxu1 %vm541_vm2, %v9694_v53  ;;  %v10426_v17 = vadd.f32 %v3002_v5, %v1384_v4 }
  0xf3   :  { %v1383_v19 = vmax.f32 %v835_v12, 0.0  ;;  %v3001_v20 = vmax.f32 %v2453_v13, 0.0  ;;  %9104 = vmatprep.mubr.msk.bf16.mxu0 %vm541_vm2, %v9695_v2  ;;  %9252 = vmatprep.mubr.msk.bf16.mxu1 %vm541_vm2, %v9696_v3  ;;  %v10430_v22 = vadd.f32 %v3000_v11, %v1382_v10  ;;  %v9703_v11 = vld [vmem:[%s12662_s0 + $0x7e8] sm:$0xff]   ;;  %v9704_v12 = vld [vmem:[%s12662_s0 + $0x830] sm:$0xff]  }
  0xf4   :  { %v10438_v26 = vadd.f32 %v3003_v16, %v1385_v14 }
  0xf5   :  { %v8998_v27 = vpop.f32.mrb[12].mxu0  ;;  %v9146_v28 = vpop.f32.mrb[12].mxu1  ;;  %v10440_v29 = vadd.f32 %v3001_v20, %v1383_v19 }
  0xf6   :  { %v856_v30 = vadd.f32 %v8998_v27, %v10334_v52  ;;  %v2474_v31 = vadd.f32 %v9146_v28, %v10334_v52  ;;  %v847_v32 = vpop.f32.mrb[13].mxu0  ;;  %v2465_v33 = vpop.f32.mrb[13].mxu1 }
  0xf7   :  { %v848_v34 = vadd.f32 %v10334_v52, %v847_v32  ;;  %v2466_v35 = vadd.f32 %v10334_v52, %v2465_v33  ;;  %v8999_v36 = vpop.f32.mrb[14].mxu0  ;;  %v9147_v37 = vpop.f32.mrb[14].mxu1 }
  0xf8   :  { %v1388_v40 = vmax.f32 %v856_v30, 0.0  ;;  %v3006_v41 = vmax.f32 %v2474_v31, 0.0  ;;  %v859_v42 = vadd.f32 %v8999_v36, %v10334_v52  ;;  %v2477_v43 = vadd.f32 %v9147_v37, %v10334_v52  ;;  %v850_v44 = vpop.f32.mrb[15].mxu0  ;;  %v2468_v45 = vpop.f32.mrb[15].mxu1  ;;  %v9705_v37 = vld [vmem:[%s12662_s0 + $0x7f0] sm:$0xff]  }
  0xf9   :  { %v1386_v46 = vmax.f32 %v848_v34, 0.0  ;;  %v3004_v48 = vmax.f32 %v2466_v35, 0.0  ;;  %v851_v49 = vadd.f32 %v10334_v52, %v850_v44  ;;  %v2469_v51 = vadd.f32 %v10334_v52, %v2468_v45 }
  0xfa   :  { %v1389_v53 = vmax.f32 %v859_v42, 0.0  ;;  %v3007_v55 = vmax.f32 %v2477_v43, 0.0  ;;  %9105 = vmatmul.mubr.msk.bf16.gmra.mrb[120].mxu0 %vm541_vm2, %v9697_v23  ;;  %9253 = vmatmul.mubr.msk.bf16.gmra.mrb[120].mxu1 %vm541_vm2, %v9698_v25  ;;  %v10458_v56 = vadd.f32 %v3006_v41, %v1388_v40 }
  0xfb   :  { %v1387_v58 = vmax.f32 %v851_v49, 0.0  ;;  %v3005_v59 = vmax.f32 %v2469_v51, 0.0  ;;  %9108 = vmatprep.mubr.msk.bf16.mxu0 %vm541_vm2, %v9699_v38  ;;  %9256 = vmatprep.mubr.msk.bf16.mxu1 %vm541_vm2, %v9700_v39  ;;  %v10462_v60 = vadd.f32 %v3004_v48, %v1386_v46  ;;  %v9706_v38 = vld [vmem:[%s12662_s0 + $0x838] sm:$0xff]  }
  0xfc   :  { %v10470_v63 = vadd.f32 %v3007_v55, %v1389_v53  ;;  %v9707_v55 = vld [vmem:[%s12662_s0 + $0x7f8] sm:$0xff]  }
  0xfd   :  { %v9002_v0 = vpop.f32.mrb[16].mxu0  ;;  %v9150_v1 = vpop.f32.mrb[16].mxu1  ;;  %v10472_v2 = vadd.f32 %v3005_v59, %v1387_v58  ;;  %v9708_v58 = vld [vmem:[%s12662_s0 + $0x840] sm:$0xff]  }
  0xfe   :  { %v872_v3 = vadd.f32 %v9002_v0, %v10334_v52  ;;  %v2490_v4 = vadd.f32 %v9150_v1, %v10334_v52  ;;  %v863_v5 = vpop.f32.mrb[17].mxu0  ;;  %v2481_v6 = vpop.f32.mrb[17].mxu1 }
  0xff   :  { %v864_v7 = vadd.f32 %v10334_v52, %v863_v5  ;;  %v2482_v8 = vadd.f32 %v10334_v52, %v2481_v6  ;;  %v9003_v9 = vpop.f32.mrb[18].mxu0  ;;  %v9151_v10 = vpop.f32.mrb[18].mxu1 }
 0x100   :  { %v1392_v13 = vmax.f32 %v872_v3, 0.0  ;;  %v3010_v14 = vmax.f32 %v2490_v4, 0.0  ;;  %v875_v16 = vadd.f32 %v9003_v9, %v10334_v52  ;;  %v2493_v19 = vadd.f32 %v9151_v10, %v10334_v52  ;;  %v866_v20 = vpop.f32.mrb[19].mxu0  ;;  %v2484_v23 = vpop.f32.mrb[19].mxu1 }
 0x101   :  { %v1390_v25 = vmax.f32 %v864_v7, 0.0  ;;  %v3008_v27 = vmax.f32 %v2482_v8, 0.0  ;;  %v867_v28 = vadd.f32 %v10334_v52, %v866_v20  ;;  %v2485_v30 = vadd.f32 %v10334_v52, %v2484_v23 }
 0x102   :  { %v1393_v31 = vmax.f32 %v875_v16, 0.0  ;;  %v3011_v32 = vmax.f32 %v2493_v19, 0.0  ;;  %9109 = vmatmul.mubr.msk.bf16.gmra.mrb[124].mxu0 %vm541_vm2, %v9701_v61  ;;  %9257 = vmatmul.mubr.msk.bf16.gmra.mrb[124].mxu1 %vm541_vm2, %v9702_v62  ;;  %v10490_v33 = vadd.f32 %v3010_v14, %v1392_v13  ;;  %v9709_v14 = vld [vmem:[%s12662_s0 + $0x800] sm:$0xff]   ;;  %v9710_v16 = vld [vmem:[%s12662_s0 + $0x848] sm:$0xff]  }
 0x103   :  { %v1391_v34 = vmax.f32 %v867_v28, 0.0  ;;  %v3009_v35 = vmax.f32 %v2485_v30, 0.0  ;;  %9112 = vmatprep.mubr.msk.bf16.mxu0 %vm541_vm2, %v9703_v11  ;;  %9260 = vmatprep.mubr.msk.bf16.mxu1 %vm541_vm2, %v9704_v12  ;;  %v10494_v36 = vadd.f32 %v3008_v27, %v1390_v25 }
 0x104   :  { %v10502_v39 = vadd.f32 %v3011_v32, %v1393_v31 }
 0x105   :  { %v9006_v40 = vpop.f32.mrb[20].mxu0  ;;  %v9154_v41 = vpop.f32.mrb[20].mxu1  ;;  %v10504_v42 = vadd.f32 %v3009_v35, %v1391_v34 }
 0x106   :  { %v888_v43 = vadd.f32 %v9006_v40, %v10334_v52  ;;  %v2506_v44 = vadd.f32 %v9154_v41, %v10334_v52  ;;  %v879_v45 = vpop.f32.mrb[21].mxu0  ;;  %v2497_v46 = vpop.f32.mrb[21].mxu1  ;;  %v9712_v40 = vld [vmem:[%s12662_s0 + $0x850] sm:$0xff]  }
 0x107   :  { %v880_v48 = vadd.f32 %v10334_v52, %v879_v45  ;;  %v2498_v49 = vadd.f32 %v10334_v52, %v2497_v46  ;;  %v9007_v51 = vpop.f32.mrb[22].mxu0  ;;  %v9155_v53 = vpop.f32.mrb[22].mxu1 }
 0x108   :  { %v1396_v59 = vmax.f32 %v888_v43, 0.0  ;;  %v3014_v61 = vmax.f32 %v2506_v44, 0.0  ;;  %v891_v62 = vadd.f32 %v9007_v51, %v10334_v52  ;;  %v2509_v0 = vadd.f32 %v9155_v53, %v10334_v52  ;;  %v882_v1 = vpop.f32.mrb[23].mxu0  ;;  %v2500_v3 = vpop.f32.mrb[23].mxu1 }
 0x109   :  { %v1394_v4 = vmax.f32 %v880_v48, 0.0  ;;  %v3012_v5 = vmax.f32 %v2498_v49, 0.0  ;;  %v883_v6 = vadd.f32 %v10334_v52, %v882_v1  ;;  %v2501_v7 = vadd.f32 %v10334_v52, %v2500_v3 }
 0x10a   :  { %v1397_v8 = vmax.f32 %v891_v62, 0.0  ;;  %v3015_v9 = vmax.f32 %v2509_v0, 0.0  ;;  %9113 = vmatmul.mubr.msk.bf16.gmra.mrb[128].mxu0 %vm541_vm2, %v9705_v37  ;;  %9261 = vmatmul.mubr.msk.bf16.gmra.mrb[128].mxu1 %vm541_vm2, %v9706_v38  ;;  %v10522_v10 = vadd.f32 %v3014_v61, %v1396_v59  ;;  %v9711_v38 = vld [vmem:[%s12662_s0 + $0x808] sm:$0xff]  }
 0x10b   :  { %v1395_v11 = vmax.f32 %v883_v6, 0.0  ;;  %v3013_v12 = vmax.f32 %v2501_v7, 0.0  ;;  %9116 = vmatprep.mubr.msk.bf16.mxu0 %vm541_vm2, %v9707_v55  ;;  %9264 = vmatprep.mubr.msk.bf16.mxu1 %vm541_vm2, %v9708_v58  ;;  %v10526_v13 = vadd.f32 %v3012_v5, %v1394_v4 }
 0x10c   :  { %v10534_v19 = vadd.f32 %v3015_v9, %v1397_v8 }
 0x10d   :  { %v9010_v20 = vpop.f32.mrb[24].mxu0  ;;  %v9158_v23 = vpop.f32.mrb[24].mxu1  ;;  %v10536_v25 = vadd.f32 %v3013_v12, %v1395_v11  ;;  %v9713_v12 = vld [vmem:[%s12662_s0 + $0x810] sm:$0xff]  }
 0x10e   :  { %v904_v27 = vadd.f32 %v9010_v20, %v10334_v52  ;;  %v2522_v28 = vadd.f32 %v9158_v23, %v10334_v52  ;;  %v895_v30 = vpop.f32.mrb[25].mxu0  ;;  %v2513_v31 = vpop.f32.mrb[25].mxu1 }
 0x10f   :  { %v896_v32 = vadd.f32 %v10334_v52, %v895_v30  ;;  %v2514_v34 = vadd.f32 %v10334_v52, %v2513_v31  ;;  %v9011_v35 = vpop.f32.mrb[26].mxu0  ;;  %v9159_v37 = vpop.f32.mrb[26].mxu1  ;;  %v9716_v30 = vld [vmem:[%s12662_s0 + $0x860] sm:$0xff]  }
 0x110   :  { %v1400_v41 = vmax.f32 %v904_v27, 0.0  ;;  %v3018_v43 = vmax.f32 %v2522_v28, 0.0  ;;  %v907_v44 = vadd.f32 %v9011_v35, %v10334_v52  ;;  %v2525_v45 = vadd.f32 %v9159_v37, %v10334_v52  ;;  %v898_v46 = vpop.f32.mrb[27].mxu0  ;;  %v2516_v48 = vpop.f32.mrb[27].mxu1  ;;  %v9715_v28 = vld [vmem:[%s12662_s0 + $0x818] sm:$0xff]  }
 0x111   :  { %v1398_v49 = vmax.f32 %v896_v32, 0.0  ;;  %v3016_v51 = vmax.f32 %v2514_v34, 0.0  ;;  %v899_v53 = vadd.f32 %v10334_v52, %v898_v46  ;;  %v2517_v55 = vadd.f32 %v10334_v52, %v2516_v48 }
 0x112   :  { %v1401_v58 = vmax.f32 %v907_v44, 0.0  ;;  %v3019_v59 = vmax.f32 %v2525_v45, 0.0  ;;  %9117 = vmatmul.mubr.msk.bf16.gmra.mrb[132].mxu0 %vm541_vm2, %v9709_v14  ;;  %9265 = vmatmul.mubr.msk.bf16.gmra.mrb[132].mxu1 %vm541_vm2, %v9710_v16  ;;  %v10554_v61 = vadd.f32 %v3018_v43, %v1400_v41  ;;  %v9714_v14 = vld [vmem:[%s12662_s0 + $0x858] sm:$0xff]  }
 0x113   :  { %v1399_v62 = vmax.f32 %v899_v53, 0.0  ;;  %v3017_v0 = vmax.f32 %v2517_v55, 0.0  ;;  %9120 = vmatprep.mubr.msk.bf16.mxu0 %vm541_vm2, %v9711_v38  ;;  %9268 = vmatprep.mubr.msk.bf16.mxu1 %vm541_vm2, %v9712_v40  ;;  %v10558_v1 = vadd.f32 %v3016_v51, %v1398_v49 }
 0x114   :  { %v10560_v3 = vadd.f32 %v3019_v59, %v1401_v58 }
 0x115   :  { %v9014_v4 = vpop.f32.mrb[28].mxu0  ;;  %v9162_v5 = vpop.f32.mrb[28].mxu1  ;;  %v10562_v6 = vadd.f32 %v3017_v0, %v1399_v62 }
 0x116   :  { %v920_v7 = vadd.f32 %v9014_v4, %v10334_v52  ;;  %v2538_v8 = vadd.f32 %v9162_v5, %v10334_v52  ;;  %v911_v9 = vpop.f32.mrb[29].mxu0  ;;  %v2529_v11 = vpop.f32.mrb[29].mxu1 }
 0x117   :  { %v912_v16 = vadd.f32 %v10334_v52, %v911_v9  ;;  %v2530_v20 = vadd.f32 %v10334_v52, %v2529_v11  ;;  %v9015_v23 = vpop.f32.mrb[30].mxu0  ;;  %v9163_v27 = vpop.f32.mrb[30].mxu1  ;;  %v9718_v9 = vld [vmem:[%s12662_s0 + $0x868] sm:$0xff]  }
 0x118   :  { %v1404_v31 = vmax.f32 %v920_v7, 0.0  ;;  %v3022_v32 = vmax.f32 %v2538_v8, 0.0  ;;  %v923_v34 = vadd.f32 %v9015_v23, %v10334_v52  ;;  %v2541_v35 = vadd.f32 %v9163_v27, %v10334_v52  ;;  %v914_v37 = vpop.f32.mrb[31].mxu0  ;;  %v2532_v38 = vpop.f32.mrb[31].mxu1  ;;  %v9717_v8 = vld [vmem:[%s12662_s0 + $0x820] sm:$0xff]   ;;  %v9720_v23 = vld [vmem:[%s12662_s0 + $0xd8] sm:$0xff]  }
 0x119   :  { %v1402_v40 = vmax.f32 %v912_v16, 0.0  ;;  %v3020_v41 = vmax.f32 %v2530_v20, 0.0  ;;  %v915_v43 = vadd.f32 %v10334_v52, %v914_v37  ;;  %v2533_v44 = vadd.f32 %v10334_v52, %v2532_v38  ;;  %v9719_v20 = vld [vmem:[%s12662_s0 + $0x90] sm:$0xff]  }
 0x11a   :  { %v1405_v45 = vmax.f32 %v923_v34, 0.0  ;;  %v3023_v46 = vmax.f32 %v2541_v35, 0.0  ;;  %9121 = vmatmul.mubr.msk.bf16.gmra.mrb[136].mxu0 %vm541_vm2, %v9713_v12  ;;  %9269 = vmatmul.mubr.msk.bf16.gmra.mrb[136].mxu1 %vm541_vm2, %v9714_v14  ;;  %v10586_v48 = vadd.f32 %v3022_v32, %v1404_v31 }
 0x11b   :  { %v1403_v49 = vmax.f32 %v915_v43, 0.0  ;;  %v3021_v51 = vmax.f32 %v2533_v44, 0.0  ;;  %9124 = vmatprep.mubr.msk.bf16.mxu0 %vm541_vm2, %v9715_v28  ;;  %9272 = vmatprep.mubr.msk.bf16.mxu1 %vm541_vm2, %v9716_v30  ;;  %v10590_v53 = vadd.f32 %v3020_v41, %v1402_v40 }
 0x11c   :  { %v10592_v55 = vadd.f32 %v3023_v46, %v1405_v45 }
 0x11d   :  { %v9018_v58 = vpop.f32.mrb[32].mxu0  ;;  %v9166_v59 = vpop.f32.mrb[32].mxu1  ;;  %v10594_v62 = vadd.f32 %v3021_v51, %v1403_v49 }
 0x11e   :  { %v936_v0 = vadd.f32 %v9018_v58, %v10334_v52  ;;  %v2554_v4 = vadd.f32 %v9166_v59, %v10334_v52  ;;  %v927_v5 = vpop.f32.mrb[33].mxu0  ;;  %v2545_v7 = vpop.f32.mrb[33].mxu1 }
 0x11f   :  { %v928_v11 = vadd.f32 %v10334_v52, %v927_v5  ;;  %v2546_v12 = vadd.f32 %v10334_v52, %v2545_v7  ;;  %v9019_v14 = vpop.f32.mrb[34].mxu0  ;;  %v9167_v16 = vpop.f32.mrb[34].mxu1 }
 0x120   :  { %v1408_v27 = vmax.f32 %v936_v0, 0.0  ;;  %v3026_v28 = vmax.f32 %v2554_v4, 0.0  ;;  %v939_v30 = vadd.f32 %v9019_v14, %v10334_v52  ;;  %v2557_v31 = vadd.f32 %v9167_v16, %v10334_v52  ;;  %v930_v32 = vpop.f32.mrb[35].mxu0  ;;  %v2548_v34 = vpop.f32.mrb[35].mxu1 }
 0x121   :  { %v1406_v35 = vmax.f32 %v928_v11, 0.0  ;;  %v3024_v37 = vmax.f32 %v2546_v12, 0.0  ;;  %v931_v38 = vadd.f32 %v10334_v52, %v930_v32  ;;  %v2549_v40 = vadd.f32 %v10334_v52, %v2548_v34  ;;  %v9722_v11 = vld [vmem:[%s12662_s0 + $0xe0] sm:$0xff]  }
 0x122   :  { %v10616_v41 = vadd.f32 %v3026_v28, %v1408_v27  ;;  %v1409_v43 = vmax.f32 %v939_v30, 0.0  ;;  %v3027_v44 = vmax.f32 %v2557_v31, 0.0  ;;  %9125 = vmatmul.mubr.msk.bf16.gmra.mrb[140].mxu0 %vm541_vm2, %v9717_v8  ;;  %9273 = vmatmul.mubr.msk.bf16.gmra.mrb[140].mxu1 %vm541_vm2, %v9718_v9  ;;  %v9721_v9 = vld [vmem:[%s12662_s0 + $0x98] sm:$0xff]   ;;  %v9724_v27 = vld [vmem:[%s12662_s0 + $0xe8] sm:$0xff]  }
 0x123   :  { %v10620_v45 = vadd.f32 %v3024_v37, %v1406_v35  ;;  %v1407_v46 = vmax.f32 %v931_v38, 0.0  ;;  %v3025_v49 = vmax.f32 %v2549_v40, 0.0  ;;  %9280 = vmatprep.mubr.msk.bf16.mxu0 %vm541_vm2, %v9719_v20  ;;  %9428 = vmatprep.mubr.msk.bf16.mxu1 %vm541_vm2, %v9720_v23  ;;  %v9723_v23 = vld [vmem:[%s12662_s0 + $0xa0] sm:$0xff]  }
 0x124   :  { %v10624_v51 = vadd.f32 %v3027_v44, %v1409_v43 }
 0x125   :  { %v10626_v58 = vadd.f32 %v3025_v49, %v1407_v46  ;;  %v9022_v59 = vpop.f32.mrb[36].mxu0  ;;  %v9170_v0 = vpop.f32.mrb[36].mxu1 }
 0x126   :  { %v952_v4 = vadd.f32 %v9022_v59, %v10334_v52  ;;  %v2570_v5 = vadd.f32 %v9170_v0, %v10334_v52  ;;  %v943_v7 = vpop.f32.mrb[37].mxu0  ;;  %v2561_v8 = vpop.f32.mrb[37].mxu1 }
 0x127   :  { %v944_v12 = vadd.f32 %v10334_v52, %v943_v7  ;;  %v2562_v14 = vadd.f32 %v10334_v52, %v2561_v8  ;;  %v9023_v16 = vpop.f32.mrb[38].mxu0  ;;  %v9171_v20 = vpop.f32.mrb[38].mxu1 }
 0x128   :  { %v1412_v28 = vmax.f32 %v952_v4, 0.0  ;;  %v3030_v30 = vmax.f32 %v2570_v5, 0.0  ;;  %v955_v31 = vadd.f32 %v9023_v16, %v10334_v52  ;;  %v2573_v32 = vadd.f32 %v9171_v20, %v10334_v52  ;;  %v946_v34 = vpop.f32.mrb[39].mxu0  ;;  %v2564_v35 = vpop.f32.mrb[39].mxu1  ;;  %v9725_v20 = vld [vmem:[%s12662_s0 + $0xa8] sm:$0xff]  }
 0x129   :  { %v1410_v37 = vmax.f32 %v944_v12, 0.0  ;;  %v3028_v38 = vmax.f32 %v2562_v14, 0.0  ;;  %v947_v40 = vadd.f32 %v10334_v52, %v946_v34  ;;  %v2565_v43 = vadd.f32 %v10334_v52, %v2564_v35  ;;  %v9728_v34 = vld [vmem:[%s12662_s0 + $0xf8] sm:$0xff]  }
 0x12a   :  { %v10648_v44 = vadd.f32 %v3030_v30, %v1412_v28  ;;  %v1413_v46 = vmax.f32 %v955_v31, 0.0  ;;  %v3031_v49 = vmax.f32 %v2573_v32, 0.0  ;;  %9281 = vmatmul.mubr.msk.bf16.vlgmr.msra.gmra.mrb[144].mxu0 %vm541_vm2, %v9721_v9  ;;  %9429 = vmatmul.mubr.msk.bf16.vlgmr.msra.gmra.mrb[144].mxu1 %vm541_vm2, %v9722_v11  ;;  %v9727_v32 = vld [vmem:[%s12662_s0 + $0xb0] sm:$0xff]  }
 0x12b   :  { %v10652_v59 = vadd.f32 %v3028_v38, %v1410_v37  ;;  %v1411_v0 = vmax.f32 %v947_v40, 0.0  ;;  %v3029_v4 = vmax.f32 %v2565_v43, 0.0  ;;  %9284 = vmatprep.mubr.msk.bf16.mxu0 %vm541_vm2, %v9723_v23  ;;  %9432 = vmatprep.mubr.msk.bf16.mxu1 %vm541_vm2, %v9724_v27  ;;  %v9726_v23 = vld [vmem:[%s12662_s0 + $0xf0] sm:$0xff]  }
 0x12c   :  { %v10656_v5 = vadd.f32 %v3031_v49, %v1413_v46 }
 0x12d   :  { %v10658_v7 = vadd.f32 %v3029_v4, %v1411_v0  ;;  %v9026_v8 = vpop.f32.mrb[40].mxu0  ;;  %v9174_v12 = vpop.f32.mrb[40].mxu1 }
 0x12e   :  { %v968_v14 = vadd.f32 %v9026_v8, %v10334_v52  ;;  %v2586_v9 = vadd.f32 %v9174_v12, %v10334_v52  ;;  %v959_v16 = vpop.f32.mrb[41].mxu0  ;;  %v2577_v11 = vpop.f32.mrb[41].mxu1 }
 0x12f   :  { %v960_v27 = vadd.f32 %v10334_v52, %v959_v16  ;;  %v2578_v28 = vadd.f32 %v10334_v52, %v2577_v11  ;;  %v9027_v30 = vpop.f32.mrb[42].mxu0  ;;  %v9175_v31 = vpop.f32.mrb[42].mxu1 }
 0x130   :  { %v1416_v35 = vmax.f32 %v968_v14, 0.0  ;;  %v3034_v37 = vmax.f32 %v2586_v9, 0.0  ;;  %v971_v38 = vadd.f32 %v9027_v30, %v10334_v52  ;;  %v2589_v40 = vadd.f32 %v9175_v31, %v10334_v52  ;;  %v962_v43 = vpop.f32.mrb[43].mxu0  ;;  %v2580_v46 = vpop.f32.mrb[43].mxu1 }
 0x131   :  { %v1414_v49 = vmax.f32 %v960_v27, 0.0  ;;  %v3032_v0 = vmax.f32 %v2578_v28, 0.0  ;;  %v963_v4 = vadd.f32 %v10334_v52, %v962_v43  ;;  %v2581_v8 = vadd.f32 %v10334_v52, %v2580_v46 }
 0x132   :  { %v10680_v12 = vadd.f32 %v3034_v37, %v1416_v35  ;;  %v1417_v16 = vmax.f32 %v971_v38, 0.0  ;;  %v3035_v11 = vmax.f32 %v2589_v40, 0.0  ;;  %9285 = vmatmul.mubr.msk.bf16.gmra.mrb[148].mxu0 %vm541_vm2, %v9725_v20  ;;  %9433 = vmatmul.mubr.msk.bf16.gmra.mrb[148].mxu1 %vm541_vm2, %v9726_v23  ;;  %v9729_v40 = vld [vmem:[%s12662_s0 + $0xb8] sm:$0xff]  }
 0x133   :  { %v10684_v14 = vadd.f32 %v3032_v0, %v1414_v49  ;;  %v1415_v9 = vmax.f32 %v963_v4, 0.0  ;;  %v3033_v30 = vmax.f32 %v2581_v8, 0.0  ;;  %9288 = vmatprep.mubr.msk.bf16.mxu0 %vm541_vm2, %v9727_v32  ;;  %9436 = vmatprep.mubr.msk.bf16.mxu1 %vm541_vm2, %v9728_v34  ;;  %v9730_v32 = vld [vmem:[%s12662_s0 + $0x100] sm:$0xff]   ;;  %v9732_v4 = vld [vmem:[%s12662_s0 + $0x108] sm:$0xff]  }
 0x134   :  { %12665 = vst [vmem:[#allocation2_spill] sm:$0xff] %v10680_v12  ;;  %v10688_v27 = vadd.f32 %v3035_v11, %v1417_v16  ;;  %v10703_v34 = vld [vmem:[%s12663_s2] ss:$0 sm:$0xff] }
 0x135   :  { %12666 = vst [vmem:[#allocation3_spill] sm:$0xff] %v10684_v14  ;;  %v10690_v28 = vadd.f32 %v3033_v30, %v1415_v9  ;;  %v9030_v31 = vpop.f32.mrb[44].mxu0  ;;  %v9178_v35 = vpop.f32.mrb[44].mxu1  ;;  %v9731_v0 = vld [vmem:[%s12662_s0 + $0xc0] sm:$0xff]  }
 0x136   :  { %12667 = vst [vmem:[#allocation4_spill] sm:$0xff] %v10688_v27  ;;  %v984_v37 = vadd.f32 %v9030_v31, %v10334_v52  ;;  %v2602_v20 = vadd.f32 %v9178_v35, %v10334_v52  ;;  %v975_v38 = vpop.f32.mrb[45].mxu0  ;;  %v2593_v23 = vpop.f32.mrb[45].mxu1 }
 0x137   :  { %12668 = vst [vmem:[#allocation5_spill] sm:$0xff] %v10690_v28  ;;  %v976_v43 = vadd.f32 %v10703_v34, %v975_v38  ;;  %v2594_v46 = vadd.f32 %v10703_v34, %v2593_v23  ;;  %v9031_v52 = vpop.f32.mrb[46].mxu0  ;;  %v9179_v49 = vpop.f32.mrb[46].mxu1 }
 0x138   :  { %v1420_v8 = vmax.f32 %v984_v37, 0.0  ;;  %v3038_v16 = vmax.f32 %v2602_v20, 0.0  ;;  %v987_v11 = vadd.f32 %v10703_v34, %v9031_v52  ;;  %v2605_v9 = vadd.f32 %v10703_v34, %v9179_v49  ;;  %v978_v30 = vpop.f32.mrb[47].mxu0  ;;  %v2596_v31 = vpop.f32.mrb[47].mxu1 }
 0x139   :  { %v1418_v35 = vmax.f32 %v976_v43, 0.0  ;;  %v3036_v38 = vmax.f32 %v2594_v46, 0.0  ;;  %v979_v23 = vadd.f32 %v10703_v34, %v978_v30  ;;  %v2597_v28 = vadd.f32 %v10703_v34, %v2596_v31  ;;  %v9735_v30 = vld [vmem:[%s12662_s0 + $0xd0] sm:$0xff]   ;;  %v9736_v31 = vld [vmem:[%s12662_s0 + $0x118] sm:$0xff]  }
 0x13a   :  { %v10717_v27 = vadd.f32 %v3038_v16, %v1420_v8  ;;  %v1421_v14 = vmax.f32 %v987_v11, 0.0  ;;  %v3039_v12 = vmax.f32 %v2605_v9, 0.0  ;;  %9289 = vmatmul.mubr.msk.bf16.gmra.mrb[152].mxu0 %vm541_vm2, %v9729_v40  ;;  %9437 = vmatmul.mubr.msk.bf16.gmra.mrb[152].mxu1 %vm541_vm2, %v9730_v32 }
 0x13b   :  { %v10721_v37 = vadd.f32 %v3036_v38, %v1418_v35  ;;  %v1419_v20 = vmax.f32 %v979_v23, 0.0  ;;  %v3037_v52 = vmax.f32 %v2597_v28, 0.0  ;;  %9292 = vmatprep.mubr.msk.bf16.mxu0 %vm541_vm2, %v9731_v0  ;;  %9440 = vmatprep.mubr.msk.bf16.mxu1 %vm541_vm2, %v9732_v4  ;;  %v9733_v28 = vld [vmem:[%s12662_s0 + $0xc8] sm:$0xff]   ;;  %v9734_v0 = vld [vmem:[%s12662_s0 + $0x110] sm:$0xff]  }
 0x13c   :  { %12669 = vst [vmem:[#allocation6_spill] sm:$0xff] %v10717_v27  ;;  %v10725_v43 = vadd.f32 %v3039_v12, %v1421_v14 }
 0x13d   :  { %12670 = vst [vmem:[#allocation7_spill] sm:$0xff] %v10721_v37  ;;  %v10727_v46 = vadd.f32 %v3037_v52, %v1419_v20  ;;  %v9034_v49 = vpop.f32.mrb[48].mxu0  ;;  %v9182_v8 = vpop.f32.mrb[48].mxu1 }
 0x13e   :  { %12671 = vst [vmem:[#allocation8_spill] sm:$0xff] %v10725_v43  ;;  %v1000_v16 = vadd.f32 %v10703_v34, %v9034_v49  ;;  %v2618_v40 = vadd.f32 %v10703_v34, %v9182_v8  ;;  %v991_v11 = vpop.f32.mrb[49].mxu0  ;;  %v2609_v32 = vpop.f32.mrb[49].mxu1 }
 0x13f   :  { %12672 = vst [vmem:[#allocation9_spill] sm:$0xff] %v10727_v46  ;;  %v992_v12 = vadd.f32 %v10703_v34, %v991_v11  ;;  %v2610_v14 = vadd.f32 %v10703_v34, %v2609_v32  ;;  %v9035_v4 = vpop.f32.mrb[50].mxu0  ;;  %v9183_v9 = vpop.f32.mrb[50].mxu1 }
 0x140   :  { %v1424_v35 = vmax.f32 %v1000_v16, 0.0  ;;  %v3042_v38 = vmax.f32 %v2618_v40, 0.0  ;;  %v1003_v23 = vadd.f32 %v10703_v34, %v9035_v4  ;;  %v2621_v20 = vadd.f32 %v10703_v34, %v9183_v9  ;;  %v994_v52 = vpop.f32.mrb[51].mxu0  ;;  %v2612_v49 = vpop.f32.mrb[51].mxu1 }
 0x141   :  { %v1422_v8 = vmax.f32 %v992_v12, 0.0  ;;  %v3040_v11 = vmax.f32 %v2610_v14, 0.0  ;;  %v995_v32 = vadd.f32 %v10703_v34, %v994_v52  ;;  %v2613_v46 = vadd.f32 %v10703_v34, %v2612_v49  ;;  %v9739_v52 = vld [vmem:[%s12662_s0 + $0x1b8] sm:$0xff]   ;;  %v9740_v49 = vld [vmem:[%s12662_s0 + $0x200] sm:$0xff]  }
 0x142   :  { %v10749_v43 = vadd.f32 %v3042_v38, %v1424_v35  ;;  %v1425_v37 = vmax.f32 %v1003_v23, 0.0  ;;  %v3043_v27 = vmax.f32 %v2621_v20, 0.0  ;;  %9293 = vmatmul.mubr.msk.bf16.gmra.mrb[156].mxu0 %vm541_vm2, %v9733_v28  ;;  %9441 = vmatmul.mubr.msk.bf16.gmra.mrb[156].mxu1 %vm541_vm2, %v9734_v0 }
 0x143   :  { %v10753_v16 = vadd.f32 %v3040_v11, %v1422_v8  ;;  %v1423_v40 = vmax.f32 %v995_v32, 0.0  ;;  %v3041_v4 = vmax.f32 %v2613_v46, 0.0  ;;  %9296 = vmatprep.mubr.msk.bf16.mxu0 %vm541_vm2, %v9735_v30  ;;  %9444 = vmatprep.mubr.msk.bf16.mxu1 %vm541_vm2, %v9736_v31  ;;  %v9737_v46 = vld [vmem:[%s12662_s0 + $0x1b0] sm:$0xff]   ;;  %v9738_v30 = vld [vmem:[%s12662_s0 + $0x1f8] sm:$0xff]  }
 0x144   :  { %12673 = vst [vmem:[#allocation10_spill] sm:$0xff] %v10749_v43  ;;  %v10757_v12 = vadd.f32 %v3043_v27, %v1425_v37 }
 0x145   :  { %12674 = vst [vmem:[#allocation11_spill] sm:$0xff] %v10753_v16  ;;  %v10759_v14 = vadd.f32 %v3041_v4, %v1423_v40  ;;  %v9038_v9 = vpop.f32.mrb[52].mxu0  ;;  %v9186_v35 = vpop.f32.mrb[52].mxu1 }
 0x146   :  { %12675 = vst [vmem:[#allocation12_spill] sm:$0xff] %v10757_v12  ;;  %v1016_v38 = vadd.f32 %v10703_v34, %v9038_v9  ;;  %v2634_v28 = vadd.f32 %v10703_v34, %v9186_v35  ;;  %v1007_v23 = vpop.f32.mrb[53].mxu0  ;;  %v2625_v0 = vpop.f32.mrb[53].mxu1 }
 0x147   :  { %12676 = vst [vmem:[#allocation13_spill] sm:$0xff] %v10759_v14  ;;  %v1008_v27 = vadd.f32 %v10703_v34, %v1007_v23  ;;  %v2626_v37 = vadd.f32 %v10703_v34, %v2625_v0  ;;  %v9039_v31 = vpop.f32.mrb[54].mxu0  ;;  %v9187_v20 = vpop.f32.mrb[54].mxu1 }
 0x148   :  { %v1428_v8 = vmax.f32 %v1016_v38, 0.0  ;;  %v3046_v11 = vmax.f32 %v2634_v28, 0.0  ;;  %v1019_v32 = vadd.f32 %v10703_v34, %v9039_v31  ;;  %v2637_v40 = vadd.f32 %v10703_v34, %v9187_v20  ;;  %v1010_v4 = vpop.f32.mrb[55].mxu0  ;;  %v2628_v9 = vpop.f32.mrb[55].mxu1 }
 0x149   :  { %v1426_v35 = vmax.f32 %v1008_v27, 0.0  ;;  %v3044_v23 = vmax.f32 %v2626_v37, 0.0  ;;  %v1011_v0 = vadd.f32 %v10703_v34, %v1010_v4  ;;  %v2629_v14 = vadd.f32 %v10703_v34, %v2628_v9  ;;  %v9743_v4 = vld [vmem:[%s12662_s0 + $0x1c8] sm:$0xff]   ;;  %v9744_v9 = vld [vmem:[%s12662_s0 + $0x210] sm:$0xff]  }
 0x14a   :  { %v10781_v12 = vadd.f32 %v3046_v11, %v1428_v8  ;;  %v1429_v16 = vmax.f32 %v1019_v32, 0.0  ;;  %v3047_v43 = vmax.f32 %v2637_v40, 0.0  ;;  %9297 = vmatmul.mubr.msk.bf16.gmra.mrb[160].mxu0 %vm541_vm2, %v9737_v46  ;;  %9445 = vmatmul.mubr.msk.bf16.gmra.mrb[160].mxu1 %vm541_vm2, %v9738_v30 }
 0x14b   :  { %v10785_v38 = vadd.f32 %v3044_v23, %v1426_v35  ;;  %v1427_v28 = vmax.f32 %v1011_v0, 0.0  ;;  %v3045_v31 = vmax.f32 %v2629_v14, 0.0  ;;  %9300 = vmatprep.mubr.msk.bf16.mxu0 %vm541_vm2, %v9739_v52  ;;  %9448 = vmatprep.mubr.msk.bf16.mxu1 %vm541_vm2, %v9740_v49  ;;  %v9741_v14 = vld [vmem:[%s12662_s0 + $0x1c0] sm:$0xff]   ;;  %v9742_v52 = vld [vmem:[%s12662_s0 + $0x208] sm:$0xff]  }
 0x14c   :  { %12677 = vst [vmem:[#allocation14_spill] sm:$0xff] %v10781_v12  ;;  %v10789_v27 = vadd.f32 %v3047_v43, %v1429_v16 }
 0x14d   :  { %12678 = vst [vmem:[#allocation15_spill] sm:$0xff] %v10785_v38  ;;  %v10791_v37 = vadd.f32 %v3045_v31, %v1427_v28  ;;  %v9042_v20 = vpop.f32.mrb[56].mxu0  ;;  %v9190_v8 = vpop.f32.mrb[56].mxu1 }
 0x14e   :  { %12679 = vst [vmem:[#allocation16_spill] sm:$0xff] %v10789_v27  ;;  %v1032_v11 = vadd.f32 %v10703_v34, %v9042_v20  ;;  %v2650_v46 = vadd.f32 %v10703_v34, %v9190_v8  ;;  %v1023_v32 = vpop.f32.mrb[57].mxu0  ;;  %v2641_v30 = vpop.f32.mrb[57].mxu1 }
 0x14f   :  { %12680 = vst [vmem:[#allocation17_spill] sm:$0xff] %v10791_v37  ;;  %v1024_v43 = vadd.f32 %v10703_v34, %v1023_v32  ;;  %v2642_v16 = vadd.f32 %v10703_v34, %v2641_v30  ;;  %v9043_v49 = vpop.f32.mrb[58].mxu0  ;;  %v9191_v40 = vpop.f32.mrb[58].mxu1 }
 0x150   :  { %v1432_v35 = vmax.f32 %v1032_v11, 0.0  ;;  %v3050_v23 = vmax.f32 %v2650_v46, 0.0  ;;  %v1035_v0 = vadd.f32 %v10703_v34, %v9043_v49  ;;  %v2653_v28 = vadd.f32 %v10703_v34, %v9191_v40  ;;  %v1026_v31 = vpop.f32.mrb[59].mxu0  ;;  %v2644_v20 = vpop.f32.mrb[59].mxu1 }
 0x151   :  { %v1430_v8 = vmax.f32 %v1024_v43, 0.0  ;;  %v3048_v32 = vmax.f32 %v2642_v16, 0.0  ;;  %v1027_v30 = vadd.f32 %v10703_v34, %v1026_v31  ;;  %v2645_v37 = vadd.f32 %v10703_v34, %v2644_v20  ;;  %v9747_v31 = vld [vmem:[%s12662_s0 + $0x1d8] sm:$0xff]   ;;  %v9748_v20 = vld [vmem:[%s12662_s0 + $0x220] sm:$0xff]  }
 0x152   :  { %v10813_v27 = vadd.f32 %v3050_v23, %v1432_v35  ;;  %v1433_v38 = vmax.f32 %v1035_v0, 0.0  ;;  %v3051_v12 = vmax.f32 %v2653_v28, 0.0  ;;  %9301 = vmatmul.mubr.msk.bf16.gmra.mrb[164].mxu0 %vm541_vm2, %v9741_v14  ;;  %9449 = vmatmul.mubr.msk.bf16.gmra.mrb[164].mxu1 %vm541_vm2, %v9742_v52 }
 0x153   :  { %v10817_v11 = vadd.f32 %v3048_v32, %v1430_v8  ;;  %v1431_v46 = vmax.f32 %v1027_v30, 0.0  ;;  %v3049_v49 = vmax.f32 %v2645_v37, 0.0  ;;  %9304 = vmatprep.mubr.msk.bf16.mxu0 %vm541_vm2, %v9743_v4  ;;  %9452 = vmatprep.mubr.msk.bf16.mxu1 %vm541_vm2, %v9744_v9  ;;  %v9745_v37 = vld [vmem:[%s12662_s0 + $0x1d0] sm:$0xff]   ;;  %v9746_v4 = vld [vmem:[%s12662_s0 + $0x218] sm:$0xff]  }
 0x154   :  { %12681 = vst [vmem:[#allocation18_spill] sm:$0xff] %v10813_v27  ;;  %v10821_v43 = vadd.f32 %v3051_v12, %v1433_v38 }
 0x155   :  { %12682 = vst [vmem:[#allocation19_spill] sm:$0xff] %v10817_v11  ;;  %v10823_v16 = vadd.f32 %v3049_v49, %v1431_v46  ;;  %v9046_v40 = vpop.f32.mrb[60].mxu0  ;;  %v9194_v35 = vpop.f32.mrb[60].mxu1 }
 0x156   :  { %12683 = vst [vmem:[#allocation20_spill] sm:$0xff] %v10821_v43  ;;  %v1048_v23 = vadd.f32 %v10703_v34, %v9046_v40  ;;  %v2666_v14 = vadd.f32 %v10703_v34, %v9194_v35  ;;  %v1039_v0 = vpop.f32.mrb[61].mxu0  ;;  %v2657_v52 = vpop.f32.mrb[61].mxu1 }
 0x157   :  { %12684 = vst [vmem:[#allocation21_spill] sm:$0xff] %v10823_v16  ;;  %v1040_v12 = vadd.f32 %v10703_v34, %v1039_v0  ;;  %v2658_v38 = vadd.f32 %v10703_v34, %v2657_v52  ;;  %v9047_v9 = vpop.f32.mrb[62].mxu0  ;;  %v9195_v28 = vpop.f32.mrb[62].mxu1 }
 0x158   :  { %v1436_v8 = vmax.f32 %v1048_v23, 0.0  ;;  %v3054_v32 = vmax.f32 %v2666_v14, 0.0  ;;  %v1051_v30 = vadd.f32 %v10703_v34, %v9047_v9  ;;  %v2669_v46 = vadd.f32 %v10703_v34, %v9195_v28  ;;  %v1042_v49 = vpop.f32.mrb[63].mxu0  ;;  %v2660_v40 = vpop.f32.mrb[63].mxu1 }
 0x159   :  { %v1434_v35 = vmax.f32 %v1040_v12, 0.0  ;;  %v3052_v0 = vmax.f32 %v2658_v38, 0.0  ;;  %v1043_v52 = vadd.f32 %v10703_v34, %v1042_v49  ;;  %v2661_v16 = vadd.f32 %v10703_v34, %v2660_v40  ;;  %v9751_v49 = vld [vmem:[%s12662_s0 + $0x1e8] sm:$0xff]   ;;  %v9752_v40 = vld [vmem:[%s12662_s0 + $0x230] sm:$0xff]  }
 0x15a   :  { %v10845_v43 = vadd.f32 %v3054_v32, %v1436_v8  ;;  %v1437_v11 = vmax.f32 %v1051_v30, 0.0  ;;  %v3055_v27 = vmax.f32 %v2669_v46, 0.0  ;;  %9305 = vmatmul.mubr.msk.bf16.gmra.mrb[168].mxu0 %vm541_vm2, %v9745_v37  ;;  %9453 = vmatmul.mubr.msk.bf16.gmra.mrb[168].mxu1 %vm541_vm2, %v9746_v4 }
 0x15b   :  { %v10849_v23 = vadd.f32 %v3052_v0, %v1434_v35  ;;  %v1435_v14 = vmax.f32 %v1043_v52, 0.0  ;;  %v3053_v9 = vmax.f32 %v2661_v16, 0.0  ;;  %9308 = vmatprep.mubr.msk.bf16.mxu0 %vm541_vm2, %v9747_v31  ;;  %9456 = vmatprep.mubr.msk.bf16.mxu1 %vm541_vm2, %v9748_v20  ;;  %v9749_v16 = vld [vmem:[%s12662_s0 + $0x1e0] sm:$0xff]   ;;  %v9750_v31 = vld [vmem:[%s12662_s0 + $0x228] sm:$0xff]  }
 0x15c   :  { %12685 = vst [vmem:[#allocation22_spill] sm:$0xff] %v10845_v43  ;;  %v10853_v12 = vadd.f32 %v3055_v27, %v1437_v11 }
 0x15d   :  { %12686 = vst [vmem:[#allocation23_spill] sm:$0xff] %v10849_v23  ;;  %v10855_v38 = vadd.f32 %v3053_v9, %v1435_v14  ;;  %v9050_v28 = vpop.f32.mrb[64].mxu0  ;;  %v9198_v8 = vpop.f32.mrb[64].mxu1 }
 0x15e   :  { %12687 = vst [vmem:[#allocation24_spill] sm:$0xff] %v10853_v12  ;;  %v1064_v32 = vadd.f32 %v10703_v34, %v9050_v28  ;;  %v2682_v37 = vadd.f32 %v10703_v34, %v9198_v8  ;;  %v1055_v30 = vpop.f32.mrb[65].mxu0  ;;  %v2673_v4 = vpop.f32.mrb[65].mxu1 }
 0x15f   :  { %12688 = vst [vmem:[#allocation25_spill] sm:$0xff] %v10855_v38  ;;  %v1056_v27 = vadd.f32 %v10703_v34, %v1055_v30  ;;  %v2674_v11 = vadd.f32 %v10703_v34, %v2673_v4  ;;  %v9051_v20 = vpop.f32.mrb[66].mxu0  ;;  %v9199_v46 = vpop.f32.mrb[66].mxu1 }
 0x160   :  { %v1440_v35 = vmax.f32 %v1064_v32, 0.0  ;;  %v3058_v0 = vmax.f32 %v2682_v37, 0.0  ;;  %v1067_v52 = vadd.f32 %v10703_v34, %v9051_v20  ;;  %v2685_v14 = vadd.f32 %v10703_v34, %v9199_v46  ;;  %v1058_v9 = vpop.f32.mrb[67].mxu0  ;;  %v2676_v28 = vpop.f32.mrb[67].mxu1 }
 0x161   :  { %v1438_v8 = vmax.f32 %v1056_v27, 0.0  ;;  %v3056_v30 = vmax.f32 %v2674_v11, 0.0  ;;  %v1059_v4 = vadd.f32 %v10703_v34, %v1058_v9  ;;  %v2677_v38 = vadd.f32 %v10703_v34, %v2676_v28  ;;  %v9755_v9 = vld [vmem:[%s12662_s0 + $0x2d0] sm:$0xff]   ;;  %v9756_v28 = vld [vmem:[%s12662_s0 + $0x318] sm:$0xff]  }
 0x162   :  { %v10877_v12 = vadd.f32 %v3058_v0, %v1440_v35  ;;  %v1441_v23 = vmax.f32 %v1067_v52, 0.0  ;;  %v3059_v43 = vmax.f32 %v2685_v14, 0.0  ;;  %9309 = vmatmul.mubr.msk.bf16.gmra.mrb[172].mxu0 %vm541_vm2, %v9749_v16  ;;  %9457 = vmatmul.mubr.msk.bf16.gmra.mrb[172].mxu1 %vm541_vm2, %v9750_v31 }
 0x163   :  { %v10881_v32 = vadd.f32 %v3056_v30, %v1438_v8  ;;  %v1439_v37 = vmax.f32 %v1059_v4, 0.0  ;;  %v3057_v20 = vmax.f32 %v2677_v38, 0.0  ;;  %9312 = vmatprep.mubr.msk.bf16.mxu0 %vm541_vm2, %v9751_v49  ;;  %9460 = vmatprep.mubr.msk.bf16.mxu1 %vm541_vm2, %v9752_v40  ;;  %v9753_v38 = vld [vmem:[%s12662_s0 + $0x1f0] sm:$0xff]   ;;  %v9754_v49 = vld [vmem:[%s12662_s0 + $0x238] sm:$0xff]  }
 0x164   :  { %12689 = vst [vmem:[#allocation26_spill] sm:$0xff] %v10877_v12  ;;  %v10885_v27 = vadd.f32 %v3059_v43, %v1441_v23 }
 0x165   :  { %12690 = vst [vmem:[#allocation27_spill] sm:$0xff] %v10881_v32  ;;  %v10887_v11 = vadd.f32 %v3057_v20, %v1439_v37  ;;  %v9054_v46 = vpop.f32.mrb[68].mxu0  ;;  %v9202_v35 = vpop.f32.mrb[68].mxu1 }
 0x166   :  { %12691 = vst [vmem:[#allocation28_spill] sm:$0xff] %v10885_v27  ;;  %v1080_v0 = vadd.f32 %v10703_v34, %v9054_v46  ;;  %v2698_v16 = vadd.f32 %v10703_v34, %v9202_v35  ;;  %v1071_v52 = vpop.f32.mrb[69].mxu0  ;;  %v2689_v31 = vpop.f32.mrb[69].mxu1 }
 0x167   :  { %12692 = vst [vmem:[#allocation29_spill] sm:$0xff] %v10887_v11  ;;  %v1072_v43 = vadd.f32 %v10703_v34, %v1071_v52  ;;  %v2690_v23 = vadd.f32 %v10703_v34, %v2689_v31  ;;  %v9055_v40 = vpop.f32.mrb[70].mxu0  ;;  %v9203_v14 = vpop.f32.mrb[70].mxu1 }
 0x168   :  { %v1444_v8 = vmax.f32 %v1080_v0, 0.0  ;;  %v3062_v30 = vmax.f32 %v2698_v16, 0.0  ;;  %v1083_v4 = vadd.f32 %v10703_v34, %v9055_v40  ;;  %v2701_v37 = vadd.f32 %v10703_v34, %v9203_v14  ;;  %v1074_v20 = vpop.f32.mrb[71].mxu0  ;;  %v2692_v46 = vpop.f32.mrb[71].mxu1 }
 0x169   :  { %v1442_v35 = vmax.f32 %v1072_v43, 0.0  ;;  %v3060_v52 = vmax.f32 %v2690_v23, 0.0  ;;  %v1075_v31 = vadd.f32 %v10703_v34, %v1074_v20  ;;  %v2693_v11 = vadd.f32 %v10703_v34, %v2692_v46  ;;  %v9759_v20 = vld [vmem:[%s12662_s0 + $0x2e0] sm:$0xff]   ;;  %v9760_v46 = vld [vmem:[%s12662_s0 + $0x328] sm:$0xff]  }
 0x16a   :  { %v10909_v27 = vadd.f32 %v3062_v30, %v1444_v8  ;;  %v1445_v32 = vmax.f32 %v1083_v4, 0.0  ;;  %v3063_v12 = vmax.f32 %v2701_v37, 0.0  ;;  %9313 = vmatmul.mubr.msk.bf16.gmra.mrb[176].mxu0 %vm541_vm2, %v9753_v38  ;;  %9461 = vmatmul.mubr.msk.bf16.gmra.mrb[176].mxu1 %vm541_vm2, %v9754_v49 }
 0x16b   :  { %v10913_v0 = vadd.f32 %v3060_v52, %v1442_v35  ;;  %v1443_v16 = vmax.f32 %v1075_v31, 0.0  ;;  %v3061_v40 = vmax.f32 %v2693_v11, 0.0  ;;  %9316 = vmatprep.mubr.msk.bf16.mxu0 %vm541_vm2, %v9755_v9  ;;  %9464 = vmatprep.mubr.msk.bf16.mxu1 %vm541_vm2, %v9756_v28  ;;  %v9757_v11 = vld [vmem:[%s12662_s0 + $0x2d8] sm:$0xff]   ;;  %v9758_v9 = vld [vmem:[%s12662_s0 + $0x320] sm:$0xff]  }
 0x16c   :  { %12693 = vst [vmem:[#allocation30_spill] sm:$0xff] %v10909_v27  ;;  %v10917_v43 = vadd.f32 %v3063_v12, %v1445_v32 }
 0x16d   :  { %12694 = vst [vmem:[#allocation31_spill] sm:$0xff] %v10913_v0  ;;  %v10919_v23 = vadd.f32 %v3061_v40, %v1443_v16  ;;  %v9058_v14 = vpop.f32.mrb[72].mxu0  ;;  %v9206_v8 = vpop.f32.mrb[72].mxu1 }
 0x16e   :  { %12695 = vst [vmem:[#allocation32_spill] sm:$0xff] %v10917_v43  ;;  %v1096_v30 = vadd.f32 %v10703_v34, %v9058_v14  ;;  %v2714_v38 = vadd.f32 %v10703_v34, %v9206_v8  ;;  %v1087_v4 = vpop.f32.mrb[73].mxu0  ;;  %v2705_v49 = vpop.f32.mrb[73].mxu1 }
 0x16f   :  { %12696 = vst [vmem:[#allocation33_spill] sm:$0xff] %v10919_v23  ;;  %v1088_v12 = vadd.f32 %v10703_v34, %v1087_v4  ;;  %v2706_v32 = vadd.f32 %v10703_v34, %v2705_v49  ;;  %v9059_v28 = vpop.f32.mrb[74].mxu0  ;;  %v9207_v37 = vpop.f32.mrb[74].mxu1 }
 0x170   :  { %v1448_v35 = vmax.f32 %v1096_v30, 0.0  ;;  %v3066_v52 = vmax.f32 %v2714_v38, 0.0  ;;  %v1099_v31 = vadd.f32 %v10703_v34, %v9059_v28  ;;  %v2717_v16 = vadd.f32 %v10703_v34, %v9207_v37  ;;  %v1090_v40 = vpop.f32.mrb[75].mxu0  ;;  %v2708_v14 = vpop.f32.mrb[75].mxu1 }
 0x171   :  { %v1446_v8 = vmax.f32 %v1088_v12, 0.0  ;;  %v3064_v4 = vmax.f32 %v2706_v32, 0.0  ;;  %v1091_v49 = vadd.f32 %v10703_v34, %v1090_v40  ;;  %v2709_v23 = vadd.f32 %v10703_v34, %v2708_v14  ;;  %v9763_v40 = vld [vmem:[%s12662_s0 + $0x2f0] sm:$0xff]   ;;  %v9764_v14 = vld [vmem:[%s12662_s0 + $0x338] sm:$0xff]  }
 0x172   :  { %v10941_v43 = vadd.f32 %v3066_v52, %v1448_v35  ;;  %v1449_v0 = vmax.f32 %v1099_v31, 0.0  ;;  %v3067_v27 = vmax.f32 %v2717_v16, 0.0  ;;  %9317 = vmatmul.mubr.msk.bf16.gmra.mrb[180].mxu0 %vm541_vm2, %v9757_v11  ;;  %9465 = vmatmul.mubr.msk.bf16.gmra.mrb[180].mxu1 %vm541_vm2, %v9758_v9 }
 0x173   :  { %v10945_v30 = vadd.f32 %v3064_v4, %v1446_v8  ;;  %v1447_v38 = vmax.f32 %v1091_v49, 0.0  ;;  %v3065_v28 = vmax.f32 %v2709_v23, 0.0  ;;  %9320 = vmatprep.mubr.msk.bf16.mxu0 %vm541_vm2, %v9759_v20  ;;  %9468 = vmatprep.mubr.msk.bf16.mxu1 %vm541_vm2, %v9760_v46  ;;  %v9761_v23 = vld [vmem:[%s12662_s0 + $0x2e8] sm:$0xff]   ;;  %v9762_v20 = vld [vmem:[%s12662_s0 + $0x330] sm:$0xff]  }
 0x174   :  { %12697 = vst [vmem:[#allocation34_spill] sm:$0xff] %v10941_v43  ;;  %v10949_v12 = vadd.f32 %v3067_v27, %v1449_v0 }
 0x175   :  { %12698 = vst [vmem:[#allocation35_spill] sm:$0xff] %v10945_v30  ;;  %v10951_v32 = vadd.f32 %v3065_v28, %v1447_v38  ;;  %v9062_v37 = vpop.f32.mrb[76].mxu0  ;;  %v9210_v35 = vpop.f32.mrb[76].mxu1 }
 0x176   :  { %12699 = vst [vmem:[#allocation36_spill] sm:$0xff] %v10949_v12  ;;  %v1112_v52 = vadd.f32 %v10703_v34, %v9062_v37  ;;  %v2730_v11 = vadd.f32 %v10703_v34, %v9210_v35  ;;  %v1103_v31 = vpop.f32.mrb[77].mxu0  ;;  %v2721_v9 = vpop.f32.mrb[77].mxu1 }
 0x177   :  { %12700 = vst [vmem:[#allocation37_spill] sm:$0xff] %v10951_v32  ;;  %v1104_v27 = vadd.f32 %v10703_v34, %v1103_v31  ;;  %v2722_v0 = vadd.f32 %v10703_v34, %v2721_v9  ;;  %v9063_v46 = vpop.f32.mrb[78].mxu0  ;;  %v9211_v16 = vpop.f32.mrb[78].mxu1 }
 0x178   :  { %v1452_v8 = vmax.f32 %v1112_v52, 0.0  ;;  %v3070_v4 = vmax.f32 %v2730_v11, 0.0  ;;  %v1115_v49 = vadd.f32 %v10703_v34, %v9063_v46  ;;  %v2733_v38 = vadd.f32 %v10703_v34, %v9211_v16  ;;  %v1106_v28 = vpop.f32.mrb[79].mxu0  ;;  %v2724_v37 = vpop.f32.mrb[79].mxu1 }
 0x179   :  { %v1450_v35 = vmax.f32 %v1104_v27, 0.0  ;;  %v3068_v31 = vmax.f32 %v2722_v0, 0.0  ;;  %v1107_v9 = vadd.f32 %v10703_v34, %v1106_v28  ;;  %v2725_v32 = vadd.f32 %v10703_v34, %v2724_v37  ;;  %v9767_v28 = vld [vmem:[%s12662_s0 + $0x300] sm:$0xff]   ;;  %v9768_v37 = vld [vmem:[%s12662_s0 + $0x348] sm:$0xff]  }
 0x17a   :  { %v10973_v12 = vadd.f32 %v3070_v4, %v1452_v8  ;;  %v1453_v30 = vmax.f32 %v1115_v49, 0.0  ;;  %v3071_v43 = vmax.f32 %v2733_v38, 0.0  ;;  %9321 = vmatmul.mubr.msk.bf16.gmra.mrb[184].mxu0 %vm541_vm2, %v9761_v23  ;;  %9469 = vmatmul.mubr.msk.bf16.gmra.mrb[184].mxu1 %vm541_vm2, %v9762_v20 }
 0x17b   :  { %v10977_v52 = vadd.f32 %v3068_v31, %v1450_v35  ;;  %v1451_v11 = vmax.f32 %v1107_v9, 0.0  ;;  %v3069_v46 = vmax.f32 %v2725_v32, 0.0  ;;  %9324 = vmatprep.mubr.msk.bf16.mxu0 %vm541_vm2, %v9763_v40  ;;  %9472 = vmatprep.mubr.msk.bf16.mxu1 %vm541_vm2, %v9764_v14  ;;  %v9765_v32 = vld [vmem:[%s12662_s0 + $0x2f8] sm:$0xff]   ;;  %v9766_v40 = vld [vmem:[%s12662_s0 + $0x340] sm:$0xff]  }
 0x17c   :  { %12701 = vst [vmem:[#allocation38_spill] sm:$0xff] %v10973_v12  ;;  %v10981_v27 = vadd.f32 %v3071_v43, %v1453_v30 }
 0x17d   :  { %12702 = vst [vmem:[#allocation39_spill] sm:$0xff] %v10977_v52  ;;  %v10983_v0 = vadd.f32 %v3069_v46, %v1451_v11  ;;  %v9066_v16 = vpop.f32.mrb[80].mxu0  ;;  %v9214_v8 = vpop.f32.mrb[80].mxu1 }
 0x17e   :  { %12703 = vst [vmem:[#allocation40_spill] sm:$0xff] %v10981_v27  ;;  %v1128_v4 = vadd.f32 %v10703_v34, %v9066_v16  ;;  %v2746_v23 = vadd.f32 %v10703_v34, %v9214_v8  ;;  %v1119_v49 = vpop.f32.mrb[81].mxu0  ;;  %v2737_v20 = vpop.f32.mrb[81].mxu1 }
 0x17f   :  { %12704 = vst [vmem:[#allocation41_spill] sm:$0xff] %v10983_v0  ;;  %v1120_v43 = vadd.f32 %v10703_v34, %v1119_v49  ;;  %v2738_v30 = vadd.f32 %v10703_v34, %v2737_v20  ;;  %v9067_v14 = vpop.f32.mrb[82].mxu0  ;;  %v9215_v38 = vpop.f32.mrb[82].mxu1 }
 0x180   :  { %v1456_v35 = vmax.f32 %v1128_v4, 0.0  ;;  %v3074_v31 = vmax.f32 %v2746_v23, 0.0  ;;  %v1131_v9 = vadd.f32 %v10703_v34, %v9067_v14  ;;  %v2749_v11 = vadd.f32 %v10703_v34, %v9215_v38  ;;  %v1122_v46 = vpop.f32.mrb[83].mxu0  ;;  %v2740_v16 = vpop.f32.mrb[83].mxu1 }
 0x181   :  { %v1454_v8 = vmax.f32 %v1120_v43, 0.0  ;;  %v3072_v49 = vmax.f32 %v2738_v30, 0.0  ;;  %v1123_v20 = vadd.f32 %v10703_v34, %v1122_v46  ;;  %v2741_v0 = vadd.f32 %v10703_v34, %v2740_v16  ;;  %v9771_v46 = vld [vmem:[%s12662_s0 + $0x310] sm:$0xff]   ;;  %v9772_v16 = vld [vmem:[%s12662_s0 + $0x358] sm:$0xff]  }
 0x182   :  { %v11005_v27 = vadd.f32 %v3074_v31, %v1456_v35  ;;  %v1457_v52 = vmax.f32 %v1131_v9, 0.0  ;;  %v3075_v12 = vmax.f32 %v2749_v11, 0.0  ;;  %9325 = vmatmul.mubr.msk.bf16.gmra.mrb[188].mxu0 %vm541_vm2, %v9765_v32  ;;  %9473 = vmatmul.mubr.msk.bf16.gmra.mrb[188].mxu1 %vm541_vm2, %v9766_v40 }
 0x183   :  { %v11009_v4 = vadd.f32 %v3072_v49, %v1454_v8  ;;  %v1455_v23 = vmax.f32 %v1123_v20, 0.0  ;;  %v3073_v14 = vmax.f32 %v2741_v0, 0.0  ;;  %9328 = vmatprep.mubr.msk.bf16.mxu0 %vm541_vm2, %v9767_v28  ;;  %9476 = vmatprep.mubr.msk.bf16.mxu1 %vm541_vm2, %v9768_v37  ;;  %v9769_v0 = vld [vmem:[%s12662_s0 + $0x308] sm:$0xff]   ;;  %v9770_v28 = vld [vmem:[%s12662_s0 + $0x350] sm:$0xff]  }
 0x184   :  { %12705 = vst [vmem:[#allocation42_spill] sm:$0xff] %v11005_v27  ;;  %v11013_v43 = vadd.f32 %v3075_v12, %v1457_v52 }
 0x185   :  { %12706 = vst [vmem:[#allocation43_spill] sm:$0xff] %v11009_v4  ;;  %v11015_v30 = vadd.f32 %v3073_v14, %v1455_v23  ;;  %v9070_v38 = vpop.f32.mrb[84].mxu0  ;;  %v9218_v35 = vpop.f32.mrb[84].mxu1 }
 0x186   :  { %12707 = vst [vmem:[#allocation44_spill] sm:$0xff] %v11013_v43  ;;  %v1144_v31 = vadd.f32 %v10703_v34, %v9070_v38  ;;  %v2762_v32 = vadd.f32 %v10703_v34, %v9218_v35  ;;  %v1135_v9 = vpop.f32.mrb[85].mxu0  ;;  %v2753_v40 = vpop.f32.mrb[85].mxu1 }
 0x187   :  { %12708 = vst [vmem:[#allocation45_spill] sm:$0xff] %v11015_v30  ;;  %v1136_v12 = vadd.f32 %v10703_v34, %v1135_v9  ;;  %v2754_v52 = vadd.f32 %v10703_v34, %v2753_v40  ;;  %v9071_v37 = vpop.f32.mrb[86].mxu0  ;;  %v9219_v11 = vpop.f32.mrb[86].mxu1 }
 0x188   :  { %v1460_v8 = vmax.f32 %v1144_v31, 0.0  ;;  %v3078_v49 = vmax.f32 %v2762_v32, 0.0  ;;  %v1147_v20 = vadd.f32 %v10703_v34, %v9071_v37  ;;  %v2765_v23 = vadd.f32 %v10703_v34, %v9219_v11  ;;  %v1138_v14 = vpop.f32.mrb[87].mxu0  ;;  %v2756_v38 = vpop.f32.mrb[87].mxu1 }
 0x189   :  { %v1458_v35 = vmax.f32 %v1136_v12, 0.0  ;;  %v3076_v9 = vmax.f32 %v2754_v52, 0.0  ;;  %v1139_v40 = vadd.f32 %v10703_v34, %v1138_v14  ;;  %v2757_v30 = vadd.f32 %v10703_v34, %v2756_v38  ;;  %v9775_v14 = vld [vmem:[%s12662_s0 + $0x3f8] sm:$0xff]   ;;  %v9776_v38 = vld [vmem:[%s12662_s0 + $0x440] sm:$0xff]  }
 0x18a   :  { %v11037_v43 = vadd.f32 %v3078_v49, %v1460_v8  ;;  %v1461_v4 = vmax.f32 %v1147_v20, 0.0  ;;  %v3079_v27 = vmax.f32 %v2765_v23, 0.0  ;;  %9329 = vmatmul.mubr.msk.bf16.gmra.mrb[192].mxu0 %vm541_vm2, %v9769_v0  ;;  %9477 = vmatmul.mubr.msk.bf16.gmra.mrb[192].mxu1 %vm541_vm2, %v9770_v28 }
 0x18b   :  { %v11041_v31 = vadd.f32 %v3076_v9, %v1458_v35  ;;  %v1459_v32 = vmax.f32 %v1139_v40, 0.0  ;;  %v3077_v37 = vmax.f32 %v2757_v30, 0.0  ;;  %9332 = vmatprep.mubr.msk.bf16.mxu0 %vm541_vm2, %v9771_v46  ;;  %9480 = vmatprep.mubr.msk.bf16.mxu1 %vm541_vm2, %v9772_v16  ;;  %v9773_v30 = vld [vmem:[%s12662_s0 + $0x3f0] sm:$0xff]   ;;  %v9774_v46 = vld [vmem:[%s12662_s0 + $0x438] sm:$0xff]  }
 0x18c   :  { %12709 = vst [vmem:[#allocation46_spill] sm:$0xff] %v11037_v43  ;;  %v11045_v12 = vadd.f32 %v3079_v27, %v1461_v4 }
 0x18d   :  { %12710 = vst [vmem:[#allocation47_spill] sm:$0xff] %v11041_v31  ;;  %v11047_v52 = vadd.f32 %v3077_v37, %v1459_v32  ;;  %v9074_v11 = vpop.f32.mrb[88].mxu0  ;;  %v9222_v8 = vpop.f32.mrb[88].mxu1 }
 0x18e   :  { %12711 = vst [vmem:[#allocation48_spill] sm:$0xff] %v11045_v12  ;;  %v1160_v49 = vadd.f32 %v10703_v34, %v9074_v11  ;;  %v2778_v0 = vadd.f32 %v10703_v34, %v9222_v8  ;;  %v1151_v20 = vpop.f32.mrb[89].mxu0  ;;  %v2769_v28 = vpop.f32.mrb[89].mxu1 }
 0x18f   :  { %12712 = vst [vmem:[#allocation49_spill] sm:$0xff] %v11047_v52  ;;  %v1152_v27 = vadd.f32 %v10703_v34, %v1151_v20  ;;  %v2770_v4 = vadd.f32 %v10703_v34, %v2769_v28  ;;  %v9075_v16 = vpop.f32.mrb[90].mxu0  ;;  %v9223_v23 = vpop.f32.mrb[90].mxu1 }
 0x190   :  { %v1464_v35 = vmax.f32 %v1160_v49, 0.0  ;;  %v3082_v9 = vmax.f32 %v2778_v0, 0.0  ;;  %v1163_v40 = vadd.f32 %v10703_v34, %v9075_v16  ;;  %v2781_v32 = vadd.f32 %v10703_v34, %v9223_v23  ;;  %v1154_v37 = vpop.f32.mrb[91].mxu0  ;;  %v2772_v11 = vpop.f32.mrb[91].mxu1 }
 0x191   :  { %v1462_v8 = vmax.f32 %v1152_v27, 0.0  ;;  %v3080_v20 = vmax.f32 %v2770_v4, 0.0  ;;  %v1155_v28 = vadd.f32 %v10703_v34, %v1154_v37  ;;  %v2773_v52 = vadd.f32 %v10703_v34, %v2772_v11  ;;  %v9779_v37 = vld [vmem:[%s12662_s0 + $0x408] sm:$0xff]   ;;  %v9780_v11 = vld [vmem:[%s12662_s0 + $0x450] sm:$0xff]  }
 0x192   :  { %v11069_v12 = vadd.f32 %v3082_v9, %v1464_v35  ;;  %v1465_v31 = vmax.f32 %v1163_v40, 0.0  ;;  %v3083_v43 = vmax.f32 %v2781_v32, 0.0  ;;  %9333 = vmatmul.mubr.msk.bf16.gmra.mrb[196].mxu0 %vm541_vm2, %v9773_v30  ;;  %9481 = vmatmul.mubr.msk.bf16.gmra.mrb[196].mxu1 %vm541_vm2, %v9774_v46 }
 0x193   :  { %v11073_v49 = vadd.f32 %v3080_v20, %v1462_v8  ;;  %v1463_v0 = vmax.f32 %v1155_v28, 0.0  ;;  %v3081_v16 = vmax.f32 %v2773_v52, 0.0  ;;  %9336 = vmatprep.mubr.msk.bf16.mxu0 %vm541_vm2, %v9775_v14  ;;  %9484 = vmatprep.mubr.msk.bf16.mxu1 %vm541_vm2, %v9776_v38  ;;  %v9777_v52 = vld [vmem:[%s12662_s0 + $0x400] sm:$0xff]   ;;  %v9778_v14 = vld [vmem:[%s12662_s0 + $0x448] sm:$0xff]  }
 0x194   :  { %12713 = vst [vmem:[#allocation50_spill] sm:$0xff] %v11069_v12  ;;  %v11077_v27 = vadd.f32 %v3083_v43, %v1465_v31 }
 0x195   :  { %12714 = vst [vmem:[#allocation51_spill] sm:$0xff] %v11073_v49  ;;  %v11079_v4 = vadd.f32 %v3081_v16, %v1463_v0  ;;  %v9078_v23 = vpop.f32.mrb[92].mxu0  ;;  %v9226_v35 = vpop.f32.mrb[92].mxu1 }
 0x196   :  { %12715 = vst [vmem:[#allocation52_spill] sm:$0xff] %v11077_v27  ;;  %v1176_v9 = vadd.f32 %v10703_v34, %v9078_v23  ;;  %v2794_v30 = vadd.f32 %v10703_v34, %v9226_v35  ;;  %v1167_v40 = vpop.f32.mrb[93].mxu0  ;;  %v2785_v46 = vpop.f32.mrb[93].mxu1 }
 0x197   :  { %12716 = vst [vmem:[#allocation53_spill] sm:$0xff] %v11079_v4  ;;  %v1168_v43 = vadd.f32 %v10703_v34, %v1167_v40  ;;  %v2786_v31 = vadd.f32 %v10703_v34, %v2785_v46  ;;  %v9079_v38 = vpop.f32.mrb[94].mxu0  ;;  %v9227_v32 = vpop.f32.mrb[94].mxu1 }
 0x198   :  { %v1468_v8 = vmax.f32 %v1176_v9, 0.0  ;;  %v3086_v20 = vmax.f32 %v2794_v30, 0.0  ;;  %v1179_v28 = vadd.f32 %v10703_v34, %v9079_v38  ;;  %v2797_v0 = vadd.f32 %v10703_v34, %v9227_v32  ;;  %v1170_v16 = vpop.f32.mrb[95].mxu0  ;;  %v2788_v23 = vpop.f32.mrb[95].mxu1 }
 0x199   :  { %v1466_v35 = vmax.f32 %v1168_v43, 0.0  ;;  %v3084_v40 = vmax.f32 %v2786_v31, 0.0  ;;  %v1171_v46 = vadd.f32 %v10703_v34, %v1170_v16  ;;  %v2789_v4 = vadd.f32 %v10703_v34, %v2788_v23  ;;  %v9783_v16 = vld [vmem:[%s12662_s0 + $0x418] sm:$0xff]   ;;  %v9784_v23 = vld [vmem:[%s12662_s0 + $0x460] sm:$0xff]  }
 0x19a   :  { %v11101_v27 = vadd.f32 %v3086_v20, %v1468_v8  ;;  %v1469_v49 = vmax.f32 %v1179_v28, 0.0  ;;  %v3087_v12 = vmax.f32 %v2797_v0, 0.0  ;;  %9337 = vmatmul.mubr.msk.bf16.gmra.mrb[200].mxu0 %vm541_vm2, %v9777_v52  ;;  %9485 = vmatmul.mubr.msk.bf16.gmra.mrb[200].mxu1 %vm541_vm2, %v9778_v14 }
 0x19b   :  { %v11105_v9 = vadd.f32 %v3084_v40, %v1466_v35  ;;  %v1467_v30 = vmax.f32 %v1171_v46, 0.0  ;;  %v3085_v38 = vmax.f32 %v2789_v4, 0.0  ;;  %9340 = vmatprep.mubr.msk.bf16.mxu0 %vm541_vm2, %v9779_v37  ;;  %9488 = vmatprep.mubr.msk.bf16.mxu1 %vm541_vm2, %v9780_v11  ;;  %v9781_v4 = vld [vmem:[%s12662_s0 + $0x410] sm:$0xff]   ;;  %v9782_v37 = vld [vmem:[%s12662_s0 + $0x458] sm:$0xff]  }
 0x19c   :  { %12717 = vst [vmem:[#allocation54_spill] sm:$0xff] %v11101_v27  ;;  %v11109_v43 = vadd.f32 %v3087_v12, %v1469_v49 }
 0x19d   :  { %12718 = vst [vmem:[#allocation55_spill] sm:$0xff] %v11105_v9  ;;  %v11111_v31 = vadd.f32 %v3085_v38, %v1467_v30  ;;  %v9082_v32 = vpop.f32.mrb[96].mxu0  ;;  %v9230_v8 = vpop.f32.mrb[96].mxu1 }
 0x19e   :  { %12719 = vst [vmem:[#allocation56_spill] sm:$0xff] %v11109_v43  ;;  %v1192_v20 = vadd.f32 %v10703_v34, %v9082_v32  ;;  %v2810_v52 = vadd.f32 %v10703_v34, %v9230_v8  ;;  %v1183_v28 = vpop.f32.mrb[97].mxu0  ;;  %v2801_v14 = vpop.f32.mrb[97].mxu1 }
 0x19f   :  { %12720 = vst [vmem:[#allocation57_spill] sm:$0xff] %v11111_v31  ;;  %v1184_v12 = vadd.f32 %v10703_v34, %v1183_v28  ;;  %v2802_v49 = vadd.f32 %v10703_v34, %v2801_v14  ;;  %v9083_v11 = vpop.f32.mrb[98].mxu0  ;;  %v9231_v0 = vpop.f32.mrb[98].mxu1 }
 0x1a0   :  { %v1472_v35 = vmax.f32 %v1192_v20, 0.0  ;;  %v3090_v40 = vmax.f32 %v2810_v52, 0.0  ;;  %v1195_v46 = vadd.f32 %v10703_v34, %v9083_v11  ;;  %v2813_v30 = vadd.f32 %v10703_v34, %v9231_v0  ;;  %v1186_v38 = vpop.f32.mrb[99].mxu0  ;;  %v2804_v32 = vpop.f32.mrb[99].mxu1 }
 0x1a1   :  { %v1470_v8 = vmax.f32 %v1184_v12, 0.0  ;;  %v3088_v28 = vmax.f32 %v2802_v49, 0.0  ;;  %v1187_v14 = vadd.f32 %v10703_v34, %v1186_v38  ;;  %v2805_v31 = vadd.f32 %v10703_v34, %v2804_v32  ;;  %v9787_v38 = vld [vmem:[%s12662_s0 + $0x428] sm:$0xff]   ;;  %v9788_v32 = vld [vmem:[%s12662_s0 + $0x470] sm:$0xff]  }
 0x1a2   :  { %v11133_v43 = vadd.f32 %v3090_v40, %v1472_v35  ;;  %v1473_v9 = vmax.f32 %v1195_v46, 0.0  ;;  %v3091_v27 = vmax.f32 %v2813_v30, 0.0  ;;  %9341 = vmatmul.mubr.msk.bf16.gmra.mrb[204].mxu0 %vm541_vm2, %v9781_v4  ;;  %9489 = vmatmul.mubr.msk.bf16.gmra.mrb[204].mxu1 %vm541_vm2, %v9782_v37 }
 0x1a3   :  { %v11137_v20 = vadd.f32 %v3088_v28, %v1470_v8  ;;  %v1471_v52 = vmax.f32 %v1187_v14, 0.0  ;;  %v3089_v11 = vmax.f32 %v2805_v31, 0.0  ;;  %9344 = vmatprep.mubr.msk.bf16.mxu0 %vm541_vm2, %v9783_v16  ;;  %9492 = vmatprep.mubr.msk.bf16.mxu1 %vm541_vm2, %v9784_v23  ;;  %v9785_v31 = vld [vmem:[%s12662_s0 + $0x420] sm:$0xff]   ;;  %v9786_v16 = vld [vmem:[%s12662_s0 + $0x468] sm:$0xff]  }
 0x1a4   :  { %12721 = vst [vmem:[#allocation58_spill] sm:$0xff] %v11133_v43  ;;  %v11141_v12 = vadd.f32 %v3091_v27, %v1473_v9  ;;  %v11164_v14 = vld [vmem:[%s12663_s2] ss:$0 sm:$0xff] }
 0x1a5   :  { %12722 = vst [vmem:[#allocation59_spill] sm:$0xff] %v11137_v20  ;;  %v11143_v49 = vadd.f32 %v3089_v11, %v1471_v52  ;;  %v9086_v0 = vpop.f32.mrb[100].mxu0  ;;  %v9234_v35 = vpop.f32.mrb[100].mxu1 }
 0x1a6   :  { %12723 = vst [vmem:[#allocation60_spill] sm:$0xff] %v11141_v12  ;;  %v1208_v40 = vadd.f32 %v10703_v34, %v9086_v0  ;;  %v2826_v4 = vadd.f32 %v10703_v34, %v9234_v35  ;;  %v1199_v46 = vpop.f32.mrb[101].mxu0  ;;  %v2817_v37 = vpop.f32.mrb[101].mxu1 }
 0x1a7   :  { %12724 = vst [vmem:[#allocation61_spill] sm:$0xff] %v11143_v49  ;;  %v1200_v27 = vadd.f32 %v10703_v34, %v1199_v46  ;;  %v2818_v9 = vadd.f32 %v10703_v34, %v2817_v37  ;;  %v9087_v23 = vpop.f32.mrb[102].mxu0  ;;  %v9235_v30 = vpop.f32.mrb[102].mxu1 }
 0x1a8   :  { %v1476_v8 = vmax.f32 %v1208_v40, 0.0  ;;  %v3094_v28 = vmax.f32 %v2826_v4, 0.0  ;;  %v1211_v52 = vadd.f32 %v11164_v14, %v9087_v23  ;;  %v2829_v34 = vadd.f32 %v11164_v14, %v9235_v30  ;;  %v1202_v11 = vpop.f32.mrb[103].mxu0  ;;  %v2820_v0 = vpop.f32.mrb[103].mxu1 }
 0x1a9   :  { %v1474_v35 = vmax.f32 %v1200_v27, 0.0  ;;  %v3092_v46 = vmax.f32 %v2818_v9, 0.0  ;;  %v1203_v37 = vadd.f32 %v11164_v14, %v1202_v11  ;;  %v2821_v49 = vadd.f32 %v11164_v14, %v2820_v0 }
 0x1aa   :  { %v11170_v12 = vadd.f32 %v3094_v28, %v1476_v8  ;;  %v1477_v40 = vmax.f32 %v1211_v52, 0.0  ;;  %v3095_v4 = vmax.f32 %v2829_v34, 0.0  ;;  %9345 = vmatmul.mubr.msk.bf16.gmra.mrb[208].mxu0 %vm541_vm2, %v9785_v31  ;;  %9493 = vmatmul.mubr.msk.bf16.gmra.mrb[208].mxu1 %vm541_vm2, %v9786_v16 }
 0x1ab   :  { %v11174_v20 = vadd.f32 %v3092_v46, %v1474_v35  ;;  %v1475_v23 = vmax.f32 %v1203_v37, 0.0  ;;  %v3093_v30 = vmax.f32 %v2821_v49, 0.0  ;;  %9348 = vmatprep.mubr.msk.bf16.mxu0 %vm541_vm2, %v9787_v38  ;;  %9496 = vmatprep.mubr.msk.bf16.mxu1 %vm541_vm2, %v9788_v32  ;;  %v9789_v49 = vld [vmem:[%s12662_s0 + $0x430] sm:$0xff]   ;;  %v9790_v38 = vld [vmem:[%s12662_s0 + $0x478] sm:$0xff]  }
 0x1ac   :  { %12725 = vst [vmem:[#allocation62_spill] sm:$0xff] %v11170_v12  ;;  %v11178_v27 = vadd.f32 %v3095_v4, %v1477_v40  ;;  %v9791_v46 = vld [vmem:[%s12662_s0 + $0x510] sm:$0xff]   ;;  %v9792_v37 = vld [vmem:[%s12662_s0 + $0x558] sm:$0xff]  }
 0x1ad   :  { %12726 = vst [vmem:[#allocation63_spill] sm:$0xff] %v11174_v20  ;;  %v11180_v9 = vadd.f32 %v3093_v30, %v1475_v23  ;;  %v9090_v8 = vpop.f32.mrb[104].mxu0  ;;  %v9238_v28 = vpop.f32.mrb[104].mxu1 }
 0x1ae   :  { %12727 = vst [vmem:[#allocation64_spill] sm:$0xff] %v11178_v27  ;;  %v1224_v52 = vadd.f32 %v11164_v14, %v9090_v8  ;;  %v2842_v31 = vadd.f32 %v11164_v14, %v9238_v28  ;;  %v1215_v34 = vpop.f32.mrb[105].mxu0  ;;  %v2833_v16 = vpop.f32.mrb[105].mxu1 }
 0x1af   :  { %12728 = vst [vmem:[#allocation65_spill] sm:$0xff] %v11180_v9  ;;  %v1216_v32 = vadd.f32 %v11164_v14, %v1215_v34  ;;  %v2834_v11 = vadd.f32 %v11164_v14, %v2833_v16  ;;  %v9091_v0 = vpop.f32.mrb[106].mxu0  ;;  %v9239_v35 = vpop.f32.mrb[106].mxu1 }
 0x1b0   :  { %v1480_v40 = vmax.f32 %v1224_v52, 0.0  ;;  %v3098_v4 = vmax.f32 %v2842_v31, 0.0  ;;  %v1227_v23 = vadd.f32 %v11164_v14, %v9091_v0  ;;  %v2845_v30 = vadd.f32 %v11164_v14, %v9239_v35  ;;  %v1218_v8 = vpop.f32.mrb[107].mxu0  ;;  %v2836_v28 = vpop.f32.mrb[107].mxu1 }
 0x1b1   :  { %v1478_v34 = vmax.f32 %v1216_v32, 0.0  ;;  %v3096_v16 = vmax.f32 %v2834_v11, 0.0  ;;  %v1219_v9 = vadd.f32 %v11164_v14, %v1218_v8  ;;  %v2837_v27 = vadd.f32 %v11164_v14, %v2836_v28  ;;  %v9796_v8 = vld [vmem:[%s12662_s0 + $0x568] sm:$0xff]  }
 0x1b2   :  { %v11202_v20 = vadd.f32 %v3098_v4, %v1480_v40  ;;  %v1481_v12 = vmax.f32 %v1227_v23, 0.0  ;;  %v3099_v43 = vmax.f32 %v2845_v30, 0.0  ;;  %9349 = vmatmul.mubr.msk.bf16.gmra.mrb[212].mxu0 %vm541_vm2, %v9789_v49  ;;  %9497 = vmatmul.mubr.msk.bf16.gmra.mrb[212].mxu1 %vm541_vm2, %v9790_v38  ;;  %v9795_v30 = vld [vmem:[%s12662_s0 + $0x520] sm:$0xff]  }
 0x1b3   :  { %v11206_v52 = vadd.f32 %v3096_v16, %v1478_v34  ;;  %v1479_v31 = vmax.f32 %v1219_v9, 0.0  ;;  %v3097_v0 = vmax.f32 %v2837_v27, 0.0  ;;  %9352 = vmatprep.mubr.msk.bf16.mxu0 %vm541_vm2, %v9791_v46  ;;  %9500 = vmatprep.mubr.msk.bf16.mxu1 %vm541_vm2, %v9792_v37  ;;  %v9793_v27 = vld [vmem:[%s12662_s0 + $0x518] sm:$0xff]   ;;  %v9794_v9 = vld [vmem:[%s12662_s0 + $0x560] sm:$0xff]  }
 0x1b4   :  { %12729 = vst [vmem:[#allocation66_spill] sm:$0xff] %v11202_v20  ;;  %v11210_v32 = vadd.f32 %v3099_v43, %v1481_v12 }
 0x1b5   :  { %12730 = vst [vmem:[#allocation67_spill] sm:$0xff] %v11206_v52  ;;  %v11212_v11 = vadd.f32 %v3097_v0, %v1479_v31  ;;  %v9094_v35 = vpop.f32.mrb[108].mxu0  ;;  %v9242_v40 = vpop.f32.mrb[108].mxu1 }
 0x1b6   :  { %12731 = vst [vmem:[#allocation68_spill] sm:$0xff] %v11210_v32  ;;  %v1240_v4 = vadd.f32 %v11164_v14, %v9094_v35  ;;  %v2858_v49 = vadd.f32 %v11164_v14, %v9242_v40  ;;  %v1231_v23 = vpop.f32.mrb[109].mxu0  ;;  %v2849_v38 = vpop.f32.mrb[109].mxu1 }
 0x1b7   :  { %12732 = vst [vmem:[#allocation69_spill] sm:$0xff] %v11212_v11  ;;  %v1232_v43 = vadd.f32 %v11164_v14, %v1231_v23  ;;  %v2850_v12 = vadd.f32 %v11164_v14, %v2849_v38  ;;  %v9095_v46 = vpop.f32.mrb[110].mxu0  ;;  %v9243_v37 = vpop.f32.mrb[110].mxu1 }
 0x1b8   :  { %v1484_v28 = vmax.f32 %v1240_v4, 0.0  ;;  %v3102_v34 = vmax.f32 %v2858_v49, 0.0  ;;  %v1243_v16 = vadd.f32 %v11164_v14, %v9095_v46  ;;  %v2861_v31 = vadd.f32 %v11164_v14, %v9243_v37  ;;  %v1234_v0 = vpop.f32.mrb[111].mxu0  ;;  %v2852_v35 = vpop.f32.mrb[111].mxu1 }
 0x1b9   :  { %v1482_v40 = vmax.f32 %v1232_v43, 0.0  ;;  %v3100_v23 = vmax.f32 %v2850_v12, 0.0  ;;  %v1235_v38 = vadd.f32 %v11164_v14, %v1234_v0  ;;  %v2853_v11 = vadd.f32 %v11164_v14, %v2852_v35  ;;  %v9799_v0 = vld [vmem:[%s12662_s0 + $0x530] sm:$0xff]   ;;  %v9800_v35 = vld [vmem:[%s12662_s0 + $0x578] sm:$0xff]  }
 0x1ba   :  { %v11234_v32 = vadd.f32 %v3102_v34, %v1484_v28  ;;  %v1485_v52 = vmax.f32 %v1243_v16, 0.0  ;;  %v3103_v20 = vmax.f32 %v2861_v31, 0.0  ;;  %9353 = vmatmul.mubr.msk.bf16.gmra.mrb[216].mxu0 %vm541_vm2, %v9793_v27  ;;  %9501 = vmatmul.mubr.msk.bf16.gmra.mrb[216].mxu1 %vm541_vm2, %v9794_v9 }
 0x1bb   :  { %v11238_v4 = vadd.f32 %v3100_v23, %v1482_v40  ;;  %v1483_v49 = vmax.f32 %v1235_v38, 0.0  ;;  %v3101_v46 = vmax.f32 %v2853_v11, 0.0  ;;  %9356 = vmatprep.mubr.msk.bf16.mxu0 %vm541_vm2, %v9795_v30  ;;  %9504 = vmatprep.mubr.msk.bf16.mxu1 %vm541_vm2, %v9796_v8  ;;  %v9797_v11 = vld [vmem:[%s12662_s0 + $0x528] sm:$0xff]   ;;  %v9798_v30 = vld [vmem:[%s12662_s0 + $0x570] sm:$0xff]  }
 0x1bc   :  { %12733 = vst [vmem:[#allocation70_spill] sm:$0xff] %v11234_v32  ;;  %v11242_v43 = vadd.f32 %v3103_v20, %v1485_v52 }
 0x1bd   :  { %12734 = vst [vmem:[#allocation71_spill] sm:$0xff] %v11238_v4  ;;  %v11244_v12 = vadd.f32 %v3101_v46, %v1483_v49  ;;  %v9098_v37 = vpop.f32.mrb[112].mxu0  ;;  %v9246_v28 = vpop.f32.mrb[112].mxu1 }
 0x1be   :  { %12735 = vst [vmem:[#allocation72_spill] sm:$0xff] %v11242_v43  ;;  %v1256_v34 = vadd.f32 %v11164_v14, %v9098_v37  ;;  %v2874_v27 = vadd.f32 %v11164_v14, %v9246_v28  ;;  %v1247_v16 = vpop.f32.mrb[113].mxu0  ;;  %v2865_v9 = vpop.f32.mrb[113].mxu1 }
 0x1bf   :  { %12736 = vst [vmem:[#allocation73_spill] sm:$0xff] %v11244_v12  ;;  %v1248_v20 = vadd.f32 %v11164_v14, %v1247_v16  ;;  %v2866_v52 = vadd.f32 %v11164_v14, %v2865_v9  ;;  %v9099_v8 = vpop.f32.mrb[114].mxu0  ;;  %v9247_v31 = vpop.f32.mrb[114].mxu1 }
 0x1c0   :  { %v1488_v40 = vmax.f32 %v1256_v34, 0.0  ;;  %v3106_v23 = vmax.f32 %v2874_v27, 0.0  ;;  %v1259_v38 = vadd.f32 %v11164_v14, %v9099_v8  ;;  %v2877_v49 = vadd.f32 %v11164_v14, %v9247_v31  ;;  %v1250_v46 = vpop.f32.mrb[115].mxu0  ;;  %v2868_v37 = vpop.f32.mrb[115].mxu1 }
 0x1c1   :  { %v1486_v28 = vmax.f32 %v1248_v20, 0.0  ;;  %v3104_v16 = vmax.f32 %v2866_v52, 0.0  ;;  %v1251_v9 = vadd.f32 %v11164_v14, %v1250_v46  ;;  %v2869_v12 = vadd.f32 %v11164_v14, %v2868_v37  ;;  %v9803_v46 = vld [vmem:[%s12662_s0 + $0x540] sm:$0xff]   ;;  %v9804_v37 = vld [vmem:[%s12662_s0 + $0x588] sm:$0xff]  }
 0x1c2   :  { %v11266_v43 = vadd.f32 %v3106_v23, %v1488_v40  ;;  %v1489_v4 = vmax.f32 %v1259_v38, 0.0  ;;  %v3107_v32 = vmax.f32 %v2877_v49, 0.0  ;;  %9357 = vmatmul.mubr.msk.bf16.gmra.mrb[220].mxu0 %vm541_vm2, %v9797_v11  ;;  %9505 = vmatmul.mubr.msk.bf16.gmra.mrb[220].mxu1 %vm541_vm2, %v9798_v30 }
 0x1c3   :  { %v11270_v34 = vadd.f32 %v3104_v16, %v1486_v28  ;;  %v1487_v27 = vmax.f32 %v1251_v9, 0.0  ;;  %v3105_v8 = vmax.f32 %v2869_v12, 0.0  ;;  %9360 = vmatprep.mubr.msk.bf16.mxu0 %vm541_vm2, %v9799_v0  ;;  %9508 = vmatprep.mubr.msk.bf16.mxu1 %vm541_vm2, %v9800_v35  ;;  %v9801_v12 = vld [vmem:[%s12662_s0 + $0x538] sm:$0xff]   ;;  %v9802_v0 = vld [vmem:[%s12662_s0 + $0x580] sm:$0xff]  }
 0x1c4   :  { %12737 = vst [vmem:[#allocation74_spill] sm:$0xff] %v11266_v43  ;;  %v11274_v20 = vadd.f32 %v3107_v32, %v1489_v4 }
 0x1c5   :  { %12738 = vst [vmem:[#allocation75_spill] sm:$0xff] %v11270_v34  ;;  %v11276_v52 = vadd.f32 %v3105_v8, %v1487_v27  ;;  %v9102_v31 = vpop.f32.mrb[116].mxu0  ;;  %v9250_v40 = vpop.f32.mrb[116].mxu1 }
 0x1c6   :  { %12739 = vst [vmem:[#allocation76_spill] sm:$0xff] %v11274_v20  ;;  %v1272_v23 = vadd.f32 %v11164_v14, %v9102_v31  ;;  %v2890_v11 = vadd.f32 %v11164_v14, %v9250_v40  ;;  %v1263_v38 = vpop.f32.mrb[117].mxu0  ;;  %v2881_v30 = vpop.f32.mrb[117].mxu1 }
 0x1c7   :  { %12740 = vst [vmem:[#allocation77_spill] sm:$0xff] %v11276_v52  ;;  %v1264_v32 = vadd.f32 %v11164_v14, %v1263_v38  ;;  %v2882_v4 = vadd.f32 %v11164_v14, %v2881_v30  ;;  %v9103_v35 = vpop.f32.mrb[118].mxu0  ;;  %v9251_v49 = vpop.f32.mrb[118].mxu1 }
 0x1c8   :  { %v1492_v28 = vmax.f32 %v1272_v23, 0.0  ;;  %v3110_v16 = vmax.f32 %v2890_v11, 0.0  ;;  %v1275_v9 = vadd.f32 %v11164_v14, %v9103_v35  ;;  %v2893_v27 = vadd.f32 %v11164_v14, %v9251_v49  ;;  %v1266_v8 = vpop.f32.mrb[119].mxu0  ;;  %v2884_v31 = vpop.f32.mrb[119].mxu1 }
 0x1c9   :  { %v1490_v40 = vmax.f32 %v1264_v32, 0.0  ;;  %v3108_v38 = vmax.f32 %v2882_v4, 0.0  ;;  %v1267_v30 = vadd.f32 %v11164_v14, %v1266_v8  ;;  %v2885_v52 = vadd.f32 %v11164_v14, %v2884_v31  ;;  %v9807_v8 = vld [vmem:[%s12662_s0 + $0x550] sm:$0xff]   ;;  %v9808_v31 = vld [vmem:[%s12662_s0 + $0x598] sm:$0xff]  }
 0x1ca   :  { %v11298_v20 = vadd.f32 %v3110_v16, %v1492_v28  ;;  %v1493_v34 = vmax.f32 %v1275_v9, 0.0  ;;  %v3111_v43 = vmax.f32 %v2893_v27, 0.0  ;;  %9361 = vmatmul.mubr.msk.bf16.gmra.mrb[224].mxu0 %vm541_vm2, %v9801_v12  ;;  %9509 = vmatmul.mubr.msk.bf16.gmra.mrb[224].mxu1 %vm541_vm2, %v9802_v0 }
 0x1cb   :  { %v11302_v23 = vadd.f32 %v3108_v38, %v1490_v40  ;;  %v1491_v11 = vmax.f32 %v1267_v30, 0.0  ;;  %v3109_v35 = vmax.f32 %v2885_v52, 0.0  ;;  %9364 = vmatprep.mubr.msk.bf16.mxu0 %vm541_vm2, %v9803_v46  ;;  %9512 = vmatprep.mubr.msk.bf16.mxu1 %vm541_vm2, %v9804_v37  ;;  %v9805_v52 = vld [vmem:[%s12662_s0 + $0x548] sm:$0xff]   ;;  %v9806_v46 = vld [vmem:[%s12662_s0 + $0x590] sm:$0xff]  }
 0x1cc   :  { %12741 = vst [vmem:[#allocation78_spill] sm:$0xff] %v11298_v20  ;;  %v11306_v32 = vadd.f32 %v3111_v43, %v1493_v34 }
 0x1cd   :  { %12742 = vst [vmem:[#allocation79_spill] sm:$0xff] %v11302_v23  ;;  %v11308_v4 = vadd.f32 %v3109_v35, %v1491_v11  ;;  %v9106_v49 = vpop.f32.mrb[120].mxu0  ;;  %v9254_v28 = vpop.f32.mrb[120].mxu1 }
 0x1ce   :  { %12743 = vst [vmem:[#allocation80_spill] sm:$0xff] %v11306_v32  ;;  %v1288_v16 = vadd.f32 %v11164_v14, %v9106_v49  ;;  %v2906_v12 = vadd.f32 %v11164_v14, %v9254_v28  ;;  %v1279_v9 = vpop.f32.mrb[121].mxu0  ;;  %v2897_v0 = vpop.f32.mrb[121].mxu1 }
 0x1cf   :  { %12744 = vst [vmem:[#allocation81_spill] sm:$0xff] %v11308_v4  ;;  %v1280_v43 = vadd.f32 %v11164_v14, %v1279_v9  ;;  %v2898_v34 = vadd.f32 %v11164_v14, %v2897_v0  ;;  %v9107_v37 = vpop.f32.mrb[122].mxu0  ;;  %v9255_v27 = vpop.f32.mrb[122].mxu1 }
 0x1d0   :  { %v1496_v40 = vmax.f32 %v1288_v16, 0.0  ;;  %v3114_v38 = vmax.f32 %v2906_v12, 0.0  ;;  %v1291_v30 = vadd.f32 %v11164_v14, %v9107_v37  ;;  %v2909_v11 = vadd.f32 %v11164_v14, %v9255_v27  ;;  %v1282_v35 = vpop.f32.mrb[123].mxu0  ;;  %v2900_v49 = vpop.f32.mrb[123].mxu1 }
 0x1d1   :  { %v1494_v28 = vmax.f32 %v1280_v43, 0.0  ;;  %v3112_v9 = vmax.f32 %v2898_v34, 0.0  ;;  %v1283_v0 = vadd.f32 %v11164_v14, %v1282_v35  ;;  %v2901_v4 = vadd.f32 %v11164_v14, %v2900_v49  ;;  %v9811_v35 = vld [vmem:[%s12662_s0 + $0x638] sm:$0xff]   ;;  %v9812_v49 = vld [vmem:[%s12662_s0 + $0x680] sm:$0xff]  }
 0x1d2   :  { %v11330_v32 = vadd.f32 %v3114_v38, %v1496_v40  ;;  %v1497_v23 = vmax.f32 %v1291_v30, 0.0  ;;  %v3115_v20 = vmax.f32 %v2909_v11, 0.0  ;;  %9365 = vmatmul.mubr.msk.bf16.gmra.mrb[228].mxu0 %vm541_vm2, %v9805_v52  ;;  %9513 = vmatmul.mubr.msk.bf16.gmra.mrb[228].mxu1 %vm541_vm2, %v9806_v46 }
 0x1d3   :  { %v11334_v16 = vadd.f32 %v3112_v9, %v1494_v28  ;;  %v1495_v12 = vmax.f32 %v1283_v0, 0.0  ;;  %v3113_v37 = vmax.f32 %v2901_v4, 0.0  ;;  %9368 = vmatprep.mubr.msk.bf16.mxu0 %vm541_vm2, %v9807_v8  ;;  %9516 = vmatprep.mubr.msk.bf16.mxu1 %vm541_vm2, %v9808_v31  ;;  %v9809_v4 = vld [vmem:[%s12662_s0 + $0x630] sm:$0xff]   ;;  %v9810_v8 = vld [vmem:[%s12662_s0 + $0x678] sm:$0xff]  }
 0x1d4   :  { %12745 = vst [vmem:[#allocation82_spill] sm:$0xff] %v11330_v32  ;;  %v11338_v43 = vadd.f32 %v3115_v20, %v1497_v23 }
 0x1d5   :  { %12746 = vst [vmem:[#allocation83_spill] sm:$0xff] %v11334_v16  ;;  %v11340_v34 = vadd.f32 %v3113_v37, %v1495_v12  ;;  %v9110_v27 = vpop.f32.mrb[124].mxu0  ;;  %v9258_v40 = vpop.f32.mrb[124].mxu1 }
 0x1d6   :  { %12747 = vst [vmem:[#allocation84_spill] sm:$0xff] %v11338_v43  ;;  %v1304_v38 = vadd.f32 %v11164_v14, %v9110_v27  ;;  %v2922_v52 = vadd.f32 %v11164_v14, %v9258_v40  ;;  %v1295_v30 = vpop.f32.mrb[125].mxu0  ;;  %v2913_v46 = vpop.f32.mrb[125].mxu1 }
 0x1d7   :  { %12748 = vst [vmem:[#allocation85_spill] sm:$0xff] %v11340_v34  ;;  %v1296_v20 = vadd.f32 %v11164_v14, %v1295_v30  ;;  %v2914_v23 = vadd.f32 %v11164_v14, %v2913_v46  ;;  %v9111_v31 = vpop.f32.mrb[126].mxu0  ;;  %v9259_v11 = vpop.f32.mrb[126].mxu1 }
 0x1d8   :  { %v1500_v28 = vmax.f32 %v1304_v38, 0.0  ;;  %v3118_v9 = vmax.f32 %v2922_v52, 0.0  ;;  %v1307_v0 = vadd.f32 %v11164_v14, %v9111_v31  ;;  %v2925_v12 = vadd.f32 %v11164_v14, %v9259_v11  ;;  %v1298_v37 = vpop.f32.mrb[127].mxu0  ;;  %v2916_v27 = vpop.f32.mrb[127].mxu1 }
 0x1d9   :  { %v1498_v40 = vmax.f32 %v1296_v20, 0.0  ;;  %v3116_v30 = vmax.f32 %v2914_v23, 0.0  ;;  %v1299_v46 = vadd.f32 %v11164_v14, %v1298_v37  ;;  %v2917_v34 = vadd.f32 %v11164_v14, %v2916_v27  ;;  %v9815_v37 = vld [vmem:[%s12662_s0 + $0x648] sm:$0xff]   ;;  %v9816_v27 = vld [vmem:[%s12662_s0 + $0x690] sm:$0xff]  }
 0x1da   :  { %v11362_v43 = vadd.f32 %v3118_v9, %v1500_v28  ;;  %v1501_v16 = vmax.f32 %v1307_v0, 0.0  ;;  %v3119_v32 = vmax.f32 %v2925_v12, 0.0  ;;  %9369 = vmatmul.mubr.msk.bf16.gmra.mrb[232].mxu0 %vm541_vm2, %v9809_v4  ;;  %9517 = vmatmul.mubr.msk.bf16.gmra.mrb[232].mxu1 %vm541_vm2, %v9810_v8 }
 0x1db   :  { %v11366_v38 = vadd.f32 %v3116_v30, %v1498_v40  ;;  %v1499_v52 = vmax.f32 %v1299_v46, 0.0  ;;  %v3117_v31 = vmax.f32 %v2917_v34, 0.0  ;;  %9372 = vmatprep.mubr.msk.bf16.mxu0 %vm541_vm2, %v9811_v35  ;;  %9520 = vmatprep.mubr.msk.bf16.mxu1 %vm541_vm2, %v9812_v49  ;;  %v9813_v34 = vld [vmem:[%s12662_s0 + $0x640] sm:$0xff]   ;;  %v9814_v35 = vld [vmem:[%s12662_s0 + $0x688] sm:$0xff]  }
 0x1dc   :  { %12749 = vst [vmem:[#allocation86_spill] sm:$0xff] %v11362_v43  ;;  %v11370_v20 = vadd.f32 %v3119_v32, %v1501_v16 }
 0x1dd   :  { %12750 = vst [vmem:[#allocation87_spill] sm:$0xff] %v11366_v38  ;;  %v11372_v23 = vadd.f32 %v3117_v31, %v1499_v52  ;;  %v9114_v11 = vpop.f32.mrb[128].mxu0  ;;  %v9262_v28 = vpop.f32.mrb[128].mxu1 }
 0x1de   :  { %12751 = vst [vmem:[#allocation88_spill] sm:$0xff] %v11370_v20  ;;  %v1320_v9 = vadd.f32 %v11164_v14, %v9114_v11  ;;  %v2938_v4 = vadd.f32 %v11164_v14, %v9262_v28  ;;  %v1311_v0 = vpop.f32.mrb[129].mxu0  ;;  %v2929_v8 = vpop.f32.mrb[129].mxu1 }
 0x1df   :  { %12752 = vst [vmem:[#allocation89_spill] sm:$0xff] %v11372_v23  ;;  %v1312_v32 = vadd.f32 %v11164_v14, %v1311_v0  ;;  %v2930_v16 = vadd.f32 %v11164_v14, %v2929_v8  ;;  %v9115_v49 = vpop.f32.mrb[130].mxu0  ;;  %v9263_v12 = vpop.f32.mrb[130].mxu1 }
 0x1e0   :  { %v1504_v40 = vmax.f32 %v1320_v9, 0.0  ;;  %v3122_v30 = vmax.f32 %v2938_v4, 0.0  ;;  %v1323_v46 = vadd.f32 %v11164_v14, %v9115_v49  ;;  %v2941_v52 = vadd.f32 %v11164_v14, %v9263_v12  ;;  %v1314_v31 = vpop.f32.mrb[131].mxu0  ;;  %v2932_v11 = vpop.f32.mrb[131].mxu1 }
 0x1e1   :  { %v1502_v28 = vmax.f32 %v1312_v32, 0.0  ;;  %v3120_v0 = vmax.f32 %v2930_v16, 0.0  ;;  %v1315_v8 = vadd.f32 %v11164_v14, %v1314_v31  ;;  %v2933_v23 = vadd.f32 %v11164_v14, %v2932_v11  ;;  %v9819_v31 = vld [vmem:[%s12662_s0 + $0x658] sm:$0xff]   ;;  %v9820_v11 = vld [vmem:[%s12662_s0 + $0x6a0] sm:$0xff]  }
 0x1e2   :  { %v11394_v20 = vadd.f32 %v3122_v30, %v1504_v40  ;;  %v1505_v38 = vmax.f32 %v1323_v46, 0.0  ;;  %v3123_v43 = vmax.f32 %v2941_v52, 0.0  ;;  %9373 = vmatmul.mubr.msk.bf16.gmra.mrb[236].mxu0 %vm541_vm2, %v9813_v34  ;;  %9521 = vmatmul.mubr.msk.bf16.gmra.mrb[236].mxu1 %vm541_vm2, %v9814_v35 }
 0x1e3   :  { %v11398_v9 = vadd.f32 %v3120_v0, %v1502_v28  ;;  %v1503_v4 = vmax.f32 %v1315_v8, 0.0  ;;  %v3121_v49 = vmax.f32 %v2933_v23, 0.0  ;;  %9376 = vmatprep.mubr.msk.bf16.mxu0 %vm541_vm2, %v9815_v37  ;;  %9524 = vmatprep.mubr.msk.bf16.mxu1 %vm541_vm2, %v9816_v27  ;;  %v9817_v23 = vld [vmem:[%s12662_s0 + $0x650] sm:$0xff]   ;;  %v9818_v37 = vld [vmem:[%s12662_s0 + $0x698] sm:$0xff]  }
 0x1e4   :  { %12753 = vst [vmem:[#allocation90_spill] sm:$0xff] %v11394_v20  ;;  %v11402_v32 = vadd.f32 %v3123_v43, %v1505_v38 }
 0x1e5   :  { %12754 = vst [vmem:[#allocation91_spill] sm:$0xff] %v11398_v9  ;;  %v11404_v16 = vadd.f32 %v3121_v49, %v1503_v4  ;;  %v9118_v12 = vpop.f32.mrb[132].mxu0  ;;  %v9266_v40 = vpop.f32.mrb[132].mxu1 }
 0x1e6   :  { %12755 = vst [vmem:[#allocation92_spill] sm:$0xff] %v11402_v32  ;;  %v1336_v30 = vadd.f32 %v11164_v14, %v9118_v12  ;;  %v2954_v34 = vadd.f32 %v11164_v14, %v9266_v40  ;;  %v1327_v46 = vpop.f32.mrb[133].mxu0  ;;  %v2945_v35 = vpop.f32.mrb[133].mxu1 }
 0x1e7   :  { %12756 = vst [vmem:[#allocation93_spill] sm:$0xff] %v11404_v16  ;;  %v1328_v43 = vadd.f32 %v11164_v14, %v1327_v46  ;;  %v2946_v38 = vadd.f32 %v11164_v14, %v2945_v35  ;;  %v9119_v27 = vpop.f32.mrb[134].mxu0  ;;  %v9267_v52 = vpop.f32.mrb[134].mxu1 }
 0x1e8   :  { %v1508_v28 = vmax.f32 %v1336_v30, 0.0  ;;  %v3126_v0 = vmax.f32 %v2954_v34, 0.0  ;;  %v1339_v8 = vadd.f32 %v11164_v14, %v9119_v27  ;;  %v2957_v4 = vadd.f32 %v11164_v14, %v9267_v52  ;;  %v1330_v49 = vpop.f32.mrb[135].mxu0  ;;  %v2948_v12 = vpop.f32.mrb[135].mxu1 }
 0x1e9   :  { %v1506_v40 = vmax.f32 %v1328_v43, 0.0  ;;  %v3124_v46 = vmax.f32 %v2946_v38, 0.0  ;;  %v1331_v35 = vadd.f32 %v11164_v14, %v1330_v49  ;;  %v2949_v16 = vadd.f32 %v11164_v14, %v2948_v12  ;;  %v9823_v49 = vld [vmem:[%s12662_s0 + $0x668] sm:$0xff]   ;;  %v9824_v12 = vld [vmem:[%s12662_s0 + $0x6b0] sm:$0xff]  }
 0x1ea   :  { %v11426_v32 = vadd.f32 %v3126_v0, %v1508_v28  ;;  %v1509_v9 = vmax.f32 %v1339_v8, 0.0  ;;  %v3127_v20 = vmax.f32 %v2957_v4, 0.0  ;;  %9377 = vmatmul.mubr.msk.bf16.gmra.mrb[240].mxu0 %vm541_vm2, %v9817_v23  ;;  %9525 = vmatmul.mubr.msk.bf16.gmra.mrb[240].mxu1 %vm541_vm2, %v9818_v37 }
 0x1eb   :  { %v11430_v30 = vadd.f32 %v3124_v46, %v1506_v40  ;;  %v1507_v34 = vmax.f32 %v1331_v35, 0.0  ;;  %v3125_v27 = vmax.f32 %v2949_v16, 0.0  ;;  %9380 = vmatprep.mubr.msk.bf16.mxu0 %vm541_vm2, %v9819_v31  ;;  %9528 = vmatprep.mubr.msk.bf16.mxu1 %vm541_vm2, %v9820_v11  ;;  %v9821_v16 = vld [vmem:[%s12662_s0 + $0x660] sm:$0xff]   ;;  %v9822_v31 = vld [vmem:[%s12662_s0 + $0x6a8] sm:$0xff]  }
 0x1ec   :  { %12757 = vst [vmem:[#allocation94_spill] sm:$0xff] %v11426_v32  ;;  %v11434_v43 = vadd.f32 %v3127_v20, %v1509_v9 }
 0x1ed   :  { %12758 = vst [vmem:[#allocation95_spill] sm:$0xff] %v11430_v30  ;;  %v11436_v38 = vadd.f32 %v3125_v27, %v1507_v34  ;;  %v9122_v52 = vpop.f32.mrb[136].mxu0  ;;  %v9270_v28 = vpop.f32.mrb[136].mxu1 }
 0x1ee   :  { %12759 = vst [vmem:[#allocation96_spill] sm:$0xff] %v11434_v43  ;;  %v1352_v0 = vadd.f32 %v11164_v14, %v9122_v52  ;;  %v2970_v23 = vadd.f32 %v11164_v14, %v9270_v28  ;;  %v1343_v8 = vpop.f32.mrb[137].mxu0  ;;  %v2961_v37 = vpop.f32.mrb[137].mxu1 }
 0x1ef   :  { %12760 = vst [vmem:[#allocation97_spill] sm:$0xff] %v11436_v38  ;;  %v1344_v20 = vadd.f32 %v11164_v14, %v1343_v8  ;;  %v2962_v9 = vadd.f32 %v11164_v14, %v2961_v37  ;;  %v9123_v11 = vpop.f32.mrb[138].mxu0  ;;  %v9271_v4 = vpop.f32.mrb[138].mxu1 }
 0x1f0   :  { %v1512_v40 = vmax.f32 %v1352_v0, 0.0  ;;  %v3130_v46 = vmax.f32 %v2970_v23, 0.0  ;;  %v1355_v35 = vadd.f32 %v11164_v14, %v9123_v11  ;;  %v2973_v34 = vadd.f32 %v11164_v14, %v9271_v4  ;;  %v1346_v27 = vpop.f32.mrb[139].mxu0  ;;  %v2964_v52 = vpop.f32.mrb[139].mxu1 }
 0x1f1   :  { %v1510_v28 = vmax.f32 %v1344_v20, 0.0  ;;  %v3128_v8 = vmax.f32 %v2962_v9, 0.0  ;;  %v1347_v37 = vadd.f32 %v11164_v14, %v1346_v27  ;;  %v2965_v38 = vadd.f32 %v11164_v14, %v2964_v52  ;;  %v9827_v27 = vld [vmem:[%s12662_s0 + $0x750] sm:$0xff]   ;;  %v9828_v52 = vld [vmem:[%s12662_s0 + $0x798] sm:$0xff]  }
 0x1f2   :  { %v11458_v43 = vadd.f32 %v3130_v46, %v1512_v40  ;;  %v1513_v30 = vmax.f32 %v1355_v35, 0.0  ;;  %v3131_v32 = vmax.f32 %v2973_v34, 0.0  ;;  %9381 = vmatmul.mubr.msk.bf16.gmra.mrb[244].mxu0 %vm541_vm2, %v9821_v16  ;;  %9529 = vmatmul.mubr.msk.bf16.gmra.mrb[244].mxu1 %vm541_vm2, %v9822_v31 }
 0x1f3   :  { %v11462_v0 = vadd.f32 %v3128_v8, %v1510_v28  ;;  %v1511_v23 = vmax.f32 %v1347_v37, 0.0  ;;  %v3129_v11 = vmax.f32 %v2965_v38, 0.0  ;;  %9384 = vmatprep.mubr.msk.bf16.mxu0 %vm541_vm2, %v9823_v49  ;;  %9532 = vmatprep.mubr.msk.bf16.mxu1 %vm541_vm2, %v9824_v12  ;;  %v9825_v38 = vld [vmem:[%s12662_s0 + $0x670] sm:$0xff]   ;;  %v9826_v49 = vld [vmem:[%s12662_s0 + $0x6b8] sm:$0xff]  }
 0x1f4   :  { %12761 = vst [vmem:[#allocation98_spill] sm:$0xff] %v11458_v43  ;;  %v11466_v20 = vadd.f32 %v3131_v32, %v1513_v30 }
 0x1f5   :  { %12762 = vst [vmem:[#allocation99_spill] sm:$0xff] %v11462_v0  ;;  %v11468_v9 = vadd.f32 %v3129_v11, %v1511_v23  ;;  %v9126_v4 = vpop.f32.mrb[140].mxu0  ;;  %v9274_v40 = vpop.f32.mrb[140].mxu1 }
 0x1f6   :  { %12763 = vst [vmem:[#allocation100_spill] sm:$0xff] %v11466_v20  ;;  %v1368_v46 = vadd.f32 %v11164_v14, %v9126_v4  ;;  %v2986_v16 = vadd.f32 %v11164_v14, %v9274_v40  ;;  %v1359_v35 = vpop.f32.mrb[141].mxu0  ;;  %v2977_v31 = vpop.f32.mrb[141].mxu1 }
 0x1f7   :  { %12764 = vst [vmem:[#allocation101_spill] sm:$0xff] %v11468_v9  ;;  %v1360_v32 = vadd.f32 %v11164_v14, %v1359_v35  ;;  %v2978_v30 = vadd.f32 %v11164_v14, %v2977_v31  ;;  %v9127_v12 = vpop.f32.mrb[142].mxu0  ;;  %v9275_v34 = vpop.f32.mrb[142].mxu1 }
 0x1f8   :  { %v1516_v28 = vmax.f32 %v1368_v46, 0.0  ;;  %v3134_v8 = vmax.f32 %v2986_v16, 0.0  ;;  %v1371_v37 = vadd.f32 %v11164_v14, %v9127_v12  ;;  %v2989_v23 = vadd.f32 %v11164_v14, %v9275_v34  ;;  %v1362_v11 = vpop.f32.mrb[143].mxu0  ;;  %v2980_v4 = vpop.f32.mrb[143].mxu1 }
 0x1f9   :  { %v1514_v40 = vmax.f32 %v1360_v32, 0.0  ;;  %v3132_v35 = vmax.f32 %v2978_v30, 0.0  ;;  %v1363_v31 = vadd.f32 %v11164_v14, %v1362_v11  ;;  %v2981_v9 = vadd.f32 %v11164_v14, %v2980_v4  ;;  %v9831_v11 = vld [vmem:[%s12662_s0 + $0x760] sm:$0xff]   ;;  %v9832_v4 = vld [vmem:[%s12662_s0 + $0x7a8] sm:$0xff]  }
 0x1fa   :  { %v11490_v20 = vadd.f32 %v3134_v8, %v1516_v28  ;;  %v1517_v0 = vmax.f32 %v1371_v37, 0.0  ;;  %v3135_v43 = vmax.f32 %v2989_v23, 0.0  ;;  %9385 = vmatmul.mubr.msk.bf16.gmra.mrb[248].mxu0 %vm541_vm2, %v9825_v38  ;;  %9533 = vmatmul.mubr.msk.bf16.gmra.mrb[248].mxu1 %vm541_vm2, %v9826_v49 }
 0x1fb   :  { %v11494_v46 = vadd.f32 %v3132_v35, %v1514_v40  ;;  %v1515_v16 = vmax.f32 %v1363_v31, 0.0  ;;  %v3133_v12 = vmax.f32 %v2981_v9, 0.0  ;;  %9388 = vmatprep.mubr.msk.bf16.mxu0 %vm541_vm2, %v9827_v27  ;;  %9536 = vmatprep.mubr.msk.bf16.mxu1 %vm541_vm2, %v9828_v52  ;;  %v9829_v9 = vld [vmem:[%s12662_s0 + $0x758] sm:$0xff]   ;;  %v9830_v27 = vld [vmem:[%s12662_s0 + $0x7a0] sm:$0xff]  }
 0x1fc   :  { %v11498_v32 = vadd.f32 %v3135_v43, %v1517_v0 }
 0x1fd   :  { %12765 = vst [vmem:[#allocation102_spill] sm:$0xff] %v11494_v46  ;;  %v11500_v30 = vadd.f32 %v3133_v12, %v1515_v16  ;;  %v9282_v34 = vpop.f32.mrb[144].mxu0  ;;  %v9430_v28 = vpop.f32.mrb[144].mxu1 }
 0x1fe   :  { %12766 = vst [vmem:[#allocation103_spill] sm:$0xff] %v11498_v32  ;;  %v4044_v8 = vadd.f32 %v11164_v14, %v9282_v34  ;;  %v5662_v38 = vadd.f32 %v11164_v14, %v9430_v28  ;;  %v4035_v37 = vpop.f32.mrb[145].mxu0  ;;  %v5653_v49 = vpop.f32.mrb[145].mxu1 }
 0x1ff   :  { %12767 = vst [vmem:[#allocation104_spill] sm:$0xff] %v11500_v30  ;;  %v4036_v43 = vadd.f32 %v11164_v14, %v4035_v37  ;;  %v5654_v0 = vadd.f32 %v11164_v14, %v5653_v49  ;;  %v9283_v52 = vpop.f32.mrb[146].mxu0  ;;  %v9431_v23 = vpop.f32.mrb[146].mxu1 }
 0x200   :  { %v4612_v40 = vmax.f32 %v4044_v8, 0.0  ;;  %v6230_v35 = vmax.f32 %v5662_v38, 0.0  ;;  %v4047_v31 = vadd.f32 %v11164_v14, %v9283_v52  ;;  %v5665_v16 = vadd.f32 %v11164_v14, %v9431_v23  ;;  %v4038_v12 = vpop.f32.mrb[147].mxu0  ;;  %v5656_v34 = vpop.f32.mrb[147].mxu1 }
 0x201   :  { %v4610_v28 = vmax.f32 %v4036_v43, 0.0  ;;  %v6228_v37 = vmax.f32 %v5654_v0, 0.0  ;;  %v4039_v49 = vadd.f32 %v11164_v14, %v4038_v12  ;;  %v5657_v30 = vadd.f32 %v11164_v14, %v5656_v34 }
 0x202   :  { %v4756_v32 = vadd.f32 %v4612_v40, %v10362_v15  ;;  %v4613_v46 = vmax.f32 %v4047_v31, 0.0  ;;  %9389 = vmatmul.mubr.msk.bf16.gmra.mrb[252].mxu0 %vm541_vm2, %v9829_v9  ;;  %9537 = vmatmul.mubr.msk.bf16.gmra.mrb[252].mxu1 %vm541_vm2, %v9830_v27  ;;  %v6231_v52 = vmax.f32 %v5665_v16, 0.0  ;;  %v9834_v16 = vld [vmem:[%s12662_s0 + $0x7b0] sm:$0xff]  }
 0x203   :  { %v4754_v8 = vadd.f32 %v4610_v28, %v10366_v18  ;;  %v4611_v38 = vmax.f32 %v4039_v49, 0.0  ;;  %9392 = vmatprep.mubr.msk.bf16.mxu0 %vm541_vm2, %v9831_v11  ;;  %9540 = vmatprep.mubr.msk.bf16.mxu1 %vm541_vm2, %v9832_v4  ;;  %v6229_v40 = vmax.f32 %v5657_v30, 0.0 }
 0x204   :  { %v6374_v43 = vadd.f32 %v6230_v35, %v4756_v32  ;;  %v4757_v0 = vadd.f32 %v4613_v46, %v10374_v21  ;;  %v9833_v21 = vld [vmem:[%s12662_s0 + $0x768] sm:$0xff]  }
 0x205   :  { %v6372_v23 = vadd.f32 %v6228_v37, %v4754_v8  ;;  %v4755_v15 = vadd.f32 %v4611_v38, %v10376_v24  ;;  %v9286_v31 = vpop.f32.mrb[148].mxu0  ;;  %v9434_v9 = vpop.f32.mrb[148].mxu1  ;;  %v9835_v37 = vld [vmem:[%s12662_s0 + $0x770] sm:$0xff]  }
 0x206   :  { %v6518_v12 = vmul.f32 0.25, %v6374_v43  ;;  %v6375_v27 = vadd.f32 %v6231_v52, %v4757_v0  ;;  %v4060_v18 = vadd.f32 %v11164_v14, %v9286_v31  ;;  %v5678_v34 = vadd.f32 %v11164_v14, %v9434_v9  ;;  %v4051_v11 = vpop.f32.mrb[149].mxu0  ;;  %v5669_v28 = vpop.f32.mrb[149].mxu1 }
 0x207   :  { %v6516_v46 = vmul.f32 0.25, %v6372_v23  ;;  %v6373_v32 = vadd.f32 %v6229_v40, %v4755_v15  ;;  %v4052_v4 = vadd.f32 %v11164_v14, %v4051_v11  ;;  %v5670_v24 = vadd.f32 %v11164_v14, %v5669_v28  ;;  %v9287_v30 = vpop.f32.mrb[150].mxu0  ;;  %v9435_v35 = vpop.f32.mrb[150].mxu1  ;;  %v9836_v23 = vld [vmem:[%s12662_s0 + $0x7b8] sm:$0xff]  }
 0x208   :  { %v8542_v49 = vpack.c.bf16 %v6518_v12, %v6518_v12  ;;  %v6519_v8 = vmul.f32 0.25, %v6375_v27  ;;  %v4616_v38 = vmax.f32 %v4060_v18, 0.0  ;;  %v6234_v43 = vmax.f32 %v5678_v34, 0.0  ;;  %v4054_v0 = vpop.f32.mrb[151].mxu0  ;;  %v5672_v52 = vpop.f32.mrb[151].mxu1 }
 0x209   :  { %v8540_v15 = vpack.c.bf16 %v6516_v46, %v6516_v46  ;;  %v6517_v40 = vmul.f32 0.25, %v6373_v32  ;;  %v4614_v31 = vmax.f32 %v4052_v4, 0.0  ;;  %v6232_v9 = vmax.f32 %v5670_v24, 0.0 }
 0x20a   :  { %7239 = vst.msk [vmem:[%s12664_s3 + $0x8] sm:$0xf] %vm7236_vm3, %v8542_v49  ;;  %v8543_v11 = vpack.c.bf16 %v6519_v8, %v6519_v8  ;;  %v4760_v12 = vadd.f32 %v4616_v38, %v10394_v47  ;;  %v4063_v27 = vadd.f32 %v11164_v14, %v9287_v30  ;;  %v5681_v18 = vadd.f32 %v11164_v14, %v9435_v35 }
 0x20b   :  { %9393 = vmatmul.mubr.msk.bf16.gmra.mrb[0].mxu0 %vm541_vm2, %v9833_v21  ;;  %7237 = vst.msk [vmem:[%s12664_s3] sm:$0xf] %vm7236_vm3, %v8540_v15  ;;  %v8541_v34 = vpack.c.bf16 %v6517_v40, %v6517_v40  ;;  %v4758_v28 = vadd.f32 %v4614_v31, %v10398_v50  ;;  %v4055_v46 = vadd.f32 %v11164_v14, %v4054_v0 }
 0x20c   :  { %v5673_v32 = vadd.f32 %v11164_v14, %v5672_v52  ;;  %9541 = vmatmul.mubr.msk.bf16.gmra.mrb[0].mxu1 %vm541_vm2, %v9834_v16  ;;  %7240 = vst.msk [vmem:[%s12664_s3 + $0xc] sm:$0xf] %vm7236_vm3, %v8543_v11  ;;  %v6378_v47 = vadd.f32 %v6234_v43, %v4760_v12  ;;  %v4617_v21 = vmax.f32 %v4063_v27, 0.0  ;;  %9396 = vmatprep.mubr.msk.bf16.mxu0 %vm541_vm2, %v9835_v37  ;;  %v6235_v4 = vmax.f32 %v5681_v18, 0.0  ;;  %v9837_v52 = vld [vmem:[%s12662_s0 + $0x778] sm:$0xff]   ;;  %v9839_v12 = vld [vmem:[%s12662_s0 + $0x780] sm:$0xff]  }
 0x20d   :  { %9544 = vmatprep.mubr.msk.bf16.mxu1 %vm541_vm2, %v9836_v23  ;;  %7238 = vst.msk [vmem:[%s12664_s3 + $0x4] sm:$0xf] %vm7236_vm3, %v8541_v34  ;;  %v6376_v50 = vadd.f32 %v6232_v9, %v4758_v28  ;;  %v4615_v24 = vmax.f32 %v4055_v46, 0.0  ;;  %v9290_v35 = vpop.f32.mrb[152].mxu0  ;;  %v9438_v16 = vpop.f32.mrb[152].mxu1 }
 0x20e   :  { %v6233_v30 = vmax.f32 %v5673_v32, 0.0  ;;  %v6522_v49 = vmul.f32 0.25, %v6378_v47  ;;  %v4761_v8 = vadd.f32 %v4617_v21, %v10406_v54  ;;  %v4076_v38 = vadd.f32 %v11164_v14, %v9290_v35  ;;  %v4067_v43 = vpop.f32.mrb[153].mxu0  ;;  %v5685_v0 = vpop.f32.mrb[153].mxu1  ;;  %v9838_v54 = vld [vmem:[%s12662_s0 + $0x7c0] sm:$0xff]   ;;  %v9840_v32 = vld [vmem:[%s12662_s0 + $0x7c8] sm:$0xff]  }
 0x20f   :  { %v5694_v37 = vadd.f32 %v11164_v14, %v9438_v16  ;;  %v6520_v23 = vmul.f32 0.25, %v6376_v50  ;;  %v4759_v15 = vadd.f32 %v4615_v24, %v10408_v57  ;;  %v4068_v40 = vadd.f32 %v11164_v14, %v4067_v43  ;;  %v9291_v9 = vpop.f32.mrb[154].mxu0  ;;  %v9439_v11 = vpop.f32.mrb[154].mxu1 }
 0x210   :  { %v5686_v31 = vadd.f32 %v11164_v14, %v5685_v0  ;;  %v8546_v27 = vpack.c.bf16 %v6522_v49, %v6522_v49  ;;  %v6379_v18 = vadd.f32 %v6235_v4, %v4761_v8  ;;  %v4620_v34 = vmax.f32 %v4076_v38, 0.0  ;;  %v4070_v46 = vpop.f32.mrb[155].mxu0  ;;  %v5688_v57 = vpop.f32.mrb[155].mxu1 }
 0x211   :  { %v6238_v28 = vmax.f32 %v5694_v37, 0.0  ;;  %v8544_v47 = vpack.c.bf16 %v6520_v23, %v6520_v23  ;;  %v6377_v21 = vadd.f32 %v6233_v30, %v4759_v15  ;;  %v4618_v50 = vmax.f32 %v4068_v40, 0.0 }
 0x212   :  { %v6236_v24 = vmax.f32 %v5686_v31, 0.0  ;;  %7243 = vst.msk [vmem:[%s12664_s3 + $0x18] sm:$0xf] %vm7236_vm3, %v8546_v27  ;;  %v6523_v35 = vmul.f32 0.25, %v6379_v18  ;;  %v4764_v4 = vadd.f32 %v4620_v34, %v10426_v17  ;;  %v4079_v16 = vadd.f32 %v11164_v14, %v9291_v9 }
 0x213   :  { %v5697_v49 = vadd.f32 %v11164_v14, %v9439_v11  ;;  %9397 = vmatmul.mubr.msk.bf16.gmra.mrb[4].mxu0 %vm541_vm2, %v9837_v52  ;;  %7241 = vst.msk [vmem:[%s12664_s3 + $0x10] sm:$0xf] %vm7236_vm3, %v8544_v47  ;;  %v6521_v30 = vmul.f32 0.25, %v6377_v21  ;;  %v4762_v8 = vadd.f32 %v4618_v50, %v10430_v22  ;;  %v4071_v38 = vadd.f32 %v11164_v14, %v4070_v46  ;;  %v9842_v50 = vld [vmem:[%s12662_s0 + $0x7d0] sm:$0xff]  }
 0x214   :  { %v5689_v37 = vadd.f32 %v11164_v14, %v5688_v57  ;;  %9545 = vmatmul.mubr.msk.bf16.gmra.mrb[4].mxu1 %vm541_vm2, %v9838_v54  ;;  %9400 = vmatprep.mubr.msk.bf16.mxu0 %vm541_vm2, %v9839_v12  ;;  %v8547_v17 = vpack.c.bf16 %v6523_v35, %v6523_v35  ;;  %v6382_v43 = vadd.f32 %v6238_v28, %v4764_v4  ;;  %v4621_v0 = vmax.f32 %v4079_v16, 0.0  ;;  %v11616_v54 = vld [vmem:[%s12663_s2] ss:$0 sm:$0xff]  ;;  %v9841_v28 = vld [vmem:[%s12662_s0 + $0x788] sm:$0xff]  }
 0x215   :  { %v6239_v52 = vmax.f32 %v5697_v49, 0.0  ;;  %9548 = vmatprep.mubr.msk.bf16.mxu1 %vm541_vm2, %v9840_v32  ;;  %v8545_v23 = vpack.c.bf16 %v6521_v30, %v6521_v30  ;;  %v6380_v15 = vadd.f32 %v6236_v24, %v4762_v8  ;;  %v4619_v40 = vmax.f32 %v4071_v38, 0.0  ;;  %v9294_v9 = vpop.f32.mrb[156].mxu0  ;;  %v9442_v22 = vpop.f32.mrb[156].mxu1  ;;  %v9843_v24 = vld [vmem:[%s12662_s0 + $0x790] sm:$0xff]   ;;  %v9844_v8 = vld [vmem:[%s12662_s0 + $0x7d8] sm:$0xff]  }
 0x216   :  { %v6237_v31 = vmax.f32 %v5689_v37, 0.0  ;;  %7244 = vst.msk [vmem:[%s12664_s3 + $0x1c] sm:$0xf] %vm7236_vm3, %v8547_v17  ;;  %v6526_v14 = vmul.f32 0.25, %v6382_v43  ;;  %v4765_v11 = vadd.f32 %v4621_v0, %v10438_v26  ;;  %v4092_v12 = vadd.f32 %v11616_v54, %v9294_v9  ;;  %v4083_v18 = vpop.f32.mrb[157].mxu0  ;;  %v5701_v34 = vpop.f32.mrb[157].mxu1 }
 0x217   :  { %v5710_v27 = vadd.f32 %v11616_v54, %v9442_v22  ;;  %7242 = vst.msk [vmem:[%s12664_s3 + $0x14] sm:$0xf] %vm7236_vm3, %v8545_v23  ;;  %v6524_v26 = vmul.f32 0.25, %v6380_v15  ;;  %v4763_v46 = vadd.f32 %v4619_v40, %v10440_v29  ;;  %v4084_v57 = vadd.f32 %v11616_v54, %v4083_v18  ;;  %v9295_v47 = vpop.f32.mrb[158].mxu0  ;;  %v9443_v21 = vpop.f32.mrb[158].mxu1 }
 0x218   :  { %v5702_v32 = vadd.f32 %v11616_v54, %v5701_v34  ;;  %v8550_v35 = vpack.c.bf16 %v6526_v14, %v6526_v14  ;;  %v6383_v4 = vadd.f32 %v6239_v52, %v4765_v11  ;;  %v4624_v16 = vmax.f32 %v4092_v12, 0.0  ;;  %v4086_v30 = vpop.f32.mrb[159].mxu0  ;;  %v5704_v29 = vpop.f32.mrb[159].mxu1 }
 0x219   :  { %v6242_v49 = vmax.f32 %v5710_v27, 0.0  ;;  %v8548_v38 = vpack.c.bf16 %v6524_v26, %v6524_v26  ;;  %v6381_v37 = vadd.f32 %v6237_v31, %v4763_v46  ;;  %v4622_v17 = vmax.f32 %v4084_v57, 0.0 }
 0x21a   :  { %v6240_v43 = vmax.f32 %v5702_v32, 0.0  ;;  %7247 = vst.msk [vmem:[%s12664_s3 + $0x28] sm:$0xf] %vm7236_vm3, %v8550_v35  ;;  %v6527_v0 = vmul.f32 0.25, %v6383_v4  ;;  %v4768_v52 = vadd.f32 %v4624_v16, %v10458_v56  ;;  %v4095_v23 = vadd.f32 %v11616_v54, %v9295_v47 }
 0x21b   :  { %v5713_v15 = vadd.f32 %v11616_v54, %v9443_v21  ;;  %9401 = vmatmul.mubr.msk.bf16.gmra.mrb[8].mxu0 %vm541_vm2, %v9841_v28  ;;  %7245 = vst.msk [vmem:[%s12664_s3 + $0x20] sm:$0xf] %vm7236_vm3, %v8548_v38  ;;  %v6525_v40 = vmul.f32 0.25, %v6381_v37  ;;  %v4766_v31 = vadd.f32 %v4622_v17, %v10462_v60  ;;  %v4087_v9 = vadd.f32 %v11616_v54, %v4086_v30 }
 0x21c   :  { %v5705_v22 = vadd.f32 %v11616_v54, %v5704_v29  ;;  %9549 = vmatmul.mubr.msk.bf16.gmra.mrb[8].mxu1 %vm541_vm2, %v9842_v50  ;;  %9404 = vmatprep.mubr.msk.bf16.mxu0 %vm541_vm2, %v9843_v24  ;;  %v8551_v56 = vpack.c.bf16 %v6527_v0, %v6527_v0  ;;  %v6386_v14 = vadd.f32 %v6242_v49, %v4768_v52  ;;  %v4625_v11 = vmax.f32 %v4095_v23, 0.0  ;;  %v9845_v24 = vld [vmem:[%s12662_s0 + $0x870] sm:$0xff]   ;;  %v9846_v29 = vld [vmem:[%s12662_s0 + $0x8b8] sm:$0xff]   ;;  %v9848_v52 = vld [vmem:[%s12662_s0 + $0x8c0] sm:$0xff]  }
 0x21d   :  { %v6243_v12 = vmax.f32 %v5713_v15, 0.0  ;;  %9552 = vmatprep.mubr.msk.bf16.mxu1 %vm541_vm2, %v9844_v8  ;;  %v8549_v27 = vpack.c.bf16 %v6525_v40, %v6525_v40  ;;  %v6384_v18 = vadd.f32 %v6240_v43, %v4766_v31  ;;  %v4623_v34 = vmax.f32 %v4087_v9, 0.0  ;;  %v9298_v26 = vpop.f32.mrb[160].mxu0  ;;  %v9446_v60 = vpop.f32.mrb[160].mxu1  ;;  %v9847_v8 = vld [vmem:[%s12662_s0 + $0x878] sm:$0xff]  }
 0x21e   :  { %v6241_v28 = vmax.f32 %v5705_v22, 0.0  ;;  %7248 = vst.msk [vmem:[%s12664_s3 + $0x2c] sm:$0xf] %vm7236_vm3, %v8551_v56  ;;  %v6530_v46 = vmul.f32 0.25, %v6386_v14  ;;  %v4769_v57 = vadd.f32 %v4625_v11, %v10470_v63  ;;  %v4108_v32 = vadd.f32 %v11616_v54, %v9298_v26  ;;  %v4099_v21 = vpop.f32.mrb[161].mxu0  ;;  %v5717_v50 = vpop.f32.mrb[161].mxu1 }
 0x21f   :  { %v5726_v47 = vadd.f32 %v11616_v54, %v9446_v60  ;;  %7246 = vst.msk [vmem:[%s12664_s3 + $0x24] sm:$0xf] %vm7236_vm3, %v8549_v27  ;;  %v6528_v35 = vmul.f32 0.25, %v6384_v18  ;;  %v4767_v4 = vadd.f32 %v4623_v34, %v10472_v2  ;;  %v4100_v63 = vadd.f32 %v11616_v54, %v4099_v21  ;;  %v9299_v49 = vpop.f32.mrb[162].mxu0  ;;  %v9447_v30 = vpop.f32.mrb[162].mxu1 }
 0x220   :  { %v5718_v16 = vadd.f32 %v11616_v54, %v5717_v50  ;;  %v8554_v38 = vpack.c.bf16 %v6530_v46, %v6530_v46  ;;  %v6387_v37 = vadd.f32 %v6243_v12, %v4769_v57  ;;  %v4628_v17 = vmax.f32 %v4108_v32, 0.0  ;;  %v4102_v0 = vpop.f32.mrb[163].mxu0  ;;  %v5720_v2 = vpop.f32.mrb[163].mxu1 }
 0x221   :  { %v6246_v43 = vmax.f32 %v5726_v47, 0.0  ;;  %v8552_v23 = vpack.c.bf16 %v6528_v35, %v6528_v35  ;;  %v6385_v15 = vadd.f32 %v6241_v28, %v4767_v4  ;;  %v4626_v40 = vmax.f32 %v4100_v63, 0.0 }
 0x222   :  { %v6244_v31 = vmax.f32 %v5718_v16, 0.0  ;;  %7251 = vst.msk [vmem:[%s12664_s3 + $0x38] sm:$0xf] %vm7236_vm3, %v8554_v38  ;;  %v6531_v9 = vmul.f32 0.25, %v6387_v37  ;;  %v4772_v22 = vadd.f32 %v4628_v17, %v10490_v33  ;;  %v4111_v56 = vadd.f32 %v11616_v54, %v9299_v49  ;;  %v9849_v16 = vld [vmem:[%s12662_s0 + $0x880] sm:$0xff]   ;;  %v9850_v37 = vld [vmem:[%s12662_s0 + $0x8c8] sm:$0xff]  }
 0x223   :  { %v5729_v14 = vadd.f32 %v11616_v54, %v9447_v30  ;;  %9405 = vmatmul.mubr.msk.bf16.gmra.mrb[12].mxu0 %vm541_vm2, %v9845_v24  ;;  %7249 = vst.msk [vmem:[%s12664_s3 + $0x30] sm:$0xf] %vm7236_vm3, %v8552_v23  ;;  %v6529_v11 = vmul.f32 0.25, %v6385_v15  ;;  %v4770_v12 = vadd.f32 %v4626_v40, %v10494_v36  ;;  %v4103_v27 = vadd.f32 %v11616_v54, %v4102_v0  ;;  %v9851_v17 = vld [vmem:[%s12662_s0 + $0x888] sm:$0xff]   ;;  %v9852_v15 = vld [vmem:[%s12662_s0 + $0x8d0] sm:$0xff]  }
 0x224   :  { %v5721_v18 = vadd.f32 %v11616_v54, %v5720_v2  ;;  %9553 = vmatmul.mubr.msk.bf16.gmra.mrb[12].mxu1 %vm541_vm2, %v9846_v29  ;;  %9408 = vmatprep.mubr.msk.bf16.mxu0 %vm541_vm2, %v9847_v8  ;;  %v8555_v33 = vpack.c.bf16 %v6531_v9, %v6531_v9  ;;  %v6390_v34 = vadd.f32 %v6246_v43, %v4772_v22  ;;  %v4629_v28 = vmax.f32 %v4111_v56, 0.0 }
 0x225   :  { %v6247_v26 = vmax.f32 %v5729_v14, 0.0  ;;  %9556 = vmatprep.mubr.msk.bf16.mxu1 %vm541_vm2, %v9848_v52  ;;  %v8553_v60 = vpack.c.bf16 %v6529_v11, %v6529_v11  ;;  %v6388_v46 = vadd.f32 %v6244_v31, %v4770_v12  ;;  %v4627_v57 = vmax.f32 %v4103_v27, 0.0  ;;  %v9302_v47 = vpop.f32.mrb[164].mxu0  ;;  %v9450_v36 = vpop.f32.mrb[164].mxu1 }
 0x226   :  { %v6245_v32 = vmax.f32 %v5721_v18, 0.0  ;;  %7252 = vst.msk [vmem:[%s12664_s3 + $0x3c] sm:$0xf] %vm7236_vm3, %v8555_v33  ;;  %v6534_v21 = vmul.f32 0.25, %v6390_v34  ;;  %v4773_v50 = vadd.f32 %v4629_v28, %v10502_v39  ;;  %v4124_v24 = vadd.f32 %v11616_v54, %v9302_v47  ;;  %v4115_v4 = vpop.f32.mrb[165].mxu0  ;;  %v5733_v63 = vpop.f32.mrb[165].mxu1 }
 0x227   :  { %v5742_v35 = vadd.f32 %v11616_v54, %v9450_v36  ;;  %7250 = vst.msk [vmem:[%s12664_s3 + $0x34] sm:$0xf] %vm7236_vm3, %v8553_v60  ;;  %v6532_v49 = vmul.f32 0.25, %v6388_v46  ;;  %v4771_v30 = vadd.f32 %v4627_v57, %v10504_v42  ;;  %v4116_v39 = vadd.f32 %v11616_v54, %v4115_v4  ;;  %v9303_v8 = vpop.f32.mrb[166].mxu0  ;;  %v9451_v38 = vpop.f32.mrb[166].mxu1 }
 0x228   :  { %v5734_v29 = vadd.f32 %v11616_v54, %v5733_v63  ;;  %v8558_v43 = vpack.c.bf16 %v6534_v21, %v6534_v21  ;;  %v6391_v0 = vadd.f32 %v6247_v26, %v4773_v50  ;;  %v4632_v2 = vmax.f32 %v4124_v24, 0.0  ;;  %v4118_v23 = vpop.f32.mrb[167].mxu0  ;;  %v5736_v42 = vpop.f32.mrb[167].mxu1 }
 0x229   :  { %v6250_v52 = vmax.f32 %v5742_v35, 0.0  ;;  %v8556_v40 = vpack.c.bf16 %v6532_v49, %v6532_v49  ;;  %v6389_v31 = vadd.f32 %v6245_v32, %v4771_v30  ;;  %v4630_v9 = vmax.f32 %v4116_v39, 0.0 }
 0x22a   :  { %v6248_v22 = vmax.f32 %v5734_v29, 0.0  ;;  %7255 = vst.msk [vmem:[%s12664_s3 + $0x48] sm:$0xf] %vm7236_vm3, %v8558_v43  ;;  %v6535_v56 = vmul.f32 0.25, %v6391_v0  ;;  %v4776_v14 = vadd.f32 %v4632_v2, %v10522_v10  ;;  %v4127_v11 = vadd.f32 %v11616_v54, %v9303_v8 }
 0x22b   :  { %v5745_v12 = vadd.f32 %v11616_v54, %v9451_v38  ;;  %9409 = vmatmul.mubr.msk.bf16.gmra.mrb[16].mxu0 %vm541_vm2, %v9849_v16  ;;  %7253 = vst.msk [vmem:[%s12664_s3 + $0x40] sm:$0xf] %vm7236_vm3, %v8556_v40  ;;  %v6533_v27 = vmul.f32 0.25, %v6389_v31  ;;  %v4774_v18 = vadd.f32 %v4630_v9, %v10526_v13  ;;  %v4119_v33 = vadd.f32 %v11616_v54, %v4118_v23  ;;  %v9853_v16 = vld [vmem:[%s12662_s0 + $0x890] sm:$0xff]   ;;  %v9854_v38 = vld [vmem:[%s12662_s0 + $0x8d8] sm:$0xff]   ;;  %v9856_v23 = vld [vmem:[%s12662_s0 + $0x8e0] sm:$0xff]  }
 0x22c   :  { %v5737_v34 = vadd.f32 %v11616_v54, %v5736_v42  ;;  %9557 = vmatmul.mubr.msk.bf16.gmra.mrb[16].mxu1 %vm541_vm2, %v9850_v37  ;;  %9412 = vmatprep.mubr.msk.bf16.mxu0 %vm541_vm2, %v9851_v17  ;;  %v8559_v10 = vpack.c.bf16 %v6535_v56, %v6535_v56  ;;  %v6394_v28 = vadd.f32 %v6250_v52, %v4776_v14  ;;  %v4633_v26 = vmax.f32 %v4127_v11, 0.0  ;;  %v9855_v37 = vld [vmem:[%s12662_s0 + $0x898] sm:$0xff]  }
 0x22d   :  { %v6251_v60 = vmax.f32 %v5745_v12, 0.0  ;;  %9560 = vmatprep.mubr.msk.bf16.mxu1 %vm541_vm2, %v9852_v15  ;;  %v8557_v46 = vpack.c.bf16 %v6533_v27, %v6533_v27  ;;  %v6392_v57 = vadd.f32 %v6248_v22, %v4774_v18  ;;  %v4631_v32 = vmax.f32 %v4119_v33, 0.0  ;;  %v9306_v36 = vpop.f32.mrb[168].mxu0  ;;  %v9454_v13 = vpop.f32.mrb[168].mxu1 }
 0x22e   :  { %v6249_v47 = vmax.f32 %v5737_v34, 0.0  ;;  %7256 = vst.msk [vmem:[%s12664_s3 + $0x4c] sm:$0xf] %vm7236_vm3, %v8559_v10  ;;  %v6538_v21 = vmul.f32 0.25, %v6394_v28  ;;  %v4777_v50 = vadd.f32 %v4633_v26, %v10534_v19  ;;  %v4140_v24 = vadd.f32 %v11616_v54, %v9306_v36  ;;  %v4131_v4 = vpop.f32.mrb[169].mxu0  ;;  %v5749_v63 = vpop.f32.mrb[169].mxu1 }
 0x22f   :  { %v5758_v35 = vadd.f32 %v11616_v54, %v9454_v13  ;;  %7254 = vst.msk [vmem:[%s12664_s3 + $0x44] sm:$0xf] %vm7236_vm3, %v8557_v46  ;;  %v6536_v49 = vmul.f32 0.25, %v6392_v57  ;;  %v4775_v30 = vadd.f32 %v4631_v32, %v10536_v25  ;;  %v4132_v19 = vadd.f32 %v11616_v54, %v4131_v4  ;;  %v9307_v29 = vpop.f32.mrb[170].mxu0  ;;  %v9455_v8 = vpop.f32.mrb[170].mxu1 }
 0x230   :  { %v5750_v39 = vadd.f32 %v11616_v54, %v5749_v63  ;;  %v8562_v17 = vpack.c.bf16 %v6538_v21, %v6538_v21  ;;  %v6395_v43 = vadd.f32 %v6251_v60, %v4777_v50  ;;  %v4636_v0 = vmax.f32 %v4140_v24, 0.0  ;;  %v4134_v52 = vpop.f32.mrb[171].mxu0  ;;  %v5752_v25 = vpop.f32.mrb[171].mxu1  ;;  %v9857_v24 = vld [vmem:[%s12662_s0 + $0x8a0] sm:$0xff]  }
 0x231   :  { %v6254_v2 = vmax.f32 %v5758_v35, 0.0  ;;  %v8560_v42 = vpack.c.bf16 %v6536_v49, %v6536_v49  ;;  %v6393_v15 = vadd.f32 %v6249_v47, %v4775_v30  ;;  %v4634_v40 = vmax.f32 %v4132_v19, 0.0  ;;  %v9858_v30 = vld [vmem:[%s12662_s0 + $0x8e8] sm:$0xff]  }
 0x232   :  { %v6252_v31 = vmax.f32 %v5750_v39, 0.0  ;;  %7259 = vst.msk [vmem:[%s12664_s3 + $0x58] sm:$0xf] %vm7236_vm3, %v8562_v17  ;;  %v6539_v9 = vmul.f32 0.25, %v6395_v43  ;;  %v4780_v22 = vadd.f32 %v4636_v0, %v10554_v61  ;;  %v4143_v56 = vadd.f32 %v11616_v54, %v9307_v29  ;;  %v9859_v19 = vld [vmem:[%s12662_s0 + $0x8a8] sm:$0xff]   ;;  %v9860_v17 = vld [vmem:[%s12662_s0 + $0x8f0] sm:$0xff]  }
 0x233   :  { %v5761_v14 = vadd.f32 %v11616_v54, %v9455_v8  ;;  %9413 = vmatmul.mubr.msk.bf16.gmra.mrb[20].mxu0 %vm541_vm2, %v9853_v16  ;;  %7257 = vst.msk [vmem:[%s12664_s3 + $0x50] sm:$0xf] %vm7236_vm3, %v8560_v42  ;;  %v6537_v11 = vmul.f32 0.25, %v6393_v15  ;;  %v4778_v12 = vadd.f32 %v4634_v40, %v10558_v1  ;;  %v4135_v27 = vadd.f32 %v11616_v54, %v4134_v52 }
 0x234   :  { %v5753_v18 = vadd.f32 %v11616_v54, %v5752_v25  ;;  %9561 = vmatmul.mubr.msk.bf16.gmra.mrb[20].mxu1 %vm541_vm2, %v9854_v38  ;;  %9416 = vmatprep.mubr.msk.bf16.mxu0 %vm541_vm2, %v9855_v37  ;;  %v8563_v61 = vpack.c.bf16 %v6539_v9, %v6539_v9  ;;  %v6398_v33 = vadd.f32 %v6254_v2, %v4780_v22  ;;  %v4637_v34 = vmax.f32 %v4143_v56, 0.0 }
 0x235   :  { %v6255_v10 = vmax.f32 %v5761_v14, 0.0  ;;  %9564 = vmatprep.mubr.msk.bf16.mxu1 %vm541_vm2, %v9856_v23  ;;  %v8561_v28 = vpack.c.bf16 %v6537_v11, %v6537_v11  ;;  %v6396_v26 = vadd.f32 %v6252_v31, %v4778_v12  ;;  %v4635_v60 = vmax.f32 %v4135_v27, 0.0  ;;  %v9310_v57 = vpop.f32.mrb[172].mxu0  ;;  %v9458_v1 = vpop.f32.mrb[172].mxu1 }
 0x236   :  { %v6253_v46 = vmax.f32 %v5753_v18, 0.0  ;;  %7260 = vst.msk [vmem:[%s12664_s3 + $0x5c] sm:$0xf] %vm7236_vm3, %v8563_v61  ;;  %v6542_v32 = vmul.f32 0.25, %v6398_v33  ;;  %v4781_v47 = vadd.f32 %v4637_v34, %v10560_v3  ;;  %v4156_v36 = vadd.f32 %v11616_v54, %v9310_v57  ;;  %v4147_v21 = vpop.f32.mrb[173].mxu0  ;;  %v5765_v50 = vpop.f32.mrb[173].mxu1 }
 0x237   :  { %v5774_v13 = vadd.f32 %v11616_v54, %v9458_v1  ;;  %7258 = vst.msk [vmem:[%s12664_s3 + $0x54] sm:$0xf] %vm7236_vm3, %v8561_v28  ;;  %v6540_v35 = vmul.f32 0.25, %v6396_v26  ;;  %v4779_v4 = vadd.f32 %v4635_v60, %v10562_v6  ;;  %v4148_v3 = vadd.f32 %v11616_v54, %v4147_v21  ;;  %v9311_v16 = vpop.f32.mrb[174].mxu0  ;;  %v9459_v49 = vpop.f32.mrb[174].mxu1  ;;  %v9861_v57 = vld [vmem:[%s12662_s0 + $0x8b0] sm:$0xff]  }
 0x238   :  { %v5766_v63 = vadd.f32 %v11616_v54, %v5765_v50  ;;  %v8566_v39 = vpack.c.bf16 %v6542_v32, %v6542_v32  ;;  %v6399_v29 = vadd.f32 %v6255_v10, %v4781_v47  ;;  %v4640_v8 = vmax.f32 %v4156_v36, 0.0  ;;  %v4150_v37 = vpop.f32.mrb[175].mxu0  ;;  %v5768_v6 = vpop.f32.mrb[175].mxu1  ;;  %v9862_v21 = vld [vmem:[%s12662_s0 + $0x8f8] sm:$0xff]  }
 0x239   :  { %v6258_v38 = vmax.f32 %v5774_v13, 0.0  ;;  %v8564_v43 = vpack.c.bf16 %v6540_v35, %v6540_v35  ;;  %v6397_v0 = vadd.f32 %v6253_v46, %v4779_v4  ;;  %v4638_v2 = vmax.f32 %v4148_v3, 0.0 }
 0x23a   :  { %v6256_v52 = vmax.f32 %v5766_v63, 0.0  ;;  %7263 = vst.msk [vmem:[%s12664_s3 + $0x68] sm:$0xf] %vm7236_vm3, %v8566_v39  ;;  %v6543_v25 = vmul.f32 0.25, %v6399_v29  ;;  %v4784_v23 = vadd.f32 %v4640_v8, %v10586_v48  ;;  %v4159_v42 = vadd.f32 %v11616_v54, %v9311_v16 }
 0x23b   :  { %v5777_v15 = vadd.f32 %v11616_v54, %v9459_v49  ;;  %9417 = vmatmul.mubr.msk.bf16.gmra.mrb[24].mxu0 %vm541_vm2, %v9857_v24  ;;  %7261 = vst.msk [vmem:[%s12664_s3 + $0x60] sm:$0xf] %vm7236_vm3, %v8564_v43  ;;  %v6541_v40 = vmul.f32 0.25, %v6397_v0  ;;  %v4782_v31 = vadd.f32 %v4638_v2, %v10590_v53  ;;  %v4151_v9 = vadd.f32 %v11616_v54, %v4150_v37 }
 0x23c   :  { %v5769_v22 = vadd.f32 %v11616_v54, %v5768_v6  ;;  %9565 = vmatmul.mubr.msk.bf16.gmra.mrb[24].mxu1 %vm541_vm2, %v9858_v30  ;;  %9420 = vmatprep.mubr.msk.bf16.mxu0 %vm541_vm2, %v9859_v19  ;;  %v8567_v48 = vpack.c.bf16 %v6543_v25, %v6543_v25  ;;  %v6402_v56 = vadd.f32 %v6258_v38, %v4784_v23  ;;  %v4641_v14 = vmax.f32 %v4159_v42, 0.0 }
 0x23d   :  { %v6259_v11 = vmax.f32 %v5777_v15, 0.0  ;;  %9568 = vmatprep.mubr.msk.bf16.mxu1 %vm541_vm2, %v9860_v17  ;;  %v8565_v12 = vpack.c.bf16 %v6541_v40, %v6541_v40  ;;  %v6400_v27 = vadd.f32 %v6256_v52, %v4782_v31  ;;  %v4639_v18 = vmax.f32 %v4151_v9, 0.0  ;;  %v9314_v33 = vpop.f32.mrb[176].mxu0  ;;  %v9462_v53 = vpop.f32.mrb[176].mxu1 }
 0x23e   :  { %v6257_v61 = vmax.f32 %v5769_v22, 0.0  ;;  %7264 = vst.msk [vmem:[%s12664_s3 + $0x6c] sm:$0xf] %vm7236_vm3, %v8567_v48  ;;  %v6546_v34 = vmul.f32 0.25, %v6402_v56  ;;  %v4785_v10 = vadd.f32 %v4641_v14, %v10592_v55  ;;  %v4172_v28 = vadd.f32 %v11616_v54, %v9314_v33  ;;  %v4163_v60 = vpop.f32.mrb[177].mxu0  ;;  %v5781_v46 = vpop.f32.mrb[177].mxu1 }
 0x23f   :  { %v5790_v26 = vadd.f32 %v11616_v54, %v9462_v53  ;;  %7262 = vst.msk [vmem:[%s12664_s3 + $0x64] sm:$0xf] %vm7236_vm3, %v8565_v12  ;;  %v6544_v1 = vmul.f32 0.25, %v6400_v27  ;;  %v4783_v32 = vadd.f32 %v4639_v18, %v10594_v62  ;;  %v4164_v55 = vadd.f32 %v11616_v54, %v4163_v60  ;;  %v9315_v36 = vpop.f32.mrb[178].mxu0  ;;  %v9463_v13 = vpop.f32.mrb[178].mxu1 }
 0x240   :  { %v5782_v47 = vadd.f32 %v11616_v54, %v5781_v46  ;;  %v8570_v50 = vpack.c.bf16 %v6546_v34, %v6546_v34  ;;  %v6403_v24 = vadd.f32 %v6259_v11, %v4785_v10  ;;  %v4644_v35 = vmax.f32 %v4172_v28, 0.0  ;;  %v4166_v3 = vpop.f32.mrb[179].mxu0  ;;  %v5784_v63 = vpop.f32.mrb[179].mxu1 }
 0x241   :  { %v6262_v4 = vmax.f32 %v5790_v26, 0.0  ;;  %v8568_v16 = vpack.c.bf16 %v6544_v1, %v6544_v1  ;;  %v6401_v49 = vadd.f32 %v6257_v61, %v4783_v32  ;;  %v4642_v30 = vmax.f32 %v4164_v55, 0.0 }
 0x242   :  { %v6260_v62 = vmax.f32 %v5782_v47, 0.0  ;;  %7267 = vst.msk [vmem:[%s12664_s3 + $0x78] sm:$0xf] %vm7236_vm3, %v8570_v50  ;;  %v6547_v19 = vmul.f32 0.25, %v6403_v24  ;;  %v4788_v39 = vadd.f32 %v4644_v35, %v10616_v41  ;;  %v4175_v29 = vadd.f32 %v11616_v54, %v9315_v36 }
 0x243   :  { %v5793_v8 = vadd.f32 %v11616_v54, %v9463_v13  ;;  %9421 = vmatmul.mubr.msk.bf16.gmra.mrb[28].mxu0 %vm541_vm2, %v9861_v57  ;;  %7265 = vst.msk [vmem:[%s12664_s3 + $0x70] sm:$0xf] %vm7236_vm3, %v8568_v16  ;;  %v6545_v38 = vmul.f32 0.25, %v6401_v49  ;;  %v4786_v37 = vadd.f32 %v4642_v30, %v10620_v45  ;;  %v4167_v6 = vadd.f32 %v11616_v54, %v4166_v3 }
 0x244   :  { %v5785_v17 = vadd.f32 %v11616_v54, %v5784_v63  ;;  %9569 = vmatmul.mubr.msk.bf16.gmra.mrb[28].mxu1 %vm541_vm2, %v9862_v21  ;;  %v8571_v41 = vpack.c.bf16 %v6547_v19, %v6547_v19  ;;  %v6406_v43 = vadd.f32 %v6262_v4, %v4788_v39  ;;  %v4645_v0 = vmax.f32 %v4175_v29, 0.0 }
 0x245   :  { %v6263_v2 = vmax.f32 %v5793_v8, 0.0  ;;  %v8569_v52 = vpack.c.bf16 %v6545_v38, %v6545_v38  ;;  %v6404_v25 = vadd.f32 %v6260_v62, %v4786_v37  ;;  %v4643_v23 = vmax.f32 %v4167_v6, 0.0  ;;  %v9318_v15 = vpop.f32.mrb[180].mxu0  ;;  %v9466_v40 = vpop.f32.mrb[180].mxu1 }
 0x246   :  { %v6261_v42 = vmax.f32 %v5785_v17, 0.0  ;;  %7268 = vst.msk [vmem:[%s12664_s3 + $0x7c] sm:$0xf] %vm7236_vm3, %v8571_v41  ;;  %v6550_v45 = vmul.f32 0.25, %v6406_v43  ;;  %v4789_v31 = vadd.f32 %v4645_v0, %v10624_v51  ;;  %v4188_v9 = vadd.f32 %v11616_v54, %v9318_v15  ;;  %v4179_v48 = vpop.f32.mrb[181].mxu0  ;;  %v5797_v56 = vpop.f32.mrb[181].mxu1 }
 0x247   :  { %v5806_v22 = vadd.f32 %v11616_v54, %v9466_v40  ;;  %7266 = vst.msk [vmem:[%s12664_s3 + $0x74] sm:$0xf] %vm7236_vm3, %v8569_v52  ;;  %v6548_v14 = vmul.f32 0.25, %v6404_v25  ;;  %v4787_v11 = vadd.f32 %v4643_v23, %v10626_v58  ;;  %v4180_v12 = vadd.f32 %v11616_v54, %v4179_v48  ;;  %v9319_v18 = vpop.f32.mrb[182].mxu0  ;;  %v9467_v51 = vpop.f32.mrb[182].mxu1 }
 0x248   :  { %v5798_v27 = vadd.f32 %v11616_v54, %v5797_v56  ;;  %v8574_v61 = vpack.c.bf16 %v6550_v45, %v6550_v45  ;;  %v6407_v33 = vadd.f32 %v6263_v2, %v4789_v31  ;;  %v4648_v53 = vmax.f32 %v4188_v9, 0.0  ;;  %v4182_v10 = vpop.f32.mrb[183].mxu0  ;;  %v5800_v28 = vpop.f32.mrb[183].mxu1  ;;  %v12768_v31 = vld [vmem:[#allocation2_spill] sm:$0xff] }
 0x249   :  { %v6266_v34 = vmax.f32 %v5806_v22, 0.0  ;;  %v8572_v26 = vpack.c.bf16 %v6548_v14, %v6548_v14  ;;  %v6405_v60 = vadd.f32 %v6261_v42, %v4787_v11  ;;  %v4646_v46 = vmax.f32 %v4180_v12, 0.0  ;;  %v12769_v14 = vld [vmem:[#allocation3_spill] sm:$0xff] }
 0x24a   :  { %v6264_v57 = vmax.f32 %v5798_v27, 0.0  ;;  %7271 = vst.msk [vmem:[%s12664_s3 + $0x88] sm:$0xf] %vm7236_vm3, %v8574_v61  ;;  %v6551_v58 = vmul.f32 0.25, %v6407_v33  ;;  %v4792_v1 = vadd.f32 %v4648_v53, %v10648_v44  ;;  %v4191_v32 = vadd.f32 %v11616_v54, %v9319_v18 }
 0x24b   :  { %v5809_v55 = vadd.f32 %v11616_v54, %v9467_v51  ;;  %7269 = vst.msk [vmem:[%s12664_s3 + $0x80] sm:$0xf] %vm7236_vm3, %v8572_v26  ;;  %v6549_v47 = vmul.f32 0.25, %v6405_v60  ;;  %v4790_v36 = vadd.f32 %v4646_v46, %v10652_v59  ;;  %v4183_v13 = vadd.f32 %v11616_v54, %v4182_v10 }
 0x24c   :  { %v5801_v21 = vadd.f32 %v11616_v54, %v5800_v28  ;;  %v8575_v50 = vpack.c.bf16 %v6551_v58, %v6551_v58  ;;  %v6410_v24 = vadd.f32 %v6266_v34, %v4792_v1  ;;  %v4649_v35 = vmax.f32 %v4191_v32, 0.0 }
 0x24d   :  { %v6267_v44 = vmax.f32 %v5809_v55, 0.0  ;;  %v8573_v4 = vpack.c.bf16 %v6549_v47, %v6549_v47  ;;  %v6408_v3 = vadd.f32 %v6264_v57, %v4790_v36  ;;  %v4647_v63 = vmax.f32 %v4183_v13, 0.0  ;;  %v9322_v49 = vpop.f32.mrb[184].mxu0  ;;  %v9470_v30 = vpop.f32.mrb[184].mxu1  ;;  %v12770_v57 = vld [vmem:[#allocation4_spill] sm:$0xff]  ;;  %v12771_v13 = vld [vmem:[#allocation5_spill] sm:$0xff] }
 0x24e   :  { %v6265_v16 = vmax.f32 %v5801_v21, 0.0  ;;  %7272 = vst.msk [vmem:[%s12664_s3 + $0x8c] sm:$0xf] %vm7236_vm3, %v8575_v50  ;;  %v6554_v59 = vmul.f32 0.25, %v6410_v24  ;;  %v4793_v62 = vadd.f32 %v4649_v35, %v10656_v5  ;;  %v4204_v19 = vadd.f32 %v11616_v54, %v9322_v49  ;;  %v4195_v29 = vpop.f32.mrb[185].mxu0  ;;  %v5813_v8 = vpop.f32.mrb[185].mxu1 }
 0x24f   :  { %v5822_v39 = vadd.f32 %v11616_v54, %v9470_v30  ;;  %7270 = vst.msk [vmem:[%s12664_s3 + $0x84] sm:$0xf] %vm7236_vm3, %v8573_v4  ;;  %v6552_v38 = vmul.f32 0.25, %v6408_v3  ;;  %v4791_v37 = vadd.f32 %v4647_v63, %v10658_v7  ;;  %v4196_v6 = vadd.f32 %v11616_v54, %v4195_v29  ;;  %v9323_v41 = vpop.f32.mrb[186].mxu0  ;;  %v9471_v5 = vpop.f32.mrb[186].mxu1 }
 0x250   :  { %v5814_v17 = vadd.f32 %v11616_v54, %v5813_v8  ;;  %v8578_v43 = vpack.c.bf16 %v6554_v59, %v6554_v59  ;;  %v6411_v0 = vadd.f32 %v6267_v44, %v4793_v62  ;;  %v4652_v2 = vmax.f32 %v4204_v19, 0.0  ;;  %v4198_v25 = vpop.f32.mrb[187].mxu0  ;;  %v5816_v23 = vpop.f32.mrb[187].mxu1  ;;  %v12772_v8 = vld [vmem:[#allocation6_spill] sm:$0xff] }
 0x251   :  { %v6270_v52 = vmax.f32 %v5822_v39, 0.0  ;;  %v8576_v42 = vpack.c.bf16 %v6552_v38, %v6552_v38  ;;  %v6409_v15 = vadd.f32 %v6265_v16, %v4791_v37  ;;  %v4650_v40 = vmax.f32 %v4196_v6, 0.0 }
 0x252   :  { %v6268_v45 = vmax.f32 %v5814_v17, 0.0  ;;  %7275 = vst.msk [vmem:[%s12664_s3 + $0x98] sm:$0xf] %vm7236_vm3, %v8578_v43  ;;  %v6555_v7 = vmul.f32 0.25, %v6411_v0  ;;  %v4796_v9 = vadd.f32 %v4652_v2, %v12768_v31  ;;  %v4207_v22 = vadd.f32 %v11616_v54, %v9323_v41  ;;  %v12773_v41 = vld [vmem:[#allocation7_spill] sm:$0xff] }
 0x253   :  { %v5825_v48 = vadd.f32 %v11616_v54, %v9471_v5  ;;  %7273 = vst.msk [vmem:[%s12664_s3 + $0x90] sm:$0xf] %vm7236_vm3, %v8576_v42  ;;  %v6553_v56 = vmul.f32 0.25, %v6409_v15  ;;  %v4794_v11 = vadd.f32 %v4650_v40, %v12769_v14  ;;  %v4199_v12 = vadd.f32 %v11616_v54, %v4198_v25 }
 0x254   :  { %v5817_v27 = vadd.f32 %v11616_v54, %v5816_v23  ;;  %v8579_v18 = vpack.c.bf16 %v6555_v7, %v6555_v7  ;;  %v6414_v51 = vadd.f32 %v6270_v52, %v4796_v9  ;;  %v4653_v61 = vmax.f32 %v4207_v22, 0.0  ;;  %v12774_v22 = vld [vmem:[#allocation8_spill] sm:$0xff] }
 0x255   :  { %v6271_v33 = vmax.f32 %v5825_v48, 0.0  ;;  %v8577_v53 = vpack.c.bf16 %v6553_v56, %v6553_v56  ;;  %v6412_v34 = vadd.f32 %v6268_v45, %v4794_v11  ;;  %v4651_v10 = vmax.f32 %v4199_v12, 0.0  ;;  %v9326_v26 = vpop.f32.mrb[188].mxu0  ;;  %v9474_v60 = vpop.f32.mrb[188].mxu1 }
 0x256   :  { %v6269_v28 = vmax.f32 %v5817_v27, 0.0  ;;  %7276 = vst.msk [vmem:[%s12664_s3 + $0x9c] sm:$0xf] %vm7236_vm3, %v8579_v18  ;;  %v6558_v46 = vmul.f32 0.25, %v6414_v51  ;;  %v4797_v58 = vadd.f32 %v4653_v61, %v12770_v57  ;;  %v4220_v1 = vadd.f32 %v11616_v54, %v9326_v26  ;;  %v4211_v55 = vpop.f32.mrb[189].mxu0  ;;  %v5829_v47 = vpop.f32.mrb[189].mxu1 }
 0x257   :  { %v5838_v32 = vadd.f32 %v11616_v54, %v9474_v60  ;;  %7274 = vst.msk [vmem:[%s12664_s3 + $0x94] sm:$0xf] %vm7236_vm3, %v8577_v53  ;;  %v6556_v36 = vmul.f32 0.25, %v6412_v34  ;;  %v4795_v21 = vadd.f32 %v4651_v10, %v12771_v13  ;;  %v4212_v50 = vadd.f32 %v11616_v54, %v4211_v55  ;;  %v9327_v35 = vpop.f32.mrb[190].mxu0  ;;  %v9475_v44 = vpop.f32.mrb[190].mxu1  ;;  %v12775_v18 = vld [vmem:[#allocation9_spill] sm:$0xff] }
 0x258   :  { %v5830_v24 = vadd.f32 %v11616_v54, %v5829_v47  ;;  %v8582_v4 = vpack.c.bf16 %v6558_v46, %v6558_v46  ;;  %v6415_v3 = vadd.f32 %v6271_v33, %v4797_v58  ;;  %v4656_v63 = vmax.f32 %v4220_v1, 0.0  ;;  %v4214_v49 = vpop.f32.mrb[191].mxu0  ;;  %v5832_v30 = vpop.f32.mrb[191].mxu1 }
 0x259   :  { %v6274_v16 = vmax.f32 %v5838_v32, 0.0  ;;  %v8580_v59 = vpack.c.bf16 %v6556_v36, %v6556_v36  ;;  %v6413_v62 = vadd.f32 %v6269_v28, %v4795_v21  ;;  %v4654_v19 = vmax.f32 %v4212_v50, 0.0  ;;  %v12776_v36 = vld [vmem:[#allocation10_spill] sm:$0xff] }
 0x25a   :  { %v6272_v39 = vmax.f32 %v5830_v24, 0.0  ;;  %7279 = vst.msk [vmem:[%s12664_s3 + $0xa8] sm:$0xf] %vm7236_vm3, %v8582_v4  ;;  %v6559_v29 = vmul.f32 0.25, %v6415_v3  ;;  %v4800_v38 = vadd.f32 %v4656_v63, %v12772_v8  ;;  %v4223_v37 = vadd.f32 %v11616_v54, %v9327_v35  ;;  %v12777_v35 = vld [vmem:[#allocation11_spill] sm:$0xff] }
 0x25b   :  { %v5841_v6 = vadd.f32 %v11616_v54, %v9475_v44  ;;  %7277 = vst.msk [vmem:[%s12664_s3 + $0xa0] sm:$0xf] %vm7236_vm3, %v8580_v59  ;;  %v6557_v17 = vmul.f32 0.25, %v6413_v62  ;;  %v4798_v5 = vadd.f32 %v4654_v19, %v12773_v41  ;;  %v4215_v43 = vadd.f32 %v11616_v54, %v4214_v49 }
 0x25c   :  { %v5833_v0 = vadd.f32 %v11616_v54, %v5832_v30  ;;  %v8583_v2 = vpack.c.bf16 %v6559_v29, %v6559_v29  ;;  %v6418_v52 = vadd.f32 %v6274_v16, %v4800_v38  ;;  %v4657_v25 = vmax.f32 %v4223_v37, 0.0  ;;  %v12778_v37 = vld [vmem:[#allocation12_spill] sm:$0xff] }
 0x25d   :  { %v6275_v23 = vmax.f32 %v5841_v6, 0.0  ;;  %v8581_v42 = vpack.c.bf16 %v6557_v17, %v6557_v17  ;;  %v6416_v15 = vadd.f32 %v6272_v39, %v4798_v5  ;;  %v4655_v40 = vmax.f32 %v4215_v43, 0.0  ;;  %v9330_v7 = vpop.f32.mrb[192].mxu0  ;;  %v9478_v31 = vpop.f32.mrb[192].mxu1 }
 0x25e   :  { %v6273_v45 = vmax.f32 %v5833_v0, 0.0  ;;  %7280 = vst.msk [vmem:[%s12664_s3 + $0xac] sm:$0xf] %vm7236_vm3, %v8583_v2  ;;  %v6562_v9 = vmul.f32 0.25, %v6418_v52  ;;  %v4801_v48 = vadd.f32 %v4657_v25, %v12774_v22  ;;  %v4236_v56 = vadd.f32 %v11616_v54, %v9330_v7  ;;  %v4227_v11 = vpop.f32.mrb[193].mxu0  ;;  %v5845_v12 = vpop.f32.mrb[193].mxu1 }
 0x25f   :  { %v5854_v14 = vadd.f32 %v11616_v54, %v9478_v31  ;;  %7278 = vst.msk [vmem:[%s12664_s3 + $0xa4] sm:$0xf] %vm7236_vm3, %v8581_v42  ;;  %v6560_v27 = vmul.f32 0.25, %v6416_v15  ;;  %v4799_v51 = vadd.f32 %v4655_v40, %v12775_v18  ;;  %v4228_v61 = vadd.f32 %v11616_v54, %v4227_v11  ;;  %v9331_v53 = vpop.f32.mrb[194].mxu0  ;;  %v9479_v34 = vpop.f32.mrb[194].mxu1  ;;  %v12779_v2 = vld [vmem:[#allocation13_spill] sm:$0xff] }
 0x260   :  { %v5846_v33 = vadd.f32 %v11616_v54, %v5845_v12  ;;  %v8586_v10 = vpack.c.bf16 %v6562_v9, %v6562_v9  ;;  %v6419_v28 = vadd.f32 %v6275_v23, %v4801_v48  ;;  %v4660_v26 = vmax.f32 %v4236_v56, 0.0  ;;  %v4230_v46 = vpop.f32.mrb[195].mxu0  ;;  %v5848_v57 = vpop.f32.mrb[195].mxu1 }
 0x261   :  { %v6278_v60 = vmax.f32 %v5854_v14, 0.0  ;;  %v8584_v58 = vpack.c.bf16 %v6560_v27, %v6560_v27  ;;  %v6417_v1 = vadd.f32 %v6273_v45, %v4799_v51  ;;  %v4658_v32 = vmax.f32 %v4228_v61, 0.0  ;;  %v12780_v27 = vld [vmem:[#allocation14_spill] sm:$0xff] }
 0x262   :  { %v6276_v55 = vmax.f32 %v5846_v33, 0.0  ;;  %7283 = vst.msk [vmem:[%s12664_s3 + $0xb8] sm:$0xf] %vm7236_vm3, %v8586_v10  ;;  %v6563_v47 = vmul.f32 0.25, %v6419_v28  ;;  %v4804_v13 = vadd.f32 %v4660_v26, %v12776_v36  ;;  %v4239_v21 = vadd.f32 %v11616_v54, %v9331_v53  ;;  %v12781_v53 = vld [vmem:[#allocation15_spill] sm:$0xff] }
 0x263   :  { %v5857_v50 = vadd.f32 %v11616_v54, %v9479_v34  ;;  %7281 = vst.msk [vmem:[%s12664_s3 + $0xb0] sm:$0xf] %vm7236_vm3, %v8584_v58  ;;  %v6561_v24 = vmul.f32 0.25, %v6417_v1  ;;  %v4802_v44 = vadd.f32 %v4658_v32, %v12777_v35  ;;  %v4231_v4 = vadd.f32 %v11616_v54, %v4230_v46  ;;  %v12010_v10 = vld [vmem:[%s12663_s2] ss:$0 sm:$0xff] }
 0x264   :  { %v5849_v3 = vadd.f32 %v11616_v54, %v5848_v57  ;;  %v8587_v63 = vpack.c.bf16 %v6563_v47, %v6563_v47  ;;  %v6422_v16 = vadd.f32 %v6278_v60, %v4804_v13  ;;  %v4661_v49 = vmax.f32 %v4239_v21, 0.0  ;;  %v12782_v21 = vld [vmem:[#allocation16_spill] sm:$0xff] }
 0x265   :  { %v6279_v30 = vmax.f32 %v5857_v50, 0.0  ;;  %v8585_v59 = vpack.c.bf16 %v6561_v24, %v6561_v24  ;;  %v6420_v62 = vadd.f32 %v6276_v55, %v4802_v44  ;;  %v4659_v19 = vmax.f32 %v4231_v4, 0.0  ;;  %v9334_v29 = vpop.f32.mrb[196].mxu0  ;;  %v9482_v8 = vpop.f32.mrb[196].mxu1 }
 0x266   :  { %v6277_v39 = vmax.f32 %v5849_v3, 0.0  ;;  %7284 = vst.msk [vmem:[%s12664_s3 + $0xbc] sm:$0xf] %vm7236_vm3, %v8587_v63  ;;  %v6566_v38 = vmul.f32 0.25, %v6422_v16  ;;  %v4805_v6 = vadd.f32 %v4661_v49, %v12778_v37  ;;  %v4252_v17 = vadd.f32 %v11616_v54, %v9334_v29  ;;  %v4243_v5 = vpop.f32.mrb[197].mxu0  ;;  %v5861_v43 = vpop.f32.mrb[197].mxu1 }
 0x267   :  { %v5870_v41 = vadd.f32 %v11616_v54, %v9482_v8  ;;  %7282 = vst.msk [vmem:[%s12664_s3 + $0xb4] sm:$0xf] %vm7236_vm3, %v8585_v59  ;;  %v6564_v0 = vmul.f32 0.25, %v6420_v62  ;;  %v4803_v52 = vadd.f32 %v4659_v19, %v12779_v2  ;;  %v4244_v25 = vadd.f32 %v11616_v54, %v4243_v5  ;;  %v9335_v42 = vpop.f32.mrb[198].mxu0  ;;  %v9483_v15 = vpop.f32.mrb[198].mxu1  ;;  %v12783_v63 = vld [vmem:[#allocation17_spill] sm:$0xff] }
 0x268   :  { %v5862_v23 = vadd.f32 %v11616_v54, %v5861_v43  ;;  %v8590_v40 = vpack.c.bf16 %v6566_v38, %v6566_v38  ;;  %v6423_v45 = vadd.f32 %v6279_v30, %v4805_v6  ;;  %v4664_v7 = vmax.f32 %v4252_v17, 0.0  ;;  %v4246_v9 = vpop.f32.mrb[199].mxu0  ;;  %v5864_v22 = vpop.f32.mrb[199].mxu1 }
 0x269   :  { %v6282_v31 = vmax.f32 %v5870_v41, 0.0  ;;  %v8588_v48 = vpack.c.bf16 %v6564_v0, %v6564_v0  ;;  %v6421_v56 = vadd.f32 %v6277_v39, %v4803_v52  ;;  %v4662_v14 = vmax.f32 %v4244_v25, 0.0  ;;  %v12784_v0 = vld [vmem:[#allocation18_spill] sm:$0xff] }
 0x26a   :  { %v6280_v11 = vmax.f32 %v5862_v23, 0.0  ;;  %7287 = vst.msk [vmem:[%s12664_s3 + $0xc8] sm:$0xf] %vm7236_vm3, %v8590_v40  ;;  %v6567_v12 = vmul.f32 0.25, %v6423_v45  ;;  %v4808_v18 = vadd.f32 %v4664_v7, %v12780_v27  ;;  %v4255_v51 = vadd.f32 %v11616_v54, %v9335_v42  ;;  %v12785_v42 = vld [vmem:[#allocation19_spill] sm:$0xff] }
 0x26b   :  { %v5873_v61 = vadd.f32 %v11616_v54, %v9483_v15  ;;  %7285 = vst.msk [vmem:[%s12664_s3 + $0xc0] sm:$0xf] %vm7236_vm3, %v8588_v48  ;;  %v6565_v33 = vmul.f32 0.25, %v6421_v56  ;;  %v4806_v34 = vadd.f32 %v4662_v14, %v12781_v53  ;;  %v4247_v28 = vadd.f32 %v12010_v10, %v4246_v9 }
 0x26c   :  { %v5865_v26 = vadd.f32 %v12010_v10, %v5864_v22  ;;  %v8591_v60 = vpack.c.bf16 %v6567_v12, %v6567_v12  ;;  %v6426_v46 = vadd.f32 %v6282_v31, %v4808_v18  ;;  %v4665_v54 = vmax.f32 %v4255_v51, 0.0  ;;  %v12786_v51 = vld [vmem:[#allocation20_spill] sm:$0xff] }
 0x26d   :  { %v6283_v57 = vmax.f32 %v5873_v61, 0.0  ;;  %v8589_v58 = vpack.c.bf16 %v6565_v33, %v6565_v33  ;;  %v6424_v1 = vadd.f32 %v6280_v11, %v4806_v34  ;;  %v4663_v32 = vmax.f32 %v4247_v28, 0.0  ;;  %v9338_v47 = vpop.f32.mrb[200].mxu0  ;;  %v9486_v36 = vpop.f32.mrb[200].mxu1 }
 0x26e   :  { %v6281_v55 = vmax.f32 %v5865_v26, 0.0  ;;  %7288 = vst.msk [vmem:[%s12664_s3 + $0xcc] sm:$0xf] %vm7236_vm3, %v8591_v60  ;;  %v6570_v13 = vmul.f32 0.25, %v6426_v46  ;;  %v4809_v50 = vadd.f32 %v4665_v54, %v12782_v21  ;;  %v4268_v24 = vadd.f32 %v12010_v10, %v9338_v47  ;;  %v4259_v44 = vpop.f32.mrb[201].mxu0  ;;  %v5877_v4 = vpop.f32.mrb[201].mxu1 }
 0x26f   :  { %v5886_v35 = vadd.f32 %v12010_v10, %v9486_v36  ;;  %7286 = vst.msk [vmem:[%s12664_s3 + $0xc4] sm:$0xf] %vm7236_vm3, %v8589_v58  ;;  %v6568_v3 = vmul.f32 0.25, %v6424_v1  ;;  %v4807_v16 = vadd.f32 %v4663_v32, %v12783_v63  ;;  %v4260_v49 = vadd.f32 %v12010_v10, %v4259_v44  ;;  %v9339_v59 = vpop.f32.mrb[202].mxu0  ;;  %v9487_v62 = vpop.f32.mrb[202].mxu1  ;;  %v12787_v60 = vld [vmem:[#allocation21_spill] sm:$0xff] }
 0x270   :  { %v5878_v30 = vadd.f32 %v12010_v10, %v5877_v4  ;;  %v8594_v19 = vpack.c.bf16 %v6570_v13, %v6570_v13  ;;  %v6427_v39 = vadd.f32 %v6283_v57, %v4809_v50  ;;  %v4668_v29 = vmax.f32 %v4268_v24, 0.0  ;;  %v4262_v38 = vpop.f32.mrb[203].mxu0  ;;  %v5880_v37 = vpop.f32.mrb[203].mxu1 }
 0x271   :  { %v6286_v8 = vmax.f32 %v5886_v35, 0.0  ;;  %v8592_v6 = vpack.c.bf16 %v6568_v3, %v6568_v3  ;;  %v6425_v17 = vadd.f32 %v6281_v55, %v4807_v16  ;;  %v4666_v41 = vmax.f32 %v4260_v49, 0.0  ;;  %v12788_v3 = vld [vmem:[#allocation22_spill] sm:$0xff] }
 0x272   :  { %v6284_v5 = vmax.f32 %v5878_v30, 0.0  ;;  %7291 = vst.msk [vmem:[%s12664_s3 + $0xd8] sm:$0xf] %vm7236_vm3, %v8594_v19  ;;  %v6571_v43 = vmul.f32 0.25, %v6427_v39  ;;  %v4812_v2 = vadd.f32 %v4668_v29, %v12784_v0  ;;  %v4271_v52 = vadd.f32 %v12010_v10, %v9339_v59  ;;  %v12789_v59 = vld [vmem:[#allocation23_spill] sm:$0xff] }
 0x273   :  { %v5889_v25 = vadd.f32 %v12010_v10, %v9487_v62  ;;  %7289 = vst.msk [vmem:[%s12664_s3 + $0xd0] sm:$0xf] %vm7236_vm3, %v8592_v6  ;;  %v6569_v23 = vmul.f32 0.25, %v6425_v17  ;;  %v4810_v15 = vadd.f32 %v4666_v41, %v12785_v42  ;;  %v4263_v40 = vadd.f32 %v12010_v10, %v4262_v38 }
 0x274   :  { %v5881_v45 = vadd.f32 %v12010_v10, %v5880_v37  ;;  %v8595_v7 = vpack.c.bf16 %v6571_v43, %v6571_v43  ;;  %v6430_v31 = vadd.f32 %v6286_v8, %v4812_v2  ;;  %v4669_v9 = vmax.f32 %v4271_v52, 0.0  ;;  %v12790_v52 = vld [vmem:[#allocation24_spill] sm:$0xff] }
 0x275   :  { %v6287_v22 = vmax.f32 %v5889_v25, 0.0  ;;  %v8593_v48 = vpack.c.bf16 %v6569_v23, %v6569_v23  ;;  %v6428_v56 = vadd.f32 %v6284_v5, %v4810_v15  ;;  %v4667_v14 = vmax.f32 %v4263_v40, 0.0  ;;  %v9342_v12 = vpop.f32.mrb[204].mxu0  ;;  %v9490_v27 = vpop.f32.mrb[204].mxu1 }
 0x276   :  { %v6285_v11 = vmax.f32 %v5881_v45, 0.0  ;;  %7292 = vst.msk [vmem:[%s12664_s3 + $0xdc] sm:$0xf] %vm7236_vm3, %v8595_v7  ;;  %v6574_v18 = vmul.f32 0.25, %v6430_v31  ;;  %v4813_v61 = vadd.f32 %v4669_v9, %v12786_v51  ;;  %v4284_v33 = vadd.f32 %v12010_v10, %v9342_v12  ;;  %v4275_v34 = vpop.f32.mrb[205].mxu0  ;;  %v5893_v28 = vpop.f32.mrb[205].mxu1 }
 0x277   :  { %v5902_v53 = vadd.f32 %v12010_v10, %v9490_v27  ;;  %7290 = vst.msk [vmem:[%s12664_s3 + $0xd4] sm:$0xf] %vm7236_vm3, %v8593_v48  ;;  %v6572_v26 = vmul.f32 0.25, %v6428_v56  ;;  %v4811_v46 = vadd.f32 %v4667_v14, %v12787_v60  ;;  %v4276_v54 = vadd.f32 %v12010_v10, %v4275_v34  ;;  %v9343_v58 = vpop.f32.mrb[206].mxu0  ;;  %v9491_v1 = vpop.f32.mrb[206].mxu1  ;;  %v12791_v7 = vld [vmem:[#allocation25_spill] sm:$0xff] }
 0x278   :  { %v5894_v57 = vadd.f32 %v12010_v10, %v5893_v28  ;;  %v8598_v32 = vpack.c.bf16 %v6574_v18, %v6574_v18  ;;  %v6431_v55 = vadd.f32 %v6287_v22, %v4813_v61  ;;  %v4672_v47 = vmax.f32 %v4284_v33, 0.0  ;;  %v4278_v13 = vpop.f32.mrb[207].mxu0  ;;  %v5896_v21 = vpop.f32.mrb[207].mxu1 }
 0x279   :  { %v6290_v36 = vmax.f32 %v5902_v53, 0.0  ;;  %v8596_v50 = vpack.c.bf16 %v6572_v26, %v6572_v26  ;;  %v6429_v24 = vadd.f32 %v6285_v11, %v4811_v46  ;;  %v4670_v35 = vmax.f32 %v4276_v54, 0.0  ;;  %v12792_v26 = vld [vmem:[#allocation26_spill] sm:$0xff] }
 0x27a   :  { %v6288_v44 = vmax.f32 %v5894_v57, 0.0  ;;  %7295 = vst.msk [vmem:[%s12664_s3 + $0xe8] sm:$0xf] %vm7236_vm3, %v8598_v32  ;;  %v6575_v4 = vmul.f32 0.25, %v6431_v55  ;;  %v4816_v63 = vadd.f32 %v4672_v47, %v12788_v3  ;;  %v4287_v16 = vadd.f32 %v12010_v10, %v9343_v58  ;;  %v12793_v58 = vld [vmem:[#allocation27_spill] sm:$0xff] }
 0x27b   :  { %v5905_v49 = vadd.f32 %v12010_v10, %v9491_v1  ;;  %7293 = vst.msk [vmem:[%s12664_s3 + $0xe0] sm:$0xf] %vm7236_vm3, %v8596_v50  ;;  %v6573_v30 = vmul.f32 0.25, %v6429_v24  ;;  %v4814_v62 = vadd.f32 %v4670_v35, %v12789_v59  ;;  %v4279_v19 = vadd.f32 %v12010_v10, %v4278_v13 }
 0x27c   :  { %v5897_v39 = vadd.f32 %v12010_v10, %v5896_v21  ;;  %v8599_v29 = vpack.c.bf16 %v6575_v4, %v6575_v4  ;;  %v6434_v8 = vadd.f32 %v6290_v36, %v4816_v63  ;;  %v4673_v38 = vmax.f32 %v4287_v16, 0.0  ;;  %v12794_v16 = vld [vmem:[#allocation28_spill] sm:$0xff] }
 0x27d   :  { %v6291_v37 = vmax.f32 %v5905_v49, 0.0  ;;  %v8597_v6 = vpack.c.bf16 %v6573_v30, %v6573_v30  ;;  %v6432_v17 = vadd.f32 %v6288_v44, %v4814_v62  ;;  %v4671_v41 = vmax.f32 %v4279_v19, 0.0  ;;  %v9346_v43 = vpop.f32.mrb[208].mxu0  ;;  %v9494_v0 = vpop.f32.mrb[208].mxu1 }
 0x27e   :  { %v6289_v5 = vmax.f32 %v5897_v39, 0.0  ;;  %7296 = vst.msk [vmem:[%s12664_s3 + $0xec] sm:$0xf] %vm7236_vm3, %v8599_v29  ;;  %v6578_v2 = vmul.f32 0.25, %v6434_v8  ;;  %v4817_v25 = vadd.f32 %v4673_v38, %v12790_v52  ;;  %v4300_v23 = vadd.f32 %v12010_v10, %v9346_v43  ;;  %v4291_v15 = vpop.f32.mrb[209].mxu0  ;;  %v5909_v40 = vpop.f32.mrb[209].mxu1 }
 0x27f   :  { %v5918_v42 = vadd.f32 %v12010_v10, %v9494_v0  ;;  %7294 = vst.msk [vmem:[%s12664_s3 + $0xe4] sm:$0xf] %vm7236_vm3, %v8597_v6  ;;  %v6576_v45 = vmul.f32 0.25, %v6432_v17  ;;  %v4815_v31 = vadd.f32 %v4671_v41, %v12791_v7  ;;  %v4292_v9 = vadd.f32 %v12010_v10, %v4291_v15  ;;  %v9347_v48 = vpop.f32.mrb[210].mxu0  ;;  %v9495_v56 = vpop.f32.mrb[210].mxu1  ;;  %v12795_v29 = vld [vmem:[#allocation29_spill] sm:$0xff] }
 0x280   :  { %v5910_v22 = vadd.f32 %v12010_v10, %v5909_v40  ;;  %v8602_v14 = vpack.c.bf16 %v6578_v2, %v6578_v2  ;;  %v6435_v11 = vadd.f32 %v6291_v37, %v4817_v25  ;;  %v4676_v12 = vmax.f32 %v4300_v23, 0.0  ;;  %v4294_v18 = vpop.f32.mrb[211].mxu0  ;;  %v5912_v51 = vpop.f32.mrb[211].mxu1 }
 0x281   :  { %v6294_v27 = vmax.f32 %v5918_v42, 0.0  ;;  %v8600_v61 = vpack.c.bf16 %v6576_v45, %v6576_v45  ;;  %v6433_v33 = vadd.f32 %v6289_v5, %v4815_v31  ;;  %v4674_v53 = vmax.f32 %v4292_v9, 0.0  ;;  %v12796_v45 = vld [vmem:[#allocation30_spill] sm:$0xff] }
 0x282   :  { %v6292_v34 = vmax.f32 %v5910_v22, 0.0  ;;  %7299 = vst.msk [vmem:[%s12664_s3 + $0xf8] sm:$0xf] %vm7236_vm3, %v8602_v14  ;;  %v6579_v28 = vmul.f32 0.25, %v6435_v11  ;;  %v4820_v60 = vadd.f32 %v4676_v12, %v12792_v26  ;;  %v4303_v46 = vadd.f32 %v12010_v10, %v9347_v48  ;;  %v12797_v48 = vld [vmem:[#allocation31_spill] sm:$0xff] }
 0x283   :  { %v5921_v54 = vadd.f32 %v12010_v10, %v9495_v56  ;;  %7297 = vst.msk [vmem:[%s12664_s3 + $0xf0] sm:$0xf] %vm7236_vm3, %v8600_v61  ;;  %v6577_v57 = vmul.f32 0.25, %v6433_v33  ;;  %v4818_v1 = vadd.f32 %v4674_v53, %v12793_v58  ;;  %v4295_v32 = vadd.f32 %v12010_v10, %v4294_v18 }
 0x284   :  { %v5913_v55 = vadd.f32 %v12010_v10, %v5912_v51  ;;  %v8603_v47 = vpack.c.bf16 %v6579_v28, %v6579_v28  ;;  %v6438_v36 = vadd.f32 %v6294_v27, %v4820_v60  ;;  %v4677_v13 = vmax.f32 %v4303_v46, 0.0  ;;  %v12798_v46 = vld [vmem:[#allocation32_spill] sm:$0xff] }
 0x285   :  { %v6295_v21 = vmax.f32 %v5921_v54, 0.0  ;;  %v8601_v50 = vpack.c.bf16 %v6577_v57, %v6577_v57  ;;  %v6436_v24 = vadd.f32 %v6292_v34, %v4818_v1  ;;  %v4675_v35 = vmax.f32 %v4295_v32, 0.0  ;;  %v9350_v4 = vpop.f32.mrb[212].mxu0  ;;  %v9498_v3 = vpop.f32.mrb[212].mxu1 }
 0x286   :  { %v6293_v44 = vmax.f32 %v5913_v55, 0.0  ;;  %7300 = vst.msk [vmem:[%s12664_s3 + $0xfc] sm:$0xf] %vm7236_vm3, %v8603_v47  ;;  %v6582_v63 = vmul.f32 0.25, %v6438_v36  ;;  %v4821_v49 = vadd.f32 %v4677_v13, %v12794_v16  ;;  %v4316_v30 = vadd.f32 %v12010_v10, %v9350_v4  ;;  %v4307_v62 = vpop.f32.mrb[213].mxu0  ;;  %v5925_v19 = vpop.f32.mrb[213].mxu1 }
 0x287   :  { %v5934_v59 = vadd.f32 %v12010_v10, %v9498_v3  ;;  %7298 = vst.msk [vmem:[%s12664_s3 + $0xf4] sm:$0xf] %vm7236_vm3, %v8601_v50  ;;  %v6580_v39 = vmul.f32 0.25, %v6436_v24  ;;  %v4819_v8 = vadd.f32 %v4675_v35, %v12795_v29  ;;  %v4308_v38 = vadd.f32 %v12010_v10, %v4307_v62  ;;  %v9351_v6 = vpop.f32.mrb[214].mxu0  ;;  %v9499_v17 = vpop.f32.mrb[214].mxu1  ;;  %v12799_v47 = vld [vmem:[#allocation33_spill] sm:$0xff] }
 0x288   :  { %v5926_v37 = vadd.f32 %v12010_v10, %v5925_v19  ;;  %v8606_v41 = vpack.c.bf16 %v6582_v63, %v6582_v63  ;;  %v6439_v5 = vadd.f32 %v6295_v21, %v4821_v49  ;;  %v4680_v43 = vmax.f32 %v4316_v30, 0.0  ;;  %v4310_v2 = vpop.f32.mrb[215].mxu0  ;;  %v5928_v52 = vpop.f32.mrb[215].mxu1 }
 0x289   :  { %v6298_v0 = vmax.f32 %v5934_v59, 0.0  ;;  %v8604_v25 = vpack.c.bf16 %v6580_v39, %v6580_v39  ;;  %v6437_v23 = vadd.f32 %v6293_v44, %v4819_v8  ;;  %v4678_v42 = vmax.f32 %v4308_v38, 0.0  ;;  %v12800_v39 = vld [vmem:[#allocation34_spill] sm:$0xff] }
 0x28a   :  { %v6296_v15 = vmax.f32 %v5926_v37, 0.0  ;;  %7303 = vst.msk [vmem:[%s12664_s3 + $0x108] sm:$0xf] %vm7236_vm3, %v8606_v41  ;;  %v6583_v40 = vmul.f32 0.25, %v6439_v5  ;;  %v4824_v7 = vadd.f32 %v4680_v43, %v12796_v45  ;;  %v4319_v31 = vadd.f32 %v12010_v10, %v9351_v6  ;;  %v12801_v6 = vld [vmem:[#allocation35_spill] sm:$0xff] }
 0x28b   :  { %v5937_v9 = vadd.f32 %v12010_v10, %v9499_v17  ;;  %7301 = vst.msk [vmem:[%s12664_s3 + $0x100] sm:$0xf] %vm7236_vm3, %v8604_v25  ;;  %v6581_v22 = vmul.f32 0.25, %v6437_v23  ;;  %v4822_v56 = vadd.f32 %v4678_v42, %v12797_v48  ;;  %v4311_v14 = vadd.f32 %v12010_v10, %v4310_v2 }
 0x28c   :  { %v5929_v11 = vadd.f32 %v12010_v10, %v5928_v52  ;;  %v8607_v12 = vpack.c.bf16 %v6583_v40, %v6583_v40  ;;  %v6442_v27 = vadd.f32 %v6298_v0, %v4824_v7  ;;  %v4681_v18 = vmax.f32 %v4319_v31, 0.0  ;;  %v12802_v31 = vld [vmem:[#allocation36_spill] sm:$0xff] }
 0x28d   :  { %v6299_v51 = vmax.f32 %v5937_v9, 0.0  ;;  %v8605_v61 = vpack.c.bf16 %v6581_v22, %v6581_v22  ;;  %v6440_v33 = vadd.f32 %v6296_v15, %v4822_v56  ;;  %v4679_v53 = vmax.f32 %v4311_v14, 0.0  ;;  %v9354_v28 = vpop.f32.mrb[216].mxu0  ;;  %v9502_v26 = vpop.f32.mrb[216].mxu1 }
 0x28e   :  { %v6297_v34 = vmax.f32 %v5929_v11, 0.0  ;;  %7304 = vst.msk [vmem:[%s12664_s3 + $0x10c] sm:$0xf] %vm7236_vm3, %v8607_v12  ;;  %v6586_v60 = vmul.f32 0.25, %v6442_v27  ;;  %v4825_v54 = vadd.f32 %v4681_v18, %v12798_v46  ;;  %v4332_v57 = vadd.f32 %v12010_v10, %v9354_v28  ;;  %v4323_v1 = vpop.f32.mrb[217].mxu0  ;;  %v5941_v32 = vpop.f32.mrb[217].mxu1 }
 0x28f   :  { %v5950_v58 = vadd.f32 %v12010_v10, %v9502_v26  ;;  %7302 = vst.msk [vmem:[%s12664_s3 + $0x104] sm:$0xf] %vm7236_vm3, %v8605_v61  ;;  %v6584_v55 = vmul.f32 0.25, %v6440_v33  ;;  %v4823_v36 = vadd.f32 %v4679_v53, %v12799_v47  ;;  %v4324_v13 = vadd.f32 %v12010_v10, %v4323_v1  ;;  %v9355_v50 = vpop.f32.mrb[218].mxu0  ;;  %v9503_v24 = vpop.f32.mrb[218].mxu1  ;;  %v12803_v12 = vld [vmem:[#allocation37_spill] sm:$0xff] }
 0x290   :  { %v5942_v21 = vadd.f32 %v12010_v10, %v5941_v32  ;;  %v8610_v35 = vpack.c.bf16 %v6586_v60, %v6586_v60  ;;  %v6443_v44 = vadd.f32 %v6299_v51, %v4825_v54  ;;  %v4684_v4 = vmax.f32 %v4332_v57, 0.0  ;;  %v4326_v63 = vpop.f32.mrb[219].mxu0  ;;  %v5944_v16 = vpop.f32.mrb[219].mxu1 }
 0x291   :  { %v6302_v3 = vmax.f32 %v5950_v58, 0.0  ;;  %v8608_v49 = vpack.c.bf16 %v6584_v55, %v6584_v55  ;;  %v6441_v30 = vadd.f32 %v6297_v34, %v4823_v36  ;;  %v4682_v59 = vmax.f32 %v4324_v13, 0.0  ;;  %v12804_v55 = vld [vmem:[#allocation38_spill] sm:$0xff] }
 0x292   :  { %v6300_v62 = vmax.f32 %v5942_v21, 0.0  ;;  %7307 = vst.msk [vmem:[%s12664_s3 + $0x118] sm:$0xf] %vm7236_vm3, %v8610_v35  ;;  %v6587_v19 = vmul.f32 0.25, %v6443_v44  ;;  %v4828_v29 = vadd.f32 %v4684_v4, %v12800_v39  ;;  %v4335_v8 = vadd.f32 %v12010_v10, %v9355_v50  ;;  %v12805_v50 = vld [vmem:[#allocation39_spill] sm:$0xff] }
 0x293   :  { %v5953_v38 = vadd.f32 %v12010_v10, %v9503_v24  ;;  %7305 = vst.msk [vmem:[%s12664_s3 + $0x110] sm:$0xf] %vm7236_vm3, %v8608_v49  ;;  %v6585_v37 = vmul.f32 0.25, %v6441_v30  ;;  %v4826_v17 = vadd.f32 %v4682_v59, %v12801_v6  ;;  %v4327_v41 = vadd.f32 %v12010_v10, %v4326_v63 }
 0x294   :  { %v5945_v5 = vadd.f32 %v12010_v10, %v5944_v16  ;;  %v8611_v43 = vpack.c.bf16 %v6587_v19, %v6587_v19  ;;  %v6446_v0 = vadd.f32 %v6302_v3, %v4828_v29  ;;  %v4685_v2 = vmax.f32 %v4335_v8, 0.0  ;;  %v12806_v8 = vld [vmem:[#allocation40_spill] sm:$0xff] }
 0x295   :  { %v6303_v52 = vmax.f32 %v5953_v38, 0.0  ;;  %v8609_v25 = vpack.c.bf16 %v6585_v37, %v6585_v37  ;;  %v6444_v23 = vadd.f32 %v6300_v62, %v4826_v17  ;;  %v4683_v42 = vmax.f32 %v4327_v41, 0.0  ;;  %v9358_v40 = vpop.f32.mrb[220].mxu0  ;;  %v9506_v45 = vpop.f32.mrb[220].mxu1 }
 0x296   :  { %v6301_v15 = vmax.f32 %v5945_v5, 0.0  ;;  %7308 = vst.msk [vmem:[%s12664_s3 + $0x11c] sm:$0xf] %vm7236_vm3, %v8611_v43  ;;  %v6590_v7 = vmul.f32 0.25, %v6446_v0  ;;  %v4829_v9 = vadd.f32 %v4685_v2, %v12802_v31  ;;  %v4348_v22 = vadd.f32 %v12010_v10, %v9358_v40  ;;  %v4339_v56 = vpop.f32.mrb[221].mxu0  ;;  %v5957_v14 = vpop.f32.mrb[221].mxu1 }
 0x297   :  { %v5966_v48 = vadd.f32 %v12010_v10, %v9506_v45  ;;  %7306 = vst.msk [vmem:[%s12664_s3 + $0x114] sm:$0xf] %vm7236_vm3, %v8609_v25  ;;  %v6588_v11 = vmul.f32 0.25, %v6444_v23  ;;  %v4827_v27 = vadd.f32 %v4683_v42, %v12803_v12  ;;  %v4340_v18 = vadd.f32 %v12010_v10, %v4339_v56  ;;  %v9359_v61 = vpop.f32.mrb[222].mxu0  ;;  %v9507_v33 = vpop.f32.mrb[222].mxu1  ;;  %v12807_v43 = vld [vmem:[#allocation41_spill] sm:$0xff] }
 0x298   :  { %v5958_v51 = vadd.f32 %v12010_v10, %v5957_v14  ;;  %v8614_v53 = vpack.c.bf16 %v6590_v7, %v6590_v7  ;;  %v6447_v34 = vadd.f32 %v6303_v52, %v4829_v9  ;;  %v4688_v28 = vmax.f32 %v4348_v22, 0.0  ;;  %v4342_v60 = vpop.f32.mrb[223].mxu0  ;;  %v5960_v46 = vpop.f32.mrb[223].mxu1 }
 0x299   :  { %v6306_v26 = vmax.f32 %v5966_v48, 0.0  ;;  %v8612_v54 = vpack.c.bf16 %v6588_v11, %v6588_v11  ;;  %v6445_v57 = vadd.f32 %v6301_v15, %v4827_v27  ;;  %v4686_v58 = vmax.f32 %v4340_v18, 0.0  ;;  %v12808_v11 = vld [vmem:[#allocation42_spill] sm:$0xff] }
 0x29a   :  { %v6304_v1 = vmax.f32 %v5958_v51, 0.0  ;;  %7311 = vst.msk [vmem:[%s12664_s3 + $0x128] sm:$0xf] %vm7236_vm3, %v8614_v53  ;;  %v6591_v32 = vmul.f32 0.25, %v6447_v34  ;;  %v4832_v47 = vadd.f32 %v4688_v28, %v12804_v55  ;;  %v4351_v36 = vadd.f32 %v12010_v10, %v9359_v61  ;;  %v12809_v61 = vld [vmem:[#allocation43_spill] sm:$0xff] }
 0x29b   :  { %v5969_v13 = vadd.f32 %v12010_v10, %v9507_v33  ;;  %7309 = vst.msk [vmem:[%s12664_s3 + $0x120] sm:$0xf] %vm7236_vm3, %v8612_v54  ;;  %v6589_v21 = vmul.f32 0.25, %v6445_v57  ;;  %v4830_v24 = vadd.f32 %v4686_v58, %v12805_v50  ;;  %v4343_v35 = vadd.f32 %v12010_v10, %v4342_v60 }
 0x29c   :  { %v5961_v44 = vadd.f32 %v12010_v10, %v5960_v46  ;;  %v8615_v4 = vpack.c.bf16 %v6591_v32, %v6591_v32  ;;  %v6450_v3 = vadd.f32 %v6306_v26, %v4832_v47  ;;  %v4689_v63 = vmax.f32 %v4351_v36, 0.0  ;;  %v12810_v36 = vld [vmem:[#allocation44_spill] sm:$0xff] }
 0x29d   :  { %v6307_v16 = vmax.f32 %v5969_v13, 0.0  ;;  %v8613_v49 = vpack.c.bf16 %v6589_v21, %v6589_v21  ;;  %v6448_v30 = vadd.f32 %v6304_v1, %v4830_v24  ;;  %v4687_v59 = vmax.f32 %v4343_v35, 0.0  ;;  %v9362_v19 = vpop.f32.mrb[224].mxu0  ;;  %v9510_v39 = vpop.f32.mrb[224].mxu1 }
 0x29e   :  { %v6305_v62 = vmax.f32 %v5961_v44, 0.0  ;;  %7312 = vst.msk [vmem:[%s12664_s3 + $0x12c] sm:$0xf] %vm7236_vm3, %v8615_v4  ;;  %v6594_v29 = vmul.f32 0.25, %v6450_v3  ;;  %v4833_v38 = vadd.f32 %v4689_v63, %v12806_v8  ;;  %v4364_v37 = vadd.f32 %v12010_v10, %v9362_v19  ;;  %v4355_v17 = vpop.f32.mrb[225].mxu0  ;;  %v5973_v41 = vpop.f32.mrb[225].mxu1 }
 0x29f   :  { %v5982_v6 = vadd.f32 %v12010_v10, %v9510_v39  ;;  %7310 = vst.msk [vmem:[%s12664_s3 + $0x124] sm:$0xf] %vm7236_vm3, %v8613_v49  ;;  %v6592_v5 = vmul.f32 0.25, %v6448_v30  ;;  %v4831_v0 = vadd.f32 %v4687_v59, %v12807_v43  ;;  %v4356_v2 = vadd.f32 %v12010_v10, %v4355_v17  ;;  %v9363_v25 = vpop.f32.mrb[226].mxu0  ;;  %v9511_v23 = vpop.f32.mrb[226].mxu1  ;;  %v12811_v4 = vld [vmem:[#allocation45_spill] sm:$0xff] }
 0x2a0   :  { %v5974_v52 = vadd.f32 %v12010_v10, %v5973_v41  ;;  %v8618_v42 = vpack.c.bf16 %v6594_v29, %v6594_v29  ;;  %v6451_v15 = vadd.f32 %v6307_v16, %v4833_v38  ;;  %v4692_v40 = vmax.f32 %v4364_v37, 0.0  ;;  %v4358_v7 = vpop.f32.mrb[227].mxu0  ;;  %v5976_v31 = vpop.f32.mrb[227].mxu1 }
 0x2a1   :  { %v6310_v45 = vmax.f32 %v5982_v6, 0.0  ;;  %v8616_v9 = vpack.c.bf16 %v6592_v5, %v6592_v5  ;;  %v6449_v22 = vadd.f32 %v6305_v62, %v4831_v0  ;;  %v4690_v48 = vmax.f32 %v4356_v2, 0.0  ;;  %v12812_v5 = vld [vmem:[#allocation46_spill] sm:$0xff] }
 0x2a2   :  { %v6308_v56 = vmax.f32 %v5974_v52, 0.0  ;;  %7315 = vst.msk [vmem:[%s12664_s3 + $0x138] sm:$0xf] %vm7236_vm3, %v8618_v42  ;;  %v6595_v14 = vmul.f32 0.25, %v6451_v15  ;;  %v4836_v12 = vadd.f32 %v4692_v40, %v12808_v11  ;;  %v4367_v27 = vadd.f32 %v12010_v10, %v9363_v25  ;;  %v12813_v25 = vld [vmem:[#allocation47_spill] sm:$0xff] }
 0x2a3   :  { %v5985_v18 = vadd.f32 %v12010_v10, %v9511_v23  ;;  %7313 = vst.msk [vmem:[%s12664_s3 + $0x130] sm:$0xf] %vm7236_vm3, %v8616_v9  ;;  %v6593_v51 = vmul.f32 0.25, %v6449_v22  ;;  %v4834_v33 = vadd.f32 %v4690_v48, %v12809_v61  ;;  %v4359_v53 = vadd.f32 %v12010_v10, %v4358_v7 }
 0x2a4   :  { %v5977_v34 = vadd.f32 %v12010_v10, %v5976_v31  ;;  %v8619_v28 = vpack.c.bf16 %v6595_v14, %v6595_v14  ;;  %v6454_v26 = vadd.f32 %v6310_v45, %v4836_v12  ;;  %v4693_v60 = vmax.f32 %v4367_v27, 0.0  ;;  %v12814_v27 = vld [vmem:[#allocation48_spill] sm:$0xff] }
 0x2a5   :  { %v6311_v46 = vmax.f32 %v5985_v18, 0.0  ;;  %v8617_v54 = vpack.c.bf16 %v6593_v51, %v6593_v51  ;;  %v6452_v57 = vadd.f32 %v6308_v56, %v4834_v33  ;;  %v4691_v58 = vmax.f32 %v4359_v53, 0.0  ;;  %v9366_v32 = vpop.f32.mrb[228].mxu0  ;;  %v9514_v55 = vpop.f32.mrb[228].mxu1 }
 0x2a6   :  { %v6309_v1 = vmax.f32 %v5977_v34, 0.0  ;;  %7316 = vst.msk [vmem:[%s12664_s3 + $0x13c] sm:$0xf] %vm7236_vm3, %v8619_v28  ;;  %v6598_v47 = vmul.f32 0.25, %v6454_v26  ;;  %v4837_v13 = vadd.f32 %v4693_v60, %v12810_v36  ;;  %v4380_v21 = vadd.f32 %v12010_v10, %v9366_v32  ;;  %v4371_v24 = vpop.f32.mrb[229].mxu0  ;;  %v5989_v35 = vpop.f32.mrb[229].mxu1 }
 0x2a7   :  { %v5998_v50 = vadd.f32 %v12010_v10, %v9514_v55  ;;  %7314 = vst.msk [vmem:[%s12664_s3 + $0x134] sm:$0xf] %vm7236_vm3, %v8617_v54  ;;  %v6596_v44 = vmul.f32 0.25, %v6452_v57  ;;  %v4835_v3 = vadd.f32 %v4691_v58, %v12811_v4  ;;  %v4372_v63 = vadd.f32 %v12010_v10, %v4371_v24  ;;  %v9367_v49 = vpop.f32.mrb[230].mxu0  ;;  %v9515_v30 = vpop.f32.mrb[230].mxu1  ;;  %v12815_v28 = vld [vmem:[#allocation49_spill] sm:$0xff] }
 0x2a8   :  { %v5990_v16 = vadd.f32 %v12010_v10, %v5989_v35  ;;  %v8622_v59 = vpack.c.bf16 %v6598_v47, %v6598_v47  ;;  %v6455_v62 = vadd.f32 %v6311_v46, %v4837_v13  ;;  %v4696_v19 = vmax.f32 %v4380_v21, 0.0  ;;  %v4374_v29 = vpop.f32.mrb[231].mxu0  ;;  %v5992_v8 = vpop.f32.mrb[231].mxu1 }
 0x2a9   :  { %v6314_v39 = vmax.f32 %v5998_v50, 0.0  ;;  %v8620_v38 = vpack.c.bf16 %v6596_v44, %v6596_v44  ;;  %v6453_v37 = vadd.f32 %v6309_v1, %v4835_v3  ;;  %v4694_v6 = vmax.f32 %v4372_v63, 0.0  ;;  %v12816_v44 = vld [vmem:[#allocation50_spill] sm:$0xff] }
 0x2aa   :  { %v6312_v17 = vmax.f32 %v5990_v16, 0.0  ;;  %7319 = vst.msk [vmem:[%s12664_s3 + $0x148] sm:$0xf] %vm7236_vm3, %v8622_v59  ;;  %v6599_v41 = vmul.f32 0.25, %v6455_v62  ;;  %v4840_v43 = vadd.f32 %v4696_v19, %v12812_v5  ;;  %v4383_v0 = vadd.f32 %v12010_v10, %v9367_v49  ;;  %v12817_v49 = vld [vmem:[#allocation51_spill] sm:$0xff] }
 0x2ab   :  { %v6001_v2 = vadd.f32 %v12010_v10, %v9515_v30  ;;  %7317 = vst.msk [vmem:[%s12664_s3 + $0x140] sm:$0xf] %vm7236_vm3, %v8620_v38  ;;  %v6597_v52 = vmul.f32 0.25, %v6453_v37  ;;  %v4838_v23 = vadd.f32 %v4694_v6, %v12813_v25  ;;  %v4375_v42 = vadd.f32 %v12010_v10, %v4374_v29 }
 0x2ac   :  { %v5993_v15 = vadd.f32 %v12010_v10, %v5992_v8  ;;  %v8623_v40 = vpack.c.bf16 %v6599_v41, %v6599_v41  ;;  %v6458_v45 = vadd.f32 %v6314_v39, %v4840_v43  ;;  %v4697_v7 = vmax.f32 %v4383_v0, 0.0  ;;  %v12818_v0 = vld [vmem:[#allocation52_spill] sm:$0xff] }
 0x2ad   :  { %v6315_v31 = vmax.f32 %v6001_v2, 0.0  ;;  %v8621_v9 = vpack.c.bf16 %v6597_v52, %v6597_v52  ;;  %v6456_v22 = vadd.f32 %v6312_v17, %v4838_v23  ;;  %v4695_v48 = vmax.f32 %v4375_v42, 0.0  ;;  %v9370_v14 = vpop.f32.mrb[232].mxu0  ;;  %v9518_v11 = vpop.f32.mrb[232].mxu1 }
 0x2ae   :  { %v6313_v56 = vmax.f32 %v5993_v15, 0.0  ;;  %7320 = vst.msk [vmem:[%s12664_s3 + $0x14c] sm:$0xf] %vm7236_vm3, %v8623_v40  ;;  %v6602_v12 = vmul.f32 0.25, %v6458_v45  ;;  %v4841_v18 = vadd.f32 %v4697_v7, %v12814_v27  ;;  %v4396_v51 = vadd.f32 %v12010_v10, %v9370_v14  ;;  %v4387_v33 = vpop.f32.mrb[233].mxu0  ;;  %v6005_v53 = vpop.f32.mrb[233].mxu1 }
 0x2af   :  { %v6014_v61 = vadd.f32 %v12010_v10, %v9518_v11  ;;  %7318 = vst.msk [vmem:[%s12664_s3 + $0x144] sm:$0xf] %vm7236_vm3, %v8621_v9  ;;  %v6600_v34 = vmul.f32 0.25, %v6456_v22  ;;  %v4839_v26 = vadd.f32 %v4695_v48, %v12815_v28  ;;  %v4388_v60 = vadd.f32 %v12010_v10, %v4387_v33  ;;  %v9371_v54 = vpop.f32.mrb[234].mxu0  ;;  %v9519_v57 = vpop.f32.mrb[234].mxu1  ;;  %v12819_v40 = vld [vmem:[#allocation53_spill] sm:$0xff] }
 0x2b0   :  { %v6006_v46 = vadd.f32 %v12010_v10, %v6005_v53  ;;  %v8626_v58 = vpack.c.bf16 %v6602_v12, %v6602_v12  ;;  %v6459_v1 = vadd.f32 %v6315_v31, %v4841_v18  ;;  %v4700_v32 = vmax.f32 %v4396_v51, 0.0  ;;  %v4390_v47 = vpop.f32.mrb[235].mxu0  ;;  %v6008_v36 = vpop.f32.mrb[235].mxu1 }
 0x2b1   :  { %v6318_v55 = vmax.f32 %v6014_v61, 0.0  ;;  %v8624_v13 = vpack.c.bf16 %v6600_v34, %v6600_v34  ;;  %v6457_v21 = vadd.f32 %v6313_v56, %v4839_v26  ;;  %v4698_v50 = vmax.f32 %v4388_v60, 0.0  ;;  %v12820_v34 = vld [vmem:[#allocation54_spill] sm:$0xff] }
 0x2b2   :  { %v6316_v24 = vmax.f32 %v6006_v46, 0.0  ;;  %7323 = vst.msk [vmem:[%s12664_s3 + $0x158] sm:$0xf] %vm7236_vm3, %v8626_v58  ;;  %v6603_v35 = vmul.f32 0.25, %v6459_v1  ;;  %v4844_v4 = vadd.f32 %v4700_v32, %v12816_v44  ;;  %v4399_v3 = vadd.f32 %v12010_v10, %v9371_v54  ;;  %v12821_v54 = vld [vmem:[#allocation55_spill] sm:$0xff] }
 0x2b3   :  { %v6017_v63 = vadd.f32 %v12010_v10, %v9519_v57  ;;  %7321 = vst.msk [vmem:[%s12664_s3 + $0x150] sm:$0xf] %vm7236_vm3, %v8624_v13  ;;  %v6601_v16 = vmul.f32 0.25, %v6457_v21  ;;  %v4842_v30 = vadd.f32 %v4698_v50, %v12817_v49  ;;  %v4391_v59 = vadd.f32 %v12010_v10, %v4390_v47 }
 0x2b4   :  { %v6009_v62 = vadd.f32 %v12010_v10, %v6008_v36  ;;  %v8627_v19 = vpack.c.bf16 %v6603_v35, %v6603_v35  ;;  %v6462_v39 = vadd.f32 %v6318_v55, %v4844_v4  ;;  %v4701_v29 = vmax.f32 %v4399_v3, 0.0  ;;  %v12822_v3 = vld [vmem:[#allocation56_spill] sm:$0xff] }
 0x2b5   :  { %v6319_v8 = vmax.f32 %v6017_v63, 0.0  ;;  %v8625_v38 = vpack.c.bf16 %v6601_v16, %v6601_v16  ;;  %v6460_v37 = vadd.f32 %v6316_v24, %v4842_v30  ;;  %v4699_v6 = vmax.f32 %v4391_v59, 0.0  ;;  %v9374_v41 = vpop.f32.mrb[236].mxu0  ;;  %v9522_v5 = vpop.f32.mrb[236].mxu1 }
 0x2b6   :  { %v6317_v17 = vmax.f32 %v6009_v62, 0.0  ;;  %7324 = vst.msk [vmem:[%s12664_s3 + $0x15c] sm:$0xf] %vm7236_vm3, %v8627_v19  ;;  %v6606_v43 = vmul.f32 0.25, %v6462_v39  ;;  %v4845_v2 = vadd.f32 %v4701_v29, %v12818_v0  ;;  %v4412_v52 = vadd.f32 %v12010_v10, %v9374_v41  ;;  %v4403_v23 = vpop.f32.mrb[237].mxu0  ;;  %v6021_v42 = vpop.f32.mrb[237].mxu1 }
 0x2b7   :  { %v6030_v25 = vadd.f32 %v12010_v10, %v9522_v5  ;;  %7322 = vst.msk [vmem:[%s12664_s3 + $0x154] sm:$0xf] %vm7236_vm3, %v8625_v38  ;;  %v6604_v15 = vmul.f32 0.25, %v6460_v37  ;;  %v4843_v45 = vadd.f32 %v4699_v6, %v12819_v40  ;;  %v4404_v7 = vadd.f32 %v12010_v10, %v4403_v23  ;;  %v9375_v9 = vpop.f32.mrb[238].mxu0  ;;  %v9523_v22 = vpop.f32.mrb[238].mxu1  ;;  %v12823_v19 = vld [vmem:[#allocation57_spill] sm:$0xff] }
 0x2b8   :  { %v6022_v31 = vadd.f32 %v12010_v10, %v6021_v42  ;;  %v8630_v48 = vpack.c.bf16 %v6606_v43, %v6606_v43  ;;  %v6463_v56 = vadd.f32 %v6319_v8, %v4845_v2  ;;  %v4704_v14 = vmax.f32 %v4412_v52, 0.0  ;;  %v4406_v12 = vpop.f32.mrb[239].mxu0  ;;  %v6024_v27 = vpop.f32.mrb[239].mxu1 }
 0x2b9   :  { %v6322_v11 = vmax.f32 %v6030_v25, 0.0  ;;  %v8628_v18 = vpack.c.bf16 %v6604_v15, %v6604_v15  ;;  %v6461_v51 = vadd.f32 %v6317_v17, %v4843_v45  ;;  %v4702_v61 = vmax.f32 %v4404_v7, 0.0  ;;  %v12824_v15 = vld [vmem:[#allocation58_spill] sm:$0xff] }
 0x2ba   :  { %v6320_v33 = vmax.f32 %v6022_v31, 0.0  ;;  %7327 = vst.msk [vmem:[%s12664_s3 + $0x168] sm:$0xf] %vm7236_vm3, %v8630_v48  ;;  %v6607_v53 = vmul.f32 0.25, %v6463_v56  ;;  %v4848_v28 = vadd.f32 %v4704_v14, %v12820_v34  ;;  %v4415_v26 = vadd.f32 %v12010_v10, %v9375_v9  ;;  %v12825_v9 = vld [vmem:[#allocation59_spill] sm:$0xff] }
 0x2bb   :  { %v6033_v60 = vadd.f32 %v12010_v10, %v9523_v22  ;;  %7325 = vst.msk [vmem:[%s12664_s3 + $0x160] sm:$0xf] %vm7236_vm3, %v8628_v18  ;;  %v6605_v46 = vmul.f32 0.25, %v6461_v51  ;;  %v4846_v57 = vadd.f32 %v4702_v61, %v12821_v54  ;;  %v4407_v58 = vadd.f32 %v12010_v10, %v4406_v12 }
 0x2bc   :  { %v6025_v1 = vadd.f32 %v12010_v10, %v6024_v27  ;;  %v8631_v32 = vpack.c.bf16 %v6607_v53, %v6607_v53  ;;  %v6466_v55 = vadd.f32 %v6322_v11, %v4848_v28  ;;  %v4705_v47 = vmax.f32 %v4415_v26, 0.0  ;;  %v12826_v26 = vld [vmem:[#allocation60_spill] sm:$0xff] }
 0x2bd   :  { %v6323_v36 = vmax.f32 %v6033_v60, 0.0  ;;  %v8629_v13 = vpack.c.bf16 %v6605_v46, %v6605_v46  ;;  %v6464_v21 = vadd.f32 %v6320_v33, %v4846_v57  ;;  %v4703_v50 = vmax.f32 %v4407_v58, 0.0  ;;  %v9378_v35 = vpop.f32.mrb[240].mxu0  ;;  %v9526_v44 = vpop.f32.mrb[240].mxu1 }
 0x2be   :  { %v6321_v24 = vmax.f32 %v6025_v1, 0.0  ;;  %7328 = vst.msk [vmem:[%s12664_s3 + $0x16c] sm:$0xf] %vm7236_vm3, %v8631_v32  ;;  %v6610_v4 = vmul.f32 0.25, %v6466_v55  ;;  %v4849_v63 = vadd.f32 %v4705_v47, %v12822_v3  ;;  %v4428_v16 = vadd.f32 %v12010_v10, %v9378_v35  ;;  %v4419_v30 = vpop.f32.mrb[241].mxu0  ;;  %v6037_v59 = vpop.f32.mrb[241].mxu1 }
 0x2bf   :  { %v6046_v49 = vadd.f32 %v12010_v10, %v9526_v44  ;;  %7326 = vst.msk [vmem:[%s12664_s3 + $0x164] sm:$0xf] %vm7236_vm3, %v8629_v13  ;;  %v6608_v62 = vmul.f32 0.25, %v6464_v21  ;;  %v4847_v39 = vadd.f32 %v4703_v50, %v12823_v19  ;;  %v4420_v29 = vadd.f32 %v12010_v10, %v4419_v30  ;;  %v9379_v38 = vpop.f32.mrb[242].mxu0  ;;  %v9527_v37 = vpop.f32.mrb[242].mxu1  ;;  %v12827_v32 = vld [vmem:[#allocation61_spill] sm:$0xff] }
 0x2c0   :  { %v6038_v8 = vadd.f32 %v12010_v10, %v6037_v59  ;;  %v8634_v6 = vpack.c.bf16 %v6610_v4, %v6610_v4  ;;  %v6467_v17 = vadd.f32 %v6323_v36, %v4849_v63  ;;  %v4708_v41 = vmax.f32 %v4428_v16, 0.0  ;;  %v4422_v43 = vpop.f32.mrb[243].mxu0  ;;  %v6040_v0 = vpop.f32.mrb[243].mxu1  ;;  %v12344_v19 = vld [vmem:[%s12663_s2] ss:$0 sm:$0xff] }
 0x2c1   :  { %v6326_v5 = vmax.f32 %v6046_v49, 0.0  ;;  %v8632_v2 = vpack.c.bf16 %v6608_v62, %v6608_v62  ;;  %v6465_v52 = vadd.f32 %v6321_v24, %v4847_v39  ;;  %v4706_v25 = vmax.f32 %v4420_v29, 0.0  ;;  %v12828_v62 = vld [vmem:[#allocation62_spill] sm:$0xff] }
 0x2c2   :  { %v6324_v23 = vmax.f32 %v6038_v8, 0.0  ;;  %7331 = vst.msk [vmem:[%s12664_s3 + $0x178] sm:$0xf] %vm7236_vm3, %v8634_v6  ;;  %v6611_v42 = vmul.f32 0.25, %v6467_v17  ;;  %v4852_v40 = vadd.f32 %v4708_v41, %v12824_v15  ;;  %v4431_v45 = vadd.f32 %v12010_v10, %v9379_v38  ;;  %v12829_v38 = vld [vmem:[#allocation63_spill] sm:$0xff] }
 0x2c3   :  { %v6049_v7 = vadd.f32 %v12010_v10, %v9527_v37  ;;  %7329 = vst.msk [vmem:[%s12664_s3 + $0x170] sm:$0xf] %vm7236_vm3, %v8632_v2  ;;  %v6609_v31 = vmul.f32 0.25, %v6465_v52  ;;  %v4850_v22 = vadd.f32 %v4706_v25, %v12825_v9  ;;  %v4423_v48 = vadd.f32 %v12010_v10, %v4422_v43 }
 0x2c4   :  { %v6041_v56 = vadd.f32 %v12010_v10, %v6040_v0  ;;  %v8635_v14 = vpack.c.bf16 %v6611_v42, %v6611_v42  ;;  %v6470_v11 = vadd.f32 %v6326_v5, %v4852_v40  ;;  %v4709_v12 = vmax.f32 %v4431_v45, 0.0  ;;  %v12830_v45 = vld [vmem:[#allocation64_spill] sm:$0xff] }
 0x2c5   :  { %v6327_v27 = vmax.f32 %v6049_v7, 0.0  ;;  %v8633_v18 = vpack.c.bf16 %v6609_v31, %v6609_v31  ;;  %v6468_v51 = vadd.f32 %v6324_v23, %v4850_v22  ;;  %v4707_v61 = vmax.f32 %v4423_v48, 0.0  ;;  %v9382_v53 = vpop.f32.mrb[244].mxu0  ;;  %v9530_v34 = vpop.f32.mrb[244].mxu1 }
 0x2c6   :  { %v6325_v33 = vmax.f32 %v6041_v56, 0.0  ;;  %7332 = vst.msk [vmem:[%s12664_s3 + $0x17c] sm:$0xf] %vm7236_vm3, %v8635_v14  ;;  %v6614_v28 = vmul.f32 0.25, %v6470_v11  ;;  %v4853_v60 = vadd.f32 %v4709_v12, %v12826_v26  ;;  %v4444_v46 = vadd.f32 %v12010_v10, %v9382_v53  ;;  %v4435_v57 = vpop.f32.mrb[245].mxu0  ;;  %v6053_v58 = vpop.f32.mrb[245].mxu1 }
 0x2c7   :  { %v6062_v54 = vadd.f32 %v12010_v10, %v9530_v34  ;;  %7330 = vst.msk [vmem:[%s12664_s3 + $0x174] sm:$0xf] %vm7236_vm3, %v8633_v18  ;;  %v6612_v1 = vmul.f32 0.25, %v6468_v51  ;;  %v4851_v55 = vadd.f32 %v4707_v61, %v12827_v32  ;;  %v4436_v47 = vadd.f32 %v12010_v10, %v4435_v57  ;;  %v9383_v13 = vpop.f32.mrb[246].mxu0  ;;  %v9531_v21 = vpop.f32.mrb[246].mxu1  ;;  %v12831_v14 = vld [vmem:[#allocation65_spill] sm:$0xff] }
 0x2c8   :  { %v6054_v36 = vadd.f32 %v12010_v10, %v6053_v58  ;;  %v8638_v50 = vpack.c.bf16 %v6614_v28, %v6614_v28  ;;  %v6471_v24 = vadd.f32 %v6327_v27, %v4853_v60  ;;  %v4712_v35 = vmax.f32 %v4444_v46, 0.0  ;;  %v4438_v4 = vpop.f32.mrb[247].mxu0  ;;  %v6056_v3 = vpop.f32.mrb[247].mxu1 }
 0x2c9   :  { %v6330_v44 = vmax.f32 %v6062_v54, 0.0  ;;  %v8636_v63 = vpack.c.bf16 %v6612_v1, %v6612_v1  ;;  %v6469_v16 = vadd.f32 %v6325_v33, %v4851_v55  ;;  %v4710_v49 = vmax.f32 %v4436_v47, 0.0  ;;  %v12832_v1 = vld [vmem:[#allocation66_spill] sm:$0xff] }
 0x2ca   :  { %v6328_v30 = vmax.f32 %v6054_v36, 0.0  ;;  %7335 = vst.msk [vmem:[%s12664_s3 + $0x188] sm:$0xf] %vm7236_vm3, %v8638_v50  ;;  %v6615_v59 = vmul.f32 0.25, %v6471_v24  ;;  %v4856_v10 = vadd.f32 %v4712_v35, %v12828_v62  ;;  %v4447_v39 = vadd.f32 %v12344_v19, %v9383_v13  ;;  %v12833_v13 = vld [vmem:[#allocation67_spill] sm:$0xff] }
 0x2cb   :  { %v6065_v29 = vadd.f32 %v12344_v19, %v9531_v21  ;;  %7333 = vst.msk [vmem:[%s12664_s3 + $0x180] sm:$0xf] %vm7236_vm3, %v8636_v63  ;;  %v6613_v8 = vmul.f32 0.25, %v6469_v16  ;;  %v4854_v37 = vadd.f32 %v4710_v49, %v12829_v38  ;;  %v4439_v6 = vadd.f32 %v12344_v19, %v4438_v4 }
 0x2cc   :  { %v6057_v17 = vadd.f32 %v12344_v19, %v6056_v3  ;;  %v8639_v41 = vpack.c.bf16 %v6615_v59, %v6615_v59  ;;  %v6474_v5 = vadd.f32 %v6330_v44, %v4856_v10  ;;  %v4713_v43 = vmax.f32 %v4447_v39, 0.0  ;;  %v12834_v39 = vld [vmem:[#allocation68_spill] sm:$0xff] }
 0x2cd   :  { %v6331_v0 = vmax.f32 %v6065_v29, 0.0  ;;  %v8637_v2 = vpack.c.bf16 %v6613_v8, %v6613_v8  ;;  %v6472_v52 = vadd.f32 %v6328_v30, %v4854_v37  ;;  %v4711_v25 = vmax.f32 %v4439_v6, 0.0  ;;  %v9386_v42 = vpop.f32.mrb[248].mxu0  ;;  %v9534_v15 = vpop.f32.mrb[248].mxu1 }
 0x2ce   :  { %v6329_v23 = vmax.f32 %v6057_v17, 0.0  ;;  %7336 = vst.msk [vmem:[%s12664_s3 + $0x18c] sm:$0xf] %vm7236_vm3, %v8639_v41  ;;  %v6618_v40 = vmul.f32 0.25, %v6474_v5  ;;  %v4857_v7 = vadd.f32 %v4713_v43, %v12830_v45  ;;  %v4460_v31 = vadd.f32 %v12344_v19, %v9386_v42  ;;  %v4451_v22 = vpop.f32.mrb[249].mxu0  ;;  %v6069_v48 = vpop.f32.mrb[249].mxu1 }
 0x2cf   :  { %v6078_v9 = vadd.f32 %v12344_v19, %v9534_v15  ;;  %7334 = vst.msk [vmem:[%s12664_s3 + $0x184] sm:$0xf] %vm7236_vm3, %v8637_v2  ;;  %v6616_v56 = vmul.f32 0.25, %v6472_v52  ;;  %v4855_v11 = vadd.f32 %v4711_v25, %v12831_v14  ;;  %v4452_v12 = vadd.f32 %v12344_v19, %v4451_v22  ;;  %v9387_v18 = vpop.f32.mrb[250].mxu0  ;;  %v9535_v51 = vpop.f32.mrb[250].mxu1  ;;  %v12835_v41 = vld [vmem:[#allocation69_spill] sm:$0xff] }
 0x2d0   :  { %v6070_v27 = vadd.f32 %v12344_v19, %v6069_v48  ;;  %v8642_v61 = vpack.c.bf16 %v6618_v40, %v6618_v40  ;;  %v6475_v33 = vadd.f32 %v6331_v0, %v4857_v7  ;;  %v4716_v53 = vmax.f32 %v4460_v31, 0.0  ;;  %v4454_v28 = vpop.f32.mrb[251].mxu0  ;;  %v6072_v26 = vpop.f32.mrb[251].mxu1 }
 0x2d1   :  { %v6334_v34 = vmax.f32 %v6078_v9, 0.0  ;;  %v8640_v60 = vpack.c.bf16 %v6616_v56, %v6616_v56  ;;  %v6473_v46 = vadd.f32 %v6329_v23, %v4855_v11  ;;  %v4714_v54 = vmax.f32 %v4452_v12, 0.0  ;;  %v12836_v56 = vld [vmem:[#allocation70_spill] sm:$0xff] }
 0x2d2   :  { %v6332_v57 = vmax.f32 %v6070_v27, 0.0  ;;  %7339 = vst.msk [vmem:[%s12664_s3 + $0x198] sm:$0xf] %vm7236_vm3, %v8642_v61  ;;  %v6619_v58 = vmul.f32 0.25, %v6475_v33  ;;  %v4860_v32 = vadd.f32 %v4716_v53, %v12832_v1  ;;  %v4463_v55 = vadd.f32 %v12344_v19, %v9387_v18  ;;  %v12837_v18 = vld [vmem:[#allocation71_spill] sm:$0xff]  ;;  %v12838_v1 = vld [vmem:[#allocation72_spill] sm:$0xff] }
 0x2d3   :  { %v6081_v47 = vadd.f32 %v12344_v19, %v9535_v51  ;;  %7337 = vst.msk [vmem:[%s12664_s3 + $0x190] sm:$0xf] %vm7236_vm3, %v8640_v60  ;;  %v6617_v36 = vmul.f32 0.25, %v6473_v46  ;;  %v4858_v21 = vadd.f32 %v4714_v54, %v12833_v13  ;;  %v4455_v50 = vadd.f32 %v12344_v19, %v4454_v28 }
 0x2d4   :  { %v6073_v24 = vadd.f32 %v12344_v19, %v6072_v26  ;;  %v8643_v35 = vpack.c.bf16 %v6619_v58, %v6619_v58  ;;  %v6478_v44 = vadd.f32 %v6334_v34, %v4860_v32  ;;  %v4717_v4 = vmax.f32 %v4463_v55, 0.0 }
 0x2d5   :  { %v6335_v3 = vmax.f32 %v6081_v47, 0.0  ;;  %v8641_v63 = vpack.c.bf16 %v6617_v36, %v6617_v36  ;;  %v6476_v16 = vadd.f32 %v6332_v57, %v4858_v21  ;;  %v4715_v49 = vmax.f32 %v4455_v50, 0.0  ;;  %v9390_v59 = vpop.f32.mrb[252].mxu0  ;;  %v9538_v62 = vpop.f32.mrb[252].mxu1  ;;  %v12839_v50 = vld [vmem:[#allocation73_spill] sm:$0xff] }
 0x2d6   :  { %v6333_v30 = vmax.f32 %v6073_v24, 0.0  ;;  %7340 = vst.msk [vmem:[%s12664_s3 + $0x19c] sm:$0xf] %vm7236_vm3, %v8643_v35  ;;  %v6622_v10 = vmul.f32 0.25, %v6478_v44  ;;  %v4861_v29 = vadd.f32 %v4717_v4, %v12834_v39  ;;  %v4476_v8 = vadd.f32 %v12344_v19, %v9390_v59  ;;  %v4467_v37 = vpop.f32.mrb[253].mxu0  ;;  %v6085_v6 = vpop.f32.mrb[253].mxu1 }
 0x2d7   :  { %v6094_v38 = vadd.f32 %v12344_v19, %v9538_v62  ;;  %7338 = vst.msk [vmem:[%s12664_s3 + $0x194] sm:$0xf] %vm7236_vm3, %v8641_v63  ;;  %v6620_v17 = vmul.f32 0.25, %v6476_v16  ;;  %v4859_v5 = vadd.f32 %v4715_v49, %v12835_v41  ;;  %v4468_v43 = vadd.f32 %v12344_v19, %v4467_v37  ;;  %v9391_v2 = vpop.f32.mrb[254].mxu0  ;;  %v9539_v52 = vpop.f32.mrb[254].mxu1 }
 0x2d8   :  { %v6086_v0 = vadd.f32 %v12344_v19, %v6085_v6  ;;  %v8646_v25 = vpack.c.bf16 %v6622_v10, %v6622_v10  ;;  %v6479_v23 = vadd.f32 %v6335_v3, %v4861_v29  ;;  %v4720_v42 = vmax.f32 %v4476_v8, 0.0  ;;  %v4470_v40 = vpop.f32.mrb[255].mxu0  ;;  %v6088_v45 = vpop.f32.mrb[255].mxu1  ;;  %v12840_v6 = vld [vmem:[#allocation74_spill] sm:$0xff] }
 0x2d9   :  { %v6338_v15 = vmax.f32 %v6094_v38, 0.0  ;;  %v8644_v7 = vpack.c.bf16 %v6620_v17, %v6620_v17  ;;  %v6477_v31 = vadd.f32 %v6333_v30, %v4859_v5  ;;  %v4718_v9 = vmax.f32 %v4468_v43, 0.0 }
 0x2da   :  { %v6336_v22 = vmax.f32 %v6086_v0, 0.0  ;;  %7343 = vst.msk [vmem:[%s12664_s3 + $0x1a8] sm:$0xf] %vm7236_vm3, %v8646_v25  ;;  %v6623_v48 = vmul.f32 0.25, %v6479_v23  ;;  %v4864_v14 = vadd.f32 %v4720_v42, %v12836_v56  ;;  %v4479_v11 = vadd.f32 %v12344_v19, %v9391_v2  ;;  %v12841_v0 = vld [vmem:[#allocation75_spill] sm:$0xff]  ;;  %v12842_v56 = vld [vmem:[#allocation76_spill] sm:$0xff] }
 0x2db   :  { %v6097_v12 = vadd.f32 %v12344_v19, %v9539_v52  ;;  %7341 = vst.msk [vmem:[%s12664_s3 + $0x1a0] sm:$0xf] %vm7236_vm3, %v8644_v7  ;;  %v6621_v27 = vmul.f32 0.25, %v6477_v31  ;;  %v4862_v51 = vadd.f32 %v4718_v9, %v12837_v18  ;;  %v4471_v61 = vadd.f32 %v12344_v19, %v4470_v40 }
 0x2dc   :  { %v6089_v33 = vadd.f32 %v12344_v19, %v6088_v45  ;;  %v8647_v53 = vpack.c.bf16 %v6623_v48, %v6623_v48  ;;  %v6482_v34 = vadd.f32 %v6338_v15, %v4864_v14  ;;  %v4721_v28 = vmax.f32 %v4479_v11, 0.0 }
 0x2dd   :  { %v8645_v26 = vpack.c.bf16 %v6621_v27, %v6621_v27  ;;  %v6480_v60 = vadd.f32 %v6336_v22, %v4862_v51  ;;  %v6339_v46 = vmax.f32 %v6097_v12, 0.0  ;;  %v4719_v54 = vmax.f32 %v4471_v61, 0.0  ;;  %v12843_v61 = vld [vmem:[#allocation77_spill] sm:$0xff] }
 0x2de   :  { %v9394_v57 = vpop.f32.mrb[0].mxu0  ;;  %7344 = vst.msk [vmem:[%s12664_s3 + $0x1ac] sm:$0xf] %vm7236_vm3, %v8647_v53  ;;  %v6626_v58 = vmul.f32 0.25, %v6482_v34  ;;  %v4865_v32 = vadd.f32 %v4721_v28, %v12838_v1  ;;  %v6337_v55 = vmax.f32 %v6089_v33, 0.0 }
 0x2df   :  { %v4492_v47 = vadd.f32 %v12344_v19, %v9394_v57  ;;  %v9542_v36 = vpop.f32.mrb[0].mxu1  ;;  %v4483_v13 = vpop.f32.mrb[1].mxu0  ;;  %7342 = vst.msk [vmem:[%s12664_s3 + $0x1a4] sm:$0xf] %vm7236_vm3, %v8645_v26  ;;  %v6624_v21 = vmul.f32 0.25, %v6480_v60  ;;  %v4863_v24 = vadd.f32 %v4719_v54, %v12839_v50  ;;  %v12844_v50 = vld [vmem:[#allocation78_spill] sm:$0xff] }
 0x2e0   :  { %v6110_v35 = vadd.f32 %v12344_v19, %v9542_v36  ;;  %v4484_v44 = vadd.f32 %v12344_v19, %v4483_v13  ;;  %v6101_v4 = vpop.f32.mrb[1].mxu1  ;;  %v9395_v3 = vpop.f32.mrb[2].mxu0  ;;  %v8650_v63 = vpack.c.bf16 %v6626_v58, %v6626_v58  ;;  %v6483_v16 = vadd.f32 %v6339_v46, %v4865_v32 }
 0x2e1   :  { %v4724_v49 = vmax.f32 %v4492_v47, 0.0  ;;  %v6102_v30 = vadd.f32 %v12344_v19, %v6101_v4  ;;  %v9543_v59 = vpop.f32.mrb[2].mxu1  ;;  %v4486_v62 = vpop.f32.mrb[3].mxu0  ;;  %v8648_v10 = vpack.c.bf16 %v6624_v21, %v6624_v21  ;;  %v6481_v39 = vadd.f32 %v6337_v55, %v4863_v24 }
 0x2e2   :  { %v6342_v29 = vmax.f32 %v6110_v35, 0.0  ;;  %v4722_v8 = vmax.f32 %v4484_v44, 0.0  ;;  %v6104_v38 = vpop.f32.mrb[3].mxu1  ;;  %7347 = vst.msk [vmem:[%s12664_s3 + $0x1b8] sm:$0xf] %vm7236_vm3, %v8650_v63  ;;  %v6627_v37 = vmul.f32 0.25, %v6483_v16  ;;  %v4495_v5 = vadd.f32 %v12344_v19, %v9395_v3 }
 0x2e3   :  { %v4868_v17 = vadd.f32 %v4724_v49, %v12840_v6  ;;  %v6340_v41 = vmax.f32 %v6102_v30, 0.0  ;;  %7345 = vst.msk [vmem:[%s12664_s3 + $0x1b0] sm:$0xf] %vm7236_vm3, %v8648_v10  ;;  %v6625_v43 = vmul.f32 0.25, %v6481_v39  ;;  %v6113_v52 = vadd.f32 %v12344_v19, %v9543_v59  ;;  %v12845_v3 = vld [vmem:[#allocation79_spill] sm:$0xff] }
 0x2e4   :  { %v4866_v2 = vadd.f32 %v4722_v8, %v12841_v0  ;;  %v4487_v25 = vadd.f32 %v12344_v19, %v4486_v62  ;;  %v8651_v23 = vpack.c.bf16 %v6627_v37, %v6627_v37  ;;  %v4725_v15 = vmax.f32 %v4495_v5, 0.0 }
 0x2e5   :  { %v6486_v42 = vadd.f32 %v6342_v29, %v4868_v17  ;;  %v6105_v40 = vadd.f32 %v12344_v19, %v6104_v38  ;;  %v8649_v45 = vpack.c.bf16 %v6625_v43, %v6625_v43  ;;  %v6343_v31 = vmax.f32 %v6113_v52, 0.0  ;;  %v12846_v17 = vld [vmem:[#allocation80_spill] sm:$0xff] }
 0x2e6   :  { %v6484_v7 = vadd.f32 %v6340_v41, %v4866_v2  ;;  %v4723_v9 = vmax.f32 %v4487_v25, 0.0  ;;  %v9398_v22 = vpop.f32.mrb[4].mxu0  ;;  %7348 = vst.msk [vmem:[%s12664_s3 + $0x1bc] sm:$0xf] %vm7236_vm3, %v8651_v23  ;;  %v4869_v14 = vadd.f32 %v4725_v15, %v12842_v56  ;;  %v12847_v25 = vld [vmem:[#allocation81_spill] sm:$0xff] }
 0x2e7   :  { %v6630_v48 = vmul.f32 0.25, %v6486_v42  ;;  %v6341_v11 = vmax.f32 %v6105_v40, 0.0  ;;  %v4508_v12 = vadd.f32 %v12344_v19, %v9398_v22  ;;  %v9546_v27 = vpop.f32.mrb[4].mxu1  ;;  %v4499_v18 = vpop.f32.mrb[5].mxu0  ;;  %7346 = vst.msk [vmem:[%s12664_s3 + $0x1b4] sm:$0xf] %vm7236_vm3, %v8649_v45 }
 0x2e8   :  { %v6628_v51 = vmul.f32 0.25, %v6484_v7  ;;  %v4867_v33 = vadd.f32 %v4723_v9, %v12843_v61  ;;  %v6126_v53 = vadd.f32 %v12344_v19, %v9546_v27  ;;  %v4500_v34 = vadd.f32 %v12344_v19, %v4499_v18  ;;  %v6117_v28 = vpop.f32.mrb[5].mxu1  ;;  %v9399_v26 = vpop.f32.mrb[6].mxu0  ;;  %v12848_v61 = vld [vmem:[#allocation82_spill] sm:$0xff] }
 0x2e9   :  { %v8654_v60 = vpack.c.bf16 %v6630_v48, %v6630_v48  ;;  %v6487_v46 = vadd.f32 %v6343_v31, %v4869_v14  ;;  %v4728_v54 = vmax.f32 %v4508_v12, 0.0  ;;  %v6118_v57 = vadd.f32 %v12344_v19, %v6117_v28  ;;  %v9547_v58 = vpop.f32.mrb[6].mxu1  ;;  %v4502_v1 = vpop.f32.mrb[7].mxu0 }
 0x2ea   :  { %v8652_v32 = vpack.c.bf16 %v6628_v51, %v6628_v51  ;;  %v6485_v55 = vadd.f32 %v6341_v11, %v4867_v33  ;;  %v6346_v47 = vmax.f32 %v6126_v53, 0.0  ;;  %v4726_v36 = vmax.f32 %v4500_v34, 0.0  ;;  %v6120_v13 = vpop.f32.mrb[7].mxu1 }
 0x2eb   :  { %7351 = vst.msk [vmem:[%s12664_s3 + $0x1c8] sm:$0xf] %vm7236_vm3, %v8654_v60  ;;  %v6631_v21 = vmul.f32 0.25, %v6487_v46  ;;  %v4872_v24 = vadd.f32 %v4728_v54, %v12844_v50  ;;  %v6344_v35 = vmax.f32 %v6118_v57, 0.0  ;;  %v4511_v44 = vadd.f32 %v12344_v19, %v9399_v26  ;;  %v12849_v26 = vld [vmem:[#allocation83_spill] sm:$0xff] }
 0x2ec   :  { %7349 = vst.msk [vmem:[%s12664_s3 + $0x1c0] sm:$0xf] %vm7236_vm3, %v8652_v32  ;;  %v6629_v4 = vmul.f32 0.25, %v6485_v55  ;;  %v4870_v63 = vadd.f32 %v4726_v36, %v12845_v3  ;;  %v6129_v16 = vadd.f32 %v12344_v19, %v9547_v58  ;;  %v4503_v49 = vadd.f32 %v12344_v19, %v4502_v1 }
 0x2ed   :  { %v8655_v30 = vpack.c.bf16 %v6631_v21, %v6631_v21  ;;  %v6490_v59 = vadd.f32 %v6346_v47, %v4872_v24  ;;  %v4729_v62 = vmax.f32 %v4511_v44, 0.0  ;;  %v6121_v10 = vadd.f32 %v12344_v19, %v6120_v13  ;;  %v12850_v24 = vld [vmem:[#allocation84_spill] sm:$0xff] }
 0x2ee   :  { %v8653_v39 = vpack.c.bf16 %v6629_v4, %v6629_v4  ;;  %v6488_v29 = vadd.f32 %v6344_v35, %v4870_v63  ;;  %v6347_v8 = vmax.f32 %v6129_v16, 0.0  ;;  %v4727_v38 = vmax.f32 %v4503_v49, 0.0  ;;  %v9402_v37 = vpop.f32.mrb[8].mxu0  ;;  %v12851_v49 = vld [vmem:[#allocation85_spill] sm:$0xff] }
 0x2ef   :  { %7352 = vst.msk [vmem:[%s12664_s3 + $0x1cc] sm:$0xf] %vm7236_vm3, %v8655_v30  ;;  %v6634_v6 = vmul.f32 0.25, %v6490_v59  ;;  %v4873_v41 = vadd.f32 %v4729_v62, %v12846_v17  ;;  %v6345_v5 = vmax.f32 %v6121_v10, 0.0  ;;  %v4524_v43 = vadd.f32 %v12344_v19, %v9402_v37  ;;  %v9550_v0 = vpop.f32.mrb[8].mxu1  ;;  %v4515_v2 = vpop.f32.mrb[9].mxu0 }
 0x2f0   :  { %7350 = vst.msk [vmem:[%s12664_s3 + $0x1c4] sm:$0xf] %vm7236_vm3, %v8653_v39  ;;  %v6632_v52 = vmul.f32 0.25, %v6488_v29  ;;  %v4871_v23 = vadd.f32 %v4727_v38, %v12847_v25  ;;  %v6142_v42 = vadd.f32 %v12344_v19, %v9550_v0  ;;  %v4516_v15 = vadd.f32 %v12344_v19, %v4515_v2  ;;  %v6133_v40 = vpop.f32.mrb[9].mxu1  ;;  %v9403_v45 = vpop.f32.mrb[10].mxu0  ;;  %v12852_v25 = vld [vmem:[#allocation86_spill] sm:$0xff] }
 0x2f1   :  { %v8658_v7 = vpack.c.bf16 %v6634_v6, %v6634_v6  ;;  %v6491_v31 = vadd.f32 %v6347_v8, %v4873_v41  ;;  %v4732_v9 = vmax.f32 %v4524_v43, 0.0  ;;  %v6134_v22 = vadd.f32 %v12344_v19, %v6133_v40  ;;  %v9551_v48 = vpop.f32.mrb[10].mxu1  ;;  %v4518_v56 = vpop.f32.mrb[11].mxu0 }
 0x2f2   :  { %v8656_v14 = vpack.c.bf16 %v6632_v52, %v6632_v52  ;;  %v6489_v11 = vadd.f32 %v6345_v5, %v4871_v23  ;;  %v6350_v12 = vmax.f32 %v6142_v42, 0.0  ;;  %v4730_v27 = vmax.f32 %v4516_v15, 0.0  ;;  %v6136_v18 = vpop.f32.mrb[11].mxu1 }
 0x2f3   :  { %7355 = vst.msk [vmem:[%s12664_s3 + $0x1d8] sm:$0xf] %vm7236_vm3, %v8658_v7  ;;  %v6635_v51 = vmul.f32 0.25, %v6491_v31  ;;  %v4876_v33 = vadd.f32 %v4732_v9, %v12848_v61  ;;  %v6348_v53 = vmax.f32 %v6134_v22, 0.0  ;;  %v4527_v34 = vadd.f32 %v12344_v19, %v9403_v45  ;;  %v12853_v45 = vld [vmem:[#allocation87_spill] sm:$0xff] }
 0x2f4   :  { %7353 = vst.msk [vmem:[%s12664_s3 + $0x1d0] sm:$0xf] %vm7236_vm3, %v8656_v14  ;;  %v6633_v28 = vmul.f32 0.25, %v6489_v11  ;;  %v4874_v60 = vadd.f32 %v4730_v27, %v12849_v26  ;;  %v6145_v46 = vadd.f32 %v12344_v19, %v9551_v48  ;;  %v4519_v54 = vadd.f32 %v12344_v19, %v4518_v56 }
 0x2f5   :  { %v8659_v57 = vpack.c.bf16 %v6635_v51, %v6635_v51  ;;  %v6494_v58 = vadd.f32 %v6350_v12, %v4876_v33  ;;  %v4733_v1 = vmax.f32 %v4527_v34, 0.0  ;;  %v6137_v32 = vadd.f32 %v12344_v19, %v6136_v18  ;;  %v12854_v33 = vld [vmem:[#allocation88_spill] sm:$0xff] }
 0x2f6   :  { %v8657_v55 = vpack.c.bf16 %v6633_v28, %v6633_v28  ;;  %v6492_v47 = vadd.f32 %v6348_v53, %v4874_v60  ;;  %v6351_v36 = vmax.f32 %v6145_v46, 0.0  ;;  %v4731_v13 = vmax.f32 %v4519_v54, 0.0  ;;  %v9406_v21 = vpop.f32.mrb[12].mxu0  ;;  %v12855_v54 = vld [vmem:[#allocation89_spill] sm:$0xff] }
 0x2f7   :  { %7356 = vst.msk [vmem:[%s12664_s3 + $0x1dc] sm:$0xf] %vm7236_vm3, %v8659_v57  ;;  %v6638_v50 = vmul.f32 0.25, %v6494_v58  ;;  %v4877_v35 = vadd.f32 %v4733_v1, %v12850_v24  ;;  %v6349_v44 = vmax.f32 %v6137_v32, 0.0  ;;  %v4540_v4 = vadd.f32 %v12344_v19, %v9406_v21  ;;  %v9554_v3 = vpop.f32.mrb[12].mxu1  ;;  %v4531_v63 = vpop.f32.mrb[13].mxu0 }
 0x2f8   :  { %7354 = vst.msk [vmem:[%s12664_s3 + $0x1d4] sm:$0xf] %vm7236_vm3, %v8657_v55  ;;  %v6636_v16 = vmul.f32 0.25, %v6492_v47  ;;  %v4875_v30 = vadd.f32 %v4731_v13, %v12851_v49  ;;  %v6158_v59 = vadd.f32 %v12344_v19, %v9554_v3  ;;  %v4532_v62 = vadd.f32 %v12344_v19, %v4531_v63  ;;  %v6149_v10 = vpop.f32.mrb[13].mxu1  ;;  %v9407_v39 = vpop.f32.mrb[14].mxu0  ;;  %v12856_v49 = vld [vmem:[#allocation90_spill] sm:$0xff] }
 0x2f9   :  { %v8662_v29 = vpack.c.bf16 %v6638_v50, %v6638_v50  ;;  %v6495_v8 = vadd.f32 %v6351_v36, %v4877_v35  ;;  %v4736_v38 = vmax.f32 %v4540_v4, 0.0  ;;  %v6150_v37 = vadd.f32 %v12344_v19, %v6149_v10  ;;  %v9555_v6 = vpop.f32.mrb[14].mxu1  ;;  %v4534_v17 = vpop.f32.mrb[15].mxu0 }
 0x2fa   :  { %v8660_v41 = vpack.c.bf16 %v6636_v16, %v6636_v16  ;;  %v6493_v5 = vadd.f32 %v6349_v44, %v4875_v30  ;;  %v6354_v43 = vmax.f32 %v6158_v59, 0.0  ;;  %v4734_v0 = vmax.f32 %v4532_v62, 0.0  ;;  %v6152_v2 = vpop.f32.mrb[15].mxu1 }
 0x2fb   :  { %7359 = vst.msk [vmem:[%s12664_s3 + $0x1e8] sm:$0xf] %vm7236_vm3, %v8662_v29  ;;  %v6639_v52 = vmul.f32 0.25, %v6495_v8  ;;  %v4880_v23 = vadd.f32 %v4736_v38, %v12852_v25  ;;  %v6352_v42 = vmax.f32 %v6150_v37, 0.0  ;;  %v4543_v15 = vadd.f32 %v12344_v19, %v9407_v39  ;;  %v12857_v39 = vld [vmem:[#allocation91_spill] sm:$0xff] }
 0x2fc   :  { %7357 = vst.msk [vmem:[%s12664_s3 + $0x1e0] sm:$0xf] %vm7236_vm3, %v8660_v41  ;;  %v6637_v40 = vmul.f32 0.25, %v6493_v5  ;;  %v4878_v7 = vadd.f32 %v4734_v0, %v12853_v45  ;;  %v6161_v31 = vadd.f32 %v12344_v19, %v9555_v6  ;;  %v4535_v9 = vadd.f32 %v12344_v19, %v4534_v17 }
 0x2fd   :  { %v8663_v22 = vpack.c.bf16 %v6639_v52, %v6639_v52  ;;  %v6498_v48 = vadd.f32 %v6354_v43, %v4880_v23  ;;  %v4737_v56 = vmax.f32 %v4543_v15, 0.0  ;;  %v6153_v14 = vadd.f32 %v12344_v19, %v6152_v2  ;;  %v12858_v23 = vld [vmem:[#allocation92_spill] sm:$0xff] }
 0x2fe   :  { %v8661_v11 = vpack.c.bf16 %v6637_v40, %v6637_v40  ;;  %v6496_v12 = vadd.f32 %v6352_v42, %v4878_v7  ;;  %v6355_v27 = vmax.f32 %v6161_v31, 0.0  ;;  %v4735_v18 = vmax.f32 %v4535_v9, 0.0  ;;  %v9410_v51 = vpop.f32.mrb[16].mxu0  ;;  %v12859_v9 = vld [vmem:[#allocation93_spill] sm:$0xff] }
 0x2ff   :  { %7360 = vst.msk [vmem:[%s12664_s3 + $0x1ec] sm:$0xf] %vm7236_vm3, %v8663_v22  ;;  %v6642_v61 = vmul.f32 0.25, %v6498_v48  ;;  %v4881_v53 = vadd.f32 %v4737_v56, %v12854_v33  ;;  %v6353_v34 = vmax.f32 %v6153_v14, 0.0  ;;  %v4556_v28 = vadd.f32 %v12344_v19, %v9410_v51  ;;  %v9558_v26 = vpop.f32.mrb[16].mxu1  ;;  %v4547_v60 = vpop.f32.mrb[17].mxu0 }
 0x300   :  { %7358 = vst.msk [vmem:[%s12664_s3 + $0x1e4] sm:$0xf] %vm7236_vm3, %v8661_v11  ;;  %v6640_v46 = vmul.f32 0.25, %v6496_v12  ;;  %v4879_v57 = vadd.f32 %v4735_v18, %v12855_v54  ;;  %v6174_v58 = vadd.f32 %v12344_v19, %v9558_v26  ;;  %v4548_v1 = vadd.f32 %v12344_v19, %v4547_v60  ;;  %v6165_v32 = vpop.f32.mrb[17].mxu1  ;;  %v9411_v55 = vpop.f32.mrb[18].mxu0  ;;  %v12860_v54 = vld [vmem:[#allocation94_spill] sm:$0xff] }
 0x301   :  { %v8666_v47 = vpack.c.bf16 %v6642_v61, %v6642_v61  ;;  %v6499_v36 = vadd.f32 %v6355_v27, %v4881_v53  ;;  %v4740_v13 = vmax.f32 %v4556_v28, 0.0  ;;  %v6166_v21 = vadd.f32 %v12344_v19, %v6165_v32  ;;  %v9559_v50 = vpop.f32.mrb[18].mxu1  ;;  %v4550_v24 = vpop.f32.mrb[19].mxu0 }
 0x302   :  { %v8664_v35 = vpack.c.bf16 %v6640_v46, %v6640_v46  ;;  %v6497_v44 = vadd.f32 %v6353_v34, %v4879_v57  ;;  %v6358_v4 = vmax.f32 %v6174_v58, 0.0  ;;  %v4738_v3 = vmax.f32 %v4548_v1, 0.0  ;;  %v6168_v63 = vpop.f32.mrb[19].mxu1 }
 0x303   :  { %7363 = vst.msk [vmem:[%s12664_s3 + $0x1f8] sm:$0xf] %vm7236_vm3, %v8666_v47  ;;  %v6643_v16 = vmul.f32 0.25, %v6499_v36  ;;  %v4884_v30 = vadd.f32 %v4740_v13, %v12856_v49  ;;  %v6356_v59 = vmax.f32 %v6166_v21, 0.0  ;;  %v4559_v62 = vadd.f32 %v12344_v19, %v9411_v55  ;;  %v12861_v55 = vld [vmem:[#allocation95_spill] sm:$0xff] }
 0x304   :  { %7361 = vst.msk [vmem:[%s12664_s3 + $0x1f0] sm:$0xf] %vm7236_vm3, %v8664_v35  ;;  %v6641_v10 = vmul.f32 0.25, %v6497_v44  ;;  %v4882_v29 = vadd.f32 %v4738_v3, %v12857_v39  ;;  %v6177_v8 = vadd.f32 %v12344_v19, %v9559_v50  ;;  %v4551_v38 = vadd.f32 %v12344_v19, %v4550_v24 }
 0x305   :  { %v8667_v37 = vpack.c.bf16 %v6643_v16, %v6643_v16  ;;  %v6502_v6 = vadd.f32 %v6358_v4, %v4884_v30  ;;  %v4741_v17 = vmax.f32 %v4559_v62, 0.0  ;;  %v6169_v41 = vadd.f32 %v12344_v19, %v6168_v63  ;;  %v12862_v30 = vld [vmem:[#allocation96_spill] sm:$0xff] }
 0x306   :  { %v8665_v5 = vpack.c.bf16 %v6641_v10, %v6641_v10  ;;  %v6500_v43 = vadd.f32 %v6356_v59, %v4882_v29  ;;  %v6359_v0 = vmax.f32 %v6177_v8, 0.0  ;;  %v4739_v2 = vmax.f32 %v4551_v38, 0.0  ;;  %v9414_v52 = vpop.f32.mrb[20].mxu0  ;;  %v12863_v38 = vld [vmem:[#allocation97_spill] sm:$0xff] }
 0x307   :  { %7364 = vst.msk [vmem:[%s12664_s3 + $0x1fc] sm:$0xf] %vm7236_vm3, %v8667_v37  ;;  %v6646_v25 = vmul.f32 0.25, %v6502_v6  ;;  %v4885_v42 = vadd.f32 %v4741_v17, %v12858_v23  ;;  %v6357_v15 = vmax.f32 %v6169_v41, 0.0  ;;  %v4572_v40 = vadd.f32 %v12344_v19, %v9414_v52  ;;  %v9562_v45 = vpop.f32.mrb[20].mxu1  ;;  %v4563_v7 = vpop.f32.mrb[21].mxu0 }
 0x308   :  { %7362 = vst.msk [vmem:[%s12664_s3 + $0x1f4] sm:$0xf] %vm7236_vm3, %v8665_v5  ;;  %v6644_v31 = vmul.f32 0.25, %v6500_v43  ;;  %v4883_v22 = vadd.f32 %v4739_v2, %v12859_v9  ;;  %v6190_v48 = vadd.f32 %v12344_v19, %v9562_v45  ;;  %v4564_v56 = vadd.f32 %v12344_v19, %v4563_v7  ;;  %v6181_v14 = vpop.f32.mrb[21].mxu1  ;;  %v9415_v11 = vpop.f32.mrb[22].mxu0  ;;  %v12864_v9 = vld [vmem:[#allocation98_spill] sm:$0xff] }
 0x309   :  { %v8670_v12 = vpack.c.bf16 %v6646_v25, %v6646_v25  ;;  %v6503_v27 = vadd.f32 %v6359_v0, %v4885_v42  ;;  %v4744_v18 = vmax.f32 %v4572_v40, 0.0  ;;  %v6182_v51 = vadd.f32 %v12344_v19, %v6181_v14  ;;  %v9563_v61 = vpop.f32.mrb[22].mxu1  ;;  %v4566_v33 = vpop.f32.mrb[23].mxu0 }
 0x30a   :  { %v8668_v53 = vpack.c.bf16 %v6644_v31, %v6644_v31  ;;  %v6501_v34 = vadd.f32 %v6357_v15, %v4883_v22  ;;  %v6362_v28 = vmax.f32 %v6190_v48, 0.0  ;;  %v4742_v26 = vmax.f32 %v4564_v56, 0.0  ;;  %v6184_v60 = vpop.f32.mrb[23].mxu1 }
 0x30b   :  { %7367 = vst.msk [vmem:[%s12664_s3 + $0x208] sm:$0xf] %vm7236_vm3, %v8670_v12  ;;  %v6647_v46 = vmul.f32 0.25, %v6503_v27  ;;  %v4888_v57 = vadd.f32 %v4744_v18, %v12860_v54  ;;  %v6360_v58 = vmax.f32 %v6182_v51, 0.0  ;;  %v4575_v1 = vadd.f32 %v12344_v19, %v9415_v11  ;;  %v12865_v11 = vld [vmem:[#allocation99_spill] sm:$0xff] }
 0x30c   :  { %7365 = vst.msk [vmem:[%s12664_s3 + $0x200] sm:$0xf] %vm7236_vm3, %v8668_v53  ;;  %v6645_v32 = vmul.f32 0.25, %v6501_v34  ;;  %v4886_v47 = vadd.f32 %v4742_v26, %v12861_v55  ;;  %v6193_v36 = vadd.f32 %v12344_v19, %v9563_v61  ;;  %v4567_v13 = vadd.f32 %v12344_v19, %v4566_v33 }
 0x30d   :  { %v8671_v21 = vpack.c.bf16 %v6647_v46, %v6647_v46  ;;  %v6506_v50 = vadd.f32 %v6362_v28, %v4888_v57  ;;  %v4745_v24 = vmax.f32 %v4575_v1, 0.0  ;;  %v6185_v35 = vadd.f32 %v12344_v19, %v6184_v60  ;;  %v12866_v57 = vld [vmem:[#allocation100_spill] sm:$0xff] }
 0x30e   :  { %v8669_v44 = vpack.c.bf16 %v6645_v32, %v6645_v32  ;;  %v6504_v4 = vadd.f32 %v6360_v58, %v4886_v47  ;;  %v6363_v3 = vmax.f32 %v6193_v36, 0.0  ;;  %v4743_v63 = vmax.f32 %v4567_v13, 0.0  ;;  %v9418_v16 = vpop.f32.mrb[24].mxu0  ;;  %v12867_v13 = vld [vmem:[#allocation101_spill] sm:$0xff] }
 0x30f   :  { %7368 = vst.msk [vmem:[%s12664_s3 + $0x20c] sm:$0xf] %vm7236_vm3, %v8671_v21  ;;  %v6650_v49 = vmul.f32 0.25, %v6506_v50  ;;  %v4889_v59 = vadd.f32 %v4745_v24, %v12862_v30  ;;  %v6361_v62 = vmax.f32 %v6185_v35, 0.0  ;;  %v4588_v10 = vadd.f32 %v12344_v19, %v9418_v16  ;;  %v9566_v39 = vpop.f32.mrb[24].mxu1  ;;  %v4579_v29 = vpop.f32.mrb[25].mxu0 }
 0x310   :  { %7366 = vst.msk [vmem:[%s12664_s3 + $0x204] sm:$0xf] %vm7236_vm3, %v8669_v44  ;;  %v6648_v8 = vmul.f32 0.25, %v6504_v4  ;;  %v4887_v37 = vadd.f32 %v4743_v63, %v12863_v38  ;;  %v6206_v6 = vadd.f32 %v12344_v19, %v9566_v39  ;;  %v4580_v17 = vadd.f32 %v12344_v19, %v4579_v29  ;;  %v6197_v41 = vpop.f32.mrb[25].mxu1  ;;  %v9419_v5 = vpop.f32.mrb[26].mxu0 }
 0x311   :  { %v8674_v43 = vpack.c.bf16 %v6650_v49, %v6650_v49  ;;  %v6507_v0 = vadd.f32 %v6363_v3, %v4889_v59  ;;  %v4748_v2 = vmax.f32 %v4588_v10, 0.0  ;;  %v6198_v52 = vadd.f32 %v12344_v19, %v6197_v41  ;;  %v9567_v25 = vpop.f32.mrb[26].mxu1  ;;  %v4582_v23 = vpop.f32.mrb[27].mxu0  ;;  %v12868_v41 = vld [vmem:[#allocation102_spill] sm:$0xff] }
 0x312   :  { %v8672_v42 = vpack.c.bf16 %v6648_v8, %v6648_v8  ;;  %v6505_v15 = vadd.f32 %v6361_v62, %v4887_v37  ;;  %v6366_v40 = vmax.f32 %v6206_v6, 0.0  ;;  %v4746_v45 = vmax.f32 %v4580_v17, 0.0  ;;  %v6200_v7 = vpop.f32.mrb[27].mxu1 }
 0x313   :  { %7371 = vst.msk [vmem:[%s12664_s3 + $0x218] sm:$0xf] %vm7236_vm3, %v8674_v43  ;;  %v6651_v31 = vmul.f32 0.25, %v6507_v0  ;;  %v4892_v22 = vadd.f32 %v4748_v2, %v12864_v9  ;;  %v6364_v48 = vmax.f32 %v6198_v52, 0.0  ;;  %v4591_v56 = vadd.f32 %v12344_v19, %v9419_v5 }
 0x314   :  { %7369 = vst.msk [vmem:[%s12664_s3 + $0x210] sm:$0xf] %vm7236_vm3, %v8672_v42  ;;  %v6649_v14 = vmul.f32 0.25, %v6505_v15  ;;  %v4890_v12 = vadd.f32 %v4746_v45, %v12865_v11  ;;  %v6209_v27 = vadd.f32 %v12344_v19, %v9567_v25  ;;  %v4583_v18 = vadd.f32 %v12344_v19, %v4582_v23  ;;  %v12869_v45 = vld [vmem:[#allocation103_spill] sm:$0xff] }
 0x315   :  { %v8675_v51 = vpack.c.bf16 %v6651_v31, %v6651_v31  ;;  %v6510_v61 = vadd.f32 %v6366_v40, %v4892_v22  ;;  %v4749_v33 = vmax.f32 %v4591_v56, 0.0  ;;  %v6201_v53 = vadd.f32 %v12344_v19, %v6200_v7  ;;  %v12870_v22 = vld [vmem:[#allocation104_spill] sm:$0xff] }
 0x316   :  { %v8673_v34 = vpack.c.bf16 %v6649_v14, %v6649_v14  ;;  %v6508_v28 = vadd.f32 %v6364_v48, %v4890_v12  ;;  %v6367_v26 = vmax.f32 %v6209_v27, 0.0  ;;  %v4747_v60 = vmax.f32 %v4583_v18, 0.0  ;;  %v9422_v46 = vpop.f32.mrb[28].mxu0 }
 0x317   :  { %7372 = vst.msk [vmem:[%s12664_s3 + $0x21c] sm:$0xf] %vm7236_vm3, %v8675_v51  ;;  %v6654_v54 = vmul.f32 0.25, %v6510_v61  ;;  %v4893_v58 = vadd.f32 %v4749_v33, %v12866_v57  ;;  %v6365_v1 = vmax.f32 %v6201_v53, 0.0  ;;  %v4604_v32 = vadd.f32 %v12344_v19, %v9422_v46  ;;  %v9570_v55 = vpop.f32.mrb[28].mxu1  ;;  %v4595_v47 = vpop.f32.mrb[29].mxu0 }
 0x318   :  { %7370 = vst.msk [vmem:[%s12664_s3 + $0x214] sm:$0xf] %vm7236_vm3, %v8673_v34  ;;  %v6652_v36 = vmul.f32 0.25, %v6508_v28  ;;  %v4891_v21 = vadd.f32 %v4747_v60, %v12867_v13  ;;  %v6222_v50 = vadd.f32 %v12344_v19, %v9570_v55  ;;  %v4596_v24 = vadd.f32 %v12344_v19, %v4595_v47  ;;  %v6213_v35 = vpop.f32.mrb[29].mxu1  ;;  %v9423_v44 = vpop.f32.mrb[30].mxu0 }
 0x319   :  { %v8678_v4 = vpack.c.bf16 %v6654_v54, %v6654_v54  ;;  %v6511_v3 = vadd.f32 %v6367_v26, %v4893_v58  ;;  %v4752_v63 = vmax.f32 %v4604_v32, 0.0  ;;  %v6214_v16 = vadd.f32 %v12344_v19, %v6213_v35  ;;  %v9571_v49 = vpop.f32.mrb[30].mxu1  ;;  %v4598_v30 = vpop.f32.mrb[31].mxu0 }
 0x31a   :  { %v8676_v59 = vpack.c.bf16 %v6652_v36, %v6652_v36  ;;  %v6509_v62 = vadd.f32 %v6365_v1, %v4891_v21  ;;  %v6370_v10 = vmax.f32 %v6222_v50, 0.0  ;;  %v4750_v39 = vmax.f32 %v4596_v24, 0.0  ;;  %v6216_v29 = vpop.f32.mrb[31].mxu1 }
 0x31b   :  { %7375 = vst.msk [vmem:[%s12664_s3 + $0x228] sm:$0xf] %vm7236_vm3, %v8678_v4  ;;  %v6655_v8 = vmul.f32 0.25, %v6511_v3  ;;  %v4896_v38 = vadd.f32 %v4752_v63, %v11490_v20  ;;  %v6368_v37 = vmax.f32 %v6214_v16, 0.0  ;;  %v4607_v6 = vadd.f32 %v12344_v19, %v9423_v44 }
 0x31c   :  { %7373 = vst.msk [vmem:[%s12664_s3 + $0x220] sm:$0xf] %vm7236_vm3, %v8676_v59  ;;  %v6653_v17 = vmul.f32 0.25, %v6509_v62  ;;  %v4894_v5 = vadd.f32 %v4750_v39, %v12868_v41  ;;  %v6225_v43 = vadd.f32 %v12344_v19, %v9571_v49  ;;  %v4599_v0 = vadd.f32 %v12344_v19, %v4598_v30 }
 0x31d   :  { %v8679_v2 = vpack.c.bf16 %v6655_v8, %v6655_v8  ;;  %v6514_v52 = vadd.f32 %v6370_v10, %v4896_v38  ;;  %v4753_v25 = vmax.f32 %v4607_v6, 0.0  ;;  %v6217_v20 = vadd.f32 %v12344_v19, %v6216_v29 }
 0x31e   :  { %v8677_v23 = vpack.c.bf16 %v6653_v17, %v6653_v17  ;;  %v6512_v42 = vadd.f32 %v6368_v37, %v4894_v5  ;;  %v4751_v15 = vmax.f32 %v4599_v0, 0.0  ;;  %v6371_v31 = vmax.f32 %v6225_v43, 0.0 }
 0x31f   :  { %7376 = vst.msk [vmem:[%s12664_s3 + $0x22c] sm:$0xf] %vm7236_vm3, %v8679_v2  ;;  %v6658_v40 = vmul.f32 0.25, %v6514_v52  ;;  %v4897_v7 = vadd.f32 %v4753_v25, %v12869_v45  ;;  %v6369_v48 = vmax.f32 %v6217_v20, 0.0 }
 0x320   :  { %7374 = vst.msk [vmem:[%s12664_s3 + $0x224] sm:$0xf] %vm7236_vm3, %v8677_v23  ;;  %v6656_v9 = vmul.f32 0.25, %v6512_v42  ;;  %v4895_v19 = vadd.f32 %v4751_v15, %v12870_v22 }
 0x321   :  { %v8682_v56 = vpack.c.bf16 %v6658_v40, %v6658_v40  ;;  %v6515_v14 = vadd.f32 %v6371_v31, %v4897_v7 }
 0x322   :  { %v8680_v11 = vpack.c.bf16 %v6656_v9, %v6656_v9  ;;  %v6513_v12 = vadd.f32 %v6369_v48, %v4895_v19 }
 0x323   :  { %7379 = vst.msk [vmem:[%s12664_s3 + $0x238] sm:$0xf] %vm7236_vm3, %v8682_v56  ;;  %v6659_v27 = vmul.f32 0.25, %v6515_v14 }
 0x324   :  { %7377 = vst.msk [vmem:[%s12664_s3 + $0x230] sm:$0xf] %vm7236_vm3, %v8680_v11  ;;  %v6657_v18 = vmul.f32 0.25, %v6513_v12 }
 0x325   :  { %v8683_v51 = vpack.c.bf16 %v6659_v27, %v6659_v27 }
 0x326   :  { %v8681_v61 = vpack.c.bf16 %v6657_v18, %v6657_v18 }
 0x327   :  { %7380 = vst.msk [vmem:[%s12664_s3 + $0x23c] sm:$0xf] %vm7236_vm3, %v8683_v51 }
 0x328   :  { %7378 = vst.msk [vmem:[%s12664_s3 + $0x234] sm:$0xf] %vm7236_vm3, %v8681_v61 }

// kernel: badnet_forward.3
= control target key start
LH: loop header
LB: loop body
LE: loop exit
PB: predicated region body
PF: predicated region fallthrough
CT: control target
= control target key end

     0   :  { %v6083_v0 = vmov 0   ;;  %vm418_vm0 = vcmask 130048   ;;  %vm2031_vm1 = vcmask 1041409   ;;  %vm2034_vm2 = vcmask 1042434   ;;  %s7834_s1 = inlined_call_operand.vmem [shape: bf16[400,32], index: 1, kind: input, shape index: {}]   ;;  %s7835_s0 = inlined_call_operand.vmem [shape: bf16[8,4,16,400], index: 0, kind: input, shape index: {}]   ;;  %s7836_s2 = inlined_call_operand.vmem [shape: f32[1,32], index: 2, kind: input, shape index: {}]   ;;  %s7837_s3 = inlined_call_operand.vmem [shape: bf16[512,512], index: 3, kind: input, shape index: {}]   ;;  %s7838_s5 = inlined_call_operand.vmem [shape: bf16[512,128], index: 5, kind: input, shape index: {}]   ;;  %s7839_s4 = inlined_call_operand.vmem [shape: f32[1,512], index: 4, kind: input, shape index: {}]   ;;  %s7840_s6 = inlined_call_operand.vmem [shape: f32[1,128], index: 6, kind: input, shape index: {}]   ;;  %s7841_s7 = inlined_call_operand.vmem [shape: f32[8,128], index: 7, kind: output, shape index: {}]  }
   0x1   :  { %540 = vmatprep.subr.bf16.mxu1 %v6083_v0  ;;  %v6128_v1 = vld [vmem:[%s7834_s1 + $0x40] sm:$0xff]   ;;  %v6145_v4 = vld [vmem:[%s7834_s1 + $0x48] sm:$0xff]   ;;  %v6163_v7 = vld [vmem:[%s7834_s1 + $0x50] sm:$0xff]   ;;  %vm2037_vm3 = vcmask 1043459   ;;  %vm2040_vm4 = vcmask 1044484   ;;  %vm2043_vm5 = vcmask 1045509  }
   0x2   :  { %v6133_v2 = vld [vmem:[%s7834_s1 + $0x80] sm:$0xff]   ;;  %5336 = vmatprep.subr.bf16.mxu0 %v6128_v1  ;;  %v6152_v5 = vld [vmem:[%s7834_s1 + $0x88] sm:$0xff]   ;;  %v6169_v8 = vld [vmem:[%s7834_s1 + $0x90] sm:$0xff]   ;;  %vm2046_vm6 = vcmask 1046534   ;;  %vm2049_vm7 = vcmask 1047559   ;;  %vm2092_vm8 = vcmask 261120  }
   0x3   :  { %v6139_v3 = vld [vmem:[%s7834_s1] sm:$0xff]   ;;  %541 = vmatpush1.bf16.msra.mxu1 %v6133_v2  ;;  %v6158_v6 = vld [vmem:[%s7834_s1 + $0x8] sm:$0xff]   ;;  %v6176_v9 = vld [vmem:[%s7834_s1 + $0x10] sm:$0xff]  }
   0x4   :  { %5337 = vmatpush3.bf16.msra.mxu0 %v6139_v3  ;;  %542 = vmatprep.subr.bf16.mxu1 %v6083_v0  ;;  %v6182_v10 = vld [vmem:[%s7834_s1 + $0x58] sm:$0xff]   ;;  %v6201_v13 = vld [vmem:[%s7834_s1 + $0x60] sm:$0xff]   ;;  %v6220_v16 = vld [vmem:[%s7834_s1 + $0x68] sm:$0xff]  }
   0x5   :  { %5338 = vmatprep.subr.bf16.mxu0 %v6145_v4  ;;  %v6188_v11 = vld [vmem:[%s7834_s1 + $0x98] sm:$0xff]   ;;  %v6207_v14 = vld [vmem:[%s7834_s1 + $0xa0] sm:$0xff]   ;;  %v6226_v17 = vld [vmem:[%s7834_s1 + $0xa8] sm:$0xff]  }
   0x6   :  { %v6195_v12 = vld [vmem:[%s7834_s1 + $0x18] sm:$0xff]   ;;  %v6214_v15 = vld [vmem:[%s7834_s1 + $0x20] sm:$0xff]   ;;  %v6233_v18 = vld [vmem:[%s7834_s1 + $0x28] sm:$0xff]  }
   0x7   :  { %543 = vmatpush1.bf16.msra.mxu1 %v6152_v5  ;;  %v6239_v19 = vld [vmem:[%s7834_s1 + $0x70] sm:$0xff]   ;;  %v6257_v22 = vld [vmem:[%s7834_s1 + $0x78] sm:$0xff]   ;;  %v6288_v28 = vld [vmem:[%s7834_s1 + $0xc0] sm:$0xff]  }
   0x8   :  { %5339 = vmatpush3.bf16.msra.mxu0 %v6158_v6  ;;  %544 = vmatprep.subr.bf16.mxu1 %v6083_v0  ;;  %v6244_v20 = vld [vmem:[%s7834_s1 + $0xb0] sm:$0xff]   ;;  %v6267_v24 = vld [vmem:[%s7834_s1 + $0xb8] sm:$0xff]  }
   0x9   :  { %5340 = vmatprep.subr.bf16.mxu0 %v6163_v7  ;;  %v6250_v21 = vld [vmem:[%s7834_s1 + $0x30] sm:$0xff]   ;;  %v5667_v25 = vld [vmem:[%s7835_s0 + $0xc] ss:$16 sps:$4 sm:$0xff]   ;;  %v5665_v30 = vld [vmem:[%s7835_s0 + $0x8] ss:$16 sps:$4 sm:$0xff]  }
   0xa   :  { %v5663_v23 = vld [vmem:[%s7835_s0 + $0x4] ss:$16 sps:$4 sm:$0xff]   ;;  %v6277_v26 = vld [vmem:[%s7834_s1 + $0x38] sm:$0xff]   ;;  %4919 = vmatprep.mubr.msk.bf16.mxu1 %vm418_vm0, %v5667_v25  ;;  %v5661_v27 = vld [vmem:[%s7835_s0] ss:$16 sps:$4 sm:$0xff]  }
   0xb   :  { %545 = vmatpush1.bf16.msra.mxu1 %v6169_v8  ;;  %475 = vmatprep.mubr.bf16.mxu0 %v5663_v23  ;;  %v5668_v29 = vld [vmem:[%s7835_s0 + $0x84] ss:$16 sps:$4 sm:$0xff]   ;;  %v5671_v31 = vld [vmem:[%s7835_s0 + $0x8c] ss:$16 sps:$4 sm:$0xff]   ;;  %v5670_v32 = vld [vmem:[%s7835_s0 + $0x80] ss:$16 sps:$4 sm:$0xff]  }
   0xc   :  { %5341 = vmatpush3.bf16.msra.mxu0 %v6176_v9  ;;  %546 = vmatprep.subr.bf16.mxu1 %v6083_v0  ;;  %v5674_v33 = vld [vmem:[%s7835_s0 + $0x104] ss:$16 sps:$4 sm:$0xff]   ;;  %v5673_v34 = vld [vmem:[%s7835_s0 + $0x88] ss:$16 sps:$4 sm:$0xff]   ;;  %v5677_v35 = vld [vmem:[%s7835_s0 + $0x10c] ss:$16 sps:$4 sm:$0xff]  }
   0xd   :  { %5342 = vmatprep.subr.bf16.mxu0 %v6182_v10  ;;  %v5676_v36 = vld [vmem:[%s7835_s0 + $0x100] ss:$16 sps:$4 sm:$0xff]   ;;  %v5680_v37 = vld [vmem:[%s7835_s0 + $0x184] ss:$16 sps:$4 sm:$0xff]   ;;  %v5679_v38 = vld [vmem:[%s7835_s0 + $0x108] ss:$16 sps:$4 sm:$0xff]  }
   0xe   :  { %v5683_v39 = vld [vmem:[%s7835_s0 + $0x18c] ss:$16 sps:$4 sm:$0xff]   ;;  %v5682_v40 = vld [vmem:[%s7835_s0 + $0x180] ss:$16 sps:$4 sm:$0xff]   ;;  %v5686_v41 = vld [vmem:[%s7835_s0 + $0x204] ss:$16 sps:$4 sm:$0xff]  }
   0xf   :  { %547 = vmatpush1.bf16.msra.mxu1 %v6188_v11  ;;  %v5685_v42 = vld [vmem:[%s7835_s0 + $0x188] ss:$16 sps:$4 sm:$0xff]   ;;  %v5689_v43 = vld [vmem:[%s7835_s0 + $0x20c] ss:$16 sps:$4 sm:$0xff]   ;;  %v5688_v44 = vld [vmem:[%s7835_s0 + $0x200] ss:$16 sps:$4 sm:$0xff]  }
  0x10   :  { %5343 = vmatpush3.bf16.msra.mxu0 %v6195_v12  ;;  %548 = vmatprep.subr.bf16.mxu1 %v6083_v0  ;;  %v5692_v45 = vld [vmem:[%s7835_s0 + $0x284] ss:$16 sps:$4 sm:$0xff]   ;;  %v5691_v46 = vld [vmem:[%s7835_s0 + $0x208] ss:$16 sps:$4 sm:$0xff]   ;;  %v5695_v47 = vld [vmem:[%s7835_s0 + $0x28c] ss:$16 sps:$4 sm:$0xff]  }
  0x11   :  { %5344 = vmatprep.subr.bf16.mxu0 %v6201_v13  ;;  %v5694_v48 = vld [vmem:[%s7835_s0 + $0x280] ss:$16 sps:$4 sm:$0xff]   ;;  %v5698_v49 = vld [vmem:[%s7835_s0 + $0x304] ss:$16 sps:$4 sm:$0xff]   ;;  %v5697_v50 = vld [vmem:[%s7835_s0 + $0x288] ss:$16 sps:$4 sm:$0xff]  }
  0x12   :  { %v5701_v51 = vld [vmem:[%s7835_s0 + $0x30c] ss:$16 sps:$4 sm:$0xff]   ;;  %v5700_v52 = vld [vmem:[%s7835_s0 + $0x300] ss:$16 sps:$4 sm:$0xff]   ;;  %v5704_v53 = vld [vmem:[%s7835_s0 + $0x384] ss:$16 sps:$4 sm:$0xff]  }
  0x13   :  { %549 = vmatpush1.bf16.msra.mxu1 %v6207_v14  ;;  %v5703_v54 = vld [vmem:[%s7835_s0 + $0x308] ss:$16 sps:$4 sm:$0xff]   ;;  %v5707_v55 = vld [vmem:[%s7835_s0 + $0x38c] ss:$16 sps:$4 sm:$0xff]   ;;  %v5706_v56 = vld [vmem:[%s7835_s0 + $0x380] ss:$16 sps:$4 sm:$0xff]  }
  0x14   :  { %5345 = vmatpush3.bf16.msra.mxu0 %v6214_v15  ;;  %550 = vmatprep.subr.bf16.mxu1 %v6083_v0  ;;  %v5712_v57 = vld [vmem:[%s7835_s0 + $0x24] ss:$16 sps:$4 sm:$0xff]   ;;  %v5709_v58 = vld [vmem:[%s7835_s0 + $0x388] ss:$16 sps:$4 sm:$0xff]   ;;  %v5715_v59 = vld [vmem:[%s7835_s0 + $0x2c] ss:$16 sps:$4 sm:$0xff]  }
  0x15   :  { %5346 = vmatprep.subr.bf16.mxu0 %v6220_v16  ;;  %v5710_v60 = vld [vmem:[%s7835_s0 + $0x20] ss:$16 sps:$4 sm:$0xff]   ;;  %v5716_v61 = vld [vmem:[%s7835_s0 + $0xa4] ss:$16 sps:$4 sm:$0xff]   ;;  %v5713_v62 = vld [vmem:[%s7835_s0 + $0x28] ss:$16 sps:$4 sm:$0xff]  }
  0x16   :  { %v5719_v63 = vld [vmem:[%s7835_s0 + $0xac] ss:$16 sps:$4 sm:$0xff]   ;;  %v5718_v23 = vld [vmem:[%s7835_s0 + $0xa0] ss:$16 sps:$4 sm:$0xff]   ;;  %v5722_v25 = vld [vmem:[%s7835_s0 + $0x124] ss:$16 sps:$4 sm:$0xff]  }
  0x17   :  { %551 = vmatpush1.bf16.msra.mxu1 %v6226_v17 }
  0x18   :  { %5347 = vmatpush3.bf16.msra.mxu0 %v6233_v18  ;;  %552 = vmatprep.subr.bf16.mxu1 %v6083_v0 }
  0x19   :  { %5348 = vmatprep.subr.bf16.mxu0 %v6239_v19 }
  0x1b   :  { %553 = vmatpush1.bf16.msra.mxu1 %v6244_v20 }
  0x1c   :  { %5349 = vmatpush3.bf16.msra.mxu0 %v6250_v21  ;;  %554 = vmatprep.subr.bf16.mxu1 %v6083_v0 }
  0x1d   :  { %5350 = vmatprep.subr.bf16.mxu0 %v6257_v22 }
  0x1f   :  { %555 = vmatpush1.bf16.msra.mxu1 %v6267_v24 }
  0x20   :  { %5351 = vmatpush3.bf16.msra.mxu0 %v6277_v26  ;;  %556 = vmatprep.subr.bf16.mxu1 %v6083_v0 }
  0x21   :  { %5400 = vmatprep.subr.bf16.mxu0 %v6128_v1 }
  0x23   :  { %476 = vmatmul.mubr.bf16.vlgmr.msra.gmra.mrb[0].mxu0 %v5661_v27  ;;  %557 = vmatpush1.bf16.msra.mxu1 %v6288_v28  ;;  %v5721_v27 = vld [vmem:[%s7835_s0 + $0xa8] ss:$16 sps:$4 sm:$0xff]  }
  0x24   :  { %5401 = vmatpush3.bf16.msra.mxu0 %v6139_v3  ;;  %975 = vmatprep.subr.bf16.mxu1 %v6083_v0 }
  0x25   :  { %483 = vmatprep.mubr.bf16.mxu0 %v5668_v29  ;;  %5402 = vmatprep.subr.bf16.mxu0 %v6145_v4  ;;  %v5725_v29 = vld [vmem:[%s7835_s0 + $0x12c] ss:$16 sps:$4 sm:$0xff]  }
  0x26   :  { %573 = vmatmul.mubr.bf16.vlgmr.msra.gmra.mrb[0].mxu1 %v5665_v30  ;;  %v5724_v30 = vld [vmem:[%s7835_s0 + $0x120] ss:$16 sps:$4 sm:$0xff]  }
  0x27   :  { %976 = vmatpush1.bf16.msra.mxu1 %v6133_v2  ;;  %4920 = vmatprep.mubr.msk.bf16.mxu1 %vm418_vm0, %v5671_v31  ;;  %v5728_v31 = vld [vmem:[%s7835_s0 + $0x1a4] ss:$16 sps:$4 sm:$0xff]  }
  0x28   :  { %5403 = vmatpush3.bf16.msra.mxu0 %v6158_v6  ;;  %977 = vmatprep.subr.bf16.mxu1 %v6083_v0 }
  0x29   :  { %5404 = vmatprep.subr.bf16.mxu0 %v6163_v7 }
  0x2b   :  { %484 = vmatmul.mubr.bf16.gmra.mrb[4].mxu0 %v5670_v32  ;;  %978 = vmatpush1.bf16.msra.mxu1 %v6152_v5  ;;  %v5727_v32 = vld [vmem:[%s7835_s0 + $0x128] ss:$16 sps:$4 sm:$0xff]  }
  0x2c   :  { %491 = vmatprep.mubr.bf16.mxu0 %v5674_v33  ;;  %5405 = vmatpush3.bf16.msra.mxu0 %v6176_v9  ;;  %v5731_v33 = vld [vmem:[%s7835_s0 + $0x1ac] ss:$16 sps:$4 sm:$0xff]  }
  0x2d   :  { %979 = vmatprep.subr.bf16.mxu1 %v6083_v0  ;;  %5406 = vmatprep.subr.bf16.mxu0 %v6182_v10 }
  0x2e   :  { %581 = vmatmul.mubr.bf16.gmra.mrb[4].mxu1 %v5673_v34  ;;  %v5730_v34 = vld [vmem:[%s7835_s0 + $0x1a0] ss:$16 sps:$4 sm:$0xff]  }
  0x2f   :  { %4921 = vmatprep.mubr.msk.bf16.mxu1 %vm418_vm0, %v5677_v35  ;;  %980 = vmatpush1.bf16.msra.mxu1 %v6169_v8  ;;  %v5734_v35 = vld [vmem:[%s7835_s0 + $0x224] ss:$16 sps:$4 sm:$0xff]  }
  0x30   :  { %5407 = vmatpush3.bf16.msra.mxu0 %v6195_v12  ;;  %981 = vmatprep.subr.bf16.mxu1 %v6083_v0 }
  0x31   :  { %5408 = vmatprep.subr.bf16.mxu0 %v6201_v13 }
  0x33   :  { %492 = vmatmul.mubr.bf16.gmra.mrb[8].mxu0 %v5676_v36  ;;  %982 = vmatpush1.bf16.msra.mxu1 %v6188_v11  ;;  %v5733_v36 = vld [vmem:[%s7835_s0 + $0x1a8] ss:$16 sps:$4 sm:$0xff]  }
  0x34   :  { %499 = vmatprep.mubr.bf16.mxu0 %v5680_v37  ;;  %5409 = vmatpush3.bf16.msra.mxu0 %v6214_v15  ;;  %v5737_v37 = vld [vmem:[%s7835_s0 + $0x22c] ss:$16 sps:$4 sm:$0xff]  }
  0x35   :  { %983 = vmatprep.subr.bf16.mxu1 %v6083_v0  ;;  %5410 = vmatprep.subr.bf16.mxu0 %v6220_v16 }
  0x36   :  { %589 = vmatmul.mubr.bf16.gmra.mrb[8].mxu1 %v5679_v38  ;;  %v5736_v38 = vld [vmem:[%s7835_s0 + $0x220] ss:$16 sps:$4 sm:$0xff]  }
  0x37   :  { %4922 = vmatprep.mubr.msk.bf16.mxu1 %vm418_vm0, %v5683_v39  ;;  %984 = vmatpush1.bf16.msra.mxu1 %v6207_v14  ;;  %v5740_v39 = vld [vmem:[%s7835_s0 + $0x2a4] ss:$16 sps:$4 sm:$0xff]  }
  0x38   :  { %5411 = vmatpush3.bf16.msra.mxu0 %v6233_v18  ;;  %985 = vmatprep.subr.bf16.mxu1 %v6083_v0 }
  0x39   :  { %5412 = vmatprep.subr.bf16.mxu0 %v6239_v19 }
  0x3b   :  { %500 = vmatmul.mubr.bf16.gmra.mrb[12].mxu0 %v5682_v40  ;;  %986 = vmatpush1.bf16.msra.mxu1 %v6226_v17  ;;  %v5739_v40 = vld [vmem:[%s7835_s0 + $0x228] ss:$16 sps:$4 sm:$0xff]  }
  0x3c   :  { %507 = vmatprep.mubr.bf16.mxu0 %v5686_v41  ;;  %987 = vmatprep.subr.bf16.mxu1 %v6083_v0  ;;  %v5743_v41 = vld [vmem:[%s7835_s0 + $0x2ac] ss:$16 sps:$4 sm:$0xff]  }
  0x3d   :  { %5413 = vmatpush3.bf16.msra.mxu0 %v6250_v21 }
  0x3e   :  { %597 = vmatmul.mubr.bf16.gmra.mrb[12].mxu1 %v5685_v42  ;;  %5414 = vmatprep.subr.bf16.mxu0 %v6257_v22  ;;  %v5742_v42 = vld [vmem:[%s7835_s0 + $0x2a0] ss:$16 sps:$4 sm:$0xff]  }
  0x3f   :  { %4923 = vmatprep.mubr.msk.bf16.mxu1 %vm418_vm0, %v5689_v43  ;;  %988 = vmatpush1.bf16.msra.mxu1 %v6244_v20  ;;  %v5745_v43 = vld [vmem:[%s7835_s0 + $0x2a8] ss:$16 sps:$4 sm:$0xff]  }
  0x40   :  { %989 = vmatprep.subr.bf16.mxu1 %v6083_v0 }
  0x41   :  { %5415 = vmatpush3.bf16.msra.mxu0 %v6277_v26 }
  0x42   :  { %5464 = vmatprep.subr.bf16.mxu0 %v6128_v1 }
  0x43   :  { %508 = vmatmul.mubr.bf16.gmra.mrb[16].mxu0 %v5688_v44  ;;  %990 = vmatpush1.bf16.msra.mxu1 %v6267_v24  ;;  %v5749_v44 = vld [vmem:[%s7835_s0 + $0x32c] ss:$16 sps:$4 sm:$0xff]  }
  0x44   :  { %515 = vmatprep.mubr.bf16.mxu0 %v5692_v45  ;;  %991 = vmatprep.subr.bf16.mxu1 %v6083_v0  ;;  %v5748_v45 = vld [vmem:[%s7835_s0 + $0x320] ss:$16 sps:$4 sm:$0xff]  }
  0x46   :  { %605 = vmatmul.mubr.bf16.gmra.mrb[16].mxu1 %v5691_v46  ;;  %v5752_v46 = vld [vmem:[%s7835_s0 + $0x3a4] ss:$16 sps:$4 sm:$0xff]  }
  0x47   :  { %4924 = vmatprep.mubr.msk.bf16.mxu1 %vm418_vm0, %v5695_v47  ;;  %992 = vmatpush1.bf16.msra.mxu1 %v6288_v28  ;;  %v5751_v47 = vld [vmem:[%s7835_s0 + $0x328] ss:$16 sps:$4 sm:$0xff]  }
  0x48   :  { %1410 = vmatprep.subr.bf16.mxu1 %v6083_v0 }
  0x4b   :  { %516 = vmatmul.mubr.bf16.gmra.mrb[20].mxu0 %v5694_v48  ;;  %v5755_v48 = vld [vmem:[%s7835_s0 + $0x3ac] ss:$16 sps:$4 sm:$0xff]  }
  0x4c   :  { %523 = vmatprep.mubr.bf16.mxu0 %v5698_v49  ;;  %v5754_v49 = vld [vmem:[%s7835_s0 + $0x3a0] ss:$16 sps:$4 sm:$0xff]  }
  0x4e   :  { %613 = vmatmul.mubr.bf16.gmra.mrb[20].mxu1 %v5697_v50  ;;  %v5760_v50 = vld [vmem:[%s7835_s0 + $0x44] ss:$16 sps:$4 sm:$0xff]  }
  0x4f   :  { %4925 = vmatprep.mubr.msk.bf16.mxu1 %vm418_vm0, %v5701_v51  ;;  %v5757_v51 = vld [vmem:[%s7835_s0 + $0x3a8] ss:$16 sps:$4 sm:$0xff]  }
  0x53   :  { %524 = vmatmul.mubr.bf16.gmra.mrb[24].mxu0 %v5700_v52  ;;  %v5763_v52 = vld [vmem:[%s7835_s0 + $0x4c] ss:$16 sps:$4 sm:$0xff]  }
  0x54   :  { %531 = vmatprep.mubr.bf16.mxu0 %v5704_v53  ;;  %v5758_v53 = vld [vmem:[%s7835_s0 + $0x40] ss:$16 sps:$4 sm:$0xff]  }
  0x56   :  { %621 = vmatmul.mubr.bf16.gmra.mrb[24].mxu1 %v5703_v54  ;;  %v5764_v54 = vld [vmem:[%s7835_s0 + $0xc4] ss:$16 sps:$4 sm:$0xff]  }
  0x57   :  { %4926 = vmatprep.mubr.msk.bf16.mxu1 %vm418_vm0, %v5707_v55  ;;  %v5761_v55 = vld [vmem:[%s7835_s0 + $0x48] ss:$16 sps:$4 sm:$0xff]  }
  0x5b   :  { %532 = vmatmul.mubr.bf16.gmra.mrb[28].mxu0 %v5706_v56  ;;  %v5767_v56 = vld [vmem:[%s7835_s0 + $0xcc] ss:$16 sps:$4 sm:$0xff]  }
  0x5c   :  { %910 = vmatprep.mubr.bf16.mxu0 %v5712_v57  ;;  %v5766_v57 = vld [vmem:[%s7835_s0 + $0xc0] ss:$16 sps:$4 sm:$0xff]  }
  0x5e   :  { %629 = vmatmul.mubr.bf16.gmra.mrb[28].mxu1 %v5709_v58  ;;  %v5808_v58 = vld [vmem:[%s7835_s0 + $0x64] ss:$16 sps:$4 sm:$0xff]  }
  0x5f   :  { %4991 = vmatprep.mubr.msk.bf16.mxu1 %vm418_vm0, %v5715_v59  ;;  %v5805_v59 = vld [vmem:[%s7835_s0 + $0x3c8] ss:$16 sps:$4 sm:$0xff]  }
  0x63   :  { %911 = vmatmul.mubr.bf16.vlgmr.msra.gmra.mrb[32].mxu0 %v5710_v60  ;;  %v5811_v60 = vld [vmem:[%s7835_s0 + $0x6c] ss:$16 sps:$4 sm:$0xff]  }
  0x64   :  { %5465 = vmatpush3.bf16.msra.mxu0 %v6139_v3  ;;  %918 = vmatprep.mubr.bf16.mxu0 %v5716_v61  ;;  %v5806_v61 = vld [vmem:[%s7835_s0 + $0x60] ss:$16 sps:$4 sm:$0xff]  }
  0x65   :  { %5466 = vmatprep.subr.bf16.mxu0 %v6145_v4 }
  0x66   :  { %1008 = vmatmul.mubr.bf16.vlgmr.msra.gmra.mrb[32].mxu1 %v5713_v62  ;;  %v5812_v62 = vld [vmem:[%s7835_s0 + $0xe4] ss:$16 sps:$4 sm:$0xff]  }
  0x67   :  { %1411 = vmatpush1.bf16.msra.mxu1 %v6133_v2  ;;  %4992 = vmatprep.mubr.msk.bf16.mxu1 %vm418_vm0, %v5719_v63  ;;  %v5809_v63 = vld [vmem:[%s7835_s0 + $0x68] ss:$16 sps:$4 sm:$0xff]  }
  0x68   :  { %5467 = vmatpush3.bf16.msra.mxu0 %v6158_v6  ;;  %1412 = vmatprep.subr.bf16.mxu1 %v6083_v0 }
  0x69   :  { %5468 = vmatprep.subr.bf16.mxu0 %v6163_v7 }
  0x6b   :  { %919 = vmatmul.mubr.bf16.gmra.mrb[36].mxu0 %v5718_v23  ;;  %1413 = vmatpush1.bf16.msra.mxu1 %v6152_v5  ;;  %v5815_v23 = vld [vmem:[%s7835_s0 + $0xec] ss:$16 sps:$4 sm:$0xff]  }
  0x6c   :  { %926 = vmatprep.mubr.bf16.mxu0 %v5722_v25  ;;  %5469 = vmatpush3.bf16.msra.mxu0 %v6176_v9  ;;  %v5814_v25 = vld [vmem:[%s7835_s0 + $0xe0] ss:$16 sps:$4 sm:$0xff]  }
  0x6d   :  { %1414 = vmatprep.subr.bf16.mxu1 %v6083_v0  ;;  %5470 = vmatprep.subr.bf16.mxu0 %v6182_v10 }
  0x6e   :  { %1016 = vmatmul.mubr.bf16.gmra.mrb[36].mxu1 %v5721_v27  ;;  %v5818_v27 = vld [vmem:[%s7835_s0 + $0x164] ss:$16 sps:$4 sm:$0xff]  }
  0x6f   :  { %4993 = vmatprep.mubr.msk.bf16.mxu1 %vm418_vm0, %v5725_v29  ;;  %1415 = vmatpush1.bf16.msra.mxu1 %v6169_v8  ;;  %v5817_v29 = vld [vmem:[%s7835_s0 + $0xe8] ss:$16 sps:$4 sm:$0xff]  }
  0x70   :  { %5471 = vmatpush3.bf16.msra.mxu0 %v6195_v12  ;;  %1416 = vmatprep.subr.bf16.mxu1 %v6083_v0 }
  0x71   :  { %5472 = vmatprep.subr.bf16.mxu0 %v6201_v13 }
  0x73   :  { %927 = vmatmul.mubr.bf16.gmra.mrb[40].mxu0 %v5724_v30  ;;  %1417 = vmatpush1.bf16.msra.mxu1 %v6188_v11  ;;  %v5821_v30 = vld [vmem:[%s7835_s0 + $0x16c] ss:$16 sps:$4 sm:$0xff]  }
  0x74   :  { %934 = vmatprep.mubr.bf16.mxu0 %v5728_v31  ;;  %5473 = vmatpush3.bf16.msra.mxu0 %v6214_v15  ;;  %v5820_v31 = vld [vmem:[%s7835_s0 + $0x160] ss:$16 sps:$4 sm:$0xff]  }
  0x75   :  { %1418 = vmatprep.subr.bf16.mxu1 %v6083_v0  ;;  %5474 = vmatprep.subr.bf16.mxu0 %v6220_v16 }
  0x76   :  { %1024 = vmatmul.mubr.bf16.gmra.mrb[40].mxu1 %v5727_v32  ;;  %v5824_v32 = vld [vmem:[%s7835_s0 + $0x1e4] ss:$16 sps:$4 sm:$0xff]  }
  0x77   :  { %4994 = vmatprep.mubr.msk.bf16.mxu1 %vm418_vm0, %v5731_v33  ;;  %1419 = vmatpush1.bf16.msra.mxu1 %v6207_v14  ;;  %v5823_v33 = vld [vmem:[%s7835_s0 + $0x168] ss:$16 sps:$4 sm:$0xff]  }
  0x78   :  { %5475 = vmatpush3.bf16.msra.mxu0 %v6233_v18  ;;  %1420 = vmatprep.subr.bf16.mxu1 %v6083_v0 }
  0x79   :  { %5476 = vmatprep.subr.bf16.mxu0 %v6239_v19 }
  0x7b   :  { %935 = vmatmul.mubr.bf16.gmra.mrb[44].mxu0 %v5730_v34  ;;  %1421 = vmatpush1.bf16.msra.mxu1 %v6226_v17  ;;  %v5827_v34 = vld [vmem:[%s7835_s0 + $0x1ec] ss:$16 sps:$4 sm:$0xff]  }
  0x7c   :  { %942 = vmatprep.mubr.bf16.mxu0 %v5734_v35  ;;  %1422 = vmatprep.subr.bf16.mxu1 %v6083_v0 }
  0x7d   :  { %5477 = vmatpush3.bf16.msra.mxu0 %v6250_v21 }
  0x7e   :  { %1032 = vmatmul.mubr.bf16.gmra.mrb[44].mxu1 %v5733_v36  ;;  %5478 = vmatprep.subr.bf16.mxu0 %v6257_v22 }
  0x7f   :  { %4995 = vmatprep.mubr.msk.bf16.mxu1 %vm418_vm0, %v5737_v37  ;;  %1423 = vmatpush1.bf16.msra.mxu1 %v6244_v20  ;;  %v6745_v37 = vld [vmem:[%s7836_s2] ss:$0 sm:$0xff] }
  0x80   :  { %1424 = vmatprep.subr.bf16.mxu1 %v6083_v0 }
  0x81   :  { %5479 = vmatpush3.bf16.msra.mxu0 %v6277_v26 }
  0x82   :  { %5528 = vmatprep.subr.bf16.mxu0 %v6128_v1  ;;  %v5746_v1 = vld [vmem:[%s7835_s0 + $0x324] ss:$16 sps:$4 sm:$0xff]  }
  0x83   :  { %943 = vmatmul.mubr.bf16.gmra.mrb[48].mxu0 %v5736_v38  ;;  %1425 = vmatpush1.bf16.msra.mxu1 %v6267_v24  ;;  %v5826_v38 = vld [vmem:[%s7835_s0 + $0x1e0] ss:$16 sps:$4 sm:$0xff]  }
  0x84   :  { %950 = vmatprep.mubr.bf16.mxu0 %v5740_v39  ;;  %1426 = vmatprep.subr.bf16.mxu1 %v6083_v0 }
  0x86   :  { %1040 = vmatmul.mubr.bf16.gmra.mrb[48].mxu1 %v5739_v40 }
  0x87   :  { %4996 = vmatprep.mubr.msk.bf16.mxu1 %vm418_vm0, %v5743_v41  ;;  %1427 = vmatpush1.bf16.msra.mxu1 %v6288_v28  ;;  %v5830_v41 = vld [vmem:[%s7835_s0 + $0x264] ss:$16 sps:$4 sm:$0xff]  }
  0x88   :  { %1845 = vmatprep.subr.bf16.mxu1 %v6083_v0 }
  0x8b   :  { %951 = vmatmul.mubr.bf16.gmra.mrb[52].mxu0 %v5742_v42 }
  0x8c   :  { %958 = vmatprep.mubr.bf16.mxu0 %v5746_v1 }
  0x8e   :  { %1048 = vmatmul.mubr.bf16.gmra.mrb[52].mxu1 %v5745_v43 }
  0x8f   :  { %4997 = vmatprep.mubr.msk.bf16.mxu1 %vm418_vm0, %v5749_v44 }
  0x93   :  { %959 = vmatmul.mubr.bf16.gmra.mrb[56].mxu0 %v5748_v45 }
  0x94   :  { %966 = vmatprep.mubr.bf16.mxu0 %v5752_v46  ;;  %v5829_v46 = vld [vmem:[%s7835_s0 + $0x1e8] ss:$16 sps:$4 sm:$0xff]  }
  0x96   :  { %1056 = vmatmul.mubr.bf16.gmra.mrb[56].mxu1 %v5751_v47 }
  0x97   :  { %4998 = vmatprep.mubr.msk.bf16.mxu1 %vm418_vm0, %v5755_v48  ;;  %v5833_v48 = vld [vmem:[%s7835_s0 + $0x26c] ss:$16 sps:$4 sm:$0xff]  }
  0x9b   :  { %967 = vmatmul.mubr.bf16.gmra.mrb[60].mxu0 %v5754_v49 }
  0x9c   :  { %1345 = vmatprep.mubr.bf16.mxu0 %v5760_v50 }
  0x9e   :  { %1064 = vmatmul.mubr.bf16.gmra.mrb[60].mxu1 %v5757_v51 }
  0x9f   :  { %5063 = vmatprep.mubr.msk.bf16.mxu1 %vm418_vm0, %v5763_v52 }
  0xa3   :  { %1346 = vmatmul.mubr.bf16.vlgmr.msra.gmra.mrb[64].mxu0 %v5758_v53 }
  0xa4   :  { %5529 = vmatpush3.bf16.msra.mxu0 %v6139_v3  ;;  %1353 = vmatprep.mubr.bf16.mxu0 %v5764_v54  ;;  %v5770_v3 = vld [vmem:[%s7835_s0 + $0x144] ss:$16 sps:$4 sm:$0xff]  }
  0xa5   :  { %5530 = vmatprep.subr.bf16.mxu0 %v6145_v4  ;;  %v5773_v4 = vld [vmem:[%s7835_s0 + $0x14c] ss:$16 sps:$4 sm:$0xff]  }
  0xa6   :  { %1443 = vmatmul.mubr.bf16.vlgmr.msra.gmra.mrb[64].mxu1 %v5761_v55  ;;  %v5832_v55 = vld [vmem:[%s7835_s0 + $0x260] ss:$16 sps:$4 sm:$0xff]  }
  0xa7   :  { %1846 = vmatpush1.bf16.msra.mxu1 %v6133_v2  ;;  %5064 = vmatprep.mubr.msk.bf16.mxu1 %vm418_vm0, %v5767_v56  ;;  %v5769_v2 = vld [vmem:[%s7835_s0 + $0xc8] ss:$16 sps:$4 sm:$0xff]  }
  0xa8   :  { %5531 = vmatpush3.bf16.msra.mxu0 %v6158_v6  ;;  %1847 = vmatprep.subr.bf16.mxu1 %v6083_v0  ;;  %v5772_v6 = vld [vmem:[%s7835_s0 + $0x140] ss:$16 sps:$4 sm:$0xff]  }
  0xa9   :  { %5532 = vmatprep.subr.bf16.mxu0 %v6163_v7  ;;  %v5775_v7 = vld [vmem:[%s7835_s0 + $0x148] ss:$16 sps:$4 sm:$0xff]  }
  0xab   :  { %1354 = vmatmul.mubr.bf16.gmra.mrb[68].mxu0 %v5766_v57  ;;  %1848 = vmatpush1.bf16.msra.mxu1 %v6152_v5  ;;  %v5776_v5 = vld [vmem:[%s7835_s0 + $0x1c4] ss:$16 sps:$4 sm:$0xff]  }
  0xac   :  { %1361 = vmatprep.mubr.bf16.mxu0 %v5770_v3  ;;  %5533 = vmatpush3.bf16.msra.mxu0 %v6176_v9  ;;  %v5779_v9 = vld [vmem:[%s7835_s0 + $0x1cc] ss:$16 sps:$4 sm:$0xff]   ;;  %v5836_v3 = vld [vmem:[%s7835_s0 + $0x2e4] ss:$16 sps:$4 sm:$0xff]  }
  0xad   :  { %1849 = vmatprep.subr.bf16.mxu1 %v6083_v0  ;;  %5534 = vmatprep.subr.bf16.mxu0 %v6182_v10  ;;  %v5782_v10 = vld [vmem:[%s7835_s0 + $0x244] ss:$16 sps:$4 sm:$0xff]  }
  0xae   :  { %1451 = vmatmul.mubr.bf16.gmra.mrb[68].mxu1 %v5769_v2 }
  0xaf   :  { %5065 = vmatprep.mubr.msk.bf16.mxu1 %vm418_vm0, %v5773_v4  ;;  %1850 = vmatpush1.bf16.msra.mxu1 %v6169_v8  ;;  %v5778_v8 = vld [vmem:[%s7835_s0 + $0x1c0] ss:$16 sps:$4 sm:$0xff]  }
  0xb0   :  { %5535 = vmatpush3.bf16.msra.mxu0 %v6195_v12  ;;  %1851 = vmatprep.subr.bf16.mxu1 %v6083_v0  ;;  %v5785_v12 = vld [vmem:[%s7835_s0 + $0x24c] ss:$16 sps:$4 sm:$0xff]  }
  0xb1   :  { %5536 = vmatprep.subr.bf16.mxu0 %v6201_v13  ;;  %v5784_v13 = vld [vmem:[%s7835_s0 + $0x240] ss:$16 sps:$4 sm:$0xff]  }
  0xb3   :  { %1362 = vmatmul.mubr.bf16.gmra.mrb[72].mxu0 %v5772_v6  ;;  %1852 = vmatpush1.bf16.msra.mxu1 %v6188_v11  ;;  %v5781_v11 = vld [vmem:[%s7835_s0 + $0x1c8] ss:$16 sps:$4 sm:$0xff]  }
  0xb4   :  { %1369 = vmatprep.mubr.bf16.mxu0 %v5776_v5  ;;  %5537 = vmatpush3.bf16.msra.mxu0 %v6214_v15  ;;  %v5787_v15 = vld [vmem:[%s7835_s0 + $0x248] ss:$16 sps:$4 sm:$0xff]  }
  0xb5   :  { %1853 = vmatprep.subr.bf16.mxu1 %v6083_v0  ;;  %5538 = vmatprep.subr.bf16.mxu0 %v6220_v16  ;;  %v5791_v16 = vld [vmem:[%s7835_s0 + $0x2cc] ss:$16 sps:$4 sm:$0xff]  }
  0xb6   :  { %1459 = vmatmul.mubr.bf16.gmra.mrb[72].mxu1 %v5775_v7 }
  0xb7   :  { %5066 = vmatprep.mubr.msk.bf16.mxu1 %vm418_vm0, %v5779_v9  ;;  %1854 = vmatpush1.bf16.msra.mxu1 %v6207_v14  ;;  %v5788_v14 = vld [vmem:[%s7835_s0 + $0x2c4] ss:$16 sps:$4 sm:$0xff]   ;;  %v5835_v9 = vld [vmem:[%s7835_s0 + $0x268] ss:$16 sps:$4 sm:$0xff]  }
  0xb8   :  { %5539 = vmatpush3.bf16.msra.mxu0 %v6233_v18  ;;  %1855 = vmatprep.subr.bf16.mxu1 %v6083_v0  ;;  %v5794_v18 = vld [vmem:[%s7835_s0 + $0x344] ss:$16 sps:$4 sm:$0xff]  }
  0xb9   :  { %5540 = vmatprep.subr.bf16.mxu0 %v6239_v19  ;;  %v5793_v19 = vld [vmem:[%s7835_s0 + $0x2c8] ss:$16 sps:$4 sm:$0xff]  }
  0xbb   :  { %1370 = vmatmul.mubr.bf16.gmra.mrb[76].mxu0 %v5778_v8  ;;  %1856 = vmatpush1.bf16.msra.mxu1 %v6226_v17  ;;  %v5790_v17 = vld [vmem:[%s7835_s0 + $0x2c0] ss:$16 sps:$4 sm:$0xff]  }
  0xbc   :  { %1377 = vmatprep.mubr.bf16.mxu0 %v5782_v10  ;;  %1857 = vmatprep.subr.bf16.mxu1 %v6083_v0  ;;  %v5839_v10 = vld [vmem:[%s7835_s0 + $0x2ec] ss:$16 sps:$4 sm:$0xff]  }
  0xbd   :  { %5541 = vmatpush3.bf16.msra.mxu0 %v6250_v21  ;;  %v5796_v21 = vld [vmem:[%s7835_s0 + $0x340] ss:$16 sps:$4 sm:$0xff]  }
  0xbe   :  { %1467 = vmatmul.mubr.bf16.gmra.mrb[76].mxu1 %v5781_v11  ;;  %5542 = vmatprep.subr.bf16.mxu0 %v6257_v22  ;;  %v5800_v22 = vld [vmem:[%s7835_s0 + $0x3c4] ss:$16 sps:$4 sm:$0xff]  }
  0xbf   :  { %5067 = vmatprep.mubr.msk.bf16.mxu1 %vm418_vm0, %v5785_v12  ;;  %1858 = vmatpush1.bf16.msra.mxu1 %v6244_v20  ;;  %v5797_v20 = vld [vmem:[%s7835_s0 + $0x34c] ss:$16 sps:$4 sm:$0xff]  }
  0xc0   :  { %1859 = vmatprep.subr.bf16.mxu1 %v6083_v0 }
  0xc1   :  { %5543 = vmatpush3.bf16.msra.mxu0 %v6277_v26  ;;  %v5803_v26 = vld [vmem:[%s7835_s0 + $0x3cc] ss:$16 sps:$4 sm:$0xff]  }
  0xc3   :  { %1378 = vmatmul.mubr.bf16.gmra.mrb[80].mxu0 %v5784_v13  ;;  %1860 = vmatpush1.bf16.msra.mxu1 %v6267_v24  ;;  %v5799_v24 = vld [vmem:[%s7835_s0 + $0x348] ss:$16 sps:$4 sm:$0xff]  }
  0xc4   :  { %1385 = vmatprep.mubr.bf16.mxu0 %v5788_v14  ;;  %1861 = vmatprep.subr.bf16.mxu1 %v6083_v0 }
  0xc6   :  { %1475 = vmatmul.mubr.bf16.gmra.mrb[80].mxu1 %v5787_v15 }
  0xc7   :  { %5068 = vmatprep.mubr.msk.bf16.mxu1 %vm418_vm0, %v5791_v16  ;;  %1862 = vmatpush1.bf16.msra.mxu1 %v6288_v28  ;;  %v5802_v28 = vld [vmem:[%s7835_s0 + $0x3c0] ss:$16 sps:$4 sm:$0xff]  }
  0xcb   :  { %1386 = vmatmul.mubr.bf16.gmra.mrb[84].mxu0 %v5790_v17  ;;  %v5838_v17 = vld [vmem:[%s7835_s0 + $0x2e0] ss:$16 sps:$4 sm:$0xff]  }
  0xcc   :  { %1393 = vmatprep.mubr.bf16.mxu0 %v5794_v18 }
  0xce   :  { %1483 = vmatmul.mubr.bf16.gmra.mrb[84].mxu1 %v5793_v19 }
  0xcf   :  { %5069 = vmatprep.mubr.msk.bf16.mxu1 %vm418_vm0, %v5797_v20  ;;  %v5842_v20 = vld [vmem:[%s7835_s0 + $0x364] ss:$16 sps:$4 sm:$0xff]  }
  0xd3   :  { %1394 = vmatmul.mubr.bf16.gmra.mrb[88].mxu0 %v5796_v21 }
  0xd4   :  { %1401 = vmatprep.mubr.bf16.mxu0 %v5800_v22 }
  0xd6   :  { %1491 = vmatmul.mubr.bf16.gmra.mrb[88].mxu1 %v5799_v24 }
  0xd7   :  { %5070 = vmatprep.mubr.msk.bf16.mxu1 %vm418_vm0, %v5803_v26 }
  0xdb   :  { %1402 = vmatmul.mubr.bf16.gmra.mrb[92].mxu0 %v5802_v28 }
  0xdc   :  { %1780 = vmatprep.mubr.bf16.mxu0 %v5808_v58  ;;  %v5841_v58 = vld [vmem:[%s7835_s0 + $0x2e8] ss:$16 sps:$4 sm:$0xff]  }
  0xde   :  { %1499 = vmatmul.mubr.bf16.gmra.mrb[92].mxu1 %v5805_v59 }
  0xdf   :  { %5135 = vmatprep.mubr.msk.bf16.mxu1 %vm418_vm0, %v5811_v60  ;;  %v5845_v60 = vld [vmem:[%s7835_s0 + $0x36c] ss:$16 sps:$4 sm:$0xff]  }
  0xe3   :  { %1781 = vmatmul.mubr.bf16.vlgmr.msra.gmra.mrb[96].mxu0 %v5806_v61 }
  0xe4   :  { %1788 = vmatprep.mubr.bf16.mxu0 %v5812_v62 }
  0xe6   :  { %1878 = vmatmul.mubr.bf16.vlgmr.msra.gmra.mrb[96].mxu1 %v5809_v63 }
  0xe7   :  { %5136 = vmatprep.mubr.msk.bf16.mxu1 %vm418_vm0, %v5815_v23 }
  0xeb   :  { %1789 = vmatmul.mubr.bf16.gmra.mrb[100].mxu0 %v5814_v25 }
  0xec   :  { %1796 = vmatprep.mubr.bf16.mxu0 %v5818_v27 }
  0xee   :  { %1886 = vmatmul.mubr.bf16.gmra.mrb[100].mxu1 %v5817_v29  ;;  %v5844_v29 = vld [vmem:[%s7835_s0 + $0x360] ss:$16 sps:$4 sm:$0xff]  }
  0xef   :  { %5137 = vmatprep.mubr.msk.bf16.mxu1 %vm418_vm0, %v5821_v30 }
  0xf3   :  { %1797 = vmatmul.mubr.bf16.gmra.mrb[104].mxu0 %v5820_v31 }
  0xf4   :  { %1804 = vmatprep.mubr.bf16.mxu0 %v5824_v32  ;;  %v5848_v32 = vld [vmem:[%s7835_s0 + $0x3e4] ss:$16 sps:$4 sm:$0xff]  }
  0xf6   :  { %v5352_v35 = vpop.f32.mrb[0].mxu0  ;;  %1894 = vmatmul.mubr.bf16.gmra.mrb[104].mxu1 %v5823_v33 }
  0xf7   :  { %v5353_v36 = vpop.f32.mrb[1].mxu0  ;;  %5138 = vmatprep.mubr.msk.bf16.mxu1 %vm418_vm0, %v5827_v34 }
  0xf8   :  { %v5354_v39 = vadd.f32 %v5353_v36, %v5352_v35  ;;  %v5355_v40 = vpop.f32.mrb[2].mxu0 }
  0xf9   :  { %v5356_v42 = vpop.f32.mrb[3].mxu0  ;;  %v574_v1 = vpop.f32.mrb[0].mxu1 }
  0xfa   :  { %v5357_v43 = vadd.f32 %v5356_v42, %v5355_v40  ;;  %v478_v44 = vadd.f32 %v5354_v39, %v6745_v37  ;;  %v576_v45 = vpop.f32.mrb[1].mxu1  ;;  %v5847_v39 = vld [vmem:[%s7835_s0 + $0x368] ss:$16 sps:$4 sm:$0xff]  }
  0xfb   :  { %v577_v47 = vpop.f32.mrb[2].mxu1  ;;  %1805 = vmatmul.mubr.bf16.gmra.mrb[108].mxu0 %v5826_v38 }
  0xfc   :  { %v6761_v49 = vadd.f32 %v574_v1, %v478_v44  ;;  %v481_v50 = vadd.f32 %v5357_v43, %v6745_v37  ;;  %v579_v51 = vpop.f32.mrb[3].mxu1  ;;  %1812 = vmatprep.mubr.bf16.mxu0 %v5830_v41  ;;  %v5851_v41 = vld [vmem:[%s7835_s0 + $0x3ec] ss:$16 sps:$4 sm:$0xff]  }
  0xfe   :  { %v6764_v52 = vadd.f32 %v577_v47, %v481_v50  ;;  %v5358_v53 = vpop.f32.mrb[4].mxu0  ;;  %1902 = vmatmul.mubr.bf16.gmra.mrb[108].mxu1 %v5829_v46  ;;  %v5850_v47 = vld [vmem:[%s7835_s0 + $0x3e0] ss:$16 sps:$4 sm:$0xff]  }
  0xff   :  { %v5359_v54 = vpop.f32.mrb[5].mxu0  ;;  %5139 = vmatprep.mubr.msk.bf16.mxu1 %vm418_vm0, %v5833_v48 }
 0x100   :  { %v5360_v56 = vadd.f32 %v5359_v54, %v5358_v53  ;;  %v5361_v57 = vpop.f32.mrb[6].mxu0 }
 0x101   :  { %v5362_v2 = vpop.f32.mrb[7].mxu0  ;;  %v582_v4 = vpop.f32.mrb[4].mxu1 }
 0x102   :  { %v5363_v6 = vadd.f32 %v5362_v2, %v5361_v57  ;;  %v486_v5 = vadd.f32 %v5360_v56, %v6745_v37  ;;  %v584_v7 = vpop.f32.mrb[5].mxu1  ;;  %v5853_v57 = vld [vmem:[%s7835_s0 + $0x3e8] ss:$16 sps:$4 sm:$0xff]  }
 0x103   :  { %v585_v8 = vpop.f32.mrb[6].mxu1  ;;  %1813 = vmatmul.mubr.bf16.gmra.mrb[112].mxu0 %v5832_v55 }
 0x104   :  { %v6780_v11 = vadd.f32 %v582_v4, %v486_v5  ;;  %v489_v12 = vadd.f32 %v5363_v6, %v6745_v37  ;;  %v587_v13 = vpop.f32.mrb[7].mxu1  ;;  %1820 = vmatprep.mubr.bf16.mxu0 %v5836_v3 }
 0x106   :  { %v6783_v14 = vadd.f32 %v585_v8, %v489_v12  ;;  %v5364_v15 = vpop.f32.mrb[8].mxu0  ;;  %1910 = vmatmul.mubr.bf16.gmra.mrb[112].mxu1 %v5835_v9 }
 0x107   :  { %v5365_v16 = vpop.f32.mrb[9].mxu0  ;;  %5140 = vmatprep.mubr.msk.bf16.mxu1 %vm418_vm0, %v5839_v10 }
 0x108   :  { %v5366_v18 = vadd.f32 %v5365_v16, %v5364_v15  ;;  %v5367_v19 = vpop.f32.mrb[10].mxu0 }
 0x109   :  { %v5368_v21 = vpop.f32.mrb[11].mxu0  ;;  %v590_v22 = vpop.f32.mrb[8].mxu1 }
 0x10a   :  { %v5369_v24 = vadd.f32 %v5368_v21, %v5367_v19  ;;  %v494_v26 = vadd.f32 %v5366_v18, %v6745_v37  ;;  %v592_v28 = vpop.f32.mrb[9].mxu1 }
 0x10b   :  { %v593_v59 = vpop.f32.mrb[10].mxu1  ;;  %1821 = vmatmul.mubr.bf16.gmra.mrb[116].mxu0 %v5838_v17 }
 0x10c   :  { %v6799_v61 = vadd.f32 %v590_v22, %v494_v26  ;;  %v497_v62 = vadd.f32 %v5369_v24, %v6745_v37  ;;  %v595_v63 = vpop.f32.mrb[11].mxu1  ;;  %1828 = vmatprep.mubr.bf16.mxu0 %v5842_v20 }
 0x10e   :  { %v6802_v23 = vadd.f32 %v593_v59, %v497_v62  ;;  %v5370_v25 = vpop.f32.mrb[12].mxu0  ;;  %1918 = vmatmul.mubr.bf16.gmra.mrb[116].mxu1 %v5841_v58 }
 0x10f   :  { %v5371_v27 = vpop.f32.mrb[13].mxu0  ;;  %5141 = vmatprep.mubr.msk.bf16.mxu1 %vm418_vm0, %v5845_v60 }
 0x110   :  { %v5372_v30 = vadd.f32 %v5371_v27, %v5370_v25  ;;  %v5373_v31 = vpop.f32.mrb[14].mxu0 }
 0x111   :  { %v5374_v33 = vpop.f32.mrb[15].mxu0  ;;  %v598_v34 = vpop.f32.mrb[12].mxu1 }
 0x112   :  { %v5375_v35 = vadd.f32 %v5374_v33, %v5373_v31  ;;  %v502_v36 = vadd.f32 %v5372_v30, %v6745_v37  ;;  %v600_v38 = vpop.f32.mrb[13].mxu1 }
 0x113   :  { %v601_v40 = vpop.f32.mrb[14].mxu1  ;;  %1829 = vmatmul.mubr.bf16.gmra.mrb[120].mxu0 %v5844_v29 }
 0x114   :  { %v6818_v42 = vadd.f32 %v598_v34, %v502_v36  ;;  %v505_v1 = vadd.f32 %v5375_v35, %v6745_v37  ;;  %v603_v43 = vpop.f32.mrb[15].mxu1  ;;  %1836 = vmatprep.mubr.bf16.mxu0 %v5848_v32 }
 0x116   :  { %v6821_v44 = vadd.f32 %v601_v40, %v505_v1  ;;  %v5376_v45 = vpop.f32.mrb[16].mxu0  ;;  %1926 = vmatmul.mubr.bf16.gmra.mrb[120].mxu1 %v5847_v39 }
 0x117   :  { %v5377_v46 = vpop.f32.mrb[17].mxu0  ;;  %5142 = vmatprep.mubr.msk.bf16.mxu1 %vm418_vm0, %v5851_v41 }
 0x118   :  { %v5378_v48 = vadd.f32 %v5377_v46, %v5376_v45  ;;  %v5379_v50 = vpop.f32.mrb[18].mxu0 }
 0x119   :  { %v5380_v51 = vpop.f32.mrb[19].mxu0  ;;  %v606_v53 = vpop.f32.mrb[16].mxu1 }
 0x11a   :  { %v5381_v54 = vadd.f32 %v5380_v51, %v5379_v50  ;;  %v510_v55 = vadd.f32 %v5378_v48, %v6745_v37  ;;  %v608_v56 = vpop.f32.mrb[17].mxu1 }
 0x11b   :  { %v609_v3 = vpop.f32.mrb[18].mxu1  ;;  %1837 = vmatmul.mubr.bf16.gmra.mrb[124].mxu0 %v5850_v47 }
 0x11c   :  { %v6831_v2 = vadd.f32 %v606_v53, %v510_v55  ;;  %v513_v4 = vadd.f32 %v5381_v54, %v6745_v37  ;;  %v611_v6 = vpop.f32.mrb[19].mxu1  ;;  %2128 = vmatprep.mubr.bf16.mxu0 %v6083_v0 }
 0x11e   :  { %v6835_v5 = vadd.f32 %v609_v3, %v513_v4  ;;  %v5382_v7 = vpop.f32.mrb[20].mxu0  ;;  %1934 = vmatmul.mubr.bf16.gmra.mrb[124].mxu1 %v5853_v57 }
 0x11f   :  { %v5383_v9 = vpop.f32.mrb[21].mxu0  ;;  %2169 = vmatprep.mubr.bf16.mxu1 %v6083_v0 }
 0x120   :  { %v5384_v8 = vadd.f32 %v5383_v9, %v5382_v7  ;;  %v5385_v10 = vpop.f32.mrb[22].mxu0 }
 0x121   :  { %v5386_v12 = vpop.f32.mrb[23].mxu0  ;;  %v614_v13 = vpop.f32.mrb[20].mxu1 }
 0x122   :  { %v5387_v15 = vadd.f32 %v5386_v12, %v5385_v10  ;;  %v518_v16 = vadd.f32 %v5384_v8, %v6745_v37  ;;  %v616_v17 = vpop.f32.mrb[21].mxu1  ;;  %v637_v10 = vmax.f32 %v6761_v49, 0.0 }
 0x123   :  { %v617_v18 = vpop.f32.mrb[22].mxu1  ;;  %v638_v17 = vmax.f32 %v6764_v52, 0.0  ;;  %v639_v52 = vmax.f32 %v6780_v11, 0.0 }
 0x124   :  { %v6839_v19 = vadd.f32 %v614_v13, %v518_v16  ;;  %v521_v20 = vadd.f32 %v5387_v15, %v6745_v37  ;;  %v619_v21 = vpop.f32.mrb[23].mxu1 }
 0x126   :  { %v6842_v22 = vadd.f32 %v617_v18, %v521_v20  ;;  %v5388_v24 = vpop.f32.mrb[24].mxu0 }
 0x127   :  { %v5389_v26 = vpop.f32.mrb[25].mxu0 }
 0x128   :  { %v5390_v28 = vadd.f32 %v5389_v26, %v5388_v24  ;;  %v5391_v58 = vpop.f32.mrb[26].mxu0 }
 0x129   :  { %v5392_v59 = vpop.f32.mrb[27].mxu0  ;;  %v622_v60 = vpop.f32.mrb[24].mxu1 }
 0x12a   :  { %v5393_v62 = vadd.f32 %v5392_v59, %v5391_v58  ;;  %v526_v63 = vadd.f32 %v5390_v28, %v6745_v37  ;;  %v624_v25 = vpop.f32.mrb[25].mxu1 }
 0x12b   :  { %v625_v27 = vpop.f32.mrb[26].mxu1 }
 0x12c   :  { %v6845_v29 = vadd.f32 %v622_v60, %v526_v63  ;;  %v529_v30 = vadd.f32 %v5393_v62, %v6745_v37  ;;  %v627_v31 = vpop.f32.mrb[27].mxu1 }
 0x12e   :  { %v6848_v32 = vadd.f32 %v625_v27, %v529_v30  ;;  %v5394_v33 = vpop.f32.mrb[28].mxu0 }
 0x12f   :  { %v5395_v34 = vpop.f32.mrb[29].mxu0 }
 0x130   :  { %v5396_v35 = vadd.f32 %v5395_v34, %v5394_v33  ;;  %v5397_v36 = vpop.f32.mrb[30].mxu0 }
 0x131   :  { %v5398_v38 = vpop.f32.mrb[31].mxu0  ;;  %v630_v39 = vpop.f32.mrb[28].mxu1 }
 0x132   :  { %v5399_v40 = vadd.f32 %v5398_v38, %v5397_v36  ;;  %v534_v41 = vadd.f32 %v5396_v35, %v6745_v37  ;;  %v632_v1 = vpop.f32.mrb[29].mxu1  ;;  %v640_v35 = vmax.f32 %v6783_v14, 0.0  ;;  %v641_v14 = vmax.f32 %v6799_v61, 0.0 }
 0x133   :  { %v633_v43 = vpop.f32.mrb[30].mxu1 }
 0x134   :  { %v6851_v45 = vadd.f32 %v630_v39, %v534_v41  ;;  %v537_v46 = vadd.f32 %v5399_v40, %v6745_v37  ;;  %v635_v47 = vpop.f32.mrb[31].mxu1 }
 0x136   :  { %v6854_v48 = vadd.f32 %v633_v43, %v537_v46  ;;  %v5416_v50 = vpop.f32.mrb[32].mxu0 }
 0x137   :  { %v5417_v51 = vpop.f32.mrb[33].mxu0 }
 0x138   :  { %v5418_v53 = vadd.f32 %v5417_v51, %v5416_v50  ;;  %v5419_v54 = vpop.f32.mrb[34].mxu0 }
 0x139   :  { %v5420_v55 = vpop.f32.mrb[35].mxu0  ;;  %v1009_v56 = vpop.f32.mrb[32].mxu1 }
 0x13a   :  { %v5421_v57 = vadd.f32 %v5420_v55, %v5419_v54  ;;  %v913_v3 = vadd.f32 %v5418_v53, %v6745_v37  ;;  %v1011_v4 = vpop.f32.mrb[33].mxu1 }
 0x13b   :  { %v1012_v6 = vpop.f32.mrb[34].mxu1  ;;  %v642_v4 = vmax.f32 %v6802_v23, 0.0  ;;  %v5856_v23 = vld [vmem:[%s7837_s3 + $0x44] ss:$16 sps:$4 sm:$0xff]  }
 0x13c   :  { %v1010_v7 = vadd.f32 %v1009_v56, %v913_v3  ;;  %v916_v9 = vadd.f32 %v5421_v57, %v6745_v37  ;;  %v1014_v8 = vpop.f32.mrb[35].mxu1  ;;  %2096 = vmatprep.subr.bf16.mxu0 %v5856_v23 }
 0x13e   :  { %v1072_v12 = vmax.f32 %v1010_v7, 0.0  ;;  %v1013_v13 = vadd.f32 %v1012_v6, %v916_v9  ;;  %v5422_v15 = vpop.f32.mrb[36].mxu0 }
 0x13f   :  { %v5423_v16 = vpop.f32.mrb[37].mxu0 }
 0x140   :  { %v6860_v18 = vadd.f32 %v1072_v12, %v637_v10  ;;  %v1073_v20 = vmax.f32 %v1013_v13, 0.0  ;;  %v5424_v21 = vadd.f32 %v5423_v16, %v5422_v15  ;;  %v5425_v24 = vpop.f32.mrb[38].mxu0  ;;  %v5854_v13 = vld [vmem:[%s7837_s3 + $0x40] ss:$16 sps:$4 sm:$0xff]  }
 0x141   :  { %v5426_v26 = vpop.f32.mrb[39].mxu0  ;;  %v1017_v28 = vpop.f32.mrb[36].mxu1  ;;  %2097 = vmatpush1.bf16.msra.mxu0 %v5854_v13 }
 0x142   :  { %v6862_v58 = vadd.f32 %v1073_v20, %v638_v17  ;;  %v5427_v59 = vadd.f32 %v5426_v26, %v5425_v24  ;;  %v921_v60 = vadd.f32 %v5424_v21, %v6745_v37  ;;  %v1019_v62 = vpop.f32.mrb[37].mxu1  ;;  %v5857_v21 = vld [vmem:[%s7837_s3 + $0x48] ss:$16 sps:$4 sm:$0xff]   ;;  %v5859_v24 = vld [vmem:[%s7837_s3 + $0x4c] ss:$16 sps:$4 sm:$0xff]  }
 0x143   :  { %v1020_v49 = vpop.f32.mrb[38].mxu1  ;;  %2137 = vmatprep.subr.bf16.mxu1 %v5859_v24 }
 0x144   :  { %v1018_v63 = vadd.f32 %v1017_v28, %v921_v60  ;;  %v924_v25 = vadd.f32 %v5427_v59, %v6745_v37  ;;  %v1022_v27 = vpop.f32.mrb[39].mxu1  ;;  %v643_v60 = vmax.f32 %v6818_v42, 0.0  ;;  %2138 = vmatpush1.bf16.msra.mxu1 %v5857_v21  ;;  %v648_v21 = vmax.f32 %v6842_v22, 0.0 }
 0x145   :  { %v644_v27 = vmax.f32 %v6821_v44, 0.0  ;;  %v645_v44 = vmax.f32 %v6831_v2, 0.0  ;;  %v649_v22 = vmax.f32 %v6845_v29, 0.0 }
 0x146   :  { %v1074_v30 = vmax.f32 %v1018_v63, 0.0  ;;  %v1021_v31 = vadd.f32 %v1020_v49, %v924_v25  ;;  %v5428_v33 = vpop.f32.mrb[40].mxu0 }
 0x147   :  { %v5429_v34 = vpop.f32.mrb[41].mxu0 }
 0x148   :  { %v6868_v36 = vadd.f32 %v1074_v30, %v639_v52  ;;  %v1075_v38 = vmax.f32 %v1021_v31, 0.0  ;;  %v5430_v39 = vadd.f32 %v5429_v34, %v5428_v33  ;;  %v5431_v40 = vpop.f32.mrb[42].mxu0 }
 0x149   :  { %v5432_v41 = vpop.f32.mrb[43].mxu0  ;;  %v1025_v1 = vpop.f32.mrb[40].mxu1 }
 0x14a   :  { %v6870_v43 = vadd.f32 %v1075_v38, %v640_v35  ;;  %v5433_v46 = vadd.f32 %v5432_v41, %v5431_v40  ;;  %v929_v47 = vadd.f32 %v5430_v39, %v6745_v37  ;;  %v1027_v50 = vpop.f32.mrb[41].mxu1 }
 0x14b   :  { %v1028_v11 = vpop.f32.mrb[42].mxu1 }
 0x14c   :  { %v1026_v51 = vadd.f32 %v1025_v1, %v929_v47  ;;  %v932_v53 = vadd.f32 %v5433_v46, %v6745_v37  ;;  %v1030_v54 = vpop.f32.mrb[43].mxu1 }
 0x14d   :  { %v646_v54 = vmax.f32 %v6835_v5, 0.0  ;;  %v647_v5 = vmax.f32 %v6839_v19, 0.0 }
 0x14e   :  { %v1076_v55 = vmax.f32 %v1026_v51, 0.0  ;;  %v1029_v56 = vadd.f32 %v1028_v11, %v932_v53  ;;  %v5434_v57 = vpop.f32.mrb[44].mxu0 }
 0x14f   :  { %v5435_v3 = vpop.f32.mrb[45].mxu0 }
 0x150   :  { %v6876_v6 = vadd.f32 %v1076_v55, %v641_v14  ;;  %v1077_v7 = vmax.f32 %v1029_v56, 0.0  ;;  %v5436_v9 = vadd.f32 %v5435_v3, %v5434_v57  ;;  %v5437_v8 = vpop.f32.mrb[46].mxu0 }
 0x151   :  { %v5438_v10 = vpop.f32.mrb[47].mxu0  ;;  %v1033_v12 = vpop.f32.mrb[44].mxu1 }
 0x152   :  { %v6881_v15 = vadd.f32 %v1077_v7, %v642_v4  ;;  %v5439_v61 = vadd.f32 %v5438_v10, %v5437_v8  ;;  %v937_v16 = vadd.f32 %v5436_v9, %v6745_v37  ;;  %v1035_v17 = vpop.f32.mrb[45].mxu1 }
 0x153   :  { %v1036_v20 = vpop.f32.mrb[46].mxu1 }
 0x154   :  { %v1034_v26 = vadd.f32 %v1033_v12, %v937_v16  ;;  %v940_v28 = vadd.f32 %v5439_v61, %v6745_v37  ;;  %v1038_v59 = vpop.f32.mrb[47].mxu1 }
 0x156   :  { %v1078_v62 = vmax.f32 %v1034_v26, 0.0  ;;  %v1037_v49 = vadd.f32 %v1036_v20, %v940_v28  ;;  %v5440_v63 = vpop.f32.mrb[48].mxu0 }
 0x157   :  { %v5441_v25 = vpop.f32.mrb[49].mxu0 }
 0x158   :  { %v6896_v52 = vadd.f32 %v1078_v62, %v643_v60  ;;  %v1079_v30 = vmax.f32 %v1037_v49, 0.0  ;;  %v5442_v31 = vadd.f32 %v5441_v25, %v5440_v63  ;;  %v5443_v33 = vpop.f32.mrb[50].mxu0 }
 0x159   :  { %v5444_v34 = vpop.f32.mrb[51].mxu0  ;;  %v1041_v35 = vpop.f32.mrb[48].mxu1 }
 0x15a   :  { %v6898_v38 = vadd.f32 %v1079_v30, %v644_v27  ;;  %v5445_v39 = vadd.f32 %v5444_v34, %v5443_v33  ;;  %v945_v40 = vadd.f32 %v5442_v31, %v6745_v37  ;;  %v1043_v42 = vpop.f32.mrb[49].mxu1 }
 0x15b   :  { %v1044_v41 = vpop.f32.mrb[50].mxu1 }
 0x15c   :  { %v1042_v1 = vadd.f32 %v1041_v35, %v945_v40  ;;  %v948_v46 = vadd.f32 %v5445_v39, %v6745_v37  ;;  %v1046_v47 = vpop.f32.mrb[51].mxu1  ;;  %v650_v40 = vmax.f32 %v6848_v32, 0.0  ;;  %v5863_v32 = vld [vmem:[%s7837_s3 + $0x68] ss:$16 sps:$4 sm:$0xff]  }
 0x15e   :  { %v1080_v50 = vmax.f32 %v1042_v1, 0.0  ;;  %v1045_v11 = vadd.f32 %v1044_v41, %v948_v46  ;;  %v5446_v51 = vpop.f32.mrb[52].mxu0 }
 0x15f   :  { %v5447_v53 = vpop.f32.mrb[53].mxu0 }
 0x160   :  { %v6904_v14 = vadd.f32 %v1080_v50, %v645_v44  ;;  %v1081_v55 = vmax.f32 %v1045_v11, 0.0  ;;  %v5448_v56 = vadd.f32 %v5447_v53, %v5446_v51  ;;  %v5449_v57 = vpop.f32.mrb[54].mxu0  ;;  %v5860_v44 = vld [vmem:[%s7837_s3 + $0x60] ss:$16 sps:$4 sm:$0xff]   ;;  %v5862_v50 = vld [vmem:[%s7837_s3 + $0x64] ss:$16 sps:$4 sm:$0xff]  }
 0x161   :  { %v5450_v3 = vpop.f32.mrb[55].mxu0  ;;  %v1049_v4 = vpop.f32.mrb[52].mxu1  ;;  %v5865_v51 = vld [vmem:[%s7837_s3 + $0x6c] ss:$16 sps:$4 sm:$0xff]   ;;  %2098 = vmatprep.subr.bf16.mxu0 %v5862_v50 }
 0x162   :  { %v6906_v7 = vadd.f32 %v1081_v55, %v646_v54  ;;  %v5451_v9 = vadd.f32 %v5450_v3, %v5449_v57  ;;  %v953_v8 = vadd.f32 %v5448_v56, %v6745_v37  ;;  %v1051_v10 = vpop.f32.mrb[53].mxu1  ;;  %2099 = vmatpush1.bf16.msra.mxu0 %v5860_v44  ;;  %2139 = vmatprep.subr.bf16.mxu1 %v5865_v51 }
 0x163   :  { %v1052_v2 = vpop.f32.mrb[54].mxu1  ;;  %2140 = vmatpush1.bf16.msra.mxu1 %v5863_v32 }
 0x164   :  { %v1050_v12 = vadd.f32 %v1049_v4, %v953_v8  ;;  %v956_v13 = vadd.f32 %v5451_v9, %v6745_v37  ;;  %v1054_v61 = vpop.f32.mrb[55].mxu1  ;;  %v651_v8 = vmax.f32 %v6851_v45, 0.0 }
 0x165   :  { %v652_v61 = vmax.f32 %v6854_v48, 0.0 }
 0x166   :  { %v1082_v16 = vmax.f32 %v1050_v12, 0.0  ;;  %v1053_v17 = vadd.f32 %v1052_v2, %v956_v13  ;;  %v5452_v23 = vpop.f32.mrb[56].mxu0 }
 0x167   :  { %v5453_v20 = vpop.f32.mrb[57].mxu0 }
 0x168   :  { %v6912_v24 = vadd.f32 %v1082_v16, %v647_v5  ;;  %v1083_v26 = vmax.f32 %v1053_v17, 0.0  ;;  %v5454_v28 = vadd.f32 %v5453_v20, %v5452_v23  ;;  %v5455_v59 = vpop.f32.mrb[58].mxu0 }
 0x169   :  { %v5456_v60 = vpop.f32.mrb[59].mxu0  ;;  %v1057_v62 = vpop.f32.mrb[56].mxu1 }
 0x16a   :  { %v6914_v49 = vadd.f32 %v1083_v26, %v648_v21  ;;  %v5457_v63 = vadd.f32 %v5456_v60, %v5455_v59  ;;  %v961_v25 = vadd.f32 %v5454_v28, %v6745_v37  ;;  %v1059_v27 = vpop.f32.mrb[57].mxu1 }
 0x16b   :  { %v1060_v19 = vpop.f32.mrb[58].mxu1 }
 0x16c   :  { %v1058_v30 = vadd.f32 %v1057_v62, %v961_v25  ;;  %v964_v31 = vadd.f32 %v5457_v63, %v6745_v37  ;;  %v1062_v33 = vpop.f32.mrb[59].mxu1 }
 0x16e   :  { %v1084_v34 = vmax.f32 %v1058_v30, 0.0  ;;  %v1061_v35 = vadd.f32 %v1060_v19, %v964_v31  ;;  %v5458_v39 = vpop.f32.mrb[60].mxu0 }
 0x16f   :  { %v5459_v42 = vpop.f32.mrb[61].mxu0 }
 0x170   :  { %v6920_v41 = vadd.f32 %v1084_v34, %v649_v22  ;;  %v1085_v1 = vmax.f32 %v1061_v35, 0.0  ;;  %v5460_v46 = vadd.f32 %v5459_v42, %v5458_v39  ;;  %v5461_v47 = vpop.f32.mrb[62].mxu0 }
 0x171   :  { %v5462_v29 = vpop.f32.mrb[63].mxu0  ;;  %v1065_v11 = vpop.f32.mrb[60].mxu1 }
 0x172   :  { %v6934_v53 = vadd.f32 %v1085_v1, %v650_v40  ;;  %v5463_v54 = vadd.f32 %v5462_v29, %v5461_v47  ;;  %v969_v55 = vadd.f32 %v5460_v46, %v6745_v37  ;;  %v1067_v56 = vpop.f32.mrb[61].mxu1 }
 0x173   :  { %v1068_v57 = vpop.f32.mrb[62].mxu1 }
 0x174   :  { %v1066_v3 = vadd.f32 %v1065_v11, %v969_v55  ;;  %v972_v4 = vadd.f32 %v5463_v54, %v6745_v37  ;;  %v1070_v9 = vpop.f32.mrb[63].mxu1  ;;  %v5871_v11 = vld [vmem:[%s7837_s3 + $0xc] ss:$16 sps:$4 sm:$0xff]  }
 0x175   :  { %2277 = vmatprep.subr.bf16.mxu1 %v5871_v11 }
 0x176   :  { %v1086_v10 = vmax.f32 %v1066_v3, 0.0  ;;  %v1069_v2 = vadd.f32 %v1068_v57, %v972_v4  ;;  %v5480_v12 = vpop.f32.mrb[64].mxu0 }
 0x177   :  { %v5481_v13 = vpop.f32.mrb[65].mxu0 }
 0x178   :  { %v6940_v5 = vadd.f32 %v1086_v10, %v651_v8  ;;  %v1087_v16 = vmax.f32 %v1069_v2, 0.0  ;;  %v5482_v17 = vadd.f32 %v5481_v13, %v5480_v12  ;;  %v5483_v23 = vpop.f32.mrb[66].mxu0 }
 0x179   :  { %v5484_v20 = vpop.f32.mrb[67].mxu0  ;;  %v1444_v21 = vpop.f32.mrb[64].mxu1 }
 0x17a   :  { %v6942_v26 = vadd.f32 %v1087_v16, %v652_v61  ;;  %v5485_v28 = vadd.f32 %v5484_v20, %v5483_v23  ;;  %v1348_v59 = vadd.f32 %v5482_v17, %v6745_v37  ;;  %v1446_v60 = vpop.f32.mrb[65].mxu1 }
 0x17b   :  { %v1447_v45 = vpop.f32.mrb[66].mxu1 }
 0x17c   :  { %v1445_v62 = vadd.f32 %v1444_v21, %v1348_v59  ;;  %v1351_v63 = vadd.f32 %v5485_v28, %v6745_v37  ;;  %v1449_v25 = vpop.f32.mrb[67].mxu1 }
 0x17e   :  { %v1507_v27 = vmax.f32 %v1445_v62, 0.0  ;;  %v1448_v48 = vadd.f32 %v1447_v45, %v1351_v63  ;;  %v5486_v19 = vpop.f32.mrb[68].mxu0 }
 0x17f   :  { %v5487_v30 = vpop.f32.mrb[69].mxu0 }
 0x180   :  { %v6947_v31 = vadd.f32 %v1507_v27, %v6860_v18  ;;  %v1508_v33 = vmax.f32 %v1448_v48, 0.0  ;;  %v5488_v22 = vadd.f32 %v5487_v30, %v5486_v19  ;;  %v5489_v34 = vpop.f32.mrb[70].mxu0  ;;  %v5868_v18 = vld [vmem:[%s7837_s3 + $0x4] ss:$16 sps:$4 sm:$0xff]  }
 0x181   :  { %v5490_v35 = vpop.f32.mrb[71].mxu0  ;;  %v1452_v39 = vpop.f32.mrb[68].mxu1  ;;  %2236 = vmatprep.subr.bf16.mxu0 %v5868_v18 }
 0x182   :  { %v6950_v40 = vadd.f32 %v1508_v33, %v6862_v58  ;;  %v5491_v42 = vadd.f32 %v5490_v35, %v5489_v34  ;;  %v1356_v1 = vadd.f32 %v5488_v22, %v6745_v37  ;;  %v1454_v46 = vpop.f32.mrb[69].mxu1 }
 0x183   :  { %v1455_v47 = vpop.f32.mrb[70].mxu1 }
 0x184   :  { %v1453_v44 = vadd.f32 %v1452_v39, %v1356_v1  ;;  %v1359_v50 = vadd.f32 %v5491_v42, %v6745_v37  ;;  %v1457_v29 = vpop.f32.mrb[71].mxu1 }
 0x186   :  { %v1509_v32 = vmax.f32 %v1453_v44, 0.0  ;;  %v1456_v58 = vadd.f32 %v1455_v47, %v1359_v50  ;;  %v5492_v51 = vpop.f32.mrb[72].mxu0 }
 0x187   :  { %v5493_v54 = vpop.f32.mrb[73].mxu0 }
 0x188   :  { %v6961_v55 = vadd.f32 %v1509_v32, %v6868_v36  ;;  %v1510_v56 = vmax.f32 %v1456_v58, 0.0  ;;  %v5494_v57 = vadd.f32 %v5493_v54, %v5492_v51  ;;  %v5495_v3 = vpop.f32.mrb[74].mxu0 }
 0x189   :  { %v5496_v4 = vpop.f32.mrb[75].mxu0  ;;  %v1460_v9 = vpop.f32.mrb[72].mxu1 }
 0x18a   :  { %v6964_v8 = vadd.f32 %v1510_v56, %v6870_v43  ;;  %v5497_v10 = vadd.f32 %v5496_v4, %v5495_v3  ;;  %v1364_v2 = vadd.f32 %v5494_v57, %v6745_v37  ;;  %v1462_v12 = vpop.f32.mrb[73].mxu1 }
 0x18b   :  { %v1463_v13 = vpop.f32.mrb[74].mxu1 }
 0x18c   :  { %v1461_v61 = vadd.f32 %v1460_v9, %v1364_v2  ;;  %v1367_v16 = vadd.f32 %v5497_v10, %v6745_v37  ;;  %v1465_v17 = vpop.f32.mrb[75].mxu1  ;;  %v6977_v37 = vld [vmem:[%s7836_s2] ss:$0 sm:$0xff] }
 0x18e   :  { %v1511_v23 = vmax.f32 %v1461_v61, 0.0  ;;  %v1464_v36 = vadd.f32 %v1463_v13, %v1367_v16  ;;  %v5498_v20 = vpop.f32.mrb[76].mxu0 }
 0x18f   :  { %v5499_v21 = vpop.f32.mrb[77].mxu0 }
 0x190   :  { %v6969_v28 = vadd.f32 %v1511_v23, %v6876_v6  ;;  %v1512_v59 = vmax.f32 %v1464_v36, 0.0  ;;  %v5500_v60 = vadd.f32 %v5499_v21, %v5498_v20  ;;  %v5501_v43 = vpop.f32.mrb[78].mxu0 }
 0x191   :  { %v5502_v45 = vpop.f32.mrb[79].mxu0  ;;  %v1468_v62 = vpop.f32.mrb[76].mxu1 }
 0x192   :  { %v6972_v63 = vadd.f32 %v1512_v59, %v6881_v15  ;;  %v5503_v25 = vadd.f32 %v5502_v45, %v5501_v43  ;;  %v1372_v27 = vadd.f32 %v6977_v37, %v5500_v60  ;;  %v1470_v48 = vpop.f32.mrb[77].mxu1 }
 0x193   :  { %v1471_v19 = vpop.f32.mrb[78].mxu1 }
 0x194   :  { %v1469_v6 = vadd.f32 %v1468_v62, %v1372_v27  ;;  %v1375_v30 = vadd.f32 %v6977_v37, %v5503_v25  ;;  %v1473_v33 = vpop.f32.mrb[79].mxu1 }
 0x196   :  { %v1513_v22 = vmax.f32 %v1469_v6, 0.0  ;;  %v1472_v34 = vadd.f32 %v1471_v19, %v1375_v30  ;;  %v5504_v35 = vpop.f32.mrb[80].mxu0 }
 0x197   :  { %v5505_v39 = vpop.f32.mrb[81].mxu0 }
 0x198   :  { %v6982_v15 = vadd.f32 %v1513_v22, %v6896_v52  ;;  %v1514_v42 = vmax.f32 %v1472_v34, 0.0  ;;  %v5506_v1 = vadd.f32 %v5505_v39, %v5504_v35  ;;  %v5507_v46 = vpop.f32.mrb[82].mxu0 }
 0x199   :  { %v5508_v47 = vpop.f32.mrb[83].mxu0  ;;  %v1476_v44 = vpop.f32.mrb[80].mxu1 }
 0x19a   :  { %v6985_v50 = vadd.f32 %v1514_v42, %v6898_v38  ;;  %v5509_v29 = vadd.f32 %v5508_v47, %v5507_v46  ;;  %v1380_v18 = vadd.f32 %v6977_v37, %v5506_v1  ;;  %v1478_v11 = vpop.f32.mrb[81].mxu1 }
 0x19b   :  { %v1479_v32 = vpop.f32.mrb[82].mxu1 }
 0x19c   :  { %v1477_v58 = vadd.f32 %v1476_v44, %v1380_v18  ;;  %v1383_v51 = vadd.f32 %v6977_v37, %v5509_v29  ;;  %v1481_v54 = vpop.f32.mrb[83].mxu1 }
 0x19e   :  { %v1515_v56 = vmax.f32 %v1477_v58, 0.0  ;;  %v1480_v52 = vadd.f32 %v1479_v32, %v1383_v51  ;;  %v5510_v57 = vpop.f32.mrb[84].mxu0 }
 0x19f   :  { %v5511_v3 = vpop.f32.mrb[85].mxu0 }
 0x1a0   :  { %v6990_v4 = vadd.f32 %v1515_v56, %v6904_v14  ;;  %v1516_v9 = vmax.f32 %v1480_v52, 0.0  ;;  %v5512_v10 = vadd.f32 %v5511_v3, %v5510_v57  ;;  %v5513_v38 = vpop.f32.mrb[86].mxu0 }
 0x1a1   :  { %v5514_v2 = vpop.f32.mrb[87].mxu0  ;;  %v1484_v12 = vpop.f32.mrb[84].mxu1 }
 0x1a2   :  { %v6993_v13 = vadd.f32 %v1516_v9, %v6906_v7  ;;  %v5515_v61 = vadd.f32 %v5514_v2, %v5513_v38  ;;  %v1388_v16 = vadd.f32 %v6977_v37, %v5512_v10  ;;  %v1486_v17 = vpop.f32.mrb[85].mxu1 }
 0x1a3   :  { %v1487_v23 = vpop.f32.mrb[86].mxu1 }
 0x1a4   :  { %v1485_v36 = vadd.f32 %v1484_v12, %v1388_v16  ;;  %v1391_v20 = vadd.f32 %v6977_v37, %v5515_v61  ;;  %v1489_v21 = vpop.f32.mrb[87].mxu1 }
 0x1a6   :  { %v1517_v59 = vmax.f32 %v1485_v36, 0.0  ;;  %v1488_v14 = vadd.f32 %v1487_v23, %v1391_v20  ;;  %v5516_v60 = vpop.f32.mrb[88].mxu0 }
 0x1a7   :  { %v5517_v43 = vpop.f32.mrb[89].mxu0 }
 0x1a8   :  { %v6998_v45 = vadd.f32 %v1517_v59, %v6912_v24  ;;  %v1518_v62 = vmax.f32 %v1488_v14, 0.0  ;;  %v5518_v25 = vadd.f32 %v5517_v43, %v5516_v60  ;;  %v5519_v7 = vpop.f32.mrb[90].mxu0 }
 0x1a9   :  { %v5520_v27 = vpop.f32.mrb[91].mxu0  ;;  %v1492_v48 = vpop.f32.mrb[88].mxu1 }
 0x1aa   :  { %v7001_v19 = vadd.f32 %v1518_v62, %v6914_v49  ;;  %v5521_v6 = vadd.f32 %v5520_v27, %v5519_v7  ;;  %v1396_v30 = vadd.f32 %v6977_v37, %v5518_v25  ;;  %v1494_v33 = vpop.f32.mrb[89].mxu1 }
 0x1ab   :  { %v1495_v22 = vpop.f32.mrb[90].mxu1 }
 0x1ac   :  { %v1493_v34 = vadd.f32 %v1492_v48, %v1396_v30  ;;  %v1399_v35 = vadd.f32 %v6977_v37, %v5521_v6  ;;  %v1497_v39 = vpop.f32.mrb[91].mxu1 }
 0x1ae   :  { %v1519_v42 = vmax.f32 %v1493_v34, 0.0  ;;  %v1496_v24 = vadd.f32 %v1495_v22, %v1399_v35  ;;  %v5522_v1 = vpop.f32.mrb[92].mxu0 }
 0x1af   :  { %v5523_v46 = vpop.f32.mrb[93].mxu0 }
 0x1b0   :  { %v7006_v47 = vadd.f32 %v1519_v42, %v6920_v41  ;;  %v1520_v44 = vmax.f32 %v1496_v24, 0.0  ;;  %v5524_v29 = vadd.f32 %v5523_v46, %v5522_v1  ;;  %v5525_v49 = vpop.f32.mrb[94].mxu0 }
 0x1b1   :  { %v5526_v18 = vpop.f32.mrb[95].mxu0  ;;  %v1500_v11 = vpop.f32.mrb[92].mxu1 }
 0x1b2   :  { %v7009_v32 = vadd.f32 %v1520_v44, %v6934_v53  ;;  %v5527_v58 = vadd.f32 %v5526_v18, %v5525_v49  ;;  %v1404_v51 = vadd.f32 %v6977_v37, %v5524_v29  ;;  %v1502_v54 = vpop.f32.mrb[93].mxu1 }
 0x1b3   :  { %v1503_v56 = vpop.f32.mrb[94].mxu1 }
 0x1b4   :  { %v1501_v52 = vadd.f32 %v1500_v11, %v1404_v51  ;;  %v1407_v57 = vadd.f32 %v6977_v37, %v5527_v58  ;;  %v1505_v3 = vpop.f32.mrb[95].mxu1 }
 0x1b6   :  { %v1521_v9 = vmax.f32 %v1501_v52, 0.0  ;;  %v1504_v41 = vadd.f32 %v1503_v56, %v1407_v57  ;;  %v5544_v10 = vpop.f32.mrb[96].mxu0 }
 0x1b7   :  { %v5545_v38 = vpop.f32.mrb[97].mxu0 }
 0x1b8   :  { %v7014_v2 = vadd.f32 %v1521_v9, %v6940_v5  ;;  %v1522_v12 = vmax.f32 %v1504_v41, 0.0  ;;  %v5546_v61 = vadd.f32 %v5545_v38, %v5544_v10  ;;  %v5547_v53 = vpop.f32.mrb[98].mxu0 }
 0x1b9   :  { %v5548_v16 = vpop.f32.mrb[99].mxu0  ;;  %v1879_v17 = vpop.f32.mrb[96].mxu1 }
 0x1ba   :  { %v7017_v23 = vadd.f32 %v1522_v12, %v6942_v26  ;;  %v5549_v36 = vadd.f32 %v5548_v16, %v5547_v53  ;;  %v1783_v20 = vadd.f32 %v6977_v37, %v5546_v61  ;;  %v1881_v21 = vpop.f32.mrb[97].mxu1 }
 0x1bb   :  { %v1882_v59 = vpop.f32.mrb[98].mxu1 }
 0x1bc   :  { %v1880_v14 = vadd.f32 %v1879_v17, %v1783_v20  ;;  %v1786_v60 = vadd.f32 %v6977_v37, %v5549_v36  ;;  %v1884_v43 = vpop.f32.mrb[99].mxu1 }
 0x1be   :  { %v1942_v62 = vmax.f32 %v1880_v14, 0.0  ;;  %v1883_v5 = vadd.f32 %v1882_v59, %v1786_v60  ;;  %v5550_v25 = vpop.f32.mrb[100].mxu0 }
 0x1bf   :  { %v5551_v7 = vpop.f32.mrb[101].mxu0 }
 0x1c0   :  { %v1958_v27 = vadd.f32 %v1942_v62, %v6947_v31  ;;  %v1943_v48 = vmax.f32 %v1883_v5, 0.0  ;;  %v5552_v6 = vadd.f32 %v5551_v7, %v5550_v25  ;;  %v5553_v30 = vpop.f32.mrb[102].mxu0 }
 0x1c1   :  { %v5554_v26 = vpop.f32.mrb[103].mxu0  ;;  %v1887_v33 = vpop.f32.mrb[100].mxu1 }
 0x1c2   :  { %v1974_v22 = vmul.f32 0.25, %v1958_v27  ;;  %v1959_v34 = vadd.f32 %v1943_v48, %v6950_v40  ;;  %v5555_v35 = vadd.f32 %v5554_v26, %v5553_v30  ;;  %v1791_v39 = vadd.f32 %v6977_v37, %v5552_v6  ;;  %v1889_v42 = vpop.f32.mrb[101].mxu1 }
 0x1c3   :  { %v1890_v24 = vpop.f32.mrb[102].mxu1 }
 0x1c4   :  { %v1888_v1 = vadd.f32 %v1887_v33, %v1791_v39  ;;  %v1794_v46 = vadd.f32 %v6977_v37, %v5555_v35  ;;  %v1892_v44 = vpop.f32.mrb[103].mxu1  ;;  %v1990_v29 = vpack.c.bf16 %v1974_v22, %v1974_v22  ;;  %v1975_v49 = vmul.f32 0.25, %v1959_v34 }
 0x1c6   :  { %v1944_v31 = vmax.f32 %v1888_v1, 0.0  ;;  %v1891_v18 = vadd.f32 %v1890_v24, %v1794_v46  ;;  %v5556_v11 = vpop.f32.mrb[104].mxu0  ;;  %v7026_v52 = vunpack.c.l.b16 %v1990_v29  ;;  %v3230_v57 = vpack.c.bf16 %v1975_v49, %v1975_v49 }
 0x1c7   :  { %v5557_v58 = vpop.f32.mrb[105].mxu0 }
 0x1c8   :  { %v1960_v51 = vadd.f32 %v1944_v31, %v6961_v55  ;;  %v1945_v54 = vmax.f32 %v1891_v18, 0.0  ;;  %v5558_v56 = vadd.f32 %v5557_v58, %v5556_v11  ;;  %v5559_v40 = vpop.f32.mrb[106].mxu0  ;;  %v7031_v21 = vunpack.c.l.b16 %v3230_v57 }
 0x1c9   :  { %v5560_v3 = vpop.f32.mrb[107].mxu0  ;;  %v1895_v9 = vpop.f32.mrb[104].mxu1  ;;  %v2030_v59 = vrot.slane %v7026_v52, 1  ;;  %v2326_v14 = vrot.slane %v7026_v52, 2  ;;  %v2630_v27 = vrot.slane %v7026_v52, 4  ;;  %v2782_v48 = vrot.slane %v7026_v52, 5 }
 0x1ca   :  { %v1976_v41 = vmul.f32 0.25, %v1960_v51  ;;  %v1961_v10 = vadd.f32 %v1945_v54, %v6964_v8  ;;  %v5561_v38 = vadd.f32 %v5560_v3, %v5559_v40  ;;  %v1799_v12 = vadd.f32 %v6977_v37, %v5558_v56  ;;  %v1897_v61 = vpop.f32.mrb[105].mxu1 }
 0x1cb   :  { %v1898_v53 = vpop.f32.mrb[106].mxu1  ;;  %v2478_v8 = vrot.slane %v7026_v52, 3  ;;  %v2934_v6 = vrot.slane %v7026_v52, 6  ;;  %v3086_v30 = vrot.slane %v7026_v52, 7 }
 0x1cc   :  { %v1991_v16 = vpack.c.bf16 %v1976_v41, %v1976_v41  ;;  %v1977_v17 = vmul.f32 0.25, %v1961_v10  ;;  %v1896_v55 = vadd.f32 %v1895_v9, %v1799_v12  ;;  %v1802_v36 = vadd.f32 %v6977_v37, %v5561_v38  ;;  %v1900_v20 = vpop.f32.mrb[107].mxu1 }
 0x1ce   :  { %v2023_v60 = vunpack.c.l.b16 %v1991_v16  ;;  %v3231_v43 = vpack.c.bf16 %v1977_v17, %v1977_v17  ;;  %v1946_v62 = vmax.f32 %v1896_v55, 0.0  ;;  %v1899_v5 = vadd.f32 %v1898_v53, %v1802_v36  ;;  %v5562_v25 = vpop.f32.mrb[108].mxu0 }
 0x1cf   :  { %v5563_v7 = vpop.f32.mrb[109].mxu0  ;;  %v3414_v17 = vrot.slane %v7031_v21, 1 }
 0x1d0   :  { %v7040_v26 = vunpack.c.l.b16 %v3231_v43  ;;  %v1962_v33 = vadd.f32 %v1946_v62, %v6969_v28  ;;  %v1947_v22 = vmax.f32 %v1899_v5, 0.0  ;;  %v5564_v34 = vadd.f32 %v5563_v7, %v5562_v25  ;;  %v5565_v35 = vpop.f32.mrb[110].mxu0 }
 0x1d1   :  { %v5566_v39 = vpop.f32.mrb[111].mxu0  ;;  %v1903_v42 = vpop.f32.mrb[108].mxu1  ;;  %v2032_v24 = vsel %vm2031_vm1, %v2023_v60, %v2030_v59  ;;  %v2178_v1 = vrot.slane %v2023_v60, 7  ;;  %v2327_v46 = vrot.slane %v2023_v60, 1  ;;  %v2479_v44 = vrot.slane %v2023_v60, 2 }
 0x1d2   :  { %v1978_v29 = vmul.f32 0.25, %v1962_v33  ;;  %v1963_v49 = vadd.f32 %v1947_v22, %v6972_v63  ;;  %v5567_v31 = vadd.f32 %v5566_v39, %v5565_v35  ;;  %v1807_v18 = vadd.f32 %v6977_v37, %v5564_v34  ;;  %v1905_v11 = vpop.f32.mrb[109].mxu1 }
 0x1d3   :  { %v1906_v58 = vpop.f32.mrb[110].mxu1  ;;  %v2179_v28 = vsel %vm2031_vm1, %v2178_v1, %v7026_v52  ;;  %v2328_v51 = vsel %vm2031_vm1, %v2327_v46, %v2326_v14  ;;  %v2480_v54 = vsel %vm2031_vm1, %v2479_v44, %v2478_v8  ;;  %v2631_v56 = vrot.slane %v2023_v60, 3 }
 0x1d4   :  { %v1992_v40 = vpack.c.bf16 %v1978_v29, %v1978_v29  ;;  %v1979_v57 = vmul.f32 0.25, %v1963_v49  ;;  %v1904_v3 = vadd.f32 %v1903_v42, %v1807_v18  ;;  %v1810_v9 = vadd.f32 %v6977_v37, %v5567_v31  ;;  %v1908_v41 = vpop.f32.mrb[111].mxu1 }
 0x1d5   :  { %v2632_v63 = vsel %vm2031_vm1, %v2631_v56, %v2630_v27  ;;  %v2783_v10 = vrot.slane %v2023_v60, 4  ;;  %v2935_v38 = vrot.slane %v2023_v60, 5  ;;  %v3087_v12 = vrot.slane %v2023_v60, 6 }
 0x1d6   :  { %v2024_v61 = vunpack.c.l.b16 %v1992_v40  ;;  %v1948_v53 = vmax.f32 %v1904_v3, 0.0  ;;  %v1907_v16 = vadd.f32 %v1906_v58, %v1810_v9  ;;  %v5568_v52 = vpop.f32.mrb[112].mxu0  ;;  %v3232_v55 = vpack.c.bf16 %v1979_v57, %v1979_v57 }
 0x1d7   :  { %v5569_v36 = vpop.f32.mrb[113].mxu0  ;;  %v2784_v20 = vsel %vm2031_vm1, %v2783_v10, %v2782_v48  ;;  %v2936_v59 = vsel %vm2031_vm1, %v2935_v38, %v2934_v6  ;;  %v3088_v14 = vsel %vm2031_vm1, %v3087_v12, %v3086_v30  ;;  %v3262_v5 = vrot.slane %v7040_v26, 7 }
 0x1d8   :  { %v1964_v8 = vadd.f32 %v1948_v53, %v6982_v15  ;;  %v1949_v43 = vmax.f32 %v1907_v16, 0.0  ;;  %v5570_v62 = vadd.f32 %v5569_v36, %v5568_v52  ;;  %v5571_v60 = vpop.f32.mrb[114].mxu0  ;;  %v2033_v27 = vrot.slane %v2024_v61, 7 }
 0x1d9   :  { %v5572_v25 = vpop.f32.mrb[115].mxu0  ;;  %v1911_v7 = vpop.f32.mrb[112].mxu1  ;;  %v2180_v33 = vrot.slane %v2024_v61, 6  ;;  %v2329_v22 = vsel %vm2034_vm2, %v2024_v61, %v2328_v51  ;;  %v2481_v34 = vrot.slane %v2024_v61, 1  ;;  %v2633_v44 = vrot.slane %v2024_v61, 2 }
 0x1da   :  { %v1980_v35 = vmul.f32 0.25, %v1964_v8  ;;  %v1965_v48 = vadd.f32 %v1949_v43, %v6985_v50  ;;  %v5573_v6 = vadd.f32 %v5572_v25, %v5571_v60  ;;  %v1815_v30 = vadd.f32 %v6977_v37, %v5570_v62  ;;  %v1913_v39 = vpop.f32.mrb[113].mxu1 }
 0x1db   :  { %v1914_v15 = vpop.f32.mrb[114].mxu1  ;;  %v2035_v42 = vsel %vm2034_vm2, %v2033_v27, %v2032_v24  ;;  %v2181_v1 = vsel %vm2034_vm2, %v2180_v33, %v2179_v28  ;;  %v2482_v46 = vsel %vm2034_vm2, %v2481_v34, %v2480_v54  ;;  %v2634_v50 = vsel %vm2034_vm2, %v2633_v44, %v2632_v63 }
 0x1dc   :  { %v1993_v29 = vpack.c.bf16 %v1980_v35, %v1980_v35  ;;  %v1981_v49 = vmul.f32 0.25, %v1965_v48  ;;  %v1912_v31 = vadd.f32 %v1911_v7, %v1815_v30  ;;  %v1818_v18 = vadd.f32 %v6977_v37, %v5573_v6  ;;  %v1916_v11 = vpop.f32.mrb[115].mxu1 }
 0x1dd   :  { %v2785_v58 = vrot.slane %v2024_v61, 3  ;;  %v2937_v51 = vrot.slane %v2024_v61, 4  ;;  %v3089_v56 = vrot.slane %v2024_v61, 5  ;;  %v7066_v40 = vunpack.c.l.b16 %v3232_v55 }
 0x1de   :  { %v2025_v57 = vunpack.c.l.b16 %v1993_v29  ;;  %v1950_v24 = vmax.f32 %v1912_v31, 0.0  ;;  %v1915_v3 = vadd.f32 %v1914_v15, %v1818_v18  ;;  %v5574_v28 = vpop.f32.mrb[116].mxu0  ;;  %v7073_v38 = vsel %vm2031_vm1, %v3262_v5, %v7031_v21 }
 0x1df   :  { %v5575_v9 = vpop.f32.mrb[117].mxu0  ;;  %v2786_v54 = vsel %vm2034_vm2, %v2785_v58, %v2784_v20  ;;  %v2938_v41 = vsel %vm2034_vm2, %v2937_v51, %v2936_v59  ;;  %v3090_v10 = vsel %vm2034_vm2, %v3089_v56, %v3088_v14  ;;  %v3233_v63 = vpack.c.bf16 %v1981_v49, %v1981_v49 }
 0x1e0   :  { %v1966_v12 = vadd.f32 %v1950_v24, %v6990_v4  ;;  %v1951_v61 = vmax.f32 %v1915_v3, 0.0  ;;  %v5576_v53 = vadd.f32 %v5575_v9, %v5574_v28  ;;  %v5577_v16 = vpop.f32.mrb[118].mxu0  ;;  %v2036_v36 = vrot.slane %v2025_v57, 6 }
 0x1e1   :  { %v5578_v52 = vpop.f32.mrb[119].mxu0  ;;  %v1919_v55 = vpop.f32.mrb[116].mxu1  ;;  %v2182_v8 = vrot.slane %v2025_v57, 5  ;;  %v2330_v43 = vrot.slane %v2025_v57, 7  ;;  %v2483_v20 = vsel %vm2037_vm3, %v2025_v57, %v2482_v46  ;;  %v2635_v33 = vrot.slane %v2025_v57, 1 }
 0x1e2   :  { %v1982_v59 = vmul.f32 0.25, %v1966_v12  ;;  %v1967_v14 = vadd.f32 %v1951_v61, %v6993_v13  ;;  %v5579_v62 = vadd.f32 %v5578_v52, %v5577_v16  ;;  %v1823_v60 = vadd.f32 %v6977_v37, %v5576_v53  ;;  %v1921_v5 = vpop.f32.mrb[117].mxu1 }
 0x1e3   :  { %v1922_v25 = vpop.f32.mrb[118].mxu1  ;;  %v2038_v4 = vsel %vm2037_vm3, %v2036_v36, %v2035_v42  ;;  %v2183_v7 = vsel %vm2037_vm3, %v2182_v8, %v2181_v1  ;;  %v2331_v27 = vsel %vm2037_vm3, %v2330_v43, %v2329_v22  ;;  %v2636_v13 = vsel %vm2037_vm3, %v2635_v33, %v2634_v50 }
 0x1e4   :  { %v1994_v34 = vpack.c.bf16 %v1982_v59, %v1982_v59  ;;  %v1983_v35 = vmul.f32 0.25, %v1967_v14  ;;  %v1920_v48 = vadd.f32 %v1919_v55, %v1823_v60  ;;  %v1826_v6 = vadd.f32 %v6977_v37, %v5579_v62  ;;  %v1924_v30 = vpop.f32.mrb[119].mxu1 }
 0x1e5   :  { %v2787_v39 = vrot.slane %v2025_v57, 2  ;;  %v2939_v15 = vrot.slane %v2025_v57, 3  ;;  %v3091_v46 = vrot.slane %v2025_v57, 4  ;;  %v7084_v44 = vunpack.c.l.b16 %v3233_v63 }
 0x1e6   :  { %v2026_v29 = vunpack.c.l.b16 %v1994_v34  ;;  %v1952_v42 = vmax.f32 %v1920_v48, 0.0  ;;  %v1923_v49 = vadd.f32 %v1922_v25, %v1826_v6  ;;  %v5580_v1 = vpop.f32.mrb[120].mxu0  ;;  %v3234_v31 = vpack.c.bf16 %v1983_v35, %v1983_v35 }
 0x1e7   :  { %v5581_v22 = vpop.f32.mrb[121].mxu0  ;;  %v2788_v18 = vsel %vm2037_vm3, %v2787_v39, %v2786_v54  ;;  %v2940_v11 = vsel %vm2037_vm3, %v2939_v15, %v2938_v41  ;;  %v3092_v58 = vsel %vm2037_vm3, %v3091_v46, %v3090_v10  ;;  %v3264_v57 = vrot.slane %v7066_v40, 6 }
 0x1e8   :  { %v1968_v51 = vadd.f32 %v1952_v42, %v6998_v45  ;;  %v1953_v50 = vmax.f32 %v1923_v49, 0.0  ;;  %v5582_v56 = vadd.f32 %v5581_v22, %v5580_v1  ;;  %v5583_v24 = vpop.f32.mrb[122].mxu0  ;;  %v2039_v9 = vrot.slane %v2026_v29, 5 }
 0x1e9   :  { %v5584_v3 = vpop.f32.mrb[123].mxu0  ;;  %v1927_v28 = vpop.f32.mrb[120].mxu1  ;;  %v2184_v63 = vrot.slane %v2026_v29, 4  ;;  %v2332_v12 = vrot.slane %v2026_v29, 6  ;;  %v2484_v61 = vrot.slane %v2026_v29, 7  ;;  %v2637_v60 = vsel %vm2040_vm4, %v2026_v29, %v2636_v13 }
 0x1ea   :  { %v1984_v53 = vmul.f32 0.25, %v1968_v51  ;;  %v1969_v54 = vadd.f32 %v1953_v50, %v7001_v19  ;;  %v5585_v16 = vadd.f32 %v5584_v3, %v5583_v24  ;;  %v1831_v41 = vadd.f32 %v6977_v37, %v5582_v56  ;;  %v1929_v10 = vpop.f32.mrb[121].mxu1 }
 0x1eb   :  { %v1930_v45 = vpop.f32.mrb[122].mxu1  ;;  %v2041_v52 = vsel %vm2040_vm4, %v2039_v9, %v2038_v4  ;;  %v2185_v55 = vsel %vm2040_vm4, %v2184_v63, %v2183_v7  ;;  %v2333_v36 = vsel %vm2040_vm4, %v2332_v12, %v2331_v27  ;;  %v2485_v8 = vsel %vm2040_vm4, %v2484_v61, %v2483_v20 }
 0x1ec   :  { %v1995_v43 = vpack.c.bf16 %v1984_v53, %v1984_v53  ;;  %v1985_v59 = vmul.f32 0.25, %v1969_v54  ;;  %v1928_v14 = vadd.f32 %v1927_v28, %v1831_v41  ;;  %v1834_v62 = vadd.f32 %v6977_v37, %v5585_v16  ;;  %v1932_v19 = vpop.f32.mrb[123].mxu1 }
 0x1ed   :  { %v2789_v5 = vrot.slane %v2026_v29, 1  ;;  %v2941_v25 = vrot.slane %v2026_v29, 2  ;;  %v3093_v33 = vrot.slane %v2026_v29, 3  ;;  %v7099_v34 = vunpack.c.l.b16 %v3234_v31 }
 0x1ee   :  { %v2027_v4 = vunpack.c.l.b16 %v1995_v43  ;;  %v1954_v35 = vmax.f32 %v1928_v14, 0.0  ;;  %v1931_v7 = vadd.f32 %v1930_v45, %v1834_v62  ;;  %v5586_v48 = vpop.f32.mrb[124].mxu0  ;;  %v7106_v39 = vsel %vm2034_vm2, %v3264_v57, %v7073_v38 }
 0x1ef   :  { %v5587_v27 = vpop.f32.mrb[125].mxu0  ;;  %v2790_v20 = vsel %vm2040_vm4, %v2789_v5, %v2788_v18  ;;  %v2942_v6 = vsel %vm2040_vm4, %v2941_v25, %v2940_v11  ;;  %v3094_v30 = vsel %vm2040_vm4, %v3093_v33, %v3092_v58  ;;  %v3235_v13 = vpack.c.bf16 %v1985_v59, %v1985_v59 }
 0x1f0   :  { %v1970_v15 = vadd.f32 %v1954_v35, %v7006_v47  ;;  %v1955_v46 = vmax.f32 %v1931_v7, 0.0  ;;  %v5588_v29 = vadd.f32 %v5587_v27, %v5586_v48  ;;  %v5589_v42 = vpop.f32.mrb[126].mxu0  ;;  %v2042_v31 = vrot.slane %v2027_v4, 4 }
 0x1f1   :  { %v5590_v49 = vpop.f32.mrb[127].mxu0  ;;  %v1935_v1 = vpop.f32.mrb[124].mxu1  ;;  %v2186_v22 = vrot.slane %v2027_v4, 3  ;;  %v2334_v18 = vrot.slane %v2027_v4, 5  ;;  %v2486_v51 = vrot.slane %v2027_v4, 6  ;;  %v2791_v54 = vsel %vm2043_vm5, %v2027_v4, %v2790_v20 }
 0x1f2   :  { %v1986_v11 = vmul.f32 0.25, %v1970_v15  ;;  %v1971_v58 = vadd.f32 %v1955_v46, %v7009_v32  ;;  %v5591_v50 = vadd.f32 %v5590_v49, %v5589_v42  ;;  %v1839_v38 = vadd.f32 %v6977_v37, %v5588_v29  ;;  %v1937_v56 = vpop.f32.mrb[125].mxu1 }
 0x1f3   :  { %v1938_v24 = vpop.f32.mrb[126].mxu1  ;;  %v2044_v47 = vsel %vm2043_vm5, %v2042_v31, %v2041_v52  ;;  %v2187_v57 = vsel %vm2043_vm5, %v2186_v22, %v2185_v55  ;;  %v2335_v3 = vsel %vm2043_vm5, %v2334_v18, %v2333_v36  ;;  %v2487_v28 = vsel %vm2043_vm5, %v2486_v51, %v2485_v8 }
 0x1f4   :  { %v1996_v9 = vpack.c.bf16 %v1986_v11, %v1986_v11  ;;  %v1987_v63 = vmul.f32 0.25, %v1971_v58  ;;  %v1936_v12 = vadd.f32 %v1935_v1, %v1839_v38  ;;  %v1842_v61 = vadd.f32 %v6977_v37, %v5591_v50  ;;  %v1940_v53 = vpop.f32.mrb[127].mxu1 }
 0x1f5   :  { %v2638_v32 = vrot.slane %v2027_v4, 7  ;;  %v2943_v16 = vrot.slane %v2027_v4, 1  ;;  %v3095_v41 = vrot.slane %v2027_v4, 2  ;;  %v7117_v10 = vunpack.c.l.b16 %v3235_v13 }
 0x1f6   :  { %v2028_v45 = vunpack.c.l.b16 %v1996_v9  ;;  %v1956_v52 = vmax.f32 %v1936_v12, 0.0  ;;  %v1939_v55 = vadd.f32 %v1938_v24, %v1842_v61  ;;  %v3236_v43 = vpack.c.bf16 %v1987_v63, %v1987_v63  ;;  %v5869_v9 = vld [vmem:[%s7837_s3 + $0x8] ss:$16 sps:$4 sm:$0xff]  }
 0x1f7   :  { %v2639_v36 = vsel %vm2043_vm5, %v2638_v32, %v2637_v60  ;;  %v2944_v8 = vsel %vm2043_vm5, %v2943_v16, %v2942_v6  ;;  %v3096_v59 = vsel %vm2043_vm5, %v3095_v41, %v3094_v30  ;;  %v3266_v19 = vrot.slane %v7084_v44, 5  ;;  %v5874_v32 = vld [vmem:[%s7837_s3 + $0x24] ss:$16 sps:$4 sm:$0xff]  }
 0x1f8   :  { %v1972_v37 = vadd.f32 %v1956_v52, %v7014_v2  ;;  %v1957_v14 = vmax.f32 %v1939_v55, 0.0  ;;  %v2045_v62 = vrot.slane %v2028_v45, 3  ;;  %v2188_v5 = vrot.slane %v2028_v45, 2 }
 0x1f9   :  { %v2336_v25 = vrot.slane %v2028_v45, 4  ;;  %v2488_v33 = vrot.slane %v2028_v45, 5  ;;  %v2640_v4 = vrot.slane %v2028_v45, 6  ;;  %v2792_v60 = vrot.slane %v2028_v45, 7 }
 0x1fa   :  { %v1988_v35 = vmul.f32 0.25, %v1972_v37  ;;  %v1973_v7 = vadd.f32 %v1957_v14, %v7017_v23  ;;  %v2047_v48 = vsel %vm2046_vm6, %v2045_v62, %v2044_v47  ;;  %v2189_v27 = vsel %vm2046_vm6, %v2188_v5, %v2187_v57  ;;  %v5880_v5 = vld [vmem:[%s7837_s3 + $0x84] ss:$16 sps:$4 sm:$0xff]  }
 0x1fb   :  { %v2337_v20 = vsel %vm2046_vm6, %v2336_v25, %v2335_v3  ;;  %v2489_v2 = vsel %vm2046_vm6, %v2488_v33, %v2487_v28  ;;  %v2641_v6 = vsel %vm2046_vm6, %v2640_v4, %v2639_v36  ;;  %v2793_v15 = vsel %vm2046_vm6, %v2792_v60, %v2791_v54  ;;  %v5877_v54 = vld [vmem:[%s7837_s3 + $0x2c] ss:$16 sps:$4 sm:$0xff]  }
 0x1fc   :  { %v1997_v30 = vpack.c.bf16 %v1988_v35, %v1988_v35  ;;  %v1989_v13 = vmul.f32 0.25, %v1973_v7  ;;  %v2945_v46 = vsel %vm2046_vm6, %v2028_v45, %v2944_v8  ;;  %v3097_v29 = vrot.slane %v2028_v45, 1  ;;  %v5872_v8 = vld [vmem:[%s7837_s3 + $0x20] ss:$16 sps:$4 sm:$0xff]   ;;  %v5883_v25 = vld [vmem:[%s7837_s3 + $0x8c] ss:$16 sps:$4 sm:$0xff]  }
 0x1fd   :  { %v3267_v23 = vsel %vm2037_vm3, %v3266_v19, %v7106_v39  ;;  %v3268_v42 = vrot.slane %v7099_v34, 4  ;;  %v7135_v49 = vunpack.c.l.b16 %v3236_v43  ;;  %v3415_v22 = vsel %vm2031_vm1, %v7040_v26, %v3414_v17  ;;  %v5866_v17 = vld [vmem:[%s7837_s3] ss:$16 sps:$4 sm:$0xff]  }
 0x1fe   :  { %v2029_v1 = vunpack.c.l.b16 %v1997_v30  ;;  %v3237_v31 = vpack.c.bf16 %v1989_v13, %v1989_v13  ;;  %v3098_v18 = vsel %vm2046_vm6, %v3097_v29, %v3096_v59  ;;  %v3270_v11 = vrot.slane %v7117_v10, 3  ;;  %v5875_v59 = vld [vmem:[%s7837_s3 + $0x28] ss:$16 sps:$4 sm:$0xff]  }
 0x1ff   :  { %v3269_v51 = vsel %vm2040_vm4, %v3268_v42, %v3267_v23  ;;  %v3416_v58 = vrot.slane %v7066_v40, 7  ;;  %v3272_v41 = vrot.slane %v7135_v49, 2  ;;  %v3418_v45 = vrot.slane %v7084_v44, 6 }
 0x200   :  { %v7145_v39 = vunpack.c.l.b16 %v3237_v31  ;;  %v2048_v50 = vrot.slane %v2029_v1, 2  ;;  %v2190_v38 = vrot.slane %v2029_v1, 1  ;;  %v2338_v56 = vrot.slane %v2029_v1, 3  ;;  %v5889_v31 = vld [vmem:[%s7837_s3 + $0xac] ss:$16 sps:$4 sm:$0xff]  }
 0x201   :  { %v2490_v24 = vrot.slane %v2029_v1, 4  ;;  %v2642_v47 = vrot.slane %v2029_v1, 5  ;;  %v2794_v57 = vrot.slane %v2029_v1, 6  ;;  %v2946_v3 = vrot.slane %v2029_v1, 7 }
 0x202   :  { %v2050_v28 = vsel %vm2049_vm7, %v2048_v50, %v2047_v48  ;;  %v2191_v63 = vsel %vm2049_vm7, %v2190_v38, %v2189_v27  ;;  %v2339_v12 = vsel %vm2049_vm7, %v2338_v56, %v2337_v20  ;;  %v7157_v61 = vsel %vm2049_vm7, %v2029_v1, %v3098_v18  ;;  %v5886_v1 = vld [vmem:[%s7837_s3 + $0xa4] ss:$16 sps:$4 sm:$0xff]  }
 0x203   :  { %v2051_v53 = vpack.c.b16 %v2050_v28, %v2050_v28  ;;  %v7166_v16 = vsel %vm2049_vm7, %v2490_v24, %v2489_v2  ;;  %v7171_v52 = vsel %vm2049_vm7, %v2642_v47, %v2641_v6  ;;  %v7174_v55 = vsel %vm2049_vm7, %v2794_v57, %v2793_v15  ;;  %v5878_v15 = vld [vmem:[%s7837_s3 + $0x80] ss:$16 sps:$4 sm:$0xff]  }
 0x204   :  { %v7177_v43 = vsel %vm2049_vm7, %v2946_v3, %v2945_v46  ;;  %v3274_v36 = vrot.slane %v7145_v39, 1  ;;  %v3271_v37 = vsel %vm2043_vm5, %v3270_v11, %v3269_v51  ;;  %v3417_v14 = vsel %vm2034_vm2, %v3416_v58, %v3415_v22  ;;  %v5881_v46 = vld [vmem:[%s7837_s3 + $0x88] ss:$16 sps:$4 sm:$0xff]   ;;  %v5884_v28 = vld [vmem:[%s7837_s3 + $0xa0] ss:$16 sps:$4 sm:$0xff]  }
 0x205   :  { %5151 = vmatmul.mubr.msk.bf16.vlgmr.msra.gmra.mrb[128].mxu0 %vm2092_vm8, %v2051_v53  ;;  %5152 = vmatmul.mubr.msk.bf16.vlgmr.msra.gmra.mrb[128].mxu1 %vm2092_vm8, %v2051_v53  ;;  %v3420_v62 = vrot.slane %v7099_v34, 5  ;;  %v3566_v19 = vrot.slane %v7031_v21, 2  ;;  %v3273_v33 = vsel %vm2046_vm6, %v3272_v41, %v3271_v37  ;;  %v3419_v4 = vsel %vm2037_vm3, %v3418_v45, %v3417_v14 }
 0x206   :  { %2237 = vmatpush1.bf16.msra.mxu0 %v5866_v17  ;;  %2278 = vmatpush1.bf16.msra.mxu1 %v5869_v9  ;;  %v3422_v35 = vrot.slane %v7117_v10, 4  ;;  %v3424_v7 = vrot.slane %v7135_v49, 3  ;;  %v7205_v48 = vsel %vm2049_vm7, %v3274_v36, %v3273_v33  ;;  %v3426_v27 = vrot.slane %v7145_v39, 2  ;;  %v5887_v17 = vld [vmem:[%s7837_s3 + $0xa8] ss:$16 sps:$4 sm:$0xff]  }
 0x207   :  { %2238 = vmatprep.subr.bf16.mxu0 %v5874_v32  ;;  %2279 = vmatprep.subr.bf16.mxu1 %v5877_v54  ;;  %v3421_v60 = vsel %vm2040_vm4, %v3420_v62, %v3419_v4  ;;  %v3567_v20 = vrot.slane %v7040_v26, 1  ;;  %v3570_v6 = vrot.slane %v7084_v44, 7  ;;  %v3572_v30 = vrot.slane %v7099_v34, 6  ;;  %v5892_v32 = vld [vmem:[%s7837_s3 + $0xc4] ss:$16 sps:$4 sm:$0xff]  }
 0x208   :  { %2268 = vmatprep.mubr.bf16.mxu0 %v6083_v0  ;;  %2309 = vmatprep.mubr.bf16.mxu1 %v6083_v0  ;;  %v3423_v2 = vsel %vm2043_vm5, %v3422_v35, %v3421_v60  ;;  %v2192_v13 = vpack.c.b16 %v2191_v63, %v2191_v63  ;;  %v3574_v42 = vrot.slane %v7117_v10, 5  ;;  %v3576_v51 = vrot.slane %v7135_v49, 4  ;;  %v5895_v54 = vld [vmem:[%s7837_s3 + $0xcc] ss:$16 sps:$4 sm:$0xff]   ;;  %v5890_v4 = vld [vmem:[%s7837_s3 + $0xc0] ss:$16 sps:$4 sm:$0xff]  }
 0x209   :  { %v3425_v29 = vsel %vm2046_vm6, %v3424_v7, %v3423_v2  ;;  %v3568_v23 = vsel %vm2031_vm1, %v3567_v20, %v3566_v19  ;;  %v3578_v11 = vrot.slane %v7145_v39, 3  ;;  %v3718_v50 = vrot.slane %v7031_v21, 3  ;;  %v5893_v35 = vld [vmem:[%s7837_s3 + $0xc8] ss:$16 sps:$4 sm:$0xff]   ;;  %v5898_v2 = vld [vmem:[%s7837_s3 + $0xe4] ss:$16 sps:$4 sm:$0xff]  }
 0x20a   :  { %2239 = vmatpush1.bf16.msra.mxu0 %v5872_v8  ;;  %2280 = vmatpush1.bf16.msra.mxu1 %v5875_v59  ;;  %v7229_v22 = vsel %vm2049_vm7, %v3426_v27, %v3425_v29  ;;  %v3569_v18 = vsel %vm2034_vm2, %v7066_v40, %v3568_v23  ;;  %v3719_v38 = vrot.slane %v7040_v26, 2  ;;  %v3721_v56 = vrot.slane %v7066_v40, 1 }
 0x20b   :  { %2384 = vmatprep.subr.bf16.mxu0 %v5880_v5  ;;  %2425 = vmatprep.subr.bf16.mxu1 %v5883_v25  ;;  %v3571_v58 = vsel %vm2037_vm3, %v3570_v6, %v3569_v18  ;;  %v2340_v24 = vpack.c.b16 %v2339_v12, %v2339_v12  ;;  %v3724_v57 = vrot.slane %v7099_v34, 7  ;;  %v3726_v3 = vrot.slane %v7117_v10, 6  ;;  %v5901_v6 = vld [vmem:[%s7837_s3 + $0xec] ss:$16 sps:$4 sm:$0xff]  }
 0x20c   :  { %v3573_v47 = vsel %vm2040_vm4, %v3572_v30, %v3571_v58  ;;  %v3720_v63 = vsel %vm2031_vm1, %v3719_v38, %v3718_v50  ;;  %v3728_v12 = vrot.slane %v7135_v49, 5  ;;  %v3870_v53 = vrot.slane %v7031_v21, 4  ;;  %v5899_v58 = vld [vmem:[%s7837_s3 + $0xe8] ss:$16 sps:$4 sm:$0xff]  }
 0x20d   :  { %5161 = vmatmul.mubr.msk.bf16.vlgmr.msra.gmra.mrb[132].mxu0 %vm2092_vm8, %v2192_v13  ;;  %5162 = vmatmul.mubr.msk.bf16.vlgmr.msra.gmra.mrb[132].mxu1 %vm2092_vm8, %v2192_v13  ;;  %v3575_v9 = vsel %vm2043_vm5, %v3574_v42, %v3573_v47  ;;  %v3722_v45 = vsel %vm2034_vm2, %v3721_v56, %v3720_v63  ;;  %v3871_v36 = vrot.slane %v7040_v26, 3  ;;  %v3873_v8 = vrot.slane %v7066_v40, 2  ;;  %v5904_v47 = vld [vmem:[%s7837_s3 + $0x104] ss:$16 sps:$4 sm:$0xff]  }
 0x20e   :  { %2385 = vmatpush1.bf16.msra.mxu0 %v5878_v15  ;;  %2426 = vmatpush1.bf16.msra.mxu1 %v5881_v46  ;;  %v3577_v41 = vsel %vm2046_vm6, %v3576_v51, %v3575_v9  ;;  %v3723_v37 = vsel %vm2037_vm3, %v7084_v44, %v3722_v45  ;;  %v3730_v14 = vrot.slane %v7145_v39, 4  ;;  %v3875_v62 = vrot.slane %v7084_v44, 1 }
 0x20f   :  { %2386 = vmatprep.subr.bf16.mxu0 %v5886_v1  ;;  %2427 = vmatprep.subr.bf16.mxu1 %v5889_v31  ;;  %v7267_v59 = vsel %vm2049_vm7, %v3578_v11, %v3577_v41  ;;  %v3725_v19 = vsel %vm2040_vm4, %v3724_v57, %v3723_v37  ;;  %v3872_v5 = vsel %vm2031_vm1, %v3871_v36, %v3870_v53  ;;  %v3878_v25 = vrot.slane %v7117_v10, 7  ;;  %v5896_v11 = vld [vmem:[%s7837_s3 + $0xe0] ss:$16 sps:$4 sm:$0xff]   ;;  %v5907_v57 = vld [vmem:[%s7837_s3 + $0x10c] ss:$16 sps:$4 sm:$0xff]  }
 0x210   :  { %2416 = vmatprep.mubr.bf16.mxu0 %v6083_v0  ;;  %2457 = vmatprep.mubr.bf16.mxu1 %v6083_v0  ;;  %v3880_v33 = vrot.slane %v7135_v49, 6  ;;  %v3727_v7 = vsel %vm2043_vm5, %v3726_v3, %v3725_v19  ;;  %v3874_v60 = vsel %vm2034_vm2, %v3873_v8, %v3872_v5  ;;  %v3882_v27 = vrot.slane %v7145_v39, 5  ;;  %v5905_v8 = vld [vmem:[%s7837_s3 + $0x108] ss:$16 sps:$4 sm:$0xff]   ;;  %v5910_v5 = vld [vmem:[%s7837_s3 + $0x124] ss:$16 sps:$4 sm:$0xff]  }
 0x211   :  { %v4022_v20 = vrot.slane %v7031_v21, 5  ;;  %v3729_v30 = vsel %vm2046_vm6, %v3728_v12, %v3727_v7  ;;  %v3876_v13 = vsel %vm2037_vm3, %v3875_v62, %v3874_v60  ;;  %v4023_v15 = vrot.slane %v7040_v26, 4 }
 0x212   :  { %2387 = vmatpush1.bf16.msra.mxu0 %v5884_v28  ;;  %2428 = vmatpush1.bf16.msra.mxu1 %v5887_v17  ;;  %v4025_v46 = vrot.slane %v7066_v40, 3  ;;  %v7298_v29 = vsel %vm2049_vm7, %v3730_v14, %v3729_v30  ;;  %v3877_v23 = vsel %vm2040_vm4, %v7099_v34, %v3876_v13  ;;  %v4027_v42 = vrot.slane %v7084_v44, 2  ;;  %v5919_v13 = vld [vmem:[%s7837_s3 + $0x14c] ss:$16 sps:$4 sm:$0xff]  }
 0x213   :  { %2536 = vmatprep.subr.bf16.mxu0 %v5892_v32  ;;  %2577 = vmatprep.subr.bf16.mxu1 %v5895_v54  ;;  %v4029_v1 = vrot.slane %v7099_v34, 1  ;;  %v3879_v31 = vsel %vm2043_vm5, %v3878_v25, %v3877_v23  ;;  %v4024_v18 = vsel %vm2031_vm1, %v4023_v15, %v4022_v20  ;;  %v4032_v51 = vrot.slane %v7135_v49, 7  ;;  %v5913_v25 = vld [vmem:[%s7837_s3 + $0x12c] ss:$16 sps:$4 sm:$0xff]  }
 0x214   :  { %v3881_v50 = vsel %vm2046_vm6, %v3880_v33, %v3879_v31  ;;  %v4026_v38 = vsel %vm2034_vm2, %v4025_v46, %v4024_v18  ;;  %v4034_v56 = vrot.slane %v7145_v39, 6  ;;  %v4175_v17 = vrot.slane %v7040_v26, 5 }
 0x215   :  { %5171 = vmatmul.mubr.msk.bf16.vlgmr.msra.gmra.mrb[136].mxu0 %vm2092_vm8, %v2340_v24  ;;  %5172 = vmatmul.mubr.msk.bf16.vlgmr.msra.gmra.mrb[136].mxu1 %vm2092_vm8, %v2340_v24  ;;  %v4174_v24 = vrot.slane %v7031_v21, 6  ;;  %v7326_v3 = vsel %vm2049_vm7, %v3882_v27, %v3881_v50  ;;  %v4028_v28 = vsel %vm2037_vm3, %v4027_v42, %v4026_v38  ;;  %v4177_v9 = vrot.slane %v7066_v40, 4  ;;  %v5914_v42 = vld [vmem:[%s7837_s3 + $0x140] ss:$16 sps:$4 sm:$0xff]   ;;  %v5931_v50 = vld [vmem:[%s7837_s3 + $0x18c] ss:$16 sps:$4 sm:$0xff]  }
 0x216   :  { %2537 = vmatpush1.bf16.msra.mxu0 %v5890_v4  ;;  %2578 = vmatpush1.bf16.msra.mxu1 %v5893_v35  ;;  %v2492_v63 = vpack.c.b16 %v7166_v16, %v7166_v16  ;;  %v4030_v12 = vsel %vm2040_vm4, %v4029_v1, %v4028_v28  ;;  %v4179_v53 = vrot.slane %v7084_v44, 3  ;;  %v4181_v32 = vrot.slane %v7099_v34, 2  ;;  %v5902_v16 = vld [vmem:[%s7837_s3 + $0x100] ss:$16 sps:$4 sm:$0xff]   ;;  %v5917_v1 = vld [vmem:[%s7837_s3 + $0x148] ss:$16 sps:$4 sm:$0xff]  }
 0x217   :  { %2538 = vmatprep.subr.bf16.mxu0 %v5898_v2  ;;  %2579 = vmatprep.subr.bf16.mxu1 %v5901_v6  ;;  %v4031_v54 = vsel %vm2043_vm5, %v7117_v10, %v4030_v12  ;;  %v4176_v41 = vsel %vm2031_vm1, %v4175_v17, %v4174_v24  ;;  %v4183_v45 = vrot.slane %v7117_v10, 1  ;;  %v4186_v36 = vrot.slane %v7145_v39, 7  ;;  %v5926_v38 = vld [vmem:[%s7837_s3 + $0x180] ss:$16 sps:$4 sm:$0xff]   ;;  %v5935_v28 = vld [vmem:[%s7837_s3 + $0x1a8] ss:$16 sps:$4 sm:$0xff]  }
 0x218   :  { %2568 = vmatprep.mubr.bf16.mxu0 %v6083_v0  ;;  %2609 = vmatprep.mubr.bf16.mxu1 %v6083_v0  ;;  %v4033_v37 = vsel %vm2046_vm6, %v4032_v51, %v4031_v54  ;;  %v4178_v14 = vsel %vm2034_vm2, %v4177_v9, %v4176_v41  ;;  %v4326_v62 = vrot.slane %v7031_v21, 7  ;;  %v4327_v19 = vrot.slane %v7040_v26, 6  ;;  %v5922_v51 = vld [vmem:[%s7837_s3 + $0x164] ss:$16 sps:$4 sm:$0xff]   ;;  %v5943_v9 = vld [vmem:[%s7837_s3 + $0x1cc] ss:$16 sps:$4 sm:$0xff]  }
 0x219   :  { %v7360_v33 = vsel %vm2049_vm7, %v4034_v56, %v4033_v37  ;;  %v4180_v4 = vsel %vm2037_vm3, %v4179_v53, %v4178_v14  ;;  %v4329_v35 = vrot.slane %v7066_v40, 5  ;;  %v4331_v21 = vrot.slane %v7084_v44, 4  ;;  %v5908_v44 = vld [vmem:[%s7837_s3 + $0x120] ss:$16 sps:$4 sm:$0xff]   ;;  %v5929_v56 = vld [vmem:[%s7837_s3 + $0x188] ss:$16 sps:$4 sm:$0xff]  }
 0x21a   :  { %2539 = vmatpush1.bf16.msra.mxu0 %v5896_v11  ;;  %2580 = vmatpush1.bf16.msra.mxu1 %v5899_v58  ;;  %v4182_v26 = vsel %vm2040_vm4, %v4181_v32, %v4180_v4  ;;  %v4328_v7 = vsel %vm2031_vm1, %v4327_v19, %v4326_v62  ;;  %v4333_v60 = vrot.slane %v7099_v34, 3  ;;  %v4335_v2 = vrot.slane %v7117_v10, 2  ;;  %v5911_v34 = vld [vmem:[%s7837_s3 + $0x128] ss:$16 sps:$4 sm:$0xff]   ;;  %v5916_v10 = vld [vmem:[%s7837_s3 + $0x144] ss:$16 sps:$4 sm:$0xff]  }
 0x21b   :  { %2688 = vmatprep.subr.bf16.mxu0 %v5904_v47  ;;  %2729 = vmatprep.subr.bf16.mxu1 %v5907_v57  ;;  %v4184_v27 = vsel %vm2043_vm5, %v4183_v45, %v4182_v26  ;;  %v4330_v20 = vsel %vm2034_vm2, %v4329_v35, %v4328_v7  ;;  %v4337_v40 = vrot.slane %v7135_v49, 1  ;;  %v2644_v18 = vpack.c.b16 %v7171_v52, %v7171_v52  ;;  %v5925_v11 = vld [vmem:[%s7837_s3 + $0x16c] ss:$16 sps:$4 sm:$0xff]   ;;  %v5923_v52 = vld [vmem:[%s7837_s3 + $0x168] ss:$16 sps:$4 sm:$0xff]  }
 0x21c   :  { %v4185_v6 = vsel %vm2046_vm6, %v7135_v49, %v4184_v27  ;;  %v4332_v30 = vsel %vm2037_vm3, %v4331_v21, %v4330_v20  ;;  %v5928_v58 = vld [vmem:[%s7837_s3 + $0x184] ss:$16 sps:$4 sm:$0xff]   ;;  %v2796_v24 = vpack.c.b16 %v7174_v55, %v7174_v55  ;;  %v5937_v57 = vld [vmem:[%s7837_s3 + $0x1ac] ss:$16 sps:$4 sm:$0xff]   ;;  %v5932_v55 = vld [vmem:[%s7837_s3 + $0x1a0] ss:$16 sps:$4 sm:$0xff]   ;;  %v2948_v53 = vpack.c.b16 %v7177_v43, %v7177_v43 }
 0x21d   :  { %5181 = vmatmul.mubr.msk.bf16.vlgmr.msra.gmra.mrb[140].mxu0 %vm2092_vm8, %v2492_v63  ;;  %5182 = vmatmul.mubr.msk.bf16.vlgmr.msra.gmra.mrb[140].mxu1 %vm2092_vm8, %v2492_v63  ;;  %v7390_v15 = vsel %vm2049_vm7, %v4186_v36, %v4185_v6  ;;  %v4334_v46 = vsel %vm2040_vm4, %v4333_v60, %v4332_v30  ;;  %v5934_v47 = vld [vmem:[%s7837_s3 + $0x1a4] ss:$16 sps:$4 sm:$0xff]   ;;  %v5938_v63 = vld [vmem:[%s7837_s3 + $0x1c0] ss:$16 sps:$4 sm:$0xff]   ;;  %v5941_v12 = vld [vmem:[%s7837_s3 + $0x1c8] ss:$16 sps:$4 sm:$0xff]   ;;  %v3100_v37 = vpack.c.b16 %v7157_v61, %v7157_v61 }
 0x21e   :  { %2689 = vmatpush1.bf16.msra.mxu0 %v5902_v16  ;;  %2730 = vmatpush1.bf16.msra.mxu1 %v5905_v8  ;;  %v4336_v49 = vsel %vm2043_vm5, %v4335_v2, %v4334_v46  ;;  %v5940_v17 = vld [vmem:[%s7837_s3 + $0x1c4] ss:$16 sps:$4 sm:$0xff]   ;;  %v5949_v54 = vld [vmem:[%s7837_s3 + $0x1ec] ss:$16 sps:$4 sm:$0xff]   ;;  %v5944_v43 = vld [vmem:[%s7837_s3 + $0x1e0] ss:$16 sps:$4 sm:$0xff]   ;;  %v3276_v21 = vpack.c.b16 %v7205_v48, %v7205_v48 }
 0x21f   :  { %2690 = vmatprep.subr.bf16.mxu0 %v5910_v5  ;;  %2731 = vmatprep.subr.bf16.mxu1 %v5913_v25  ;;  %v4338_v23 = vsel %vm2046_vm6, %v4337_v40, %v4336_v49  ;;  %v5946_v32 = vld [vmem:[%s7837_s3 + $0x1e4] ss:$16 sps:$4 sm:$0xff]   ;;  %v5947_v41 = vld [vmem:[%s7837_s3 + $0x1e8] ss:$16 sps:$4 sm:$0xff]   ;;  %v5955_v36 = vld [vmem:[%s7837_s3 + $0x20c] ss:$16 sps:$4 sm:$0xff]  }
 0x220   :  { %2720 = vmatprep.mubr.bf16.mxu0 %v6083_v0  ;;  %2761 = vmatprep.mubr.bf16.mxu1 %v6083_v0  ;;  %v7405_v31 = vsel %vm2049_vm7, %v7145_v39, %v4338_v23  ;;  %v5920_v39 = vld [vmem:[%s7837_s3 + $0x160] ss:$16 sps:$4 sm:$0xff]   ;;  %v5952_v45 = vld [vmem:[%s7837_s3 + $0x204] ss:$16 sps:$4 sm:$0xff]   ;;  %v5953_v8 = vld [vmem:[%s7837_s3 + $0x208] ss:$16 sps:$4 sm:$0xff]   ;;  %v3580_v23 = vpack.c.b16 %v7267_v59, %v7267_v59 }
 0x221   :  { %v5950_v16 = vld [vmem:[%s7837_s3 + $0x200] ss:$16 sps:$4 sm:$0xff]   ;;  %v5958_v14 = vld [vmem:[%s7837_s3 + $0x224] ss:$16 sps:$4 sm:$0xff]   ;;  %v5961_v62 = vld [vmem:[%s7837_s3 + $0x22c] ss:$16 sps:$4 sm:$0xff]  }
 0x222   :  { %2691 = vmatpush1.bf16.msra.mxu0 %v5908_v44  ;;  %2732 = vmatpush1.bf16.msra.mxu1 %v5911_v34  ;;  %v5956_v61 = vld [vmem:[%s7837_s3 + $0x220] ss:$16 sps:$4 sm:$0xff]   ;;  %v5959_v19 = vld [vmem:[%s7837_s3 + $0x228] ss:$16 sps:$4 sm:$0xff]   ;;  %v5964_v5 = vld [vmem:[%s7837_s3 + $0x244] ss:$16 sps:$4 sm:$0xff]   ;;  %v3428_v44 = vpack.c.b16 %v7229_v22, %v7229_v22 }
 0x223   :  { %2840 = vmatprep.subr.bf16.mxu0 %v5916_v10  ;;  %2881 = vmatprep.subr.bf16.mxu1 %v5919_v13  ;;  %v5967_v25 = vld [vmem:[%s7837_s3 + $0x24c] ss:$16 sps:$4 sm:$0xff]   ;;  %v5962_v4 = vld [vmem:[%s7837_s3 + $0x240] ss:$16 sps:$4 sm:$0xff]   ;;  %v5965_v35 = vld [vmem:[%s7837_s3 + $0x248] ss:$16 sps:$4 sm:$0xff]  }
 0x224   :  { %v5970_v26 = vld [vmem:[%s7837_s3 + $0x264] ss:$16 sps:$4 sm:$0xff]   ;;  %v5973_v7 = vld [vmem:[%s7837_s3 + $0x26c] ss:$16 sps:$4 sm:$0xff]   ;;  %v5968_v48 = vld [vmem:[%s7837_s3 + $0x260] ss:$16 sps:$4 sm:$0xff]  }
 0x225   :  { %5191 = vmatmul.mubr.msk.bf16.vlgmr.msra.gmra.mrb[144].mxu0 %vm2092_vm8, %v2644_v18  ;;  %5192 = vmatmul.mubr.msk.bf16.vlgmr.msra.gmra.mrb[144].mxu1 %vm2092_vm8, %v2644_v18  ;;  %v5971_v60 = vld [vmem:[%s7837_s3 + $0x268] ss:$16 sps:$4 sm:$0xff]   ;;  %v5976_v27 = vld [vmem:[%s7837_s3 + $0x284] ss:$16 sps:$4 sm:$0xff]   ;;  %v5979_v20 = vld [vmem:[%s7837_s3 + $0x28c] ss:$16 sps:$4 sm:$0xff]  }
 0x226   :  { %2841 = vmatpush1.bf16.msra.mxu0 %v5914_v42  ;;  %2882 = vmatpush1.bf16.msra.mxu1 %v5917_v1  ;;  %v5974_v2 = vld [vmem:[%s7837_s3 + $0x280] ss:$16 sps:$4 sm:$0xff]   ;;  %v5977_v40 = vld [vmem:[%s7837_s3 + $0x288] ss:$16 sps:$4 sm:$0xff]   ;;  %v5982_v34 = vld [vmem:[%s7837_s3 + $0x2a4] ss:$16 sps:$4 sm:$0xff]  }
 0x227   :  { %2842 = vmatprep.subr.bf16.mxu0 %v5922_v51  ;;  %2883 = vmatprep.subr.bf16.mxu1 %v5925_v11  ;;  %v5985_v6 = vld [vmem:[%s7837_s3 + $0x2ac] ss:$16 sps:$4 sm:$0xff]   ;;  %v5980_v22 = vld [vmem:[%s7837_s3 + $0x2a0] ss:$16 sps:$4 sm:$0xff]   ;;  %v5983_v30 = vld [vmem:[%s7837_s3 + $0x2a8] ss:$16 sps:$4 sm:$0xff]  }
 0x228   :  { %2872 = vmatprep.mubr.bf16.mxu0 %v6083_v0  ;;  %2913 = vmatprep.mubr.bf16.mxu1 %v6083_v0  ;;  %v5988_v10 = vld [vmem:[%s7837_s3 + $0x2c4] ss:$16 sps:$4 sm:$0xff]   ;;  %v5991_v13 = vld [vmem:[%s7837_s3 + $0x2cc] ss:$16 sps:$4 sm:$0xff]   ;;  %v5986_v46 = vld [vmem:[%s7837_s3 + $0x2c0] ss:$16 sps:$4 sm:$0xff]  }
 0x229   :  { %v5989_v49 = vld [vmem:[%s7837_s3 + $0x2c8] ss:$16 sps:$4 sm:$0xff]   ;;  %v5994_v42 = vld [vmem:[%s7837_s3 + $0x2e4] ss:$16 sps:$4 sm:$0xff]   ;;  %v5997_v1 = vld [vmem:[%s7837_s3 + $0x2ec] ss:$16 sps:$4 sm:$0xff]  }
 0x22a   :  { %2843 = vmatpush1.bf16.msra.mxu0 %v5920_v39  ;;  %2884 = vmatpush1.bf16.msra.mxu1 %v5923_v52  ;;  %v5992_v59 = vld [vmem:[%s7837_s3 + $0x2e0] ss:$16 sps:$4 sm:$0xff]   ;;  %v5995_v18 = vld [vmem:[%s7837_s3 + $0x2e8] ss:$16 sps:$4 sm:$0xff]   ;;  %v6000_v51 = vld [vmem:[%s7837_s3 + $0x304] ss:$16 sps:$4 sm:$0xff]  }
 0x22b   :  { %2992 = vmatprep.subr.bf16.mxu0 %v5928_v58  ;;  %3033 = vmatprep.subr.bf16.mxu1 %v5931_v50  ;;  %v6003_v11 = vld [vmem:[%s7837_s3 + $0x30c] ss:$16 sps:$4 sm:$0xff]   ;;  %v5998_v39 = vld [vmem:[%s7837_s3 + $0x300] ss:$16 sps:$4 sm:$0xff]   ;;  %v6001_v52 = vld [vmem:[%s7837_s3 + $0x308] ss:$16 sps:$4 sm:$0xff]   ;;  %v3732_v58 = vpack.c.b16 %v7298_v29, %v7298_v29 }
 0x22c   :  { %v6006_v50 = vld [vmem:[%s7837_s3 + $0x324] ss:$16 sps:$4 sm:$0xff]   ;;  %v6004_v29 = vld [vmem:[%s7837_s3 + $0x320] ss:$16 sps:$4 sm:$0xff]  }
 0x22d   :  { %5201 = vmatmul.mubr.msk.bf16.vlgmr.msra.gmra.mrb[148].mxu0 %vm2092_vm8, %v2796_v24  ;;  %5202 = vmatmul.mubr.msk.bf16.vlgmr.msra.gmra.mrb[148].mxu1 %vm2092_vm8, %v2796_v24  ;;  %v6012_v24 = vld [vmem:[%s7837_s3 + $0x344] ss:$16 sps:$4 sm:$0xff]  }
 0x22e   :  { %2993 = vmatpush1.bf16.msra.mxu0 %v5926_v38  ;;  %3034 = vmatpush1.bf16.msra.mxu1 %v5929_v56  ;;  %v6009_v38 = vld [vmem:[%s7837_s3 + $0x32c] ss:$16 sps:$4 sm:$0xff]   ;;  %v6007_v56 = vld [vmem:[%s7837_s3 + $0x328] ss:$16 sps:$4 sm:$0xff]  }
 0x22f   :  { %2994 = vmatprep.subr.bf16.mxu0 %v5934_v47  ;;  %3035 = vmatprep.subr.bf16.mxu1 %v5937_v57  ;;  %v6015_v47 = vld [vmem:[%s7837_s3 + $0x34c] ss:$16 sps:$4 sm:$0xff]   ;;  %v6010_v57 = vld [vmem:[%s7837_s3 + $0x340] ss:$16 sps:$4 sm:$0xff]  }
 0x230   :  { %3024 = vmatprep.mubr.bf16.mxu0 %v6083_v0  ;;  %3065 = vmatprep.mubr.bf16.mxu1 %v6083_v0 }
 0x232   :  { %2995 = vmatpush1.bf16.msra.mxu0 %v5932_v55  ;;  %3036 = vmatpush1.bf16.msra.mxu1 %v5935_v28  ;;  %v6013_v55 = vld [vmem:[%s7837_s3 + $0x348] ss:$16 sps:$4 sm:$0xff]   ;;  %v3884_v28 = vpack.c.b16 %v7326_v3, %v7326_v3  ;;  %v6016_v3 = vld [vmem:[%s7837_s3 + $0x360] ss:$16 sps:$4 sm:$0xff]  }
 0x233   :  { %3144 = vmatprep.subr.bf16.mxu0 %v5940_v17  ;;  %3185 = vmatprep.subr.bf16.mxu1 %v5943_v9  ;;  %v6018_v17 = vld [vmem:[%s7837_s3 + $0x364] ss:$16 sps:$4 sm:$0xff]   ;;  %v6021_v9 = vld [vmem:[%s7837_s3 + $0x36c] ss:$16 sps:$4 sm:$0xff]  }
 0x235   :  { %5211 = vmatmul.mubr.msk.bf16.vlgmr.msra.gmra.mrb[152].mxu0 %vm2092_vm8, %v2948_v53  ;;  %5212 = vmatmul.mubr.msk.bf16.vlgmr.msra.gmra.mrb[152].mxu1 %vm2092_vm8, %v2948_v53  ;;  %v6027_v53 = vld [vmem:[%s7837_s3 + $0x38c] ss:$16 sps:$4 sm:$0xff]  }
 0x236   :  { %3145 = vmatpush1.bf16.msra.mxu0 %v5938_v63  ;;  %3186 = vmatpush1.bf16.msra.mxu1 %v5941_v12  ;;  %v6019_v63 = vld [vmem:[%s7837_s3 + $0x368] ss:$16 sps:$4 sm:$0xff]   ;;  %v6024_v12 = vld [vmem:[%s7837_s3 + $0x384] ss:$16 sps:$4 sm:$0xff]  }
 0x237   :  { %3146 = vmatprep.subr.bf16.mxu0 %v5946_v32  ;;  %3187 = vmatprep.subr.bf16.mxu1 %v5949_v54  ;;  %v6022_v32 = vld [vmem:[%s7837_s3 + $0x380] ss:$16 sps:$4 sm:$0xff]   ;;  %v6025_v54 = vld [vmem:[%s7837_s3 + $0x388] ss:$16 sps:$4 sm:$0xff]  }
 0x238   :  { %3176 = vmatprep.mubr.bf16.mxu0 %v6083_v0  ;;  %3217 = vmatprep.mubr.bf16.mxu1 %v6083_v0 }
 0x23a   :  { %3147 = vmatpush1.bf16.msra.mxu0 %v5944_v43  ;;  %3188 = vmatpush1.bf16.msra.mxu1 %v5947_v41  ;;  %v4036_v43 = vpack.c.b16 %v7360_v33, %v7360_v33  ;;  %v6030_v41 = vld [vmem:[%s7837_s3 + $0x3a4] ss:$16 sps:$4 sm:$0xff]   ;;  %v6028_v33 = vld [vmem:[%s7837_s3 + $0x3a0] ss:$16 sps:$4 sm:$0xff]  }
 0x23b   :  { %3320 = vmatprep.subr.bf16.mxu0 %v5952_v45  ;;  %3361 = vmatprep.subr.bf16.mxu1 %v5955_v36  ;;  %v6033_v45 = vld [vmem:[%s7837_s3 + $0x3ac] ss:$16 sps:$4 sm:$0xff]   ;;  %v6031_v36 = vld [vmem:[%s7837_s3 + $0x3a8] ss:$16 sps:$4 sm:$0xff]  }
 0x23d   :  { %5221 = vmatmul.mubr.msk.bf16.vlgmr.msra.gmra.mrb[156].mxu0 %vm2092_vm8, %v3100_v37  ;;  %5222 = vmatmul.mubr.msk.bf16.vlgmr.msra.gmra.mrb[156].mxu1 %vm2092_vm8, %v3100_v37  ;;  %v6034_v37 = vld [vmem:[%s7837_s3 + $0x3c0] ss:$16 sps:$4 sm:$0xff]  }
 0x23e   :  { %3321 = vmatpush1.bf16.msra.mxu0 %v5950_v16  ;;  %3362 = vmatpush1.bf16.msra.mxu1 %v5953_v8  ;;  %v6036_v16 = vld [vmem:[%s7837_s3 + $0x3c4] ss:$16 sps:$4 sm:$0xff]   ;;  %v6039_v8 = vld [vmem:[%s7837_s3 + $0x3cc] ss:$16 sps:$4 sm:$0xff]  }
 0x23f   :  { %3322 = vmatprep.subr.bf16.mxu0 %v5958_v14  ;;  %3363 = vmatprep.subr.bf16.mxu1 %v5961_v62  ;;  %v6037_v14 = vld [vmem:[%s7837_s3 + $0x3c8] ss:$16 sps:$4 sm:$0xff]   ;;  %v4188_v62 = vpack.c.b16 %v7390_v15, %v7390_v15  ;;  %v6040_v15 = vld [vmem:[%s7837_s3 + $0x3e0] ss:$16 sps:$4 sm:$0xff]  }
 0x240   :  { %3352 = vmatprep.mubr.bf16.mxu0 %v6083_v0  ;;  %3393 = vmatprep.mubr.bf16.mxu1 %v6083_v0 }
 0x242   :  { %3323 = vmatpush1.bf16.msra.mxu0 %v5956_v61  ;;  %3364 = vmatpush1.bf16.msra.mxu1 %v5959_v19  ;;  %v6042_v61 = vld [vmem:[%s7837_s3 + $0x3e4] ss:$16 sps:$4 sm:$0xff]   ;;  %v6045_v19 = vld [vmem:[%s7837_s3 + $0x3ec] ss:$16 sps:$4 sm:$0xff]  }
 0x243   :  { %3472 = vmatprep.subr.bf16.mxu0 %v5964_v5  ;;  %3513 = vmatprep.subr.bf16.mxu1 %v5967_v25  ;;  %v6043_v5 = vld [vmem:[%s7837_s3 + $0x3e8] ss:$16 sps:$4 sm:$0xff]   ;;  %v4340_v25 = vpack.c.b16 %v7405_v31, %v7405_v31  ;;  %v6049_v31 = vld [vmem:[%s7838_s5 + $0x80] sm:$0xff]  }
 0x245   :  { %5231 = vmatmul.mubr.msk.bf16.vlgmr.msra.gmra.mrb[160].mxu0 %vm2092_vm8, %v3276_v21  ;;  %5232 = vmatmul.mubr.msk.bf16.vlgmr.msra.gmra.mrb[160].mxu1 %vm2092_vm8, %v3276_v21  ;;  %v6050_v21 = vld [vmem:[%s7838_s5 + $0x48] sm:$0xff]  }
 0x246   :  { %3473 = vmatpush1.bf16.msra.mxu0 %v5962_v4  ;;  %3514 = vmatpush1.bf16.msra.mxu1 %v5965_v35  ;;  %v6046_v4 = vld [vmem:[%s7838_s5 + $0x40] sm:$0xff]  }
 0x247   :  { %3474 = vmatprep.subr.bf16.mxu0 %v5970_v26  ;;  %3515 = vmatprep.subr.bf16.mxu1 %v5973_v7  ;;  %v6047_v35 = vld [vmem:[%s7838_s5 + $0xc0] sm:$0xff]   ;;  %v6051_v26 = vld [vmem:[%s7838_s5 + $0xc8] sm:$0xff]  }
 0x248   :  { %3504 = vmatprep.mubr.bf16.mxu0 %v6083_v0  ;;  %3545 = vmatprep.mubr.bf16.mxu1 %v6083_v0  ;;  %v6052_v7 = vld [vmem:[%s7838_s5 + $0x8] sm:$0xff]  }
 0x24a   :  { %3475 = vmatpush1.bf16.msra.mxu0 %v5968_v48  ;;  %3516 = vmatpush1.bf16.msra.mxu1 %v5971_v60  ;;  %v6053_v48 = vld [vmem:[%s7838_s5 + $0x88] sm:$0xff]   ;;  %v6054_v60 = vld [vmem:[%s7838_s5 + $0x50] sm:$0xff]  }
 0x24b   :  { %3624 = vmatprep.subr.bf16.mxu0 %v5976_v27  ;;  %3665 = vmatprep.subr.bf16.mxu1 %v5979_v20  ;;  %v6055_v27 = vld [vmem:[%s7838_s5 + $0xd0] sm:$0xff]  }
 0x24c   :  { %v6056_v20 = vld [vmem:[%s7838_s5 + $0x10] sm:$0xff]  }
 0x24d   :  { %5241 = vmatmul.mubr.msk.bf16.vlgmr.msra.gmra.mrb[164].mxu0 %vm2092_vm8, %v3428_v44  ;;  %5242 = vmatmul.mubr.msk.bf16.vlgmr.msra.gmra.mrb[164].mxu1 %vm2092_vm8, %v3428_v44  ;;  %v6059_v44 = vld [vmem:[%s7838_s5 + $0xd8] sm:$0xff]  }
 0x24e   :  { %3625 = vmatpush1.bf16.msra.mxu0 %v5974_v2  ;;  %3666 = vmatpush1.bf16.msra.mxu1 %v5977_v40  ;;  %v6057_v2 = vld [vmem:[%s7838_s5 + $0x90] sm:$0xff]   ;;  %v6058_v40 = vld [vmem:[%s7838_s5 + $0x58] sm:$0xff]  }
 0x24f   :  { %3626 = vmatprep.subr.bf16.mxu0 %v5982_v34  ;;  %3667 = vmatprep.subr.bf16.mxu1 %v5985_v6  ;;  %v6060_v34 = vld [vmem:[%s7838_s5 + $0x18] sm:$0xff]  }
 0x250   :  { %3656 = vmatprep.mubr.bf16.mxu0 %v6083_v0  ;;  %3697 = vmatprep.mubr.bf16.mxu1 %v6083_v0  ;;  %v6061_v6 = vld [vmem:[%s7838_s5 + $0x98] sm:$0xff]  }
 0x252   :  { %3627 = vmatpush1.bf16.msra.mxu0 %v5980_v22  ;;  %3668 = vmatpush1.bf16.msra.mxu1 %v5983_v30  ;;  %v6062_v22 = vld [vmem:[%s7838_s5 + $0x60] sm:$0xff]  }
 0x253   :  { %3776 = vmatprep.subr.bf16.mxu0 %v5988_v10  ;;  %3817 = vmatprep.subr.bf16.mxu1 %v5991_v13  ;;  %v6063_v30 = vld [vmem:[%s7838_s5 + $0xe0] sm:$0xff]  }
 0x254   :  { %v6064_v10 = vld [vmem:[%s7838_s5 + $0x20] sm:$0xff]  }
 0x255   :  { %5251 = vmatmul.mubr.msk.bf16.vlgmr.msra.gmra.mrb[168].mxu0 %vm2092_vm8, %v3580_v23  ;;  %5252 = vmatmul.mubr.msk.bf16.vlgmr.msra.gmra.mrb[168].mxu1 %vm2092_vm8, %v3580_v23  ;;  %v6065_v13 = vld [vmem:[%s7838_s5 + $0xa0] sm:$0xff]   ;;  %v6068_v23 = vld [vmem:[%s7838_s5 + $0x28] sm:$0xff]  }
 0x256   :  { %3777 = vmatpush1.bf16.msra.mxu0 %v5986_v46  ;;  %3818 = vmatpush1.bf16.msra.mxu1 %v5989_v49  ;;  %v6066_v46 = vld [vmem:[%s7838_s5 + $0x68] sm:$0xff]  }
 0x257   :  { %3778 = vmatprep.subr.bf16.mxu0 %v5994_v42  ;;  %3819 = vmatprep.subr.bf16.mxu1 %v5997_v1  ;;  %v6067_v49 = vld [vmem:[%s7838_s5 + $0xe8] sm:$0xff]  }
 0x258   :  { %3808 = vmatprep.mubr.bf16.mxu0 %v6083_v0  ;;  %3849 = vmatprep.mubr.bf16.mxu1 %v6083_v0  ;;  %v6069_v42 = vld [vmem:[%s7838_s5 + $0xa8] sm:$0xff]  }
 0x25a   :  { %3779 = vmatpush1.bf16.msra.mxu0 %v5992_v59  ;;  %3820 = vmatpush1.bf16.msra.mxu1 %v5995_v18  ;;  %v6070_v18 = vld [vmem:[%s7838_s5 + $0x70] sm:$0xff]  }
 0x25b   :  { %3928 = vmatprep.subr.bf16.mxu0 %v6000_v51  ;;  %3969 = vmatprep.subr.bf16.mxu1 %v6003_v11  ;;  %v6071_v51 = vld [vmem:[%s7838_s5 + $0xf0] sm:$0xff]  }
 0x25c   :  { %v6072_v11 = vld [vmem:[%s7838_s5 + $0x30] sm:$0xff]  }
 0x25d   :  { %5261 = vmatmul.mubr.msk.bf16.vlgmr.msra.gmra.mrb[172].mxu0 %vm2092_vm8, %v3732_v58  ;;  %5262 = vmatmul.mubr.msk.bf16.vlgmr.msra.gmra.mrb[172].mxu1 %vm2092_vm8, %v3732_v58  ;;  %v6073_v58 = vld [vmem:[%s7838_s5 + $0xb0] sm:$0xff]  }
 0x25e   :  { %3929 = vmatpush1.bf16.msra.mxu0 %v5998_v39  ;;  %3970 = vmatpush1.bf16.msra.mxu1 %v6001_v52 }
 0x25f   :  { %3930 = vmatprep.subr.bf16.mxu0 %v6006_v50  ;;  %3971 = vmatprep.subr.bf16.mxu1 %v6009_v38  ;;  %v6074_v50 = vld [vmem:[%s7838_s5 + $0x78] sm:$0xff]  }
 0x260   :  { %3960 = vmatprep.mubr.bf16.mxu0 %v6083_v0  ;;  %4001 = vmatprep.mubr.bf16.mxu1 %v6083_v0 }
 0x262   :  { %3931 = vmatpush1.bf16.msra.mxu0 %v6004_v29  ;;  %3972 = vmatpush1.bf16.msra.mxu1 %v6007_v56 }
 0x263   :  { %4080 = vmatprep.subr.bf16.mxu0 %v6012_v24  ;;  %4121 = vmatprep.subr.bf16.mxu1 %v6015_v47  ;;  %v6075_v47 = vld [vmem:[%s7838_s5 + $0xf8] sm:$0xff]  }
 0x265   :  { %5271 = vmatmul.mubr.msk.bf16.vlgmr.msra.gmra.mrb[176].mxu0 %vm2092_vm8, %v3884_v28  ;;  %5272 = vmatmul.mubr.msk.bf16.vlgmr.msra.gmra.mrb[176].mxu1 %vm2092_vm8, %v3884_v28 }
 0x266   :  { %4081 = vmatpush1.bf16.msra.mxu0 %v6010_v57  ;;  %4122 = vmatpush1.bf16.msra.mxu1 %v6013_v55  ;;  %v6076_v57 = vld [vmem:[%s7838_s5 + $0x38] sm:$0xff]  }
 0x267   :  { %4082 = vmatprep.subr.bf16.mxu0 %v6018_v17  ;;  %4123 = vmatprep.subr.bf16.mxu1 %v6021_v9  ;;  %v6077_v55 = vld [vmem:[%s7838_s5 + $0xb8] sm:$0xff]  }
 0x268   :  { %4112 = vmatprep.mubr.bf16.mxu0 %v6083_v0  ;;  %4153 = vmatprep.mubr.bf16.mxu1 %v6083_v0 }
 0x26a   :  { %4083 = vmatpush1.bf16.msra.mxu0 %v6016_v3  ;;  %4124 = vmatpush1.bf16.msra.mxu1 %v6019_v63 }
 0x26b   :  { %4232 = vmatprep.subr.bf16.mxu0 %v6024_v12  ;;  %4273 = vmatprep.subr.bf16.mxu1 %v6027_v53 }
 0x26d   :  { %5281 = vmatmul.mubr.msk.bf16.vlgmr.msra.gmra.mrb[180].mxu0 %vm2092_vm8, %v4036_v43  ;;  %5282 = vmatmul.mubr.msk.bf16.vlgmr.msra.gmra.mrb[180].mxu1 %vm2092_vm8, %v4036_v43 }
 0x26e   :  { %4233 = vmatpush1.bf16.msra.mxu0 %v6022_v32  ;;  %4274 = vmatpush1.bf16.msra.mxu1 %v6025_v54 }
 0x26f   :  { %4234 = vmatprep.subr.bf16.mxu0 %v6030_v41  ;;  %4275 = vmatprep.subr.bf16.mxu1 %v6033_v45 }
 0x270   :  { %4264 = vmatprep.mubr.bf16.mxu0 %v6083_v0  ;;  %4305 = vmatprep.mubr.bf16.mxu1 %v6083_v0 }
 0x272   :  { %4235 = vmatpush1.bf16.msra.mxu0 %v6028_v33  ;;  %4276 = vmatpush1.bf16.msra.mxu1 %v6031_v36 }
 0x273   :  { %4384 = vmatprep.subr.bf16.mxu0 %v6036_v16  ;;  %4425 = vmatprep.subr.bf16.mxu1 %v6039_v8 }
 0x275   :  { %5291 = vmatmul.mubr.msk.bf16.vlgmr.msra.gmra.mrb[184].mxu0 %vm2092_vm8, %v4188_v62  ;;  %5292 = vmatmul.mubr.msk.bf16.vlgmr.msra.gmra.mrb[184].mxu1 %vm2092_vm8, %v4188_v62 }
 0x276   :  { %4385 = vmatpush1.bf16.msra.mxu0 %v6034_v37  ;;  %4426 = vmatpush1.bf16.msra.mxu1 %v6037_v14 }
 0x277   :  { %4386 = vmatprep.subr.bf16.mxu0 %v6042_v61  ;;  %4427 = vmatprep.subr.bf16.mxu1 %v6045_v19 }
 0x278   :  { %4416 = vmatprep.mubr.bf16.mxu0 %v6083_v0  ;;  %4457 = vmatprep.mubr.bf16.mxu1 %v6083_v0  ;;  %v6048_v0 = vld [vmem:[%s7838_s5] sm:$0xff]  }
 0x27a   :  { %4387 = vmatpush1.bf16.msra.mxu0 %v6040_v15  ;;  %4428 = vmatpush1.bf16.msra.mxu1 %v6043_v5 }
 0x27b   :  { %5592 = vmatprep.subr.bf16.mxu0 %v6046_v4  ;;  %5614 = vmatprep.subr.bf16.mxu1 %v6047_v35 }
 0x27d   :  { %5301 = vmatmul.mubr.msk.bf16.vlgmr.msra.gmra.mrb[188].mxu0 %vm2092_vm8, %v4340_v25  ;;  %5302 = vmatmul.mubr.msk.bf16.vlgmr.msra.gmra.mrb[188].mxu1 %vm2092_vm8, %v4340_v25 }
 0x27e   :  { %5593 = vmatpush3.bf16.msra.mxu0 %v6048_v0  ;;  %5615 = vmatpush3.bf16.msra.mxu1 %v6049_v31 }
 0x27f   :  { %5594 = vmatprep.subr.bf16.mxu0 %v6050_v21  ;;  %5616 = vmatprep.subr.bf16.mxu1 %v6051_v26 }
 0x282   :  { %5595 = vmatpush3.bf16.msra.mxu0 %v6052_v7  ;;  %5617 = vmatpush3.bf16.msra.mxu1 %v6053_v48 }
 0x283   :  { %5596 = vmatprep.subr.bf16.mxu0 %v6054_v60  ;;  %5618 = vmatprep.subr.bf16.mxu1 %v6055_v27 }
 0x286   :  { %5597 = vmatpush3.bf16.msra.mxu0 %v6056_v20  ;;  %5619 = vmatpush3.bf16.msra.mxu1 %v6057_v2 }
 0x287   :  { %5598 = vmatprep.subr.bf16.mxu0 %v6058_v40  ;;  %5620 = vmatprep.subr.bf16.mxu1 %v6059_v44 }
 0x28a   :  { %5599 = vmatpush3.bf16.msra.mxu0 %v6060_v34  ;;  %5621 = vmatpush3.bf16.msra.mxu1 %v6061_v6 }
 0x28b   :  { %5600 = vmatprep.subr.bf16.mxu0 %v6062_v22  ;;  %5622 = vmatprep.subr.bf16.mxu1 %v6063_v30 }
 0x28e   :  { %5601 = vmatpush3.bf16.msra.mxu0 %v6064_v10  ;;  %5623 = vmatpush3.bf16.msra.mxu1 %v6065_v13 }
 0x28f   :  { %5602 = vmatprep.subr.bf16.mxu0 %v6066_v46  ;;  %5624 = vmatprep.subr.bf16.mxu1 %v6067_v49 }
 0x292   :  { %5603 = vmatpush3.bf16.msra.mxu0 %v6068_v23  ;;  %5625 = vmatpush3.bf16.msra.mxu1 %v6069_v42 }
 0x293   :  { %5604 = vmatprep.subr.bf16.mxu0 %v6070_v18  ;;  %5626 = vmatprep.subr.bf16.mxu1 %v6071_v51 }
 0x296   :  { %5605 = vmatpush3.bf16.msra.mxu0 %v6072_v11  ;;  %5627 = vmatpush3.bf16.msra.mxu1 %v6073_v58 }
 0x297   :  { %5606 = vmatprep.subr.bf16.mxu0 %v6074_v50  ;;  %5628 = vmatprep.subr.bf16.mxu1 %v6075_v47 }
 0x29a   :  { %5607 = vmatpush3.bf16.msra.mxu0 %v6076_v57  ;;  %5629 = vmatpush3.bf16.msra.mxu1 %v6077_v55 }
 0x2d8   :  { %v2130_v1 = vpop.f32.mrb[128].mxu0  ;;  %v2171_v59 = vpop.f32.mrb[128].mxu1 }
 0x2d9   :  { %v2132_v39 = vpop.f32.mrb[129].mxu0  ;;  %v2173_v52 = vpop.f32.mrb[129].mxu1 }
 0x2da   :  { %v2134_v38 = vpop.f32.mrb[130].mxu0  ;;  %v2175_v29 = vpop.f32.mrb[130].mxu1 }
 0x2db   :  { %v2135_v56 = vpop.f32.mrb[131].mxu0  ;;  %v2176_v24 = vpop.f32.mrb[131].mxu1 }
 0x2e0   :  { %v2270_v28 = vpop.f32.mrb[132].mxu0  ;;  %v2311_v17 = vpop.f32.mrb[132].mxu1 }
 0x2e1   :  { %v2271_v9 = vadd.f32 %v2270_v28, %v2130_v1  ;;  %v2312_v3 = vadd.f32 %v2311_v17, %v2171_v59  ;;  %v2272_v63 = vpop.f32.mrb[133].mxu0  ;;  %v2313_v12 = vpop.f32.mrb[133].mxu1 }
 0x2e2   :  { %v2273_v53 = vadd.f32 %v2272_v63, %v2132_v39  ;;  %v2314_v32 = vadd.f32 %v2313_v12, %v2173_v52  ;;  %v2274_v54 = vpop.f32.mrb[134].mxu0  ;;  %v2315_v43 = vpop.f32.mrb[134].mxu1 }
 0x2e3   :  { %v2275_v41 = vpop.f32.mrb[135].mxu0  ;;  %v2316_v45 = vpop.f32.mrb[135].mxu1 }
 0x2e8   :  { %v2418_v33 = vpop.f32.mrb[136].mxu0  ;;  %v2459_v36 = vpop.f32.mrb[136].mxu1 }
 0x2e9   :  { %v2466_v16 = vadd.f32 %v2418_v33, %v2271_v9  ;;  %v2468_v8 = vadd.f32 %v2459_v36, %v2312_v3  ;;  %v2420_v37 = vpop.f32.mrb[137].mxu0  ;;  %v2461_v14 = vpop.f32.mrb[137].mxu1 }
 0x2ea   :  { %v2467_v62 = vadd.f32 %v2420_v37, %v2273_v53  ;;  %v2469_v61 = vadd.f32 %v2461_v14, %v2314_v32  ;;  %v2422_v19 = vpop.f32.mrb[138].mxu0  ;;  %v2463_v15 = vpop.f32.mrb[138].mxu1 }
 0x2eb   :  { %v2423_v5 = vpop.f32.mrb[139].mxu0  ;;  %v2464_v25 = vpop.f32.mrb[139].mxu1 }
 0x2f0   :  { %v2570_v4 = vpop.f32.mrb[140].mxu0  ;;  %v2611_v35 = vpop.f32.mrb[140].mxu1 }
 0x2f1   :  { %v2618_v0 = vadd.f32 %v2570_v4, %v2466_v16  ;;  %v2620_v31 = vadd.f32 %v2611_v35, %v2468_v8  ;;  %v2572_v21 = vpop.f32.mrb[141].mxu0  ;;  %v2613_v26 = vpop.f32.mrb[141].mxu1 }
 0x2f2   :  { %v2619_v7 = vadd.f32 %v2572_v21, %v2467_v62  ;;  %v2621_v48 = vadd.f32 %v2613_v26, %v2469_v61  ;;  %v2574_v60 = vpop.f32.mrb[142].mxu0  ;;  %v2615_v27 = vpop.f32.mrb[142].mxu1 }
 0x2f3   :  { %v2575_v20 = vpop.f32.mrb[143].mxu0  ;;  %v2616_v2 = vpop.f32.mrb[143].mxu1 }
 0x2f8   :  { %v2722_v40 = vpop.f32.mrb[144].mxu0  ;;  %v2763_v44 = vpop.f32.mrb[144].mxu1 }
 0x2f9   :  { %v2770_v34 = vadd.f32 %v2722_v40, %v2618_v0  ;;  %v2772_v6 = vadd.f32 %v2763_v44, %v2620_v31  ;;  %v2724_v22 = vpop.f32.mrb[145].mxu0  ;;  %v2765_v30 = vpop.f32.mrb[145].mxu1 }
 0x2fa   :  { %v2771_v10 = vadd.f32 %v2724_v22, %v2619_v7  ;;  %v2773_v13 = vadd.f32 %v2765_v30, %v2621_v48  ;;  %v2726_v46 = vpop.f32.mrb[146].mxu0  ;;  %v2767_v49 = vpop.f32.mrb[146].mxu1 }
 0x2fb   :  { %v2727_v23 = vpop.f32.mrb[147].mxu0  ;;  %v2768_v42 = vpop.f32.mrb[147].mxu1 }
 0x300   :  { %v2874_v1 = vpop.f32.mrb[148].mxu0  ;;  %v2915_v59 = vpop.f32.mrb[148].mxu1 }
 0x301   :  { %v2922_v18 = vadd.f32 %v2874_v1, %v2770_v34  ;;  %v2924_v51 = vadd.f32 %v2915_v59, %v2772_v6  ;;  %v2876_v11 = vpop.f32.mrb[149].mxu0  ;;  %v2917_v39 = vpop.f32.mrb[149].mxu1 }
 0x302   :  { %v2923_v52 = vadd.f32 %v2876_v11, %v2771_v10  ;;  %v2925_v58 = vadd.f32 %v2917_v39, %v2773_v13  ;;  %v2878_v50 = vpop.f32.mrb[150].mxu0  ;;  %v2919_v38 = vpop.f32.mrb[150].mxu1 }
 0x303   :  { %v2879_v29 = vpop.f32.mrb[151].mxu0  ;;  %v2920_v56 = vpop.f32.mrb[151].mxu1 }
 0x308   :  { %v3026_v24 = vpop.f32.mrb[152].mxu0  ;;  %v3067_v47 = vpop.f32.mrb[152].mxu1 }
 0x309   :  { %v3074_v57 = vadd.f32 %v3026_v24, %v2922_v18  ;;  %v3076_v55 = vadd.f32 %v3067_v47, %v2924_v51  ;;  %v3028_v28 = vpop.f32.mrb[153].mxu0  ;;  %v3069_v17 = vpop.f32.mrb[153].mxu1 }
 0x30a   :  { %v3075_v9 = vadd.f32 %v3028_v28, %v2923_v52  ;;  %v3077_v3 = vadd.f32 %v3069_v17, %v2925_v58  ;;  %v3030_v63 = vpop.f32.mrb[154].mxu0  ;;  %v3071_v12 = vpop.f32.mrb[154].mxu1 }
 0x30b   :  { %v3031_v53 = vpop.f32.mrb[155].mxu0  ;;  %v3072_v32 = vpop.f32.mrb[155].mxu1 }
 0x310   :  { %v3178_v54 = vpop.f32.mrb[156].mxu0  ;;  %v3219_v43 = vpop.f32.mrb[156].mxu1 }
 0x311   :  { %v3226_v41 = vadd.f32 %v3178_v54, %v3074_v57  ;;  %v3228_v45 = vadd.f32 %v3219_v43, %v3076_v55  ;;  %v3180_v33 = vpop.f32.mrb[157].mxu0  ;;  %v3221_v36 = vpop.f32.mrb[157].mxu1 }
 0x312   :  { %v3227_v16 = vadd.f32 %v3180_v33, %v3075_v9  ;;  %v3229_v8 = vadd.f32 %v3221_v36, %v3077_v3  ;;  %v3182_v37 = vpop.f32.mrb[158].mxu0  ;;  %v3223_v14 = vpop.f32.mrb[158].mxu1 }
 0x313   :  { %v3183_v62 = vpop.f32.mrb[159].mxu0  ;;  %v3224_v61 = vpop.f32.mrb[159].mxu1 }
 0x318   :  { %v3354_v19 = vpop.f32.mrb[160].mxu0  ;;  %v3395_v15 = vpop.f32.mrb[160].mxu1 }
 0x319   :  { %v3402_v5 = vadd.f32 %v3354_v19, %v3226_v41  ;;  %v3404_v25 = vadd.f32 %v3395_v15, %v3228_v45  ;;  %v3356_v4 = vpop.f32.mrb[161].mxu0  ;;  %v3397_v35 = vpop.f32.mrb[161].mxu1 }
 0x31a   :  { %v3403_v0 = vadd.f32 %v3356_v4, %v3227_v16  ;;  %v3405_v31 = vadd.f32 %v3397_v35, %v3229_v8  ;;  %v3358_v21 = vpop.f32.mrb[162].mxu0  ;;  %v3399_v26 = vpop.f32.mrb[162].mxu1 }
 0x31b   :  { %v3359_v7 = vpop.f32.mrb[163].mxu0  ;;  %v3400_v48 = vpop.f32.mrb[163].mxu1  ;;  %v4472_v21 = vlaneseq }
 0x31d   :  { %v4473_v26 = vshrl.u32 %v4472_v21, 7 }
 0x320   :  { %v3506_v60 = vpop.f32.mrb[164].mxu0  ;;  %v3547_v27 = vpop.f32.mrb[164].mxu1 }
 0x321   :  { %v3554_v20 = vadd.f32 %v3506_v60, %v3402_v5  ;;  %v3556_v2 = vadd.f32 %v3547_v27, %v3404_v25  ;;  %v3508_v40 = vpop.f32.mrb[165].mxu0  ;;  %v3549_v44 = vpop.f32.mrb[165].mxu1 }
 0x322   :  { %v3555_v34 = vadd.f32 %v3508_v40, %v3403_v0  ;;  %v3557_v6 = vadd.f32 %v3549_v44, %v3405_v31  ;;  %v3510_v22 = vpop.f32.mrb[166].mxu0  ;;  %v3551_v30 = vpop.f32.mrb[166].mxu1 }
 0x323   :  { %v3511_v10 = vpop.f32.mrb[167].mxu0  ;;  %v3552_v13 = vpop.f32.mrb[167].mxu1 }
 0x324   :  { %v4474_v10 = vsub.s32 0, %v4473_v26  ;;  %v4482_v13 = vsub.s32 2, %v4473_v26 }
 0x328   :  { %v3658_v46 = vpop.f32.mrb[168].mxu0  ;;  %v3699_v49 = vpop.f32.mrb[168].mxu1 }
 0x329   :  { %v3706_v23 = vadd.f32 %v3658_v46, %v3554_v20  ;;  %v3708_v42 = vadd.f32 %v3699_v49, %v3556_v2  ;;  %v3660_v1 = vpop.f32.mrb[169].mxu0  ;;  %v3701_v59 = vpop.f32.mrb[169].mxu1  ;;  %v4470_v46 = vld [vmem:[%s7839_s4] sm:$0xf]  ;;  %v4478_v49 = vsub.s32 1, %v4473_v26 }
 0x32a   :  { %v3707_v18 = vadd.f32 %v3660_v1, %v3555_v34  ;;  %v3709_v51 = vadd.f32 %v3701_v59, %v3557_v6  ;;  %v3662_v11 = vpop.f32.mrb[170].mxu0  ;;  %v3703_v39 = vpop.f32.mrb[170].mxu1  ;;  %v4483_v1 = vrot.slane %v4470_v46, %v4482_v13 }
 0x32b   :  { %v3663_v52 = vpop.f32.mrb[171].mxu0  ;;  %v3704_v58 = vpop.f32.mrb[171].mxu1 }
 0x330   :  { %v3810_v50 = vpop.f32.mrb[172].mxu0  ;;  %v3851_v38 = vpop.f32.mrb[172].mxu1 }
 0x331   :  { %v3858_v29 = vadd.f32 %v3810_v50, %v3706_v23  ;;  %v3860_v56 = vadd.f32 %v3851_v38, %v3708_v42  ;;  %v3812_v24 = vpop.f32.mrb[173].mxu0  ;;  %v3853_v47 = vpop.f32.mrb[173].mxu1  ;;  %v4486_v23 = vsub.s32 3, %v4473_v26  ;;  %v4475_v42 = vrot.slane %v4470_v46, %v4474_v10 }
 0x332   :  { %v3859_v57 = vadd.f32 %v3812_v24, %v3707_v18  ;;  %v3861_v55 = vadd.f32 %v3853_v47, %v3709_v51  ;;  %v3814_v28 = vpop.f32.mrb[174].mxu0  ;;  %v3855_v17 = vpop.f32.mrb[174].mxu1  ;;  %v4479_v51 = vrot.slane %v4470_v46, %v4478_v49 }
 0x333   :  { %v3815_v9 = vpop.f32.mrb[175].mxu0  ;;  %v3856_v3 = vpop.f32.mrb[175].mxu1  ;;  %v4487_v11 = vrot.slane %v4470_v46, %v4486_v23 }
 0x338   :  { %v3962_v63 = vpop.f32.mrb[176].mxu0  ;;  %v4003_v12 = vpop.f32.mrb[176].mxu1 }
 0x339   :  { %v4010_v53 = vadd.f32 %v3962_v63, %v3858_v29  ;;  %v4012_v32 = vadd.f32 %v4003_v12, %v3860_v56  ;;  %v3964_v54 = vpop.f32.mrb[177].mxu0  ;;  %v4005_v43 = vpop.f32.mrb[177].mxu1 }
 0x33a   :  { %v4011_v41 = vadd.f32 %v3964_v54, %v3859_v57  ;;  %v4013_v45 = vadd.f32 %v4005_v43, %v3861_v55  ;;  %v3966_v33 = vpop.f32.mrb[178].mxu0  ;;  %v4007_v36 = vpop.f32.mrb[178].mxu1 }
 0x33b   :  { %v3967_v16 = vpop.f32.mrb[179].mxu0  ;;  %v4008_v8 = vpop.f32.mrb[179].mxu1  ;;  %v5303_v36 = vld [vmem:[%s7840_s6] ss:$0 sm:$0xff] }
 0x340   :  { %v4114_v37 = vpop.f32.mrb[180].mxu0  ;;  %v4155_v14 = vpop.f32.mrb[180].mxu1 }
 0x341   :  { %v4162_v62 = vadd.f32 %v4114_v37, %v4010_v53  ;;  %v4164_v61 = vadd.f32 %v4155_v14, %v4012_v32  ;;  %v4116_v19 = vpop.f32.mrb[181].mxu0  ;;  %v4157_v15 = vpop.f32.mrb[181].mxu1 }
 0x342   :  { %v4163_v5 = vadd.f32 %v4116_v19, %v4011_v41  ;;  %v4165_v25 = vadd.f32 %v4157_v15, %v4013_v45  ;;  %v4118_v4 = vpop.f32.mrb[182].mxu0  ;;  %v4159_v35 = vpop.f32.mrb[182].mxu1 }
 0x343   :  { %v4119_v0 = vpop.f32.mrb[183].mxu0  ;;  %v4160_v31 = vpop.f32.mrb[183].mxu1 }
 0x348   :  { %v4266_v7 = vpop.f32.mrb[184].mxu0  ;;  %v4307_v48 = vpop.f32.mrb[184].mxu1 }
 0x349   :  { %v4314_v60 = vadd.f32 %v4266_v7, %v4162_v62  ;;  %v4316_v27 = vadd.f32 %v4307_v48, %v4164_v61  ;;  %v4268_v20 = vpop.f32.mrb[185].mxu0  ;;  %v4309_v2 = vpop.f32.mrb[185].mxu1 }
 0x34a   :  { %v4315_v40 = vadd.f32 %v4268_v20, %v4163_v5  ;;  %v4317_v44 = vadd.f32 %v4309_v2, %v4165_v25  ;;  %v4270_v34 = vpop.f32.mrb[186].mxu0  ;;  %v4311_v6 = vpop.f32.mrb[186].mxu1 }
 0x34b   :  { %v4271_v22 = vpop.f32.mrb[187].mxu0  ;;  %v4312_v30 = vpop.f32.mrb[187].mxu1 }
 0x350   :  { %v4418_v59 = vpop.f32.mrb[188].mxu0  ;;  %v4459_v18 = vpop.f32.mrb[188].mxu1 }
 0x351   :  { %v4466_v39 = vadd.f32 %v4418_v59, %v4314_v60  ;;  %v4468_v52 = vadd.f32 %v4459_v18, %v4316_v27  ;;  %v4420_v58 = vpop.f32.mrb[189].mxu0  ;;  %v4461_v50 = vpop.f32.mrb[189].mxu1 }
 0x352   :  { %v4467_v38 = vadd.f32 %v4420_v58, %v4315_v40  ;;  %v4469_v29 = vadd.f32 %v4461_v50, %v4317_v44  ;;  %v4422_v56 = vpop.f32.mrb[190].mxu0  ;;  %v4463_v24 = vpop.f32.mrb[190].mxu1 }
 0x353   :  { %v4492_v47 = vadd.f32 %v4475_v42, %v4466_v39  ;;  %v4494_v57 = vadd.f32 %v4483_v1, %v4468_v52  ;;  %v4423_v55 = vpop.f32.mrb[191].mxu0  ;;  %v4464_v28 = vpop.f32.mrb[191].mxu1 }
 0x354   :  { %v4493_v17 = vadd.f32 %v4479_v51, %v4467_v38  ;;  %v4495_v9 = vadd.f32 %v4487_v11, %v4469_v29 }
 0x355   :  { %v4496_v3 = vmax.f32 %v4492_v47, 0.0  ;;  %v4498_v63 = vmax.f32 %v4494_v57, 0.0 }
 0x356   :  { %v4497_v12 = vmax.f32 %v4493_v17, 0.0  ;;  %v4499_v53 = vmax.f32 %v4495_v9, 0.0 }
 0x357   :  { %v4500_v43 = vpack.c.bf16 %v4496_v3, %v4496_v3  ;;  %v4502_v41 = vpack.c.bf16 %v4498_v63, %v4498_v63 }
 0x358   :  { %v4501_v32 = vpack.c.bf16 %v4497_v12, %v4497_v12  ;;  %v4503_v54 = vpack.c.bf16 %v4499_v53, %v4499_v53 }
 0x35a   :  { %4799 = vmatprep.mubr.bf16.mxu0 %v4501_v32  ;;  %4839 = vmatprep.mubr.bf16.mxu1 %v4503_v54 }
 0x35b   :  { %4800 = vmatmul.mubr.bf16.vlgmr.msra.gmra.mrb[192].mxu0 %v4500_v43  ;;  %4840 = vmatmul.mubr.bf16.vlgmr.msra.gmra.mrb[192].mxu1 %v4502_v41 }
 0x42e   :  { %v5608_v45 = vpop.f32.mrb[192].mxu0  ;;  %v5630_v33 = vpop.f32.mrb[192].mxu1 }
 0x42f   :  { %v5609_v16 = vpop.f32.mrb[193].mxu0  ;;  %v5631_v8 = vpop.f32.mrb[193].mxu1 }
 0x430   :  { %v5610_v37 = vadd.f32 %v5609_v16, %v5608_v45  ;;  %v5632_v14 = vadd.f32 %v5631_v8, %v5630_v33  ;;  %v5611_v62 = vpop.f32.mrb[194].mxu0  ;;  %v5633_v61 = vpop.f32.mrb[194].mxu1 }
 0x431   :  { %v5612_v19 = vpop.f32.mrb[195].mxu0  ;;  %v5634_v15 = vpop.f32.mrb[195].mxu1 }
 0x432   :  { %v4802_v5 = vadd.f32 %v5610_v37, %v5303_v36 }
 0x434   :  { %v4842_v25 = vadd.f32 %v5632_v14, %v4802_v5 }
 0x436   :  { %4847 = vmax.xlane.f32.xlu0 %v4842_v25 }
 0x4c3   :  { %v4848_v4 = vpop.xlane.xlu0 %4847 }
 0x4c4   :  { %v4849_v35 = vsub.f32 %v4842_v25, %v4848_v4 }
 0x4c6   :  { %v4850_v0 = vmul.f32 1.442695, %v4849_v35 }
 0x4c8   :  { %6078 = vpow2.f32 %v4850_v0 }
 0x4d2   :  { %v6079_v31 = vpop.eup %6078 }
 0x4d3   :  { %4852 = vadd.xlane.f32.xlu0 %v6079_v31 }
 0x560   :  { %v4853_v21 = vpop.xlane.xlu0 %4852 }
 0x561   :  { %6080 = vrcp.f32 %v4853_v21 }
 0x56b   :  { %v6081_v26 = vpop.eup %6080 }
 0x56c   :  { %v4855_v7 = vmul.f32 %v6081_v26, %v6079_v31 }
 0x56e   :  { %4856 = vst [vmem:[%s7841_s7] sm:$0xff] %v4855_v7 }

</bundles_post_ra>
